<compile_context>
chip_gen: v7x
topology: tpu7x:2x2x1
jax: 0.10.0
libtpu: 0.0.40
codegen_flags: <defaults>
</compile_context>

<pallas_src>
import math

import jax
import jax.numpy as jnp
from jax.experimental import pallas as pl
from jax.experimental.pallas import tpu as pltpu


def _pair(v):
    return tuple(v) if isinstance(v, (tuple, list)) else (v, v)


def _round_up(x, m):
    return (x + m - 1) // m * m


def _cdiv(a, b):
    return -(-a // b)


def _vmem_limit_bytes():
    """Generation-aware scoped-VMEM limit (~3/4 of physical, capped)."""
    cap = 64 * 1024 * 1024
    try:
        info = pltpu.get_tpu_info()
        cap = int(getattr(info, "vmem_capacity_bytes", cap)) or cap
    except Exception:
        pass
    return min(cap * 3 // 4, 112 * 1024 * 1024)


# ---------------------------------------------------------------------------
# Kernels
# ---------------------------------------------------------------------------
def _conv_mm_kernel(p_ref, w_ref, b_ref, o_ref):
    # p: (1, TM, K) patches, w: (1, K, TOC) weights, b: (1, 1, TOC), o: (1, TM, TOC)
    acc = jnp.dot(p_ref[0], w_ref[0], preferred_element_type=jnp.float32)
    o_ref[0] = (acc + b_ref[0]).astype(o_ref.dtype)


def _conv_mm_ktiled_kernel(p_ref, w_ref, b_ref, o_ref, acc_ref):
    # grid = (G, OCB, MB, KB); K axis innermost ("arbitrary") -> accumulate (P3).
    @pl.when(pl.program_id(3) == 0)
    def _init():
        acc_ref[...] = jnp.zeros_like(acc_ref)

    acc_ref[...] += jnp.dot(p_ref[0], w_ref[0], preferred_element_type=jnp.float32)

    @pl.when(pl.program_id(3) == pl.num_programs(3) - 1)
    def _fin():
        o_ref[0] = (acc_ref[...] + b_ref[0]).astype(o_ref.dtype)


def _make_direct_kernel(KH, KW, dH, dW, TOH, OW):
    """Direct conv kernel: KH*KW taps as static in-VMEM slices, per-row MXU dots."""

    def kernel(x_ref, w_ref, b_ref, o_ref):
        # x: (1, TIH, Wp, Cin) halo'd input rows for TOH output rows
        # w: (KH, KW, Cin, TOC)   b: (1, TOC) f32   o: (1, TOH, OW, TOC)
        bias = b_ref[...]                                  # (1, TOC), hoisted
        for oh in range(TOH):
            acc = None
            for kh in range(KH):
                row = oh + kh * dH
                for kw in range(KW):
                    lhs = x_ref[0, row, pl.ds(kw * dW, OW), :]     # (OW, Cin)
                    part = jnp.dot(lhs, w_ref[kh, kw],
                                   preferred_element_type=jnp.float32)
                    acc = part if acc is None else acc + part
            o_ref[0, oh] = (acc + bias).astype(o_ref.dtype)

    return kernel


# ---------------------------------------------------------------------------
# Wrapper-side glue (plain XLA, outside the kernels)
# ---------------------------------------------------------------------------
def _same_padding(H, KH, stride, dilation):
    sH, _ = stride
    dH, _ = dilation
    out_rows = (H + sH - 1) // sH
    padding_rows = max(0, (out_rows - 1) * sH + (KH - 1) * dH + 1 - H)
    rows_odd = (padding_rows % 2) != 0
    # NOTE: the reference derives the W padding from the H computation (quirk
    # of the original conv2d_same) -- replicated faithfully.
    padding_cols = padding_rows
    cols_odd = rows_odd
    return (padding_rows // 2, padding_rows // 2 + int(rows_odd),
            padding_cols // 2, padding_cols // 2 + int(cols_odd))


def prepare_conv_weights(weight, bias, groups, compute_dtype):
    """OIHW weight -> (G, K, OCP) matmul slab (K = KH*KW*Cg, OCP lane-padded)."""
    OC, Cg, KH, KW = weight.shape
    ocg = OC // groups
    # TODO(synk): OCP padding wastes 128/ocg lanes for depthwise-style convs.
    OCP = _round_up(ocg, 128)
    w = weight.reshape(groups, ocg, Cg, KH, KW)
    w = jnp.transpose(w, (0, 3, 4, 2, 1))              # (G, KH, KW, Cg, ocg)
    w = w.reshape(groups, KH * KW * Cg, ocg)           # K-order: (kh, kw, cg)
    w = jnp.pad(w, ((0, 0), (0, 0), (0, OCP - ocg))).astype(compute_dtype)
    if bias is None:
        b = jnp.zeros((groups, 1, OCP), jnp.float32)
    else:
        b = jnp.pad(bias.reshape(groups, 1, ocg).astype(jnp.float32),
                    ((0, 0), (0, 0), (0, OCP - ocg)))
    return w, b


def _im2col(x_pad, KH, KW, OH, OW, stride, dilation, groups):
    """(N, Hp, Wp, Cin) padded NHWC -> (G, N*OH*OW, KH*KW*Cg) patch slab."""
    N, _, _, Cin = x_pad.shape
    sH, sW = stride
    dH, dW = dilation
    Cg = Cin // groups
    taps = []
    for kh in range(KH):
        for kw in range(KW):
            taps.append(jax.lax.slice(
                x_pad,
                (0, kh * dH, kw * dW, 0),
                (N, kh * dH + (OH - 1) * sH + 1,
                 kw * dW + (OW - 1) * sW + 1, Cin),
                (1, sH, sW, 1)))                        # (N, OH, OW, Cin)
    p = jnp.stack(taps, axis=3)                         # (N, OH, OW, T, Cin)
    p = p.reshape(N, OH, OW, KH * KW, groups, Cg)
    p = jnp.transpose(p, (4, 0, 1, 2, 3, 5))            # (G, N, OH, OW, T, Cg)
    return p.reshape(groups, N * OH * OW, KH * KW * Cg)


def _conv_direct_path(x_pad, w_mat, b_mat, KH, KW, dH, dW, OH, OW,
                      out_channels, out_dtype, budget, vmem_limit):
    """groups==1, stride==(1,1): halo row-blocks, no materialized im2col slab."""
    N, Hp, Wp, Cin = x_pad.shape
    _, K, OCP = w_mat.shape
    bytes_c = x_pad.dtype.itemsize
    bytes_o = jnp.dtype(out_dtype).itemsize

    # Lane-dense OC tile: full OCP when the double-buffered weight slab fits ->
    # weight block index is constant over the whole inner sweep (resident).
    TOC = 128
    for cand in range(min(OCP, 512), 0, -128):
        if OCP % cand == 0 and 2 * K * cand * bytes_c <= budget * 0.4:
            TOC = cand
            break

    # Output rows per grid step from the remaining budget (cap bounds the
    # statically unrolled tap loop).
    TOH = max(1, min(16, OH))
    while TOH > 1:
        TIH = TOH + (KH - 1) * dH
        need = (2 * TIH * Wp * Cin * bytes_c + 2 * K * TOC * bytes_c
                + 2 * TOH * OW * TOC * bytes_o)
        if need <= budget:
            break
        TOH //= 2
    TIH = TOH + (KH - 1) * dH
    RB = _cdiv(OH, TOH)
    OH_pad = RB * TOH
    if OH_pad > OH:                    # bottom rows so every halo is in-bounds
        x_pad = jnp.pad(x_pad, ((0, 0), (0, OH_pad - OH), (0, 0), (0, 0)))

    # Row-block halo layout: ~ (TOH+KH-1)/TOH duplication vs KH*KW for im2col.
    x_halo = jnp.stack([x_pad[:, r * TOH: r * TOH + TIH] for r in range(RB)],
                       axis=1).reshape(N * RB, TIH, Wp, Cin)

    w_dir = w_mat.reshape(KH, KW, Cin, OCP)   # K-order (kh,kw,c) -> free reshape
    b_dir = b_mat.reshape(1, OCP)

    OCB = OCP // TOC
    NR = N * RB
    out = pl.pallas_call(
        _make_direct_kernel(KH, KW, dH, dW, TOH, OW),
        out_shape=jax.ShapeDtypeStruct((NR, TOH, OW, OCP), out_dtype),
        grid_spec=pltpu.PrefetchScalarGridSpec(
            num_scalar_prefetch=0,
            grid=(OCB, NR),                        # OC outer -> weight resident
            in_specs=[
                pl.BlockSpec((1, TIH, Wp, Cin), lambda o, m: (m, 0, 0, 0)),
                pl.BlockSpec((KH, KW, Cin, TOC), lambda o, m: (0, 0, 0, o)),
                pl.BlockSpec((1, TOC), lambda o, m: (0, o)),
            ],
            out_specs=pl.BlockSpec((1, TOH, OW, TOC), lambda o, m: (m, 0, 0, o)),
        ),
        compiler_params=pltpu.CompilerParams(
            dimension_semantics=("parallel", "parallel"),
            vmem_limit_bytes=vmem_limit,
        ),
    )(x_halo, w_dir, b_dir)

    out = out.reshape(N, OH_pad, OW, OCP)[:, :OH, :, :out_channels]
    # TODO(synk): skip this NHWC->NCHW transpose when the consumer takes NHWC.
    return jnp.transpose(out, (0, 3, 1, 2))


def _conv_im2col_path(x_pad, w_mat, b_mat, KH, KW, stride, dilation, groups,
                      OH, OW, out_channels, out_dtype, budget, vmem_limit,
                      k_tile):
    """Grouped / strided fallback: grouped im2col matmul with resident weights."""
    N = x_pad.shape[0]
    G, K, OCP = w_mat.shape
    ocg = out_channels // groups
    bytes_c = x_pad.dtype.itemsize
    bytes_o = jnp.dtype(out_dtype).itemsize
    sub = 16 if bytes_c == 2 else 8                    # bf16 sublane packing

    patches = _im2col(x_pad, KH, KW, OH, OW, stride, dilation, groups)
    M = N * OH * OW

    # K-tiling guard (v7x 64 MiB VMEM / very deep contractions) -- P3 pattern.
    need_k = k_tile is not None
    if not need_k:
        min_need = (2 * sub * K * bytes_c + 2 * K * 128 * bytes_c
                    + 2 * sub * 128 * bytes_o)
        need_k = min_need > budget
    if need_k:
        TK = int(k_tile) if k_tile else 1024
        TK = max(128, _round_up(min(TK, K), 128))
        K_pad = _round_up(K, TK)
        if K_pad != K:                                  # zero K-padding is exact
            patches = jnp.pad(patches, ((0, 0), (0, 0), (0, K_pad - K)))
            w_mat = jnp.pad(w_mat, ((0, 0), (0, K_pad - K), (0, 0)))
        KB = K_pad // TK
    else:
        TK, KB = K, 1

    # Lane-dense OC tile: prefer whole OCP (no oc axis, trivially resident).
    TOC = 128
    for cand in range(OCP, 0, -128):
        if OCP % cand == 0 and 2 * TK * cand * bytes_c <= budget * 0.4:
            TOC = cand
            break

    # Budget-driven M tile (bigger tiles -> fewer grid steps, better DMA eff.).
    acc_b = 4 if need_k else 0
    denom = 2 * TK * bytes_c + 2 * TOC * bytes_o + TOC * acc_b
    rem = budget - 2 * TK * TOC * bytes_c
    TM = rem // denom if rem > denom else sub
    TM = max(sub, min(TM, 1024, _round_up(M, sub)))
    TM = max(sub, TM // sub * sub)
    M_pad = _round_up(M, TM)
    if M_pad != M:
        patches = jnp.pad(patches, ((0, 0), (0, M_pad - M), (0, 0)))

    OCB = OCP // TOC
    MB = M_pad // TM

    if need_k:
        grid = (G, OCB, MB, KB)
        in_specs = [
            pl.BlockSpec((1, TM, TK), lambda g, o, m, k: (g, m, k)),
            pl.BlockSpec((1, TK, TOC), lambda g, o, m, k: (g, k, o)),
            pl.BlockSpec((1, 1, TOC), lambda g, o, m, k: (g, 0, o)),
        ]
        out_spec = pl.BlockSpec((1, TM, TOC), lambda g, o, m, k: (g, m, o))
        scratch = [pltpu.VMEM((TM, TOC), jnp.float32)]
        dims = ("parallel", "parallel", "parallel", "arbitrary")
        kernel = _conv_mm_ktiled_kernel
    else:
        grid = (G, OCB, MB)
        in_specs = [
            pl.BlockSpec((1, TM, K), lambda g, o, m: (g, m, 0)),
            # Weight block index constant across the innermost m sweep -> resident.
            pl.BlockSpec((1, K, TOC), lambda g, o, m: (g, 0, o)),
            pl.BlockSpec((1, 1, TOC), lambda g, o, m: (g, 0, o)),
        ]
        out_spec = pl.BlockSpec((1, TM, TOC), lambda g, o, m: (g, m, o))
        scratch = []
        dims = ("parallel", "parallel", "parallel")
        kernel = _conv_mm_kernel

    out = pl.pallas_call(
        kernel,
        out_shape=jax.ShapeDtypeStruct((G, M_pad, OCP), out_dtype),
        grid_spec=pltpu.PrefetchScalarGridSpec(
            num_scalar_prefetch=0, grid=grid, in_specs=in_specs,
            out_specs=out_spec, scratch_shapes=scratch),
        compiler_params=pltpu.CompilerParams(
            dimension_semantics=dims, vmem_limit_bytes=vmem_limit),
    )(patches, w_mat, b_mat)

    out = out[:, :M, :ocg]                              # strip M / lane padding
    out = jnp.transpose(out, (1, 0, 2)).reshape(N, OH, OW, out_channels)
    # TODO(synk): skip this NHWC->NCHW transpose when the consumer takes NHWC.
    return jnp.transpose(out, (0, 3, 1, 2))


def _conv2d_same_prepared(x, w_mat, b_mat, kernel_size, stride, dilation,
                          groups, out_channels, compute_dtype, k_tile=None):
    """x: (N, Cin, H, W) NCHW; w_mat/b_mat from prepare_conv_weights."""
    N, Cin, H, W = x.shape
    KH, KW = kernel_size
    sH, sW = stride
    dH, dW = dilation
    out_dtype = x.dtype

    pad_t, pad_b, pad_l, pad_r = _same_padding(H, KH, stride, dilation)
    Hp, Wp = H + pad_t + pad_b, W + pad_l + pad_r
    OH = (Hp - dH * (KH - 1) - 1) // sH + 1
    OW = (Wp - dW * (KW - 1) - 1) // sW + 1

    vmem_limit = _vmem_limit_bytes()
    budget = int(vmem_limit * 0.6)

    # Layout glue (plain XLA): NCHW -> NHWC in the MXU compute dtype + zero pad.
    x_nhwc = jnp.transpose(x, (0, 2, 3, 1)).astype(compute_dtype)
    x_pad = jnp.pad(x_nhwc, ((0, 0), (pad_t, pad_b), (pad_l, pad_r), (0, 0)))

    if groups == 1 and (sH, sW) == (1, 1) and k_tile is None:
        return _conv_direct_path(x_pad, w_mat, b_mat, KH, KW, dH, dW, OH, OW,
                                 out_channels, out_dtype, budget, vmem_limit)
    return _conv_im2col_path(x_pad, w_mat, b_mat, KH, KW, stride, dilation,
                             groups, OH, OW, out_channels, out_dtype, budget,
                             vmem_limit, k_tile)


def conv2d_same(x, weight, bias=None, stride=(1, 1), dilation=(1, 1), groups=1,
                compute_dtype=jnp.bfloat16, k_tile=None):
    """x: (N, Cin, H, W); weight: (OC, Cin//groups, KH, KW) -- PyTorch layout."""
    OC, _, KH, KW = weight.shape
    w_mat, b_mat = prepare_conv_weights(weight, bias, groups, compute_dtype)
    return _conv2d_same_prepared(x, w_mat, b_mat, (KH, KW), _pair(stride),
                                 _pair(dilation), groups, OC, compute_dtype,
                                 k_tile=k_tile)


class Conv2d:
    """Pallas port of the PyTorch "same"-padded Conv2d module (bias=False default)."""

    def __init__(self, in_channels, out_channels, kernel_size, stride=1,
                 padding=0, dilation=1, groups=1, bias=False, *, key,
                 compute_dtype=jnp.bfloat16):
        kernel_size = _pair(kernel_size)
        stride = _pair(stride)
        padding = _pair(padding)   # API parity; forward ignores it (like the reference)
        dilation = _pair(dilation)
        if in_channels % groups != 0 or out_channels % groups != 0:
            raise ValueError("channels must be divisible by groups")
        self.kernel_size = kernel_size
        self.stride = stride
        self.dilation = dilation
        self.groups = groups
        self.out_channels = out_channels
        self.compute_dtype = compute_dtype

        # reset_parameters(): uniform(-stdv, stdv), stdv = 1/sqrt(Cin*KH*KW)
        n = in_channels
        for k in kernel_size:
            n *= k
        stdv = 1.0 / math.sqrt(n)
        kw_key, kb_key = jax.random.split(key)
        self.weight = jax.random.uniform(
            kw_key, (out_channels, in_channels // groups, *kernel_size),
            minval=-stdv, maxval=stdv, dtype=jnp.float32)
        self.bias = (jax.random.uniform(kb_key, (out_channels,), minval=-stdv,
                                        maxval=stdv, dtype=jnp.float32)
                     if bias else None)
        # Pre-transform weights/bias into the MXU matmul layout once at init.
        self._w_mat, self._b_mat = prepare_conv_weights(
            self.weight, self.bias, groups, compute_dtype)

    def __call__(self, x):
        return _conv2d_same_prepared(
            x, self._w_mat, self._b_mat, self.kernel_size, self.stride,
            self.dilation, self.groups, self.out_channels, self.compute_dtype)


if __name__ == "__main__":
    key = jax.random.PRNGKey(0)
    k_x, k_m = jax.random.split(key)
    x = jax.random.normal(k_x, (2, 4, 16, 16), dtype=jnp.float32)  # NCHW

    # 1) Default bf16 compute, stride 1, groups 1 -> direct (halo) kernel path.
    conv = Conv2d(in_channels=4, out_channels=8, kernel_size=3, stride=1,
                  bias=False, key=k_m)
    y = jax.block_until_ready(conv(x))
    assert y.shape == (2, 8, 16, 16)
    ref = jax.lax.conv_general_dilated(
        x, conv.weight, window_strides=(1, 1), padding=((1, 1), (1, 1)),
        dimension_numbers=("NCHW", "OIHW", "NCHW"))
    assert jnp.allclose(y, ref, atol=5e-2, rtol=5e-2)

    # 1b) Same conv in f32 compute -> tight numeric check of the direct path.
    conv_f32 = Conv2d(in_channels=4, out_channels=8, kernel_size=3, stride=1,
                      bias=False, key=k_m, compute_dtype=jnp.float32)
    y32 = jax.block_until_ready(conv_f32(x))
    assert jnp.allclose(y32, ref, atol=1e-4, rtol=1e-4)

    # 2) Strided + grouped + biased -> im2col matmul path (weight-resident grid).
    conv2 = Conv2d(in_channels=4, out_channels=8, kernel_size=3, stride=2,
                   groups=2, bias=True, key=k_m, compute_dtype=jnp.float32)
    y2 = jax.block_until_ready(conv2(x))
    assert y2.shape == (2, 8, 8, 8)
    ref2 = jax.lax.conv_general_dilated(
        x, conv2.weight, window_strides=(2, 2), padding=((0, 1), (0, 1)),
        dimension_numbers=("NCHW", "OIHW", "NCHW"),
        feature_group_count=2) + conv2.bias[None, :, None, None]
    assert jnp.allclose(y2, ref2, atol=1e-4, rtol=1e-4)

    # 3) K-tiled im2col path (forced small K tile) with wider channels.
    k_x2, k_w3 = jax.random.split(k_x)
    k_w3a, k_b3 = jax.random.split(k_w3)
    x3 = jax.random.normal(k_x2, (2, 32, 16, 16), dtype=jnp.float32)
    s3 = 1.0 / math.sqrt(32 * 3 * 3)
    w3 = jax.random.uniform(k_w3a, (16, 32, 3, 3), minval=-s3, maxval=s3,
                            dtype=jnp.float32)
    b3 = jax.random.uniform(k_b3, (16,), minval=-s3, maxval=s3,
                            dtype=jnp.float32)
    y3 = jax.block_until_ready(
        conv2d_same(x3, w3, b3, stride=2, compute_dtype=jnp.float32,
                    k_tile=128))
    ref3 = jax.lax.conv_general_dilated(
        x3, w3, window_strides=(2, 2), padding=((0, 1), (0, 1)),
        dimension_numbers=("NCHW", "OIHW", "NCHW")) + b3[None, :, None, None]
    assert y3.shape == (2, 16, 8, 8)
    assert jnp.allclose(y3, ref3, atol=1e-4, rtol=1e-4)

    print("KERNEL_OK")
</pallas_src>

<mosaic_0001>
module attributes {stable_mosaic.version = 11 : i64} {
  func.func @kernel(%arg0: i32, %arg1: i32, %arg2: memref<1x18x18x4xbf16, #tpu.memory_space<vmem>>, %arg3: memref<3x3x4x128xbf16, #tpu.memory_space<vmem>>, %arg4: memref<1x128xf32, #tpu.memory_space<vmem>>, %arg5: memref<1x16x16x128xf32, #tpu.memory_space<vmem>>) attributes {dimension_semantics = [#tpu.dimension_semantics<parallel>, #tpu.dimension_semantics<parallel>], iteration_bounds = array<i64: 1, 2>, scalar_prefetch = 0 : i64, scratch_operands = 0 : i64, tpu.core_type = #tpu.core_type<tc>, window_params = [{transform_indices = @transform_0, window_bounds = array<i64: 1, 18, 18, 4>}, {transform_indices = @transform_1, window_bounds = array<i64: 3, 3, 4, 128>}, {transform_indices = @transform_2, window_bounds = array<i64: 1, 128>}, {transform_indices = @transform_3, window_bounds = array<i64: 1, 16, 16, 128>}]} {
    %c0 = arith.constant 0 : index
    %c0_0 = arith.constant 0 : index
    %0 = vector.load %arg4[%c0, %c0_0] : memref<1x128xf32, #tpu.memory_space<vmem>>, vector<1x128xf32>
    %c0_1 = arith.constant 0 : index
    %c0_2 = arith.constant 0 : index
    %c0_3 = arith.constant 0 : index
    %c0_4 = arith.constant 0 : index
    %1 = vector.load %arg2[%c0_1, %c0_2, %c0_3, %c0_4] : memref<1x18x18x4xbf16, #tpu.memory_space<vmem>>, vector<1x1x16x4xbf16>
    %2 = vector.shape_cast %1 : vector<1x1x16x4xbf16> to vector<16x4xbf16>
    %c0_5 = arith.constant 0 : index
    %c0_6 = arith.constant 0 : index
    %c0_7 = arith.constant 0 : index
    %c0_8 = arith.constant 0 : index
    %3 = vector.load %arg3[%c0_5, %c0_6, %c0_7, %c0_8] : memref<3x3x4x128xbf16, #tpu.memory_space<vmem>>, vector<1x1x4x128xbf16>
    %4 = vector.shape_cast %3 : vector<1x1x4x128xbf16> to vector<4x128xbf16>
    %cst = arith.constant dense<0.000000e+00> : vector<16x128xf32>
    %5 = tpu.matmul %2, %4, %cst {dimension_numbers = #tpu.dot_dimension_numbers<[1], [0], [0], [1], [0, 0, 1, 1], [], []>} : vector<16x4xbf16>, vector<4x128xbf16>, vector<16x128xf32> -> vector<16x128xf32>
    %c0_9 = arith.constant 0 : index
    %c0_10 = arith.constant 0 : index
    %c1 = arith.constant 1 : index
    %c0_11 = arith.constant 0 : index
    %6 = vector.load %arg2[%c0_9, %c0_10, %c1, %c0_11] : memref<1x18x18x4xbf16, #tpu.memory_space<vmem>>, vector<1x1x16x4xbf16>
    %7 = vector.shape_cast %6 : vector<1x1x16x4xbf16> to vector<16x4xbf16>
    %c0_12 = arith.constant 0 : index
    %c1_13 = arith.constant 1 : index
    %c0_14 = arith.constant 0 : index
    %c0_15 = arith.constant 0 : index
    %8 = vector.load %arg3[%c0_12, %c1_13, %c0_14, %c0_15] : memref<3x3x4x128xbf16, #tpu.memory_space<vmem>>, vector<1x1x4x128xbf16>
    %9 = vector.shape_cast %8 : vector<1x1x4x128xbf16> to vector<4x128xbf16>
    %cst_16 = arith.constant dense<0.000000e+00> : vector<16x128xf32>
    %10 = tpu.matmul %7, %9, %cst_16 {dimension_numbers = #tpu.dot_dimension_numbers<[1], [0], [0], [1], [0, 0, 1, 1], [], []>} : vector<16x4xbf16>, vector<4x128xbf16>, vector<16x128xf32> -> vector<16x128xf32>
    %11 = arith.addf %5, %10 : vector<16x128xf32>
    %c0_17 = arith.constant 0 : index
    %c0_18 = arith.constant 0 : index
    %c2 = arith.constant 2 : index
    %c0_19 = arith.constant 0 : index
    %12 = vector.load %arg2[%c0_17, %c0_18, %c2, %c0_19] : memref<1x18x18x4xbf16, #tpu.memory_space<vmem>>, vector<1x1x16x4xbf16>
    %13 = vector.shape_cast %12 : vector<1x1x16x4xbf16> to vector<16x4xbf16>
    %c0_20 = arith.constant 0 : index
    %c2_21 = arith.constant 2 : index
    %c0_22 = arith.constant 0 : index
    %c0_23 = arith.constant 0 : index
    %14 = vector.load %arg3[%c0_20, %c2_21, %c0_22, %c0_23] : memref<3x3x4x128xbf16, #tpu.memory_space<vmem>>, vector<1x1x4x128xbf16>
    %15 = vector.shape_cast %14 : vector<1x1x4x128xbf16> to vector<4x128xbf16>
    %cst_24 = arith.constant dense<0.000000e+00> : vector<16x128xf32>
    %16 = tpu.matmul %13, %15, %cst_24 {dimension_numbers = #tpu.dot_dimension_numbers<[1], [0], [0], [1], [0, 0, 1, 1], [], []>} : vector<16x4xbf16>, vector<4x128xbf16>, vector<16x128xf32> -> vector<16x128xf32>
    %17 = arith.addf %11, %16 : vector<16x128xf32>
    %c0_25 = arith.constant 0 : index
    %c1_26 = arith.constant 1 : index
    %c0_27 = arith.constant 0 : index
    %c0_28 = arith.constant 0 : index
    %18 = vector.load %arg2[%c0_25, %c1_26, %c0_27, %c0_28] : memref<1x18x18x4xbf16, #tpu.memory_space<vmem>>, vector<1x1x16x4xbf16>
    %19 = vector.shape_cast %18 : vector<1x1x16x4xbf16> to vector<16x4xbf16>
    %c1_29 = arith.constant 1 : index
    %c0_30 = arith.constant 0 : index
    %c0_31 = arith.constant 0 : index
    %c0_32 = arith.constant 0 : index
    %20 = vector.load %arg3[%c1_29, %c0_30, %c0_31, %c0_32] : memref<3x3x4x128xbf16, #tpu.memory_space<vmem>>, vector<1x1x4x128xbf16>
    %21 = vector.shape_cast %20 : vector<1x1x4x128xbf16> to vector<4x128xbf16>
    %cst_33 = arith.constant dense<0.000000e+00> : vector<16x128xf32>
    %22 = tpu.matmul %19, %21, %cst_33 {dimension_numbers = #tpu.dot_dimension_numbers<[1], [0], [0], [1], [0, 0, 1, 1], [], []>} : vector<16x4xbf16>, vector<4x128xbf16>, vector<16x128xf32> -> vector<16x128xf32>
    %23 = arith.addf %17, %22 : vector<16x128xf32>
    %c0_34 = arith.constant 0 : index
    %c1_35 = arith.constant 1 : index
    %c1_36 = arith.constant 1 : index
    %c0_37 = arith.constant 0 : index
    %24 = vector.load %arg2[%c0_34, %c1_35, %c1_36, %c0_37] : memref<1x18x18x4xbf16, #tpu.memory_space<vmem>>, vector<1x1x16x4xbf16>
    %25 = vector.shape_cast %24 : vector<1x1x16x4xbf16> to vector<16x4xbf16>
    %c1_38 = arith.constant 1 : index
    %c1_39 = arith.constant 1 : index
    %c0_40 = arith.constant 0 : index
    %c0_41 = arith.constant 0 : index
    %26 = vector.load %arg3[%c1_38, %c1_39, %c0_40, %c0_41] : memref<3x3x4x128xbf16, #tpu.memory_space<vmem>>, vector<1x1x4x128xbf16>
    %27 = vector.shape_cast %26 : vector<1x1x4x128xbf16> to vector<4x128xbf16>
    %cst_42 = arith.constant dense<0.000000e+00> : vector<16x128xf32>
    %28 = tpu.matmul %25, %27, %cst_42 {dimension_numbers = #tpu.dot_dimension_numbers<[1], [0], [0], [1], [0, 0, 1, 1], [], []>} : vector<16x4xbf16>, vector<4x128xbf16>, vector<16x128xf32> -> vector<16x128xf32>
    %29 = arith.addf %23, %28 : vector<16x128xf32>
    %c0_43 = arith.constant 0 : index
    %c1_44 = arith.constant 1 : index
    %c2_45 = arith.constant 2 : index
    %c0_46 = arith.constant 0 : index
    %30 = vector.load %arg2[%c0_43, %c1_44, %c2_45, %c0_46] : memref<1x18x18x4xbf16, #tpu.memory_space<vmem>>, vector<1x1x16x4xbf16>
    %31 = vector.shape_cast %30 : vector<1x1x16x4xbf16> to vector<16x4xbf16>
    %c1_47 = arith.constant 1 : index
    %c2_48 = arith.constant 2 : index
    %c0_49 = arith.constant 0 : index
    %c0_50 = arith.constant 0 : index
    %32 = vector.load %arg3[%c1_47, %c2_48, %c0_49, %c0_50] : memref<3x3x4x128xbf16, #tpu.memory_space<vmem>>, vector<1x1x4x128xbf16>
    %33 = vector.shape_cast %32 : vector<1x1x4x128xbf16> to vector<4x128xbf16>
    %cst_51 = arith.constant dense<0.000000e+00> : vector<16x128xf32>
    %34 = tpu.matmul %31, %33, %cst_51 {dimension_numbers = #tpu.dot_dimension_numbers<[1], [0], [0], [1], [0, 0, 1, 1], [], []>} : vector<16x4xbf16>, vector<4x128xbf16>, vector<16x128xf32> -> vector<16x128xf32>
    %35 = arith.addf %29, %34 : vector<16x128xf32>
    %c0_52 = arith.constant 0 : index
    %c2_53 = arith.constant 2 : index
    %c0_54 = arith.constant 0 : index
    %c0_55 = arith.constant 0 : index
    %36 = vector.load %arg2[%c0_52, %c2_53, %c0_54, %c0_55] : memref<1x18x18x4xbf16, #tpu.memory_space<vmem>>, vector<1x1x16x4xbf16>
    %37 = vector.shape_cast %36 : vector<1x1x16x4xbf16> to vector<16x4xbf16>
    %c2_56 = arith.constant 2 : index
    %c0_57 = arith.constant 0 : index
    %c0_58 = arith.constant 0 : index
    %c0_59 = arith.constant 0 : index
    %38 = vector.load %arg3[%c2_56, %c0_57, %c0_58, %c0_59] : memref<3x3x4x128xbf16, #tpu.memory_space<vmem>>, vector<1x1x4x128xbf16>
    %39 = vector.shape_cast %38 : vector<1x1x4x128xbf16> to vector<4x128xbf16>
    %cst_60 = arith.constant dense<0.000000e+00> : vector<16x128xf32>
    %40 = tpu.matmul %37, %39, %cst_60 {dimension_numbers = #tpu.dot_dimension_numbers<[1], [0], [0], [1], [0, 0, 1, 1], [], []>} : vector<16x4xbf16>, vector<4x128xbf16>, vector<16x128xf32> -> vector<16x128xf32>
    %41 = arith.addf %35, %40 : vector<16x128xf32>
    %c0_61 = arith.constant 0 : index
    %c2_62 = arith.constant 2 : index
    %c1_63 = arith.constant 1 : index
    %c0_64 = arith.constant 0 : index
    %42 = vector.load %arg2[%c0_61, %c2_62, %c1_63, %c0_64] : memref<1x18x18x4xbf16, #tpu.memory_space<vmem>>, vector<1x1x16x4xbf16>
    %43 = vector.shape_cast %42 : vector<1x1x16x4xbf16> to vector<16x4xbf16>
    %c2_65 = arith.constant 2 : index
    %c1_66 = arith.constant 1 : index
    %c0_67 = arith.constant 0 : index
    %c0_68 = arith.constant 0 : index
    %44 = vector.load %arg3[%c2_65, %c1_66, %c0_67, %c0_68] : memref<3x3x4x128xbf16, #tpu.memory_space<vmem>>, vector<1x1x4x128xbf16>
    %45 = vector.shape_cast %44 : vector<1x1x4x128xbf16> to vector<4x128xbf16>
    %cst_69 = arith.constant dense<0.000000e+00> : vector<16x128xf32>
    %46 = tpu.matmul %43, %45, %cst_69 {dimension_numbers = #tpu.dot_dimension_numbers<[1], [0], [0], [1], [0, 0, 1, 1], [], []>} : vector<16x4xbf16>, vector<4x128xbf16>, vector<16x128xf32> -> vector<16x128xf32>
    %47 = arith.addf %41, %46 : vector<16x128xf32>
    %c0_70 = arith.constant 0 : index
    %c2_71 = arith.constant 2 : index
    %c2_72 = arith.constant 2 : index
    %c0_73 = arith.constant 0 : index
    %48 = vector.load %arg2[%c0_70, %c2_71, %c2_72, %c0_73] : memref<1x18x18x4xbf16, #tpu.memory_space<vmem>>, vector<1x1x16x4xbf16>
    %49 = vector.shape_cast %48 : vector<1x1x16x4xbf16> to vector<16x4xbf16>
    %c2_74 = arith.constant 2 : index
    %c2_75 = arith.constant 2 : index
    %c0_76 = arith.constant 0 : index
    %c0_77 = arith.constant 0 : index
    %50 = vector.load %arg3[%c2_74, %c2_75, %c0_76, %c0_77] : memref<3x3x4x128xbf16, #tpu.memory_space<vmem>>, vector<1x1x4x128xbf16>
    %51 = vector.shape_cast %50 : vector<1x1x4x128xbf16> to vector<4x128xbf16>
    %cst_78 = arith.constant dense<0.000000e+00> : vector<16x128xf32>
    %52 = tpu.matmul %49, %51, %cst_78 {dimension_numbers = #tpu.dot_dimension_numbers<[1], [0], [0], [1], [0, 0, 1, 1], [], []>} : vector<16x4xbf16>, vector<4x128xbf16>, vector<16x128xf32> -> vector<16x128xf32>
    %53 = arith.addf %47, %52 : vector<16x128xf32>
    %54 = vector.broadcast %0 : vector<1x128xf32> to vector<16x128xf32>
    %55 = arith.addf %53, %54 : vector<16x128xf32>
    %c0_79 = arith.constant 0 : index
    %c0_80 = arith.constant 0 : index
    %c0_81 = arith.constant 0 : index
    %c0_82 = arith.constant 0 : index
    %56 = vector.load %arg5[%c0_79, %c0_80, %c0_81, %c0_82] : memref<1x16x16x128xf32, #tpu.memory_space<vmem>>, vector<1x1x16x128xf32>
    %57 = vector.shape_cast %56 : vector<1x1x16x128xf32> to vector<16x128xf32>
    %58 = vector.shape_cast %55 : vector<16x128xf32> to vector<1x1x16x128xf32>
    tpu.vector_store %arg5[%c0_79, %c0_80, %c0_81, %c0_82], %58 {strides = array<i32>} : memref<1x16x16x128xf32, #tpu.memory_space<vmem>>, vector<1x1x16x128xf32>,
    %c0_83 = arith.constant 0 : index
    %c1_84 = arith.constant 1 : index
    %c0_85 = arith.constant 0 : index
    %c0_86 = arith.constant 0 : index
    %59 = vector.load %arg2[%c0_83, %c1_84, %c0_85, %c0_86] : memref<1x18x18x4xbf16, #tpu.memory_space<vmem>>, vector<1x1x16x4xbf16>
    %60 = vector.shape_cast %59 : vector<1x1x16x4xbf16> to vector<16x4xbf16>
    %c0_87 = arith.constant 0 : index
    %c0_88 = arith.constant 0 : index
    %c0_89 = arith.constant 0 : index
    %c0_90 = arith.constant 0 : index
    %61 = vector.load %arg3[%c0_87, %c0_88, %c0_89, %c0_90] : memref<3x3x4x128xbf16, #tpu.memory_space<vmem>>, vector<1x1x4x128xbf16>
    %62 = vector.shape_cast %61 : vector<1x1x4x128xbf16> to vector<4x128xbf16>
    %cst_91 = arith.constant dense<0.000000e+00> : vector<16x128xf32>
    %63 = tpu.matmul %60, %62, %cst_91 {dimension_numbers = #tpu.dot_dimension_numbers<[1], [0], [0], [1], [0, 0, 1, 1], [], []>} : vector<16x4xbf16>, vector<4x128xbf16>, vector<16x128xf32> -> vector<16x128xf32>
    %c0_92 = arith.constant 0 : index
    %c1_93 = arith.constant 1 : index
    %c1_94 = arith.constant 1 : index
    %c0_95 = arith.constant 0 : index
    %64 = vector.load %arg2[%c0_92, %c1_93, %c1_94, %c0_95] : memref<1x18x18x4xbf16, #tpu.memory_space<vmem>>, vector<1x1x16x4xbf16>
    %65 = vector.shape_cast %64 : vector<1x1x16x4xbf16> to vector<16x4xbf16>
    %c0_96 = arith.constant 0 : index
    %c1_97 = arith.constant 1 : index
    %c0_98 = arith.constant 0 : index
    %c0_99 = arith.constant 0 : index
    %66 = vector.load %arg3[%c0_96, %c1_97, %c0_98, %c0_99] : memref<3x3x4x128xbf16, #tpu.memory_space<vmem>>, vector<1x1x4x128xbf16>
    %67 = vector.shape_cast %66 : vector<1x1x4x128xbf16> to vector<4x128xbf16>
    %cst_100 = arith.constant dense<0.000000e+00> : vector<16x128xf32>
    %68 = tpu.matmul %65, %67, %cst_100 {dimension_numbers = #tpu.dot_dimension_numbers<[1], [0], [0], [1], [0, 0, 1, 1], [], []>} : vector<16x4xbf16>, vector<4x128xbf16>, vector<16x128xf32> -> vector<16x128xf32>
    %69 = arith.addf %63, %68 : vector<16x128xf32>
    %c0_101 = arith.constant 0 : index
    %c1_102 = arith.constant 1 : index
    %c2_103 = arith.constant 2 : index
    %c0_104 = arith.constant 0 : index
    %70 = vector.load %arg2[%c0_101, %c1_102, %c2_103, %c0_104] : memref<1x18x18x4xbf16, #tpu.memory_space<vmem>>, vector<1x1x16x4xbf16>
    %71 = vector.shape_cast %70 : vector<1x1x16x4xbf16> to vector<16x4xbf16>
    %c0_105 = arith.constant 0 : index
    %c2_106 = arith.constant 2 : index
    %c0_107 = arith.constant 0 : index
    %c0_108 = arith.constant 0 : index
    %72 = vector.load %arg3[%c0_105, %c2_106, %c0_107, %c0_108] : memref<3x3x4x128xbf16, #tpu.memory_space<vmem>>, vector<1x1x4x128xbf16>
    %73 = vector.shape_cast %72 : vector<1x1x4x128xbf16> to vector<4x128xbf16>
    %cst_109 = arith.constant dense<0.000000e+00> : vector<16x128xf32>
    %74 = tpu.matmul %71, %73, %cst_109 {dimension_numbers = #tpu.dot_dimension_numbers<[1], [0], [0], [1], [0, 0, 1, 1], [], []>} : vector<16x4xbf16>, vector<4x128xbf16>, vector<16x128xf32> -> vector<16x128xf32>
    %75 = arith.addf %69, %74 : vector<16x128xf32>
    %c0_110 = arith.constant 0 : index
    %c2_111 = arith.constant 2 : index
    %c0_112 = arith.constant 0 : index
    %c0_113 = arith.constant 0 : index
    %76 = vector.load %arg2[%c0_110, %c2_111, %c0_112, %c0_113] : memref<1x18x18x4xbf16, #tpu.memory_space<vmem>>, vector<1x1x16x4xbf16>
    %77 = vector.shape_cast %76 : vector<1x1x16x4xbf16> to vector<16x4xbf16>
    %c1_114 = arith.constant 1 : index
    %c0_115 = arith.constant 0 : index
    %c0_116 = arith.constant 0 : index
    %c0_117 = arith.constant 0 : index
    %78 = vector.load %arg3[%c1_114, %c0_115, %c0_116, %c0_117] : memref<3x3x4x128xbf16, #tpu.memory_space<vmem>>, vector<1x1x4x128xbf16>
    %79 = vector.shape_cast %78 : vector<1x1x4x128xbf16> to vector<4x128xbf16>
    %cst_118 = arith.constant dense<0.000000e+00> : vector<16x128xf32>
    %80 = tpu.matmul %77, %79, %cst_118 {dimension_numbers = #tpu.dot_dimension_numbers<[1], [0], [0], [1], [0, 0, 1, 1], [], []>} : vector<16x4xbf16>, vector<4x128xbf16>, vector<16x128xf32> -> vector<16x128xf32>
    %81 = arith.addf %75, %80 : vector<16x128xf32>
    %c0_119 = arith.constant 0 : index
    %c2_120 = arith.constant 2 : index
    %c1_121 = arith.constant 1 : index
    %c0_122 = arith.constant 0 : index
    %82 = vector.load %arg2[%c0_119, %c2_120, %c1_121, %c0_122] : memref<1x18x18x4xbf16, #tpu.memory_space<vmem>>, vector<1x1x16x4xbf16>
    %83 = vector.shape_cast %82 : vector<1x1x16x4xbf16> to vector<16x4xbf16>
    %c1_123 = arith.constant 1 : index
    %c1_124 = arith.constant 1 : index
    %c0_125 = arith.constant 0 : index
    %c0_126 = arith.constant 0 : index
    %84 = vector.load %arg3[%c1_123, %c1_124, %c0_125, %c0_126] : memref<3x3x4x128xbf16, #tpu.memory_space<vmem>>, vector<1x1x4x128xbf16>
    %85 = vector.shape_cast %84 : vector<1x1x4x128xbf16> to vector<4x128xbf16>
    %cst_127 = arith.constant dense<0.000000e+00> : vector<16x128xf32>
    %86 = tpu.matmul %83, %85, %cst_127 {dimension_numbers = #tpu.dot_dimension_numbers<[1], [0], [0], [1], [0, 0, 1, 1], [], []>} : vector<16x4xbf16>, vector<4x128xbf16>, vector<16x128xf32> -> vector<16x128xf32>
    %87 = arith.addf %81, %86 : vector<16x128xf32>
    %c0_128 = arith.constant 0 : index
    %c2_129 = arith.constant 2 : index
    %c2_130 = arith.constant 2 : index
    %c0_131 = arith.constant 0 : index
    %88 = vector.load %arg2[%c0_128, %c2_129, %c2_130, %c0_131] : memref<1x18x18x4xbf16, #tpu.memory_space<vmem>>, vector<1x1x16x4xbf16>
    %89 = vector.shape_cast %88 : vector<1x1x16x4xbf16> to vector<16x4xbf16>
    %c1_132 = arith.constant 1 : index
    %c2_133 = arith.constant 2 : index
    %c0_134 = arith.constant 0 : index
    %c0_135 = arith.constant 0 : index
    %90 = vector.load %arg3[%c1_132, %c2_133, %c0_134, %c0_135] : memref<3x3x4x128xbf16, #tpu.memory_space<vmem>>, vector<1x1x4x128xbf16>
    %91 = vector.shape_cast %90 : vector<1x1x4x128xbf16> to vector<4x128xbf16>
    %cst_136 = arith.constant dense<0.000000e+00> : vector<16x128xf32>
    %92 = tpu.matmul %89, %91, %cst_136 {dimension_numbers = #tpu.dot_dimension_numbers<[1], [0], [0], [1], [0, 0, 1, 1], [], []>} : vector<16x4xbf16>, vector<4x128xbf16>, vector<16x128xf32> -> vector<16x128xf32>
    %93 = arith.addf %87, %92 : vector<16x128xf32>
    %c0_137 = arith.constant 0 : index
    %c3 = arith.constant 3 : index
    %c0_138 = arith.constant 0 : index
    %c0_139 = arith.constant 0 : index
    %94 = vector.load %arg2[%c0_137, %c3, %c0_138, %c0_139] : memref<1x18x18x4xbf16, #tpu.memory_space<vmem>>, vector<1x1x16x4xbf16>
    %95 = vector.shape_cast %94 : vector<1x1x16x4xbf16> to vector<16x4xbf16>
    %c2_140 = arith.constant 2 : index
    %c0_141 = arith.constant 0 : index
    %c0_142 = arith.constant 0 : index
    %c0_143 = arith.constant 0 : index
    %96 = vector.load %arg3[%c2_140, %c0_141, %c0_142, %c0_143] : memref<3x3x4x128xbf16, #tpu.memory_space<vmem>>, vector<1x1x4x128xbf16>
    %97 = vector.shape_cast %96 : vector<1x1x4x128xbf16> to vector<4x128xbf16>
    %cst_144 = arith.constant dense<0.000000e+00> : vector<16x128xf32>
    %98 = tpu.matmul %95, %97, %cst_144 {dimension_numbers = #tpu.dot_dimension_numbers<[1], [0], [0], [1], [0, 0, 1, 1], [], []>} : vector<16x4xbf16>, vector<4x128xbf16>, vector<16x128xf32> -> vector<16x128xf32>
    %99 = arith.addf %93, %98 : vector<16x128xf32>
    %c0_145 = arith.constant 0 : index
    %c3_146 = arith.constant 3 : index
    %c1_147 = arith.constant 1 : index
    %c0_148 = arith.constant 0 : index
    %100 = vector.load %arg2[%c0_145, %c3_146, %c1_147, %c0_148] : memref<1x18x18x4xbf16, #tpu.memory_space<vmem>>, vector<1x1x16x4xbf16>
    %101 = vector.shape_cast %100 : vector<1x1x16x4xbf16> to vector<16x4xbf16>
    %c2_149 = arith.constant 2 : index
    %c1_150 = arith.constant 1 : index
    %c0_151 = arith.constant 0 : index
    %c0_152 = arith.constant 0 : index
    %102 = vector.load %arg3[%c2_149, %c1_150, %c0_151, %c0_152] : memref<3x3x4x128xbf16, #tpu.memory_space<vmem>>, vector<1x1x4x128xbf16>
    %103 = vector.shape_cast %102 : vector<1x1x4x128xbf16> to vector<4x128xbf16>
    %cst_153 = arith.constant dense<0.000000e+00> : vector<16x128xf32>
    %104 = tpu.matmul %101, %103, %cst_153 {dimension_numbers = #tpu.dot_dimension_numbers<[1], [0], [0], [1], [0, 0, 1, 1], [], []>} : vector<16x4xbf16>, vector<4x128xbf16>, vector<16x128xf32> -> vector<16x128xf32>
    %105 = arith.addf %99, %104 : vector<16x128xf32>
    %c0_154 = arith.constant 0 : index
    %c3_155 = arith.constant 3 : index
    %c2_156 = arith.constant 2 : index
    %c0_157 = arith.constant 0 : index
    %106 = vector.load %arg2[%c0_154, %c3_155, %c2_156, %c0_157] : memref<1x18x18x4xbf16, #tpu.memory_space<vmem>>, vector<1x1x16x4xbf16>
    %107 = vector.shape_cast %106 : vector<1x1x16x4xbf16> to vector<16x4xbf16>
    %c2_158 = arith.constant 2 : index
    %c2_159 = arith.constant 2 : index
    %c0_160 = arith.constant 0 : index
    %c0_161 = arith.constant 0 : index
    %108 = vector.load %arg3[%c2_158, %c2_159, %c0_160, %c0_161] : memref<3x3x4x128xbf16, #tpu.memory_space<vmem>>, vector<1x1x4x128xbf16>
    %109 = vector.shape_cast %108 : vector<1x1x4x128xbf16> to vector<4x128xbf16>
    %cst_162 = arith.constant dense<0.000000e+00> : vector<16x128xf32>
    %110 = tpu.matmul %107, %109, %cst_162 {dimension_numbers = #tpu.dot_dimension_numbers<[1], [0], [0], [1], [0, 0, 1, 1], [], []>} : vector<16x4xbf16>, vector<4x128xbf16>, vector<16x128xf32> -> vector<16x128xf32>
    %111 = arith.addf %105, %110 : vector<16x128xf32>
    %112 = vector.broadcast %0 : vector<1x128xf32> to vector<16x128xf32>
    %113 = arith.addf %111, %112 : vector<16x128xf32>
    %c0_163 = arith.constant 0 : index
    %c1_164 = arith.constant 1 : index
    %c0_165 = arith.constant 0 : index
    %c0_166 = arith.constant 0 : index
    %114 = vector.load %arg5[%c0_163, %c1_164, %c0_165, %c0_166] : memref<1x16x16x128xf32, #tpu.memory_space<vmem>>, vector<1x1x16x128xf32>
    %115 = vector.shape_cast %114 : vector<1x1x16x128xf32> to vector<16x128xf32>
    %116 = vector.shape_cast %113 : vector<16x128xf32> to vector<1x1x16x128xf32>
    tpu.vector_store %arg5[%c0_163, %c1_164, %c0_165, %c0_166], %116 {strides = array<i32>} : memref<1x16x16x128xf32, #tpu.memory_space<vmem>>, vector<1x1x16x128xf32>,
    %c0_167 = arith.constant 0 : index
    %c2_168 = arith.constant 2 : index
    %c0_169 = arith.constant 0 : index
    %c0_170 = arith.constant 0 : index
    %117 = vector.load %arg2[%c0_167, %c2_168, %c0_169, %c0_170] : memref<1x18x18x4xbf16, #tpu.memory_space<vmem>>, vector<1x1x16x4xbf16>
    %118 = vector.shape_cast %117 : vector<1x1x16x4xbf16> to vector<16x4xbf16>
    %c0_171 = arith.constant 0 : index
    %c0_172 = arith.constant 0 : index
    %c0_173 = arith.constant 0 : index
    %c0_174 = arith.constant 0 : index
    %119 = vector.load %arg3[%c0_171, %c0_172, %c0_173, %c0_174] : memref<3x3x4x128xbf16, #tpu.memory_space<vmem>>, vector<1x1x4x128xbf16>
    %120 = vector.shape_cast %119 : vector<1x1x4x128xbf16> to vector<4x128xbf16>
    %cst_175 = arith.constant dense<0.000000e+00> : vector<16x128xf32>
    %121 = tpu.matmul %118, %120, %cst_175 {dimension_numbers = #tpu.dot_dimension_numbers<[1], [0], [0], [1], [0, 0, 1, 1], [], []>} : vector<16x4xbf16>, vector<4x128xbf16>, vector<16x128xf32> -> vector<16x128xf32>
    %c0_176 = arith.constant 0 : index
    %c2_177 = arith.constant 2 : index
    %c1_178 = arith.constant 1 : index
    %c0_179 = arith.constant 0 : index
    %122 = vector.load %arg2[%c0_176, %c2_177, %c1_178, %c0_179] : memref<1x18x18x4xbf16, #tpu.memory_space<vmem>>, vector<1x1x16x4xbf16>
    %123 = vector.shape_cast %122 : vector<1x1x16x4xbf16> to vector<16x4xbf16>
    %c0_180 = arith.constant 0 : index
    %c1_181 = arith.constant 1 : index
    %c0_182 = arith.constant 0 : index
    %c0_183 = arith.constant 0 : index
    %124 = vector.load %arg3[%c0_180, %c1_181, %c0_182, %c0_183] : memref<3x3x4x128xbf16, #tpu.memory_space<vmem>>, vector<1x1x4x128xbf16>
    %125 = vector.shape_cast %124 : vector<1x1x4x128xbf16> to vector<4x128xbf16>
    %cst_184 = arith.constant dense<0.000000e+00> : vector<16x128xf32>
    %126 = tpu.matmul %123, %125, %cst_184 {dimension_numbers = #tpu.dot_dimension_numbers<[1], [0], [0], [1], [0, 0, 1, 1], [], []>} : vector<16x4xbf16>, vector<4x128xbf16>, vector<16x128xf32> -> vector<16x128xf32>
    %127 = arith.addf %121, %126 : vector<16x128xf32>
    %c0_185 = arith.constant 0 : index
    %c2_186 = arith.constant 2 : index
    %c2_187 = arith.constant 2 : index
    %c0_188 = arith.constant 0 : index
    %128 = vector.load %arg2[%c0_185, %c2_186, %c2_187, %c0_188] : memref<1x18x18x4xbf16, #tpu.memory_space<vmem>>, vector<1x1x16x4xbf16>
    %129 = vector.shape_cast %128 : vector<1x1x16x4xbf16> to vector<16x4xbf16>
    %c0_189 = arith.constant 0 : index
    %c2_190 = arith.constant 2 : index
    %c0_191 = arith.constant 0 : index
    %c0_192 = arith.constant 0 : index
    %130 = vector.load %arg3[%c0_189, %c2_190, %c0_191, %c0_192] : memref<3x3x4x128xbf16, #tpu.memory_space<vmem>>, vector<1x1x4x128xbf16>
    %131 = vector.shape_cast %130 : vector<1x1x4x128xbf16> to vector<4x128xbf16>
    %cst_193 = arith.constant dense<0.000000e+00> : vector<16x128xf32>
    %132 = tpu.matmul %129, %131, %cst_193 {dimension_numbers = #tpu.dot_dimension_numbers<[1], [0], [0], [1], [0, 0, 1, 1], [], []>} : vector<16x4xbf16>, vector<4x128xbf16>, vector<16x128xf32> -> vector<16x128xf32>
    %133 = arith.addf %127, %132 : vector<16x128xf32>
    %c0_194 = arith.constant 0 : index
    %c3_195 = arith.constant 3 : index
    %c0_196 = arith.constant 0 : index
    %c0_197 = arith.constant 0 : index
    %134 = vector.load %arg2[%c0_194, %c3_195, %c0_196, %c0_197] : memref<1x18x18x4xbf16, #tpu.memory_space<vmem>>, vector<1x1x16x4xbf16>
    %135 = vector.shape_cast %134 : vector<1x1x16x4xbf16> to vector<16x4xbf16>
    %c1_198 = arith.constant 1 : index
    %c0_199 = arith.constant 0 : index
    %c0_200 = arith.constant 0 : index
    %c0_201 = arith.constant 0 : index
    %136 = vector.load %arg3[%c1_198, %c0_199, %c0_200, %c0_201] : memref<3x3x4x128xbf16, #tpu.memory_space<vmem>>, vector<1x1x4x128xbf16>
    %137 = vector.shape_cast %136 : vector<1x1x4x128xbf16> to vector<4x128xbf16>
    %cst_202 = arith.constant dense<0.000000e+00> : vector<16x128xf32>
    %138 = tpu.matmul %135, %137, %cst_202 {dimension_numbers = #tpu.dot_dimension_numbers<[1], [0], [0], [1], [0, 0, 1, 1], [], []>} : vector<16x4xbf16>, vector<4x128xbf16>, vector<16x128xf32> -> vector<16x128xf32>
    %139 = arith.addf %133, %138 : vector<16x128xf32>
    %c0_203 = arith.constant 0 : index
    %c3_204 = arith.constant 3 : index
    %c1_205 = arith.constant 1 : index
    %c0_206 = arith.constant 0 : index
    %140 = vector.load %arg2[%c0_203, %c3_204, %c1_205, %c0_206] : memref<1x18x18x4xbf16, #tpu.memory_space<vmem>>, vector<1x1x16x4xbf16>
    %141 = vector.shape_cast %140 : vector<1x1x16x4xbf16> to vector<16x4xbf16>
    %c1_207 = arith.constant 1 : index
    %c1_208 = arith.constant 1 : index
    %c0_209 = arith.constant 0 : index
    %c0_210 = arith.constant 0 : index
    %142 = vector.load %arg3[%c1_207, %c1_208, %c0_209, %c0_210] : memref<3x3x4x128xbf16, #tpu.memory_space<vmem>>, vector<1x1x4x128xbf16>
    %143 = vector.shape_cast %142 : vector<1x1x4x128xbf16> to vector<4x128xbf16>
    %cst_211 = arith.constant dense<0.000000e+00> : vector<16x128xf32>
    %144 = tpu.matmul %141, %143, %cst_211 {dimension_numbers = #tpu.dot_dimension_numbers<[1], [0], [0], [1], [0, 0, 1, 1], [], []>} : vector<16x4xbf16>, vector<4x128xbf16>, vector<16x128xf32> -> vector<16x128xf32>
    %145 = arith.addf %139, %144 : vector<16x128xf32>
    %c0_212 = arith.constant 0 : index
    %c3_213 = arith.constant 3 : index
    %c2_214 = arith.constant 2 : index
    %c0_215 = arith.constant 0 : index
    %146 = vector.load %arg2[%c0_212, %c3_213, %c2_214, %c0_215] : memref<1x18x18x4xbf16, #tpu.memory_space<vmem>>, vector<1x1x16x4xbf16>
    %147 = vector.shape_cast %146 : vector<1x1x16x4xbf16> to vector<16x4xbf16>
    %c1_216 = arith.constant 1 : index
    %c2_217 = arith.constant 2 : index
    %c0_218 = arith.constant 0 : index
    %c0_219 = arith.constant 0 : index
    %148 = vector.load %arg3[%c1_216, %c2_217, %c0_218, %c0_219] : memref<3x3x4x128xbf16, #tpu.memory_space<vmem>>, vector<1x1x4x128xbf16>
    %149 = vector.shape_cast %148 : vector<1x1x4x128xbf16> to vector<4x128xbf16>
    %cst_220 = arith.constant dense<0.000000e+00> : vector<16x128xf32>
    %150 = tpu.matmul %147, %149, %cst_220 {dimension_numbers = #tpu.dot_dimension_numbers<[1], [0], [0], [1], [0, 0, 1, 1], [], []>} : vector<16x4xbf16>, vector<4x128xbf16>, vector<16x128xf32> -> vector<16x128xf32>
    %151 = arith.addf %145, %150 : vector<16x128xf32>
    %c0_221 = arith.constant 0 : index
    %c4 = arith.constant 4 : index
    %c0_222 = arith.constant 0 : index
    %c0_223 = arith.constant 0 : index
    %152 = vector.load %arg2[%c0_221, %c4, %c0_222, %c0_223] : memref<1x18x18x4xbf16, #tpu.memory_space<vmem>>, vector<1x1x16x4xbf16>
    %153 = vector.shape_cast %152 : vector<1x1x16x4xbf16> to vector<16x4xbf16>
    %c2_224 = arith.constant 2 : index
    %c0_225 = arith.constant 0 : index
    %c0_226 = arith.constant 0 : index
    %c0_227 = arith.constant 0 : index
    %154 = vector.load %arg3[%c2_224, %c0_225, %c0_226, %c0_227] : memref<3x3x4x128xbf16, #tpu.memory_space<vmem>>, vector<1x1x4x128xbf16>
    %155 = vector.shape_cast %154 : vector<1x1x4x128xbf16> to vector<4x128xbf16>
    %cst_228 = arith.constant dense<0.000000e+00> : vector<16x128xf32>
    %156 = tpu.matmul %153, %155, %cst_228 {dimension_numbers = #tpu.dot_dimension_numbers<[1], [0], [0], [1], [0, 0, 1, 1], [], []>} : vector<16x4xbf16>, vector<4x128xbf16>, vector<16x128xf32> -> vector<16x128xf32>
    %157 = arith.addf %151, %156 : vector<16x128xf32>
    %c0_229 = arith.constant 0 : index
    %c4_230 = arith.constant 4 : index
    %c1_231 = arith.constant 1 : index
    %c0_232 = arith.constant 0 : index
    %158 = vector.load %arg2[%c0_229, %c4_230, %c1_231, %c0_232] : memref<1x18x18x4xbf16, #tpu.memory_space<vmem>>, vector<1x1x16x4xbf16>
    %159 = vector.shape_cast %158 : vector<1x1x16x4xbf16> to vector<16x4xbf16>
    %c2_233 = arith.constant 2 : index
    %c1_234 = arith.constant 1 : index
    %c0_235 = arith.constant 0 : index
    %c0_236 = arith.constant 0 : index
    %160 = vector.load %arg3[%c2_233, %c1_234, %c0_235, %c0_236] : memref<3x3x4x128xbf16, #tpu.memory_space<vmem>>, vector<1x1x4x128xbf16>
    %161 = vector.shape_cast %160 : vector<1x1x4x128xbf16> to vector<4x128xbf16>
    %cst_237 = arith.constant dense<0.000000e+00> : vector<16x128xf32>
    %162 = tpu.matmul %159, %161, %cst_237 {dimension_numbers = #tpu.dot_dimension_numbers<[1], [0], [0], [1], [0, 0, 1, 1], [], []>} : vector<16x4xbf16>, vector<4x128xbf16>, vector<16x128xf32> -> vector<16x128xf32>
    %163 = arith.addf %157, %162 : vector<16x128xf32>
    %c0_238 = arith.constant 0 : index
    %c4_239 = arith.constant 4 : index
    %c2_240 = arith.constant 2 : index
    %c0_241 = arith.constant 0 : index
    %164 = vector.load %arg2[%c0_238, %c4_239, %c2_240, %c0_241] : memref<1x18x18x4xbf16, #tpu.memory_space<vmem>>, vector<1x1x16x4xbf16>
    %165 = vector.shape_cast %164 : vector<1x1x16x4xbf16> to vector<16x4xbf16>
    %c2_242 = arith.constant 2 : index
    %c2_243 = arith.constant 2 : index
    %c0_244 = arith.constant 0 : index
    %c0_245 = arith.constant 0 : index
    %166 = vector.load %arg3[%c2_242, %c2_243, %c0_244, %c0_245] : memref<3x3x4x128xbf16, #tpu.memory_space<vmem>>, vector<1x1x4x128xbf16>
    %167 = vector.shape_cast %166 : vector<1x1x4x128xbf16> to vector<4x128xbf16>
    %cst_246 = arith.constant dense<0.000000e+00> : vector<16x128xf32>
    %168 = tpu.matmul %165, %167, %cst_246 {dimension_numbers = #tpu.dot_dimension_numbers<[1], [0], [0], [1], [0, 0, 1, 1], [], []>} : vector<16x4xbf16>, vector<4x128xbf16>, vector<16x128xf32> -> vector<16x128xf32>
    %169 = arith.addf %163, %168 : vector<16x128xf32>
    %170 = vector.broadcast %0 : vector<1x128xf32> to vector<16x128xf32>
    %171 = arith.addf %169, %170 : vector<16x128xf32>
    %c0_247 = arith.constant 0 : index
    %c2_248 = arith.constant 2 : index
    %c0_249 = arith.constant 0 : index
    %c0_250 = arith.constant 0 : index
    %172 = vector.load %arg5[%c0_247, %c2_248, %c0_249, %c0_250] : memref<1x16x16x128xf32, #tpu.memory_space<vmem>>, vector<1x1x16x128xf32>
    %173 = vector.shape_cast %172 : vector<1x1x16x128xf32> to vector<16x128xf32>
    %174 = vector.shape_cast %171 : vector<16x128xf32> to vector<1x1x16x128xf32>
    tpu.vector_store %arg5[%c0_247, %c2_248, %c0_249, %c0_250], %174 {strides = array<i32>} : memref<1x16x16x128xf32, #tpu.memory_space<vmem>>, vector<1x1x16x128xf32>,
    %c0_251 = arith.constant 0 : index
    %c3_252 = arith.constant 3 : index
    %c0_253 = arith.constant 0 : index
    %c0_254 = arith.constant 0 : index
    %175 = vector.load %arg2[%c0_251, %c3_252, %c0_253, %c0_254] : memref<1x18x18x4xbf16, #tpu.memory_space<vmem>>, vector<1x1x16x4xbf16>
    %176 = vector.shape_cast %175 : vector<1x1x16x4xbf16> to vector<16x4xbf16>
    %c0_255 = arith.constant 0 : index
    %c0_256 = arith.constant 0 : index
    %c0_257 = arith.constant 0 : index
    %c0_258 = arith.constant 0 : index
    %177 = vector.load %arg3[%c0_255, %c0_256, %c0_257, %c0_258] : memref<3x3x4x128xbf16, #tpu.memory_space<vmem>>, vector<1x1x4x128xbf16>
    %178 = vector.shape_cast %177 : vector<1x1x4x128xbf16> to vector<4x128xbf16>
    %cst_259 = arith.constant dense<0.000000e+00> : vector<16x128xf32>
    %179 = tpu.matmul %176, %178, %cst_259 {dimension_numbers = #tpu.dot_dimension_numbers<[1], [0], [0], [1], [0, 0, 1, 1], [], []>} : vector<16x4xbf16>, vector<4x128xbf16>, vector<16x128xf32> -> vector<16x128xf32>
    %c0_260 = arith.constant 0 : index
    %c3_261 = arith.constant 3 : index
    %c1_262 = arith.constant 1 : index
    %c0_263 = arith.constant 0 : index
    %180 = vector.load %arg2[%c0_260, %c3_261, %c1_262, %c0_263] : memref<1x18x18x4xbf16, #tpu.memory_space<vmem>>, vector<1x1x16x4xbf16>
    %181 = vector.shape_cast %180 : vector<1x1x16x4xbf16> to vector<16x4xbf16>
    %c0_264 = arith.constant 0 : index
    %c1_265 = arith.constant 1 : index
    %c0_266 = arith.constant 0 : index
    %c0_267 = arith.constant 0 : index
    %182 = vector.load %arg3[%c0_264, %c1_265, %c0_266, %c0_267] : memref<3x3x4x128xbf16, #tpu.memory_space<vmem>>, vector<1x1x4x128xbf16>
    %183 = vector.shape_cast %182 : vector<1x1x4x128xbf16> to vector<4x128xbf16>
    %cst_268 = arith.constant dense<0.000000e+00> : vector<16x128xf32>
    %184 = tpu.matmul %181, %183, %cst_268 {dimension_numbers = #tpu.dot_dimension_numbers<[1], [0], [0], [1], [0, 0, 1, 1], [], []>} : vector<16x4xbf16>, vector<4x128xbf16>, vector<16x128xf32> -> vector<16x128xf32>
    %185 = arith.addf %179, %184 : vector<16x128xf32>
    %c0_269 = arith.constant 0 : index
    %c3_270 = arith.constant 3 : index
    %c2_271 = arith.constant 2 : index
    %c0_272 = arith.constant 0 : index
    %186 = vector.load %arg2[%c0_269, %c3_270, %c2_271, %c0_272] : memref<1x18x18x4xbf16, #tpu.memory_space<vmem>>, vector<1x1x16x4xbf16>
    %187 = vector.shape_cast %186 : vector<1x1x16x4xbf16> to vector<16x4xbf16>
    %c0_273 = arith.constant 0 : index
    %c2_274 = arith.constant 2 : index
    %c0_275 = arith.constant 0 : index
    %c0_276 = arith.constant 0 : index
    %188 = vector.load %arg3[%c0_273, %c2_274, %c0_275, %c0_276] : memref<3x3x4x128xbf16, #tpu.memory_space<vmem>>, vector<1x1x4x128xbf16>
    %189 = vector.shape_cast %188 : vector<1x1x4x128xbf16> to vector<4x128xbf16>
    %cst_277 = arith.constant dense<0.000000e+00> : vector<16x128xf32>
    %190 = tpu.matmul %187, %189, %cst_277 {dimension_numbers = #tpu.dot_dimension_numbers<[1], [0], [0], [1], [0, 0, 1, 1], [], []>} : vector<16x4xbf16>, vector<4x128xbf16>, vector<16x128xf32> -> vector<16x128xf32>
    %191 = arith.addf %185, %190 : vector<16x128xf32>
    %c0_278 = arith.constant 0 : index
    %c4_279 = arith.constant 4 : index
    %c0_280 = arith.constant 0 : index
    %c0_281 = arith.constant 0 : index
    %192 = vector.load %arg2[%c0_278, %c4_279, %c0_280, %c0_281] : memref<1x18x18x4xbf16, #tpu.memory_space<vmem>>, vector<1x1x16x4xbf16>
    %193 = vector.shape_cast %192 : vector<1x1x16x4xbf16> to vector<16x4xbf16>
    %c1_282 = arith.constant 1 : index
    %c0_283 = arith.constant 0 : index
    %c0_284 = arith.constant 0 : index
    %c0_285 = arith.constant 0 : index
    %194 = vector.load %arg3[%c1_282, %c0_283, %c0_284, %c0_285] : memref<3x3x4x128xbf16, #tpu.memory_space<vmem>>, vector<1x1x4x128xbf16>
    %195 = vector.shape_cast %194 : vector<1x1x4x128xbf16> to vector<4x128xbf16>
    %cst_286 = arith.constant dense<0.000000e+00> : vector<16x128xf32>
    %196 = tpu.matmul %193, %195, %cst_286 {dimension_numbers = #tpu.dot_dimension_numbers<[1], [0], [0], [1], [0, 0, 1, 1], [], []>} : vector<16x4xbf16>, vector<4x128xbf16>, vector<16x128xf32> -> vector<16x128xf32>
    %197 = arith.addf %191, %196 : vector<16x128xf32>
    %c0_287 = arith.constant 0 : index
    %c4_288 = arith.constant 4 : index
    %c1_289 = arith.constant 1 : index
    %c0_290 = arith.constant 0 : index
    %198 = vector.load %arg2[%c0_287, %c4_288, %c1_289, %c0_290] : memref<1x18x18x4xbf16, #tpu.memory_space<vmem>>, vector<1x1x16x4xbf16>
    %199 = vector.shape_cast %198 : vector<1x1x16x4xbf16> to vector<16x4xbf16>
    %c1_291 = arith.constant 1 : index
    %c1_292 = arith.constant 1 : index
    %c0_293 = arith.constant 0 : index
    %c0_294 = arith.constant 0 : index
    %200 = vector.load %arg3[%c1_291, %c1_292, %c0_293, %c0_294] : memref<3x3x4x128xbf16, #tpu.memory_space<vmem>>, vector<1x1x4x128xbf16>
    %201 = vector.shape_cast %200 : vector<1x1x4x128xbf16> to vector<4x128xbf16>
    %cst_295 = arith.constant dense<0.000000e+00> : vector<16x128xf32>
    %202 = tpu.matmul %199, %201, %cst_295 {dimension_numbers = #tpu.dot_dimension_numbers<[1], [0], [0], [1], [0, 0, 1, 1], [], []>} : vector<16x4xbf16>, vector<4x128xbf16>, vector<16x128xf32> -> vector<16x128xf32>
    %203 = arith.addf %197, %202 : vector<16x128xf32>
    %c0_296 = arith.constant 0 : index
    %c4_297 = arith.constant 4 : index
    %c2_298 = arith.constant 2 : index
    %c0_299 = arith.constant 0 : index
    %204 = vector.load %arg2[%c0_296, %c4_297, %c2_298, %c0_299] : memref<1x18x18x4xbf16, #tpu.memory_space<vmem>>, vector<1x1x16x4xbf16>
    %205 = vector.shape_cast %204 : vector<1x1x16x4xbf16> to vector<16x4xbf16>
    %c1_300 = arith.constant 1 : index
    %c2_301 = arith.constant 2 : index
    %c0_302 = arith.constant 0 : index
    %c0_303 = arith.constant 0 : index
    %206 = vector.load %arg3[%c1_300, %c2_301, %c0_302, %c0_303] : memref<3x3x4x128xbf16, #tpu.memory_space<vmem>>, vector<1x1x4x128xbf16>
    %207 = vector.shape_cast %206 : vector<1x1x4x128xbf16> to vector<4x128xbf16>
    %cst_304 = arith.constant dense<0.000000e+00> : vector<16x128xf32>
    %208 = tpu.matmul %205, %207, %cst_304 {dimension_numbers = #tpu.dot_dimension_numbers<[1], [0], [0], [1], [0, 0, 1, 1], [], []>} : vector<16x4xbf16>, vector<4x128xbf16>, vector<16x128xf32> -> vector<16x128xf32>
    %209 = arith.addf %203, %208 : vector<16x128xf32>
    %c0_305 = arith.constant 0 : index
    %c5 = arith.constant 5 : index
    %c0_306 = arith.constant 0 : index
    %c0_307 = arith.constant 0 : index
    %210 = vector.load %arg2[%c0_305, %c5, %c0_306, %c0_307] : memref<1x18x18x4xbf16, #tpu.memory_space<vmem>>, vector<1x1x16x4xbf16>
    %211 = vector.shape_cast %210 : vector<1x1x16x4xbf16> to vector<16x4xbf16>
    %c2_308 = arith.constant 2 : index
    %c0_309 = arith.constant 0 : index
    %c0_310 = arith.constant 0 : index
    %c0_311 = arith.constant 0 : index
    %212 = vector.load %arg3[%c2_308, %c0_309, %c0_310, %c0_311] : memref<3x3x4x128xbf16, #tpu.memory_space<vmem>>, vector<1x1x4x128xbf16>
    %213 = vector.shape_cast %212 : vector<1x1x4x128xbf16> to vector<4x128xbf16>
    %cst_312 = arith.constant dense<0.000000e+00> : vector<16x128xf32>
    %214 = tpu.matmul %211, %213, %cst_312 {dimension_numbers = #tpu.dot_dimension_numbers<[1], [0], [0], [1], [0, 0, 1, 1], [], []>} : vector<16x4xbf16>, vector<4x128xbf16>, vector<16x128xf32> -> vector<16x128xf32>
    %215 = arith.addf %209, %214 : vector<16x128xf32>
    %c0_313 = arith.constant 0 : index
    %c5_314 = arith.constant 5 : index
    %c1_315 = arith.constant 1 : index
    %c0_316 = arith.constant 0 : index
    %216 = vector.load %arg2[%c0_313, %c5_314, %c1_315, %c0_316] : memref<1x18x18x4xbf16, #tpu.memory_space<vmem>>, vector<1x1x16x4xbf16>
    %217 = vector.shape_cast %216 : vector<1x1x16x4xbf16> to vector<16x4xbf16>
    %c2_317 = arith.constant 2 : index
    %c1_318 = arith.constant 1 : index
    %c0_319 = arith.constant 0 : index
    %c0_320 = arith.constant 0 : index
    %218 = vector.load %arg3[%c2_317, %c1_318, %c0_319, %c0_320] : memref<3x3x4x128xbf16, #tpu.memory_space<vmem>>, vector<1x1x4x128xbf16>
    %219 = vector.shape_cast %218 : vector<1x1x4x128xbf16> to vector<4x128xbf16>
    %cst_321 = arith.constant dense<0.000000e+00> : vector<16x128xf32>
    %220 = tpu.matmul %217, %219, %cst_321 {dimension_numbers = #tpu.dot_dimension_numbers<[1], [0], [0], [1], [0, 0, 1, 1], [], []>} : vector<16x4xbf16>, vector<4x128xbf16>, vector<16x128xf32> -> vector<16x128xf32>
    %221 = arith.addf %215, %220 : vector<16x128xf32>
    %c0_322 = arith.constant 0 : index
    %c5_323 = arith.constant 5 : index
    %c2_324 = arith.constant 2 : index
    %c0_325 = arith.constant 0 : index
    %222 = vector.load %arg2[%c0_322, %c5_323, %c2_324, %c0_325] : memref<1x18x18x4xbf16, #tpu.memory_space<vmem>>, vector<1x1x16x4xbf16>
    %223 = vector.shape_cast %222 : vector<1x1x16x4xbf16> to vector<16x4xbf16>
    %c2_326 = arith.constant 2 : index
    %c2_327 = arith.constant 2 : index
    %c0_328 = arith.constant 0 : index
    %c0_329 = arith.constant 0 : index
    %224 = vector.load %arg3[%c2_326, %c2_327, %c0_328, %c0_329] : memref<3x3x4x128xbf16, #tpu.memory_space<vmem>>, vector<1x1x4x128xbf16>
    %225 = vector.shape_cast %224 : vector<1x1x4x128xbf16> to vector<4x128xbf16>
    %cst_330 = arith.constant dense<0.000000e+00> : vector<16x128xf32>
    %226 = tpu.matmul %223, %225, %cst_330 {dimension_numbers = #tpu.dot_dimension_numbers<[1], [0], [0], [1], [0, 0, 1, 1], [], []>} : vector<16x4xbf16>, vector<4x128xbf16>, vector<16x128xf32> -> vector<16x128xf32>
    %227 = arith.addf %221, %226 : vector<16x128xf32>
    %228 = vector.broadcast %0 : vector<1x128xf32> to vector<16x128xf32>
    %229 = arith.addf %227, %228 : vector<16x128xf32>
    %c0_331 = arith.constant 0 : index
    %c3_332 = arith.constant 3 : index
    %c0_333 = arith.constant 0 : index
    %c0_334 = arith.constant 0 : index
    %230 = vector.load %arg5[%c0_331, %c3_332, %c0_333, %c0_334] : memref<1x16x16x128xf32, #tpu.memory_space<vmem>>, vector<1x1x16x128xf32>
    %231 = vector.shape_cast %230 : vector<1x1x16x128xf32> to vector<16x128xf32>
    %232 = vector.shape_cast %229 : vector<16x128xf32> to vector<1x1x16x128xf32>
    tpu.vector_store %arg5[%c0_331, %c3_332, %c0_333, %c0_334], %232 {strides = array<i32>} : memref<1x16x16x128xf32, #tpu.memory_space<vmem>>, vector<1x1x16x128xf32>,
    %c0_335 = arith.constant 0 : index
    %c4_336 = arith.constant 4 : index
    %c0_337 = arith.constant 0 : index
    %c0_338 = arith.constant 0 : index
    %233 = vector.load %arg2[%c0_335, %c4_336, %c0_337, %c0_338] : memref<1x18x18x4xbf16, #tpu.memory_space<vmem>>, vector<1x1x16x4xbf16>
    %234 = vector.shape_cast %233 : vector<1x1x16x4xbf16> to vector<16x4xbf16>
    %c0_339 = arith.constant 0 : index
    %c0_340 = arith.constant 0 : index
    %c0_341 = arith.constant 0 : index
    %c0_342 = arith.constant 0 : index
    %235 = vector.load %arg3[%c0_339, %c0_340, %c0_341, %c0_342] : memref<3x3x4x128xbf16, #tpu.memory_space<vmem>>, vector<1x1x4x128xbf16>
    %236 = vector.shape_cast %235 : vector<1x1x4x128xbf16> to vector<4x128xbf16>
    %cst_343 = arith.constant dense<0.000000e+00> : vector<16x128xf32>
    %237 = tpu.matmul %234, %236, %cst_343 {dimension_numbers = #tpu.dot_dimension_numbers<[1], [0], [0], [1], [0, 0, 1, 1], [], []>} : vector<16x4xbf16>, vector<4x128xbf16>, vector<16x128xf32> -> vector<16x128xf32>
    %c0_344 = arith.constant 0 : index
    %c4_345 = arith.constant 4 : index
    %c1_346 = arith.constant 1 : index
    %c0_347 = arith.constant 0 : index
    %238 = vector.load %arg2[%c0_344, %c4_345, %c1_346, %c0_347] : memref<1x18x18x4xbf16, #tpu.memory_space<vmem>>, vector<1x1x16x4xbf16>
    %239 = vector.shape_cast %238 : vector<1x1x16x4xbf16> to vector<16x4xbf16>
    %c0_348 = arith.constant 0 : index
    %c1_349 = arith.constant 1 : index
    %c0_350 = arith.constant 0 : index
    %c0_351 = arith.constant 0 : index
    %240 = vector.load %arg3[%c0_348, %c1_349, %c0_350, %c0_351] : memref<3x3x4x128xbf16, #tpu.memory_space<vmem>>, vector<1x1x4x128xbf16>
    %241 = vector.shape_cast %240 : vector<1x1x4x128xbf16> to vector<4x128xbf16>
    %cst_352 = arith.constant dense<0.000000e+00> : vector<16x128xf32>
    %242 = tpu.matmul %239, %241, %cst_352 {dimension_numbers = #tpu.dot_dimension_numbers<[1], [0], [0], [1], [0, 0, 1, 1], [], []>} : vector<16x4xbf16>, vector<4x128xbf16>, vector<16x128xf32> -> vector<16x128xf32>
    %243 = arith.addf %237, %242 : vector<16x128xf32>
    %c0_353 = arith.constant 0 : index
    %c4_354 = arith.constant 4 : index
    %c2_355 = arith.constant 2 : index
    %c0_356 = arith.constant 0 : index
    %244 = vector.load %arg2[%c0_353, %c4_354, %c2_355, %c0_356] : memref<1x18x18x4xbf16, #tpu.memory_space<vmem>>, vector<1x1x16x4xbf16>
    %245 = vector.shape_cast %244 : vector<1x1x16x4xbf16> to vector<16x4xbf16>
    %c0_357 = arith.constant 0 : index
    %c2_358 = arith.constant 2 : index
    %c0_359 = arith.constant 0 : index
    %c0_360 = arith.constant 0 : index
    %246 = vector.load %arg3[%c0_357, %c2_358, %c0_359, %c0_360] : memref<3x3x4x128xbf16, #tpu.memory_space<vmem>>, vector<1x1x4x128xbf16>
    %247 = vector.shape_cast %246 : vector<1x1x4x128xbf16> to vector<4x128xbf16>
    %cst_361 = arith.constant dense<0.000000e+00> : vector<16x128xf32>
    %248 = tpu.matmul %245, %247, %cst_361 {dimension_numbers = #tpu.dot_dimension_numbers<[1], [0], [0], [1], [0, 0, 1, 1], [], []>} : vector<16x4xbf16>, vector<4x128xbf16>, vector<16x128xf32> -> vector<16x128xf32>
    %249 = arith.addf %243, %248 : vector<16x128xf32>
    %c0_362 = arith.constant 0 : index
    %c5_363 = arith.constant 5 : index
    %c0_364 = arith.constant 0 : index
    %c0_365 = arith.constant 0 : index
    %250 = vector.load %arg2[%c0_362, %c5_363, %c0_364, %c0_365] : memref<1x18x18x4xbf16, #tpu.memory_space<vmem>>, vector<1x1x16x4xbf16>
    %251 = vector.shape_cast %250 : vector<1x1x16x4xbf16> to vector<16x4xbf16>
    %c1_366 = arith.constant 1 : index
    %c0_367 = arith.constant 0 : index
    %c0_368 = arith.constant 0 : index
    %c0_369 = arith.constant 0 : index
    %252 = vector.load %arg3[%c1_366, %c0_367, %c0_368, %c0_369] : memref<3x3x4x128xbf16, #tpu.memory_space<vmem>>, vector<1x1x4x128xbf16>
    %253 = vector.shape_cast %252 : vector<1x1x4x128xbf16> to vector<4x128xbf16>
    %cst_370 = arith.constant dense<0.000000e+00> : vector<16x128xf32>
    %254 = tpu.matmul %251, %253, %cst_370 {dimension_numbers = #tpu.dot_dimension_numbers<[1], [0], [0], [1], [0, 0, 1, 1], [], []>} : vector<16x4xbf16>, vector<4x128xbf16>, vector<16x128xf32> -> vector<16x128xf32>
    %255 = arith.addf %249, %254 : vector<16x128xf32>
    %c0_371 = arith.constant 0 : index
    %c5_372 = arith.constant 5 : index
    %c1_373 = arith.constant 1 : index
    %c0_374 = arith.constant 0 : index
    %256 = vector.load %arg2[%c0_371, %c5_372, %c1_373, %c0_374] : memref<1x18x18x4xbf16, #tpu.memory_space<vmem>>, vector<1x1x16x4xbf16>
    %257 = vector.shape_cast %256 : vector<1x1x16x4xbf16> to vector<16x4xbf16>
    %c1_375 = arith.constant 1 : index
    %c1_376 = arith.constant 1 : index
    %c0_377 = arith.constant 0 : index
    %c0_378 = arith.constant 0 : index
    %258 = vector.load %arg3[%c1_375, %c1_376, %c0_377, %c0_378] : memref<3x3x4x128xbf16, #tpu.memory_space<vmem>>, vector<1x1x4x128xbf16>
    %259 = vector.shape_cast %258 : vector<1x1x4x128xbf16> to vector<4x128xbf16>
    %cst_379 = arith.constant dense<0.000000e+00> : vector<16x128xf32>
    %260 = tpu.matmul %257, %259, %cst_379 {dimension_numbers = #tpu.dot_dimension_numbers<[1], [0], [0], [1], [0, 0, 1, 1], [], []>} : vector<16x4xbf16>, vector<4x128xbf16>, vector<16x128xf32> -> vector<16x128xf32>
    %261 = arith.addf %255, %260 : vector<16x128xf32>
    %c0_380 = arith.constant 0 : index
    %c5_381 = arith.constant 5 : index
    %c2_382 = arith.constant 2 : index
    %c0_383 = arith.constant 0 : index
    %262 = vector.load %arg2[%c0_380, %c5_381, %c2_382, %c0_383] : memref<1x18x18x4xbf16, #tpu.memory_space<vmem>>, vector<1x1x16x4xbf16>
    %263 = vector.shape_cast %262 : vector<1x1x16x4xbf16> to vector<16x4xbf16>
    %c1_384 = arith.constant 1 : index
    %c2_385 = arith.constant 2 : index
    %c0_386 = arith.constant 0 : index
    %c0_387 = arith.constant 0 : index
    %264 = vector.load %arg3[%c1_384, %c2_385, %c0_386, %c0_387] : memref<3x3x4x128xbf16, #tpu.memory_space<vmem>>, vector<1x1x4x128xbf16>
    %265 = vector.shape_cast %264 : vector<1x1x4x128xbf16> to vector<4x128xbf16>
    %cst_388 = arith.constant dense<0.000000e+00> : vector<16x128xf32>
    %266 = tpu.matmul %263, %265, %cst_388 {dimension_numbers = #tpu.dot_dimension_numbers<[1], [0], [0], [1], [0, 0, 1, 1], [], []>} : vector<16x4xbf16>, vector<4x128xbf16>, vector<16x128xf32> -> vector<16x128xf32>
    %267 = arith.addf %261, %266 : vector<16x128xf32>
    %c0_389 = arith.constant 0 : index
    %c6 = arith.constant 6 : index
    %c0_390 = arith.constant 0 : index
    %c0_391 = arith.constant 0 : index
    %268 = vector.load %arg2[%c0_389, %c6, %c0_390, %c0_391] : memref<1x18x18x4xbf16, #tpu.memory_space<vmem>>, vector<1x1x16x4xbf16>
    %269 = vector.shape_cast %268 : vector<1x1x16x4xbf16> to vector<16x4xbf16>
    %c2_392 = arith.constant 2 : index
    %c0_393 = arith.constant 0 : index
    %c0_394 = arith.constant 0 : index
    %c0_395 = arith.constant 0 : index
    %270 = vector.load %arg3[%c2_392, %c0_393, %c0_394, %c0_395] : memref<3x3x4x128xbf16, #tpu.memory_space<vmem>>, vector<1x1x4x128xbf16>
    %271 = vector.shape_cast %270 : vector<1x1x4x128xbf16> to vector<4x128xbf16>
    %cst_396 = arith.constant dense<0.000000e+00> : vector<16x128xf32>
    %272 = tpu.matmul %269, %271, %cst_396 {dimension_numbers = #tpu.dot_dimension_numbers<[1], [0], [0], [1], [0, 0, 1, 1], [], []>} : vector<16x4xbf16>, vector<4x128xbf16>, vector<16x128xf32> -> vector<16x128xf32>
    %273 = arith.addf %267, %272 : vector<16x128xf32>
    %c0_397 = arith.constant 0 : index
    %c6_398 = arith.constant 6 : index
    %c1_399 = arith.constant 1 : index
    %c0_400 = arith.constant 0 : index
    %274 = vector.load %arg2[%c0_397, %c6_398, %c1_399, %c0_400] : memref<1x18x18x4xbf16, #tpu.memory_space<vmem>>, vector<1x1x16x4xbf16>
    %275 = vector.shape_cast %274 : vector<1x1x16x4xbf16> to vector<16x4xbf16>
    %c2_401 = arith.constant 2 : index
    %c1_402 = arith.constant 1 : index
    %c0_403 = arith.constant 0 : index
    %c0_404 = arith.constant 0 : index
    %276 = vector.load %arg3[%c2_401, %c1_402, %c0_403, %c0_404] : memref<3x3x4x128xbf16, #tpu.memory_space<vmem>>, vector<1x1x4x128xbf16>
    %277 = vector.shape_cast %276 : vector<1x1x4x128xbf16> to vector<4x128xbf16>
    %cst_405 = arith.constant dense<0.000000e+00> : vector<16x128xf32>
    %278 = tpu.matmul %275, %277, %cst_405 {dimension_numbers = #tpu.dot_dimension_numbers<[1], [0], [0], [1], [0, 0, 1, 1], [], []>} : vector<16x4xbf16>, vector<4x128xbf16>, vector<16x128xf32> -> vector<16x128xf32>
    %279 = arith.addf %273, %278 : vector<16x128xf32>
    %c0_406 = arith.constant 0 : index
    %c6_407 = arith.constant 6 : index
    %c2_408 = arith.constant 2 : index
    %c0_409 = arith.constant 0 : index
    %280 = vector.load %arg2[%c0_406, %c6_407, %c2_408, %c0_409] : memref<1x18x18x4xbf16, #tpu.memory_space<vmem>>, vector<1x1x16x4xbf16>
    %281 = vector.shape_cast %280 : vector<1x1x16x4xbf16> to vector<16x4xbf16>
    %c2_410 = arith.constant 2 : index
    %c2_411 = arith.constant 2 : index
    %c0_412 = arith.constant 0 : index
    %c0_413 = arith.constant 0 : index
    %282 = vector.load %arg3[%c2_410, %c2_411, %c0_412, %c0_413] : memref<3x3x4x128xbf16, #tpu.memory_space<vmem>>, vector<1x1x4x128xbf16>
    %283 = vector.shape_cast %282 : vector<1x1x4x128xbf16> to vector<4x128xbf16>
    %cst_414 = arith.constant dense<0.000000e+00> : vector<16x128xf32>
    %284 = tpu.matmul %281, %283, %cst_414 {dimension_numbers = #tpu.dot_dimension_numbers<[1], [0], [0], [1], [0, 0, 1, 1], [], []>} : vector<16x4xbf16>, vector<4x128xbf16>, vector<16x128xf32> -> vector<16x128xf32>
    %285 = arith.addf %279, %284 : vector<16x128xf32>
    %286 = vector.broadcast %0 : vector<1x128xf32> to vector<16x128xf32>
    %287 = arith.addf %285, %286 : vector<16x128xf32>
    %c0_415 = arith.constant 0 : index
    %c4_416 = arith.constant 4 : index
    %c0_417 = arith.constant 0 : index
    %c0_418 = arith.constant 0 : index
    %288 = vector.load %arg5[%c0_415, %c4_416, %c0_417, %c0_418] : memref<1x16x16x128xf32, #tpu.memory_space<vmem>>, vector<1x1x16x128xf32>
    %289 = vector.shape_cast %288 : vector<1x1x16x128xf32> to vector<16x128xf32>
    %290 = vector.shape_cast %287 : vector<16x128xf32> to vector<1x1x16x128xf32>
    tpu.vector_store %arg5[%c0_415, %c4_416, %c0_417, %c0_418], %290 {strides = array<i32>} : memref<1x16x16x128xf32, #tpu.memory_space<vmem>>, vector<1x1x16x128xf32>,
    %c0_419 = arith.constant 0 : index
    %c5_420 = arith.constant 5 : index
    %c0_421 = arith.constant 0 : index
    %c0_422 = arith.constant 0 : index
    %291 = vector.load %arg2[%c0_419, %c5_420, %c0_421, %c0_422] : memref<1x18x18x4xbf16, #tpu.memory_space<vmem>>, vector<1x1x16x4xbf16>
    %292 = vector.shape_cast %291 : vector<1x1x16x4xbf16> to vector<16x4xbf16>
    %c0_423 = arith.constant 0 : index
    %c0_424 = arith.constant 0 : index
    %c0_425 = arith.constant 0 : index
    %c0_426 = arith.constant 0 : index
    %293 = vector.load %arg3[%c0_423, %c0_424, %c0_425, %c0_426] : memref<3x3x4x128xbf16, #tpu.memory_space<vmem>>, vector<1x1x4x128xbf16>
    %294 = vector.shape_cast %293 : vector<1x1x4x128xbf16> to vector<4x128xbf16>
    %cst_427 = arith.constant dense<0.000000e+00> : vector<16x128xf32>
    %295 = tpu.matmul %292, %294, %cst_427 {dimension_numbers = #tpu.dot_dimension_numbers<[1], [0], [0], [1], [0, 0, 1, 1], [], []>} : vector<16x4xbf16>, vector<4x128xbf16>, vector<16x128xf32> -> vector<16x128xf32>
    %c0_428 = arith.constant 0 : index
    %c5_429 = arith.constant 5 : index
    %c1_430 = arith.constant 1 : index
    %c0_431 = arith.constant 0 : index
    %296 = vector.load %arg2[%c0_428, %c5_429, %c1_430, %c0_431] : memref<1x18x18x4xbf16, #tpu.memory_space<vmem>>, vector<1x1x16x4xbf16>
    %297 = vector.shape_cast %296 : vector<1x1x16x4xbf16> to vector<16x4xbf16>
    %c0_432 = arith.constant 0 : index
    %c1_433 = arith.constant 1 : index
    %c0_434 = arith.constant 0 : index
    %c0_435 = arith.constant 0 : index
    %298 = vector.load %arg3[%c0_432, %c1_433, %c0_434, %c0_435] : memref<3x3x4x128xbf16, #tpu.memory_space<vmem>>, vector<1x1x4x128xbf16>
    %299 = vector.shape_cast %298 : vector<1x1x4x128xbf16> to vector<4x128xbf16>
    %cst_436 = arith.constant dense<0.000000e+00> : vector<16x128xf32>
    %300 = tpu.matmul %297, %299, %cst_436 {dimension_numbers = #tpu.dot_dimension_numbers<[1], [0], [0], [1], [0, 0, 1, 1], [], []>} : vector<16x4xbf16>, vector<4x128xbf16>, vector<16x128xf32> -> vector<16x128xf32>
    %301 = arith.addf %295, %300 : vector<16x128xf32>
    %c0_437 = arith.constant 0 : index
    %c5_438 = arith.constant 5 : index
    %c2_439 = arith.constant 2 : index
    %c0_440 = arith.constant 0 : index
    %302 = vector.load %arg2[%c0_437, %c5_438, %c2_439, %c0_440] : memref<1x18x18x4xbf16, #tpu.memory_space<vmem>>, vector<1x1x16x4xbf16>
    %303 = vector.shape_cast %302 : vector<1x1x16x4xbf16> to vector<16x4xbf16>
    %c0_441 = arith.constant 0 : index
    %c2_442 = arith.constant 2 : index
    %c0_443 = arith.constant 0 : index
    %c0_444 = arith.constant 0 : index
    %304 = vector.load %arg3[%c0_441, %c2_442, %c0_443, %c0_444] : memref<3x3x4x128xbf16, #tpu.memory_space<vmem>>, vector<1x1x4x128xbf16>
    %305 = vector.shape_cast %304 : vector<1x1x4x128xbf16> to vector<4x128xbf16>
    %cst_445 = arith.constant dense<0.000000e+00> : vector<16x128xf32>
    %306 = tpu.matmul %303, %305, %cst_445 {dimension_numbers = #tpu.dot_dimension_numbers<[1], [0], [0], [1], [0, 0, 1, 1], [], []>} : vector<16x4xbf16>, vector<4x128xbf16>, vector<16x128xf32> -> vector<16x128xf32>
    %307 = arith.addf %301, %306 : vector<16x128xf32>
    %c0_446 = arith.constant 0 : index
    %c6_447 = arith.constant 6 : index
    %c0_448 = arith.constant 0 : index
    %c0_449 = arith.constant 0 : index
    %308 = vector.load %arg2[%c0_446, %c6_447, %c0_448, %c0_449] : memref<1x18x18x4xbf16, #tpu.memory_space<vmem>>, vector<1x1x16x4xbf16>
    %309 = vector.shape_cast %308 : vector<1x1x16x4xbf16> to vector<16x4xbf16>
    %c1_450 = arith.constant 1 : index
    %c0_451 = arith.constant 0 : index
    %c0_452 = arith.constant 0 : index
    %c0_453 = arith.constant 0 : index
    %310 = vector.load %arg3[%c1_450, %c0_451, %c0_452, %c0_453] : memref<3x3x4x128xbf16, #tpu.memory_space<vmem>>, vector<1x1x4x128xbf16>
    %311 = vector.shape_cast %310 : vector<1x1x4x128xbf16> to vector<4x128xbf16>
    %cst_454 = arith.constant dense<0.000000e+00> : vector<16x128xf32>
    %312 = tpu.matmul %309, %311, %cst_454 {dimension_numbers = #tpu.dot_dimension_numbers<[1], [0], [0], [1], [0, 0, 1, 1], [], []>} : vector<16x4xbf16>, vector<4x128xbf16>, vector<16x128xf32> -> vector<16x128xf32>
    %313 = arith.addf %307, %312 : vector<16x128xf32>
    %c0_455 = arith.constant 0 : index
    %c6_456 = arith.constant 6 : index
    %c1_457 = arith.constant 1 : index
    %c0_458 = arith.constant 0 : index
    %314 = vector.load %arg2[%c0_455, %c6_456, %c1_457, %c0_458] : memref<1x18x18x4xbf16, #tpu.memory_space<vmem>>, vector<1x1x16x4xbf16>
    %315 = vector.shape_cast %314 : vector<1x1x16x4xbf16> to vector<16x4xbf16>
    %c1_459 = arith.constant 1 : index
    %c1_460 = arith.constant 1 : index
    %c0_461 = arith.constant 0 : index
    %c0_462 = arith.constant 0 : index
    %316 = vector.load %arg3[%c1_459, %c1_460, %c0_461, %c0_462] : memref<3x3x4x128xbf16, #tpu.memory_space<vmem>>, vector<1x1x4x128xbf16>
    %317 = vector.shape_cast %316 : vector<1x1x4x128xbf16> to vector<4x128xbf16>
    %cst_463 = arith.constant dense<0.000000e+00> : vector<16x128xf32>
    %318 = tpu.matmul %315, %317, %cst_463 {dimension_numbers = #tpu.dot_dimension_numbers<[1], [0], [0], [1], [0, 0, 1, 1], [], []>} : vector<16x4xbf16>, vector<4x128xbf16>, vector<16x128xf32> -> vector<16x128xf32>
    %319 = arith.addf %313, %318 : vector<16x128xf32>
    %c0_464 = arith.constant 0 : index
    %c6_465 = arith.constant 6 : index
    %c2_466 = arith.constant 2 : index
    %c0_467 = arith.constant 0 : index
    %320 = vector.load %arg2[%c0_464, %c6_465, %c2_466, %c0_467] : memref<1x18x18x4xbf16, #tpu.memory_space<vmem>>, vector<1x1x16x4xbf16>
    %321 = vector.shape_cast %320 : vector<1x1x16x4xbf16> to vector<16x4xbf16>
    %c1_468 = arith.constant 1 : index
    %c2_469 = arith.constant 2 : index
    %c0_470 = arith.constant 0 : index
    %c0_471 = arith.constant 0 : index
    %322 = vector.load %arg3[%c1_468, %c2_469, %c0_470, %c0_471] : memref<3x3x4x128xbf16, #tpu.memory_space<vmem>>, vector<1x1x4x128xbf16>
    %323 = vector.shape_cast %322 : vector<1x1x4x128xbf16> to vector<4x128xbf16>
    %cst_472 = arith.constant dense<0.000000e+00> : vector<16x128xf32>
    %324 = tpu.matmul %321, %323, %cst_472 {dimension_numbers = #tpu.dot_dimension_numbers<[1], [0], [0], [1], [0, 0, 1, 1], [], []>} : vector<16x4xbf16>, vector<4x128xbf16>, vector<16x128xf32> -> vector<16x128xf32>
    %325 = arith.addf %319, %324 : vector<16x128xf32>
    %c0_473 = arith.constant 0 : index
    %c7 = arith.constant 7 : index
    %c0_474 = arith.constant 0 : index
    %c0_475 = arith.constant 0 : index
    %326 = vector.load %arg2[%c0_473, %c7, %c0_474, %c0_475] : memref<1x18x18x4xbf16, #tpu.memory_space<vmem>>, vector<1x1x16x4xbf16>
    %327 = vector.shape_cast %326 : vector<1x1x16x4xbf16> to vector<16x4xbf16>
    %c2_476 = arith.constant 2 : index
    %c0_477 = arith.constant 0 : index
    %c0_478 = arith.constant 0 : index
    %c0_479 = arith.constant 0 : index
    %328 = vector.load %arg3[%c2_476, %c0_477, %c0_478, %c0_479] : memref<3x3x4x128xbf16, #tpu.memory_space<vmem>>, vector<1x1x4x128xbf16>
    %329 = vector.shape_cast %328 : vector<1x1x4x128xbf16> to vector<4x128xbf16>
    %cst_480 = arith.constant dense<0.000000e+00> : vector<16x128xf32>
    %330 = tpu.matmul %327, %329, %cst_480 {dimension_numbers = #tpu.dot_dimension_numbers<[1], [0], [0], [1], [0, 0, 1, 1], [], []>} : vector<16x4xbf16>, vector<4x128xbf16>, vector<16x128xf32> -> vector<16x128xf32>
    %331 = arith.addf %325, %330 : vector<16x128xf32>
    %c0_481 = arith.constant 0 : index
    %c7_482 = arith.constant 7 : index
    %c1_483 = arith.constant 1 : index
    %c0_484 = arith.constant 0 : index
    %332 = vector.load %arg2[%c0_481, %c7_482, %c1_483, %c0_484] : memref<1x18x18x4xbf16, #tpu.memory_space<vmem>>, vector<1x1x16x4xbf16>
    %333 = vector.shape_cast %332 : vector<1x1x16x4xbf16> to vector<16x4xbf16>
    %c2_485 = arith.constant 2 : index
    %c1_486 = arith.constant 1 : index
    %c0_487 = arith.constant 0 : index
    %c0_488 = arith.constant 0 : index
    %334 = vector.load %arg3[%c2_485, %c1_486, %c0_487, %c0_488] : memref<3x3x4x128xbf16, #tpu.memory_space<vmem>>, vector<1x1x4x128xbf16>
    %335 = vector.shape_cast %334 : vector<1x1x4x128xbf16> to vector<4x128xbf16>
    %cst_489 = arith.constant dense<0.000000e+00> : vector<16x128xf32>
    %336 = tpu.matmul %333, %335, %cst_489 {dimension_numbers = #tpu.dot_dimension_numbers<[1], [0], [0], [1], [0, 0, 1, 1], [], []>} : vector<16x4xbf16>, vector<4x128xbf16>, vector<16x128xf32> -> vector<16x128xf32>
    %337 = arith.addf %331, %336 : vector<16x128xf32>
    %c0_490 = arith.constant 0 : index
    %c7_491 = arith.constant 7 : index
    %c2_492 = arith.constant 2 : index
    %c0_493 = arith.constant 0 : index
    %338 = vector.load %arg2[%c0_490, %c7_491, %c2_492, %c0_493] : memref<1x18x18x4xbf16, #tpu.memory_space<vmem>>, vector<1x1x16x4xbf16>
    %339 = vector.shape_cast %338 : vector<1x1x16x4xbf16> to vector<16x4xbf16>
    %c2_494 = arith.constant 2 : index
    %c2_495 = arith.constant 2 : index
    %c0_496 = arith.constant 0 : index
    %c0_497 = arith.constant 0 : index
    %340 = vector.load %arg3[%c2_494, %c2_495, %c0_496, %c0_497] : memref<3x3x4x128xbf16, #tpu.memory_space<vmem>>, vector<1x1x4x128xbf16>
    %341 = vector.shape_cast %340 : vector<1x1x4x128xbf16> to vector<4x128xbf16>
    %cst_498 = arith.constant dense<0.000000e+00> : vector<16x128xf32>
    %342 = tpu.matmul %339, %341, %cst_498 {dimension_numbers = #tpu.dot_dimension_numbers<[1], [0], [0], [1], [0, 0, 1, 1], [], []>} : vector<16x4xbf16>, vector<4x128xbf16>, vector<16x128xf32> -> vector<16x128xf32>
    %343 = arith.addf %337, %342 : vector<16x128xf32>
    %344 = vector.broadcast %0 : vector<1x128xf32> to vector<16x128xf32>
    %345 = arith.addf %343, %344 : vector<16x128xf32>
    %c0_499 = arith.constant 0 : index
    %c5_500 = arith.constant 5 : index
    %c0_501 = arith.constant 0 : index
    %c0_502 = arith.constant 0 : index
    %346 = vector.load %arg5[%c0_499, %c5_500, %c0_501, %c0_502] : memref<1x16x16x128xf32, #tpu.memory_space<vmem>>, vector<1x1x16x128xf32>
    %347 = vector.shape_cast %346 : vector<1x1x16x128xf32> to vector<16x128xf32>
    %348 = vector.shape_cast %345 : vector<16x128xf32> to vector<1x1x16x128xf32>
    tpu.vector_store %arg5[%c0_499, %c5_500, %c0_501, %c0_502], %348 {strides = array<i32>} : memref<1x16x16x128xf32, #tpu.memory_space<vmem>>, vector<1x1x16x128xf32>,
    %c0_503 = arith.constant 0 : index
    %c6_504 = arith.constant 6 : index
    %c0_505 = arith.constant 0 : index
    %c0_506 = arith.constant 0 : index
    %349 = vector.load %arg2[%c0_503, %c6_504, %c0_505, %c0_506] : memref<1x18x18x4xbf16, #tpu.memory_space<vmem>>, vector<1x1x16x4xbf16>
    %350 = vector.shape_cast %349 : vector<1x1x16x4xbf16> to vector<16x4xbf16>
    %c0_507 = arith.constant 0 : index
    %c0_508 = arith.constant 0 : index
    %c0_509 = arith.constant 0 : index
    %c0_510 = arith.constant 0 : index
    %351 = vector.load %arg3[%c0_507, %c0_508, %c0_509, %c0_510] : memref<3x3x4x128xbf16, #tpu.memory_space<vmem>>, vector<1x1x4x128xbf16>
    %352 = vector.shape_cast %351 : vector<1x1x4x128xbf16> to vector<4x128xbf16>
    %cst_511 = arith.constant dense<0.000000e+00> : vector<16x128xf32>
    %353 = tpu.matmul %350, %352, %cst_511 {dimension_numbers = #tpu.dot_dimension_numbers<[1], [0], [0], [1], [0, 0, 1, 1], [], []>} : vector<16x4xbf16>, vector<4x128xbf16>, vector<16x128xf32> -> vector<16x128xf32>
    %c0_512 = arith.constant 0 : index
    %c6_513 = arith.constant 6 : index
    %c1_514 = arith.constant 1 : index
    %c0_515 = arith.constant 0 : index
    %354 = vector.load %arg2[%c0_512, %c6_513, %c1_514, %c0_515] : memref<1x18x18x4xbf16, #tpu.memory_space<vmem>>, vector<1x1x16x4xbf16>
    %355 = vector.shape_cast %354 : vector<1x1x16x4xbf16> to vector<16x4xbf16>
    %c0_516 = arith.constant 0 : index
    %c1_517 = arith.constant 1 : index
    %c0_518 = arith.constant 0 : index
    %c0_519 = arith.constant 0 : index
    %356 = vector.load %arg3[%c0_516, %c1_517, %c0_518, %c0_519] : memref<3x3x4x128xbf16, #tpu.memory_space<vmem>>, vector<1x1x4x128xbf16>
    %357 = vector.shape_cast %356 : vector<1x1x4x128xbf16> to vector<4x128xbf16>
    %cst_520 = arith.constant dense<0.000000e+00> : vector<16x128xf32>
    %358 = tpu.matmul %355, %357, %cst_520 {dimension_numbers = #tpu.dot_dimension_numbers<[1], [0], [0], [1], [0, 0, 1, 1], [], []>} : vector<16x4xbf16>, vector<4x128xbf16>, vector<16x128xf32> -> vector<16x128xf32>
    %359 = arith.addf %353, %358 : vector<16x128xf32>
    %c0_521 = arith.constant 0 : index
    %c6_522 = arith.constant 6 : index
    %c2_523 = arith.constant 2 : index
    %c0_524 = arith.constant 0 : index
    %360 = vector.load %arg2[%c0_521, %c6_522, %c2_523, %c0_524] : memref<1x18x18x4xbf16, #tpu.memory_space<vmem>>, vector<1x1x16x4xbf16>
    %361 = vector.shape_cast %360 : vector<1x1x16x4xbf16> to vector<16x4xbf16>
    %c0_525 = arith.constant 0 : index
    %c2_526 = arith.constant 2 : index
    %c0_527 = arith.constant 0 : index
    %c0_528 = arith.constant 0 : index
    %362 = vector.load %arg3[%c0_525, %c2_526, %c0_527, %c0_528] : memref<3x3x4x128xbf16, #tpu.memory_space<vmem>>, vector<1x1x4x128xbf16>
    %363 = vector.shape_cast %362 : vector<1x1x4x128xbf16> to vector<4x128xbf16>
    %cst_529 = arith.constant dense<0.000000e+00> : vector<16x128xf32>
    %364 = tpu.matmul %361, %363, %cst_529 {dimension_numbers = #tpu.dot_dimension_numbers<[1], [0], [0], [1], [0, 0, 1, 1], [], []>} : vector<16x4xbf16>, vector<4x128xbf16>, vector<16x128xf32> -> vector<16x128xf32>
    %365 = arith.addf %359, %364 : vector<16x128xf32>
    %c0_530 = arith.constant 0 : index
    %c7_531 = arith.constant 7 : index
    %c0_532 = arith.constant 0 : index
    %c0_533 = arith.constant 0 : index
    %366 = vector.load %arg2[%c0_530, %c7_531, %c0_532, %c0_533] : memref<1x18x18x4xbf16, #tpu.memory_space<vmem>>, vector<1x1x16x4xbf16>
    %367 = vector.shape_cast %366 : vector<1x1x16x4xbf16> to vector<16x4xbf16>
    %c1_534 = arith.constant 1 : index
    %c0_535 = arith.constant 0 : index
    %c0_536 = arith.constant 0 : index
    %c0_537 = arith.constant 0 : index
    %368 = vector.load %arg3[%c1_534, %c0_535, %c0_536, %c0_537] : memref<3x3x4x128xbf16, #tpu.memory_space<vmem>>, vector<1x1x4x128xbf16>
    %369 = vector.shape_cast %368 : vector<1x1x4x128xbf16> to vector<4x128xbf16>
    %cst_538 = arith.constant dense<0.000000e+00> : vector<16x128xf32>
    %370 = tpu.matmul %367, %369, %cst_538 {dimension_numbers = #tpu.dot_dimension_numbers<[1], [0], [0], [1], [0, 0, 1, 1], [], []>} : vector<16x4xbf16>, vector<4x128xbf16>, vector<16x128xf32> -> vector<16x128xf32>
    %371 = arith.addf %365, %370 : vector<16x128xf32>
    %c0_539 = arith.constant 0 : index
    %c7_540 = arith.constant 7 : index
    %c1_541 = arith.constant 1 : index
    %c0_542 = arith.constant 0 : index
    %372 = vector.load %arg2[%c0_539, %c7_540, %c1_541, %c0_542] : memref<1x18x18x4xbf16, #tpu.memory_space<vmem>>, vector<1x1x16x4xbf16>
    %373 = vector.shape_cast %372 : vector<1x1x16x4xbf16> to vector<16x4xbf16>
    %c1_543 = arith.constant 1 : index
    %c1_544 = arith.constant 1 : index
    %c0_545 = arith.constant 0 : index
    %c0_546 = arith.constant 0 : index
    %374 = vector.load %arg3[%c1_543, %c1_544, %c0_545, %c0_546] : memref<3x3x4x128xbf16, #tpu.memory_space<vmem>>, vector<1x1x4x128xbf16>
    %375 = vector.shape_cast %374 : vector<1x1x4x128xbf16> to vector<4x128xbf16>
    %cst_547 = arith.constant dense<0.000000e+00> : vector<16x128xf32>
    %376 = tpu.matmul %373, %375, %cst_547 {dimension_numbers = #tpu.dot_dimension_numbers<[1], [0], [0], [1], [0, 0, 1, 1], [], []>} : vector<16x4xbf16>, vector<4x128xbf16>, vector<16x128xf32> -> vector<16x128xf32>
    %377 = arith.addf %371, %376 : vector<16x128xf32>
    %c0_548 = arith.constant 0 : index
    %c7_549 = arith.constant 7 : index
    %c2_550 = arith.constant 2 : index
    %c0_551 = arith.constant 0 : index
    %378 = vector.load %arg2[%c0_548, %c7_549, %c2_550, %c0_551] : memref<1x18x18x4xbf16, #tpu.memory_space<vmem>>, vector<1x1x16x4xbf16>
    %379 = vector.shape_cast %378 : vector<1x1x16x4xbf16> to vector<16x4xbf16>
    %c1_552 = arith.constant 1 : index
    %c2_553 = arith.constant 2 : index
    %c0_554 = arith.constant 0 : index
    %c0_555 = arith.constant 0 : index
    %380 = vector.load %arg3[%c1_552, %c2_553, %c0_554, %c0_555] : memref<3x3x4x128xbf16, #tpu.memory_space<vmem>>, vector<1x1x4x128xbf16>
    %381 = vector.shape_cast %380 : vector<1x1x4x128xbf16> to vector<4x128xbf16>
    %cst_556 = arith.constant dense<0.000000e+00> : vector<16x128xf32>
    %382 = tpu.matmul %379, %381, %cst_556 {dimension_numbers = #tpu.dot_dimension_numbers<[1], [0], [0], [1], [0, 0, 1, 1], [], []>} : vector<16x4xbf16>, vector<4x128xbf16>, vector<16x128xf32> -> vector<16x128xf32>
    %383 = arith.addf %377, %382 : vector<16x128xf32>
    %c0_557 = arith.constant 0 : index
    %c8 = arith.constant 8 : index
    %c0_558 = arith.constant 0 : index
    %c0_559 = arith.constant 0 : index
    %384 = vector.load %arg2[%c0_557, %c8, %c0_558, %c0_559] : memref<1x18x18x4xbf16, #tpu.memory_space<vmem>>, vector<1x1x16x4xbf16>
    %385 = vector.shape_cast %384 : vector<1x1x16x4xbf16> to vector<16x4xbf16>
    %c2_560 = arith.constant 2 : index
    %c0_561 = arith.constant 0 : index
    %c0_562 = arith.constant 0 : index
    %c0_563 = arith.constant 0 : index
    %386 = vector.load %arg3[%c2_560, %c0_561, %c0_562, %c0_563] : memref<3x3x4x128xbf16, #tpu.memory_space<vmem>>, vector<1x1x4x128xbf16>
    %387 = vector.shape_cast %386 : vector<1x1x4x128xbf16> to vector<4x128xbf16>
    %cst_564 = arith.constant dense<0.000000e+00> : vector<16x128xf32>
    %388 = tpu.matmul %385, %387, %cst_564 {dimension_numbers = #tpu.dot_dimension_numbers<[1], [0], [0], [1], [0, 0, 1, 1], [], []>} : vector<16x4xbf16>, vector<4x128xbf16>, vector<16x128xf32> -> vector<16x128xf32>
    %389 = arith.addf %383, %388 : vector<16x128xf32>
    %c0_565 = arith.constant 0 : index
    %c8_566 = arith.constant 8 : index
    %c1_567 = arith.constant 1 : index
    %c0_568 = arith.constant 0 : index
    %390 = vector.load %arg2[%c0_565, %c8_566, %c1_567, %c0_568] : memref<1x18x18x4xbf16, #tpu.memory_space<vmem>>, vector<1x1x16x4xbf16>
    %391 = vector.shape_cast %390 : vector<1x1x16x4xbf16> to vector<16x4xbf16>
    %c2_569 = arith.constant 2 : index
    %c1_570 = arith.constant 1 : index
    %c0_571 = arith.constant 0 : index
    %c0_572 = arith.constant 0 : index
    %392 = vector.load %arg3[%c2_569, %c1_570, %c0_571, %c0_572] : memref<3x3x4x128xbf16, #tpu.memory_space<vmem>>, vector<1x1x4x128xbf16>
    %393 = vector.shape_cast %392 : vector<1x1x4x128xbf16> to vector<4x128xbf16>
    %cst_573 = arith.constant dense<0.000000e+00> : vector<16x128xf32>
    %394 = tpu.matmul %391, %393, %cst_573 {dimension_numbers = #tpu.dot_dimension_numbers<[1], [0], [0], [1], [0, 0, 1, 1], [], []>} : vector<16x4xbf16>, vector<4x128xbf16>, vector<16x128xf32> -> vector<16x128xf32>
    %395 = arith.addf %389, %394 : vector<16x128xf32>
    %c0_574 = arith.constant 0 : index
    %c8_575 = arith.constant 8 : index
    %c2_576 = arith.constant 2 : index
    %c0_577 = arith.constant 0 : index
    %396 = vector.load %arg2[%c0_574, %c8_575, %c2_576, %c0_577] : memref<1x18x18x4xbf16, #tpu.memory_space<vmem>>, vector<1x1x16x4xbf16>
    %397 = vector.shape_cast %396 : vector<1x1x16x4xbf16> to vector<16x4xbf16>
    %c2_578 = arith.constant 2 : index
    %c2_579 = arith.constant 2 : index
    %c0_580 = arith.constant 0 : index
    %c0_581 = arith.constant 0 : index
    %398 = vector.load %arg3[%c2_578, %c2_579, %c0_580, %c0_581] : memref<3x3x4x128xbf16, #tpu.memory_space<vmem>>, vector<1x1x4x128xbf16>
    %399 = vector.shape_cast %398 : vector<1x1x4x128xbf16> to vector<4x128xbf16>
    %cst_582 = arith.constant dense<0.000000e+00> : vector<16x128xf32>
    %400 = tpu.matmul %397, %399, %cst_582 {dimension_numbers = #tpu.dot_dimension_numbers<[1], [0], [0], [1], [0, 0, 1, 1], [], []>} : vector<16x4xbf16>, vector<4x128xbf16>, vector<16x128xf32> -> vector<16x128xf32>
    %401 = arith.addf %395, %400 : vector<16x128xf32>
    %402 = vector.broadcast %0 : vector<1x128xf32> to vector<16x128xf32>
    %403 = arith.addf %401, %402 : vector<16x128xf32>
    %c0_583 = arith.constant 0 : index
    %c6_584 = arith.constant 6 : index
    %c0_585 = arith.constant 0 : index
    %c0_586 = arith.constant 0 : index
    %404 = vector.load %arg5[%c0_583, %c6_584, %c0_585, %c0_586] : memref<1x16x16x128xf32, #tpu.memory_space<vmem>>, vector<1x1x16x128xf32>
    %405 = vector.shape_cast %404 : vector<1x1x16x128xf32> to vector<16x128xf32>
    %406 = vector.shape_cast %403 : vector<16x128xf32> to vector<1x1x16x128xf32>
    tpu.vector_store %arg5[%c0_583, %c6_584, %c0_585, %c0_586], %406 {strides = array<i32>} : memref<1x16x16x128xf32, #tpu.memory_space<vmem>>, vector<1x1x16x128xf32>,
    %c0_587 = arith.constant 0 : index
    %c7_588 = arith.constant 7 : index
    %c0_589 = arith.constant 0 : index
    %c0_590 = arith.constant 0 : index
    %407 = vector.load %arg2[%c0_587, %c7_588, %c0_589, %c0_590] : memref<1x18x18x4xbf16, #tpu.memory_space<vmem>>, vector<1x1x16x4xbf16>
    %408 = vector.shape_cast %407 : vector<1x1x16x4xbf16> to vector<16x4xbf16>
    %c0_591 = arith.constant 0 : index
    %c0_592 = arith.constant 0 : index
    %c0_593 = arith.constant 0 : index
    %c0_594 = arith.constant 0 : index
    %409 = vector.load %arg3[%c0_591, %c0_592, %c0_593, %c0_594] : memref<3x3x4x128xbf16, #tpu.memory_space<vmem>>, vector<1x1x4x128xbf16>
    %410 = vector.shape_cast %409 : vector<1x1x4x128xbf16> to vector<4x128xbf16>
    %cst_595 = arith.constant dense<0.000000e+00> : vector<16x128xf32>
    %411 = tpu.matmul %408, %410, %cst_595 {dimension_numbers = #tpu.dot_dimension_numbers<[1], [0], [0], [1], [0, 0, 1, 1], [], []>} : vector<16x4xbf16>, vector<4x128xbf16>, vector<16x128xf32> -> vector<16x128xf32>
    %c0_596 = arith.constant 0 : index
    %c7_597 = arith.constant 7 : index
    %c1_598 = arith.constant 1 : index
    %c0_599 = arith.constant 0 : index
    %412 = vector.load %arg2[%c0_596, %c7_597, %c1_598, %c0_599] : memref<1x18x18x4xbf16, #tpu.memory_space<vmem>>, vector<1x1x16x4xbf16>
    %413 = vector.shape_cast %412 : vector<1x1x16x4xbf16> to vector<16x4xbf16>
    %c0_600 = arith.constant 0 : index
    %c1_601 = arith.constant 1 : index
    %c0_602 = arith.constant 0 : index
    %c0_603 = arith.constant 0 : index
    %414 = vector.load %arg3[%c0_600, %c1_601, %c0_602, %c0_603] : memref<3x3x4x128xbf16, #tpu.memory_space<vmem>>, vector<1x1x4x128xbf16>
    %415 = vector.shape_cast %414 : vector<1x1x4x128xbf16> to vector<4x128xbf16>
    %cst_604 = arith.constant dense<0.000000e+00> : vector<16x128xf32>
    %416 = tpu.matmul %413, %415, %cst_604 {dimension_numbers = #tpu.dot_dimension_numbers<[1], [0], [0], [1], [0, 0, 1, 1], [], []>} : vector<16x4xbf16>, vector<4x128xbf16>, vector<16x128xf32> -> vector<16x128xf32>
    %417 = arith.addf %411, %416 : vector<16x128xf32>
    %c0_605 = arith.constant 0 : index
    %c7_606 = arith.constant 7 : index
    %c2_607 = arith.constant 2 : index
    %c0_608 = arith.constant 0 : index
    %418 = vector.load %arg2[%c0_605, %c7_606, %c2_607, %c0_608] : memref<1x18x18x4xbf16, #tpu.memory_space<vmem>>, vector<1x1x16x4xbf16>
    %419 = vector.shape_cast %418 : vector<1x1x16x4xbf16> to vector<16x4xbf16>
    %c0_609 = arith.constant 0 : index
    %c2_610 = arith.constant 2 : index
    %c0_611 = arith.constant 0 : index
    %c0_612 = arith.constant 0 : index
    %420 = vector.load %arg3[%c0_609, %c2_610, %c0_611, %c0_612] : memref<3x3x4x128xbf16, #tpu.memory_space<vmem>>, vector<1x1x4x128xbf16>
    %421 = vector.shape_cast %420 : vector<1x1x4x128xbf16> to vector<4x128xbf16>
    %cst_613 = arith.constant dense<0.000000e+00> : vector<16x128xf32>
    %422 = tpu.matmul %419, %421, %cst_613 {dimension_numbers = #tpu.dot_dimension_numbers<[1], [0], [0], [1], [0, 0, 1, 1], [], []>} : vector<16x4xbf16>, vector<4x128xbf16>, vector<16x128xf32> -> vector<16x128xf32>
    %423 = arith.addf %417, %422 : vector<16x128xf32>
    %c0_614 = arith.constant 0 : index
    %c8_615 = arith.constant 8 : index
    %c0_616 = arith.constant 0 : index
    %c0_617 = arith.constant 0 : index
    %424 = vector.load %arg2[%c0_614, %c8_615, %c0_616, %c0_617] : memref<1x18x18x4xbf16, #tpu.memory_space<vmem>>, vector<1x1x16x4xbf16>
    %425 = vector.shape_cast %424 : vector<1x1x16x4xbf16> to vector<16x4xbf16>
    %c1_618 = arith.constant 1 : index
    %c0_619 = arith.constant 0 : index
    %c0_620 = arith.constant 0 : index
    %c0_621 = arith.constant 0 : index
    %426 = vector.load %arg3[%c1_618, %c0_619, %c0_620, %c0_621] : memref<3x3x4x128xbf16, #tpu.memory_space<vmem>>, vector<1x1x4x128xbf16>
    %427 = vector.shape_cast %426 : vector<1x1x4x128xbf16> to vector<4x128xbf16>
    %cst_622 = arith.constant dense<0.000000e+00> : vector<16x128xf32>
    %428 = tpu.matmul %425, %427, %cst_622 {dimension_numbers = #tpu.dot_dimension_numbers<[1], [0], [0], [1], [0, 0, 1, 1], [], []>} : vector<16x4xbf16>, vector<4x128xbf16>, vector<16x128xf32> -> vector<16x128xf32>
    %429 = arith.addf %423, %428 : vector<16x128xf32>
    %c0_623 = arith.constant 0 : index
    %c8_624 = arith.constant 8 : index
    %c1_625 = arith.constant 1 : index
    %c0_626 = arith.constant 0 : index
    %430 = vector.load %arg2[%c0_623, %c8_624, %c1_625, %c0_626] : memref<1x18x18x4xbf16, #tpu.memory_space<vmem>>, vector<1x1x16x4xbf16>
    %431 = vector.shape_cast %430 : vector<1x1x16x4xbf16> to vector<16x4xbf16>
    %c1_627 = arith.constant 1 : index
    %c1_628 = arith.constant 1 : index
    %c0_629 = arith.constant 0 : index
    %c0_630 = arith.constant 0 : index
    %432 = vector.load %arg3[%c1_627, %c1_628, %c0_629, %c0_630] : memref<3x3x4x128xbf16, #tpu.memory_space<vmem>>, vector<1x1x4x128xbf16>
    %433 = vector.shape_cast %432 : vector<1x1x4x128xbf16> to vector<4x128xbf16>
    %cst_631 = arith.constant dense<0.000000e+00> : vector<16x128xf32>
    %434 = tpu.matmul %431, %433, %cst_631 {dimension_numbers = #tpu.dot_dimension_numbers<[1], [0], [0], [1], [0, 0, 1, 1], [], []>} : vector<16x4xbf16>, vector<4x128xbf16>, vector<16x128xf32> -> vector<16x128xf32>
    %435 = arith.addf %429, %434 : vector<16x128xf32>
    %c0_632 = arith.constant 0 : index
    %c8_633 = arith.constant 8 : index
    %c2_634 = arith.constant 2 : index
    %c0_635 = arith.constant 0 : index
    %436 = vector.load %arg2[%c0_632, %c8_633, %c2_634, %c0_635] : memref<1x18x18x4xbf16, #tpu.memory_space<vmem>>, vector<1x1x16x4xbf16>
    %437 = vector.shape_cast %436 : vector<1x1x16x4xbf16> to vector<16x4xbf16>
    %c1_636 = arith.constant 1 : index
    %c2_637 = arith.constant 2 : index
    %c0_638 = arith.constant 0 : index
    %c0_639 = arith.constant 0 : index
    %438 = vector.load %arg3[%c1_636, %c2_637, %c0_638, %c0_639] : memref<3x3x4x128xbf16, #tpu.memory_space<vmem>>, vector<1x1x4x128xbf16>
    %439 = vector.shape_cast %438 : vector<1x1x4x128xbf16> to vector<4x128xbf16>
    %cst_640 = arith.constant dense<0.000000e+00> : vector<16x128xf32>
    %440 = tpu.matmul %437, %439, %cst_640 {dimension_numbers = #tpu.dot_dimension_numbers<[1], [0], [0], [1], [0, 0, 1, 1], [], []>} : vector<16x4xbf16>, vector<4x128xbf16>, vector<16x128xf32> -> vector<16x128xf32>
    %441 = arith.addf %435, %440 : vector<16x128xf32>
    %c0_641 = arith.constant 0 : index
    %c9 = arith.constant 9 : index
    %c0_642 = arith.constant 0 : index
    %c0_643 = arith.constant 0 : index
    %442 = vector.load %arg2[%c0_641, %c9, %c0_642, %c0_643] : memref<1x18x18x4xbf16, #tpu.memory_space<vmem>>, vector<1x1x16x4xbf16>
    %443 = vector.shape_cast %442 : vector<1x1x16x4xbf16> to vector<16x4xbf16>
    %c2_644 = arith.constant 2 : index
    %c0_645 = arith.constant 0 : index
    %c0_646 = arith.constant 0 : index
    %c0_647 = arith.constant 0 : index
    %444 = vector.load %arg3[%c2_644, %c0_645, %c0_646, %c0_647] : memref<3x3x4x128xbf16, #tpu.memory_space<vmem>>, vector<1x1x4x128xbf16>
    %445 = vector.shape_cast %444 : vector<1x1x4x128xbf16> to vector<4x128xbf16>
    %cst_648 = arith.constant dense<0.000000e+00> : vector<16x128xf32>
    %446 = tpu.matmul %443, %445, %cst_648 {dimension_numbers = #tpu.dot_dimension_numbers<[1], [0], [0], [1], [0, 0, 1, 1], [], []>} : vector<16x4xbf16>, vector<4x128xbf16>, vector<16x128xf32> -> vector<16x128xf32>
    %447 = arith.addf %441, %446 : vector<16x128xf32>
    %c0_649 = arith.constant 0 : index
    %c9_650 = arith.constant 9 : index
    %c1_651 = arith.constant 1 : index
    %c0_652 = arith.constant 0 : index
    %448 = vector.load %arg2[%c0_649, %c9_650, %c1_651, %c0_652] : memref<1x18x18x4xbf16, #tpu.memory_space<vmem>>, vector<1x1x16x4xbf16>
    %449 = vector.shape_cast %448 : vector<1x1x16x4xbf16> to vector<16x4xbf16>
    %c2_653 = arith.constant 2 : index
    %c1_654 = arith.constant 1 : index
    %c0_655 = arith.constant 0 : index
    %c0_656 = arith.constant 0 : index
    %450 = vector.load %arg3[%c2_653, %c1_654, %c0_655, %c0_656] : memref<3x3x4x128xbf16, #tpu.memory_space<vmem>>, vector<1x1x4x128xbf16>
    %451 = vector.shape_cast %450 : vector<1x1x4x128xbf16> to vector<4x128xbf16>
    %cst_657 = arith.constant dense<0.000000e+00> : vector<16x128xf32>
    %452 = tpu.matmul %449, %451, %cst_657 {dimension_numbers = #tpu.dot_dimension_numbers<[1], [0], [0], [1], [0, 0, 1, 1], [], []>} : vector<16x4xbf16>, vector<4x128xbf16>, vector<16x128xf32> -> vector<16x128xf32>
    %453 = arith.addf %447, %452 : vector<16x128xf32>
    %c0_658 = arith.constant 0 : index
    %c9_659 = arith.constant 9 : index
    %c2_660 = arith.constant 2 : index
    %c0_661 = arith.constant 0 : index
    %454 = vector.load %arg2[%c0_658, %c9_659, %c2_660, %c0_661] : memref<1x18x18x4xbf16, #tpu.memory_space<vmem>>, vector<1x1x16x4xbf16>
    %455 = vector.shape_cast %454 : vector<1x1x16x4xbf16> to vector<16x4xbf16>
    %c2_662 = arith.constant 2 : index
    %c2_663 = arith.constant 2 : index
    %c0_664 = arith.constant 0 : index
    %c0_665 = arith.constant 0 : index
    %456 = vector.load %arg3[%c2_662, %c2_663, %c0_664, %c0_665] : memref<3x3x4x128xbf16, #tpu.memory_space<vmem>>, vector<1x1x4x128xbf16>
    %457 = vector.shape_cast %456 : vector<1x1x4x128xbf16> to vector<4x128xbf16>
    %cst_666 = arith.constant dense<0.000000e+00> : vector<16x128xf32>
    %458 = tpu.matmul %455, %457, %cst_666 {dimension_numbers = #tpu.dot_dimension_numbers<[1], [0], [0], [1], [0, 0, 1, 1], [], []>} : vector<16x4xbf16>, vector<4x128xbf16>, vector<16x128xf32> -> vector<16x128xf32>
    %459 = arith.addf %453, %458 : vector<16x128xf32>
    %460 = vector.broadcast %0 : vector<1x128xf32> to vector<16x128xf32>
    %461 = arith.addf %459, %460 : vector<16x128xf32>
    %c0_667 = arith.constant 0 : index
    %c7_668 = arith.constant 7 : index
    %c0_669 = arith.constant 0 : index
    %c0_670 = arith.constant 0 : index
    %462 = vector.load %arg5[%c0_667, %c7_668, %c0_669, %c0_670] : memref<1x16x16x128xf32, #tpu.memory_space<vmem>>, vector<1x1x16x128xf32>
    %463 = vector.shape_cast %462 : vector<1x1x16x128xf32> to vector<16x128xf32>
    %464 = vector.shape_cast %461 : vector<16x128xf32> to vector<1x1x16x128xf32>
    tpu.vector_store %arg5[%c0_667, %c7_668, %c0_669, %c0_670], %464 {strides = array<i32>} : memref<1x16x16x128xf32, #tpu.memory_space<vmem>>, vector<1x1x16x128xf32>,
    %c0_671 = arith.constant 0 : index
    %c8_672 = arith.constant 8 : index
    %c0_673 = arith.constant 0 : index
    %c0_674 = arith.constant 0 : index
    %465 = vector.load %arg2[%c0_671, %c8_672, %c0_673, %c0_674] : memref<1x18x18x4xbf16, #tpu.memory_space<vmem>>, vector<1x1x16x4xbf16>
    %466 = vector.shape_cast %465 : vector<1x1x16x4xbf16> to vector<16x4xbf16>
    %c0_675 = arith.constant 0 : index
    %c0_676 = arith.constant 0 : index
    %c0_677 = arith.constant 0 : index
    %c0_678 = arith.constant 0 : index
    %467 = vector.load %arg3[%c0_675, %c0_676, %c0_677, %c0_678] : memref<3x3x4x128xbf16, #tpu.memory_space<vmem>>, vector<1x1x4x128xbf16>
    %468 = vector.shape_cast %467 : vector<1x1x4x128xbf16> to vector<4x128xbf16>
    %cst_679 = arith.constant dense<0.000000e+00> : vector<16x128xf32>
    %469 = tpu.matmul %466, %468, %cst_679 {dimension_numbers = #tpu.dot_dimension_numbers<[1], [0], [0], [1], [0, 0, 1, 1], [], []>} : vector<16x4xbf16>, vector<4x128xbf16>, vector<16x128xf32> -> vector<16x128xf32>
    %c0_680 = arith.constant 0 : index
    %c8_681 = arith.constant 8 : index
    %c1_682 = arith.constant 1 : index
    %c0_683 = arith.constant 0 : index
    %470 = vector.load %arg2[%c0_680, %c8_681, %c1_682, %c0_683] : memref<1x18x18x4xbf16, #tpu.memory_space<vmem>>, vector<1x1x16x4xbf16>
    %471 = vector.shape_cast %470 : vector<1x1x16x4xbf16> to vector<16x4xbf16>
    %c0_684 = arith.constant 0 : index
    %c1_685 = arith.constant 1 : index
    %c0_686 = arith.constant 0 : index
    %c0_687 = arith.constant 0 : index
    %472 = vector.load %arg3[%c0_684, %c1_685, %c0_686, %c0_687] : memref<3x3x4x128xbf16, #tpu.memory_space<vmem>>, vector<1x1x4x128xbf16>
    %473 = vector.shape_cast %472 : vector<1x1x4x128xbf16> to vector<4x128xbf16>
    %cst_688 = arith.constant dense<0.000000e+00> : vector<16x128xf32>
    %474 = tpu.matmul %471, %473, %cst_688 {dimension_numbers = #tpu.dot_dimension_numbers<[1], [0], [0], [1], [0, 0, 1, 1], [], []>} : vector<16x4xbf16>, vector<4x128xbf16>, vector<16x128xf32> -> vector<16x128xf32>
    %475 = arith.addf %469, %474 : vector<16x128xf32>
    %c0_689 = arith.constant 0 : index
    %c8_690 = arith.constant 8 : index
    %c2_691 = arith.constant 2 : index
    %c0_692 = arith.constant 0 : index
    %476 = vector.load %arg2[%c0_689, %c8_690, %c2_691, %c0_692] : memref<1x18x18x4xbf16, #tpu.memory_space<vmem>>, vector<1x1x16x4xbf16>
    %477 = vector.shape_cast %476 : vector<1x1x16x4xbf16> to vector<16x4xbf16>
    %c0_693 = arith.constant 0 : index
    %c2_694 = arith.constant 2 : index
    %c0_695 = arith.constant 0 : index
    %c0_696 = arith.constant 0 : index
    %478 = vector.load %arg3[%c0_693, %c2_694, %c0_695, %c0_696] : memref<3x3x4x128xbf16, #tpu.memory_space<vmem>>, vector<1x1x4x128xbf16>
    %479 = vector.shape_cast %478 : vector<1x1x4x128xbf16> to vector<4x128xbf16>
    %cst_697 = arith.constant dense<0.000000e+00> : vector<16x128xf32>
    %480 = tpu.matmul %477, %479, %cst_697 {dimension_numbers = #tpu.dot_dimension_numbers<[1], [0], [0], [1], [0, 0, 1, 1], [], []>} : vector<16x4xbf16>, vector<4x128xbf16>, vector<16x128xf32> -> vector<16x128xf32>
    %481 = arith.addf %475, %480 : vector<16x128xf32>
    %c0_698 = arith.constant 0 : index
    %c9_699 = arith.constant 9 : index
    %c0_700 = arith.constant 0 : index
    %c0_701 = arith.constant 0 : index
    %482 = vector.load %arg2[%c0_698, %c9_699, %c0_700, %c0_701] : memref<1x18x18x4xbf16, #tpu.memory_space<vmem>>, vector<1x1x16x4xbf16>
    %483 = vector.shape_cast %482 : vector<1x1x16x4xbf16> to vector<16x4xbf16>
    %c1_702 = arith.constant 1 : index
    %c0_703 = arith.constant 0 : index
    %c0_704 = arith.constant 0 : index
    %c0_705 = arith.constant 0 : index
    %484 = vector.load %arg3[%c1_702, %c0_703, %c0_704, %c0_705] : memref<3x3x4x128xbf16, #tpu.memory_space<vmem>>, vector<1x1x4x128xbf16>
    %485 = vector.shape_cast %484 : vector<1x1x4x128xbf16> to vector<4x128xbf16>
    %cst_706 = arith.constant dense<0.000000e+00> : vector<16x128xf32>
    %486 = tpu.matmul %483, %485, %cst_706 {dimension_numbers = #tpu.dot_dimension_numbers<[1], [0], [0], [1], [0, 0, 1, 1], [], []>} : vector<16x4xbf16>, vector<4x128xbf16>, vector<16x128xf32> -> vector<16x128xf32>
    %487 = arith.addf %481, %486 : vector<16x128xf32>
    %c0_707 = arith.constant 0 : index
    %c9_708 = arith.constant 9 : index
    %c1_709 = arith.constant 1 : index
    %c0_710 = arith.constant 0 : index
    %488 = vector.load %arg2[%c0_707, %c9_708, %c1_709, %c0_710] : memref<1x18x18x4xbf16, #tpu.memory_space<vmem>>, vector<1x1x16x4xbf16>
    %489 = vector.shape_cast %488 : vector<1x1x16x4xbf16> to vector<16x4xbf16>
    %c1_711 = arith.constant 1 : index
    %c1_712 = arith.constant 1 : index
    %c0_713 = arith.constant 0 : index
    %c0_714 = arith.constant 0 : index
    %490 = vector.load %arg3[%c1_711, %c1_712, %c0_713, %c0_714] : memref<3x3x4x128xbf16, #tpu.memory_space<vmem>>, vector<1x1x4x128xbf16>
    %491 = vector.shape_cast %490 : vector<1x1x4x128xbf16> to vector<4x128xbf16>
    %cst_715 = arith.constant dense<0.000000e+00> : vector<16x128xf32>
    %492 = tpu.matmul %489, %491, %cst_715 {dimension_numbers = #tpu.dot_dimension_numbers<[1], [0], [0], [1], [0, 0, 1, 1], [], []>} : vector<16x4xbf16>, vector<4x128xbf16>, vector<16x128xf32> -> vector<16x128xf32>
    %493 = arith.addf %487, %492 : vector<16x128xf32>
    %c0_716 = arith.constant 0 : index
    %c9_717 = arith.constant 9 : index
    %c2_718 = arith.constant 2 : index
    %c0_719 = arith.constant 0 : index
    %494 = vector.load %arg2[%c0_716, %c9_717, %c2_718, %c0_719] : memref<1x18x18x4xbf16, #tpu.memory_space<vmem>>, vector<1x1x16x4xbf16>
    %495 = vector.shape_cast %494 : vector<1x1x16x4xbf16> to vector<16x4xbf16>
    %c1_720 = arith.constant 1 : index
    %c2_721 = arith.constant 2 : index
    %c0_722 = arith.constant 0 : index
    %c0_723 = arith.constant 0 : index
    %496 = vector.load %arg3[%c1_720, %c2_721, %c0_722, %c0_723] : memref<3x3x4x128xbf16, #tpu.memory_space<vmem>>, vector<1x1x4x128xbf16>
    %497 = vector.shape_cast %496 : vector<1x1x4x128xbf16> to vector<4x128xbf16>
    %cst_724 = arith.constant dense<0.000000e+00> : vector<16x128xf32>
    %498 = tpu.matmul %495, %497, %cst_724 {dimension_numbers = #tpu.dot_dimension_numbers<[1], [0], [0], [1], [0, 0, 1, 1], [], []>} : vector<16x4xbf16>, vector<4x128xbf16>, vector<16x128xf32> -> vector<16x128xf32>
    %499 = arith.addf %493, %498 : vector<16x128xf32>
    %c0_725 = arith.constant 0 : index
    %c10 = arith.constant 10 : index
    %c0_726 = arith.constant 0 : index
    %c0_727 = arith.constant 0 : index
    %500 = vector.load %arg2[%c0_725, %c10, %c0_726, %c0_727] : memref<1x18x18x4xbf16, #tpu.memory_space<vmem>>, vector<1x1x16x4xbf16>
    %501 = vector.shape_cast %500 : vector<1x1x16x4xbf16> to vector<16x4xbf16>
    %c2_728 = arith.constant 2 : index
    %c0_729 = arith.constant 0 : index
    %c0_730 = arith.constant 0 : index
    %c0_731 = arith.constant 0 : index
    %502 = vector.load %arg3[%c2_728, %c0_729, %c0_730, %c0_731] : memref<3x3x4x128xbf16, #tpu.memory_space<vmem>>, vector<1x1x4x128xbf16>
    %503 = vector.shape_cast %502 : vector<1x1x4x128xbf16> to vector<4x128xbf16>
    %cst_732 = arith.constant dense<0.000000e+00> : vector<16x128xf32>
    %504 = tpu.matmul %501, %503, %cst_732 {dimension_numbers = #tpu.dot_dimension_numbers<[1], [0], [0], [1], [0, 0, 1, 1], [], []>} : vector<16x4xbf16>, vector<4x128xbf16>, vector<16x128xf32> -> vector<16x128xf32>
    %505 = arith.addf %499, %504 : vector<16x128xf32>
    %c0_733 = arith.constant 0 : index
    %c10_734 = arith.constant 10 : index
    %c1_735 = arith.constant 1 : index
    %c0_736 = arith.constant 0 : index
    %506 = vector.load %arg2[%c0_733, %c10_734, %c1_735, %c0_736] : memref<1x18x18x4xbf16, #tpu.memory_space<vmem>>, vector<1x1x16x4xbf16>
    %507 = vector.shape_cast %506 : vector<1x1x16x4xbf16> to vector<16x4xbf16>
    %c2_737 = arith.constant 2 : index
    %c1_738 = arith.constant 1 : index
    %c0_739 = arith.constant 0 : index
    %c0_740 = arith.constant 0 : index
    %508 = vector.load %arg3[%c2_737, %c1_738, %c0_739, %c0_740] : memref<3x3x4x128xbf16, #tpu.memory_space<vmem>>, vector<1x1x4x128xbf16>
    %509 = vector.shape_cast %508 : vector<1x1x4x128xbf16> to vector<4x128xbf16>
    %cst_741 = arith.constant dense<0.000000e+00> : vector<16x128xf32>
    %510 = tpu.matmul %507, %509, %cst_741 {dimension_numbers = #tpu.dot_dimension_numbers<[1], [0], [0], [1], [0, 0, 1, 1], [], []>} : vector<16x4xbf16>, vector<4x128xbf16>, vector<16x128xf32> -> vector<16x128xf32>
    %511 = arith.addf %505, %510 : vector<16x128xf32>
    %c0_742 = arith.constant 0 : index
    %c10_743 = arith.constant 10 : index
    %c2_744 = arith.constant 2 : index
    %c0_745 = arith.constant 0 : index
    %512 = vector.load %arg2[%c0_742, %c10_743, %c2_744, %c0_745] : memref<1x18x18x4xbf16, #tpu.memory_space<vmem>>, vector<1x1x16x4xbf16>
    %513 = vector.shape_cast %512 : vector<1x1x16x4xbf16> to vector<16x4xbf16>
    %c2_746 = arith.constant 2 : index
    %c2_747 = arith.constant 2 : index
    %c0_748 = arith.constant 0 : index
    %c0_749 = arith.constant 0 : index
    %514 = vector.load %arg3[%c2_746, %c2_747, %c0_748, %c0_749] : memref<3x3x4x128xbf16, #tpu.memory_space<vmem>>, vector<1x1x4x128xbf16>
    %515 = vector.shape_cast %514 : vector<1x1x4x128xbf16> to vector<4x128xbf16>
    %cst_750 = arith.constant dense<0.000000e+00> : vector<16x128xf32>
    %516 = tpu.matmul %513, %515, %cst_750 {dimension_numbers = #tpu.dot_dimension_numbers<[1], [0], [0], [1], [0, 0, 1, 1], [], []>} : vector<16x4xbf16>, vector<4x128xbf16>, vector<16x128xf32> -> vector<16x128xf32>
    %517 = arith.addf %511, %516 : vector<16x128xf32>
    %518 = vector.broadcast %0 : vector<1x128xf32> to vector<16x128xf32>
    %519 = arith.addf %517, %518 : vector<16x128xf32>
    %c0_751 = arith.constant 0 : index
    %c8_752 = arith.constant 8 : index
    %c0_753 = arith.constant 0 : index
    %c0_754 = arith.constant 0 : index
    %520 = vector.load %arg5[%c0_751, %c8_752, %c0_753, %c0_754] : memref<1x16x16x128xf32, #tpu.memory_space<vmem>>, vector<1x1x16x128xf32>
    %521 = vector.shape_cast %520 : vector<1x1x16x128xf32> to vector<16x128xf32>
    %522 = vector.shape_cast %519 : vector<16x128xf32> to vector<1x1x16x128xf32>
    tpu.vector_store %arg5[%c0_751, %c8_752, %c0_753, %c0_754], %522 {strides = array<i32>} : memref<1x16x16x128xf32, #tpu.memory_space<vmem>>, vector<1x1x16x128xf32>,
    %c0_755 = arith.constant 0 : index
    %c9_756 = arith.constant 9 : index
    %c0_757 = arith.constant 0 : index
    %c0_758 = arith.constant 0 : index
    %523 = vector.load %arg2[%c0_755, %c9_756, %c0_757, %c0_758] : memref<1x18x18x4xbf16, #tpu.memory_space<vmem>>, vector<1x1x16x4xbf16>
    %524 = vector.shape_cast %523 : vector<1x1x16x4xbf16> to vector<16x4xbf16>
    %c0_759 = arith.constant 0 : index
    %c0_760 = arith.constant 0 : index
    %c0_761 = arith.constant 0 : index
    %c0_762 = arith.constant 0 : index
    %525 = vector.load %arg3[%c0_759, %c0_760, %c0_761, %c0_762] : memref<3x3x4x128xbf16, #tpu.memory_space<vmem>>, vector<1x1x4x128xbf16>
    %526 = vector.shape_cast %525 : vector<1x1x4x128xbf16> to vector<4x128xbf16>
    %cst_763 = arith.constant dense<0.000000e+00> : vector<16x128xf32>
    %527 = tpu.matmul %524, %526, %cst_763 {dimension_numbers = #tpu.dot_dimension_numbers<[1], [0], [0], [1], [0, 0, 1, 1], [], []>} : vector<16x4xbf16>, vector<4x128xbf16>, vector<16x128xf32> -> vector<16x128xf32>
    %c0_764 = arith.constant 0 : index
    %c9_765 = arith.constant 9 : index
    %c1_766 = arith.constant 1 : index
    %c0_767 = arith.constant 0 : index
    %528 = vector.load %arg2[%c0_764, %c9_765, %c1_766, %c0_767] : memref<1x18x18x4xbf16, #tpu.memory_space<vmem>>, vector<1x1x16x4xbf16>
    %529 = vector.shape_cast %528 : vector<1x1x16x4xbf16> to vector<16x4xbf16>
    %c0_768 = arith.constant 0 : index
    %c1_769 = arith.constant 1 : index
    %c0_770 = arith.constant 0 : index
    %c0_771 = arith.constant 0 : index
    %530 = vector.load %arg3[%c0_768, %c1_769, %c0_770, %c0_771] : memref<3x3x4x128xbf16, #tpu.memory_space<vmem>>, vector<1x1x4x128xbf16>
    %531 = vector.shape_cast %530 : vector<1x1x4x128xbf16> to vector<4x128xbf16>
    %cst_772 = arith.constant dense<0.000000e+00> : vector<16x128xf32>
    %532 = tpu.matmul %529, %531, %cst_772 {dimension_numbers = #tpu.dot_dimension_numbers<[1], [0], [0], [1], [0, 0, 1, 1], [], []>} : vector<16x4xbf16>, vector<4x128xbf16>, vector<16x128xf32> -> vector<16x128xf32>
    %533 = arith.addf %527, %532 : vector<16x128xf32>
    %c0_773 = arith.constant 0 : index
    %c9_774 = arith.constant 9 : index
    %c2_775 = arith.constant 2 : index
    %c0_776 = arith.constant 0 : index
    %534 = vector.load %arg2[%c0_773, %c9_774, %c2_775, %c0_776] : memref<1x18x18x4xbf16, #tpu.memory_space<vmem>>, vector<1x1x16x4xbf16>
    %535 = vector.shape_cast %534 : vector<1x1x16x4xbf16> to vector<16x4xbf16>
    %c0_777 = arith.constant 0 : index
    %c2_778 = arith.constant 2 : index
    %c0_779 = arith.constant 0 : index
    %c0_780 = arith.constant 0 : index
    %536 = vector.load %arg3[%c0_777, %c2_778, %c0_779, %c0_780] : memref<3x3x4x128xbf16, #tpu.memory_space<vmem>>, vector<1x1x4x128xbf16>
    %537 = vector.shape_cast %536 : vector<1x1x4x128xbf16> to vector<4x128xbf16>
    %cst_781 = arith.constant dense<0.000000e+00> : vector<16x128xf32>
    %538 = tpu.matmul %535, %537, %cst_781 {dimension_numbers = #tpu.dot_dimension_numbers<[1], [0], [0], [1], [0, 0, 1, 1], [], []>} : vector<16x4xbf16>, vector<4x128xbf16>, vector<16x128xf32> -> vector<16x128xf32>
    %539 = arith.addf %533, %538 : vector<16x128xf32>
    %c0_782 = arith.constant 0 : index
    %c10_783 = arith.constant 10 : index
    %c0_784 = arith.constant 0 : index
    %c0_785 = arith.constant 0 : index
    %540 = vector.load %arg2[%c0_782, %c10_783, %c0_784, %c0_785] : memref<1x18x18x4xbf16, #tpu.memory_space<vmem>>, vector<1x1x16x4xbf16>
    %541 = vector.shape_cast %540 : vector<1x1x16x4xbf16> to vector<16x4xbf16>
    %c1_786 = arith.constant 1 : index
    %c0_787 = arith.constant 0 : index
    %c0_788 = arith.constant 0 : index
    %c0_789 = arith.constant 0 : index
    %542 = vector.load %arg3[%c1_786, %c0_787, %c0_788, %c0_789] : memref<3x3x4x128xbf16, #tpu.memory_space<vmem>>, vector<1x1x4x128xbf16>
    %543 = vector.shape_cast %542 : vector<1x1x4x128xbf16> to vector<4x128xbf16>
    %cst_790 = arith.constant dense<0.000000e+00> : vector<16x128xf32>
    %544 = tpu.matmul %541, %543, %cst_790 {dimension_numbers = #tpu.dot_dimension_numbers<[1], [0], [0], [1], [0, 0, 1, 1], [], []>} : vector<16x4xbf16>, vector<4x128xbf16>, vector<16x128xf32> -> vector<16x128xf32>
    %545 = arith.addf %539, %544 : vector<16x128xf32>
    %c0_791 = arith.constant 0 : index
    %c10_792 = arith.constant 10 : index
    %c1_793 = arith.constant 1 : index
    %c0_794 = arith.constant 0 : index
    %546 = vector.load %arg2[%c0_791, %c10_792, %c1_793, %c0_794] : memref<1x18x18x4xbf16, #tpu.memory_space<vmem>>, vector<1x1x16x4xbf16>
    %547 = vector.shape_cast %546 : vector<1x1x16x4xbf16> to vector<16x4xbf16>
    %c1_795 = arith.constant 1 : index
    %c1_796 = arith.constant 1 : index
    %c0_797 = arith.constant 0 : index
    %c0_798 = arith.constant 0 : index
    %548 = vector.load %arg3[%c1_795, %c1_796, %c0_797, %c0_798] : memref<3x3x4x128xbf16, #tpu.memory_space<vmem>>, vector<1x1x4x128xbf16>
    %549 = vector.shape_cast %548 : vector<1x1x4x128xbf16> to vector<4x128xbf16>
    %cst_799 = arith.constant dense<0.000000e+00> : vector<16x128xf32>
    %550 = tpu.matmul %547, %549, %cst_799 {dimension_numbers = #tpu.dot_dimension_numbers<[1], [0], [0], [1], [0, 0, 1, 1], [], []>} : vector<16x4xbf16>, vector<4x128xbf16>, vector<16x128xf32> -> vector<16x128xf32>
    %551 = arith.addf %545, %550 : vector<16x128xf32>
    %c0_800 = arith.constant 0 : index
    %c10_801 = arith.constant 10 : index
    %c2_802 = arith.constant 2 : index
    %c0_803 = arith.constant 0 : index
    %552 = vector.load %arg2[%c0_800, %c10_801, %c2_802, %c0_803] : memref<1x18x18x4xbf16, #tpu.memory_space<vmem>>, vector<1x1x16x4xbf16>
    %553 = vector.shape_cast %552 : vector<1x1x16x4xbf16> to vector<16x4xbf16>
    %c1_804 = arith.constant 1 : index
    %c2_805 = arith.constant 2 : index
    %c0_806 = arith.constant 0 : index
    %c0_807 = arith.constant 0 : index
    %554 = vector.load %arg3[%c1_804, %c2_805, %c0_806, %c0_807] : memref<3x3x4x128xbf16, #tpu.memory_space<vmem>>, vector<1x1x4x128xbf16>
    %555 = vector.shape_cast %554 : vector<1x1x4x128xbf16> to vector<4x128xbf16>
    %cst_808 = arith.constant dense<0.000000e+00> : vector<16x128xf32>
    %556 = tpu.matmul %553, %555, %cst_808 {dimension_numbers = #tpu.dot_dimension_numbers<[1], [0], [0], [1], [0, 0, 1, 1], [], []>} : vector<16x4xbf16>, vector<4x128xbf16>, vector<16x128xf32> -> vector<16x128xf32>
    %557 = arith.addf %551, %556 : vector<16x128xf32>
    %c0_809 = arith.constant 0 : index
    %c11 = arith.constant 11 : index
    %c0_810 = arith.constant 0 : index
    %c0_811 = arith.constant 0 : index
    %558 = vector.load %arg2[%c0_809, %c11, %c0_810, %c0_811] : memref<1x18x18x4xbf16, #tpu.memory_space<vmem>>, vector<1x1x16x4xbf16>
    %559 = vector.shape_cast %558 : vector<1x1x16x4xbf16> to vector<16x4xbf16>
    %c2_812 = arith.constant 2 : index
    %c0_813 = arith.constant 0 : index
    %c0_814 = arith.constant 0 : index
    %c0_815 = arith.constant 0 : index
    %560 = vector.load %arg3[%c2_812, %c0_813, %c0_814, %c0_815] : memref<3x3x4x128xbf16, #tpu.memory_space<vmem>>, vector<1x1x4x128xbf16>
    %561 = vector.shape_cast %560 : vector<1x1x4x128xbf16> to vector<4x128xbf16>
    %cst_816 = arith.constant dense<0.000000e+00> : vector<16x128xf32>
    %562 = tpu.matmul %559, %561, %cst_816 {dimension_numbers = #tpu.dot_dimension_numbers<[1], [0], [0], [1], [0, 0, 1, 1], [], []>} : vector<16x4xbf16>, vector<4x128xbf16>, vector<16x128xf32> -> vector<16x128xf32>
    %563 = arith.addf %557, %562 : vector<16x128xf32>
    %c0_817 = arith.constant 0 : index
    %c11_818 = arith.constant 11 : index
    %c1_819 = arith.constant 1 : index
    %c0_820 = arith.constant 0 : index
    %564 = vector.load %arg2[%c0_817, %c11_818, %c1_819, %c0_820] : memref<1x18x18x4xbf16, #tpu.memory_space<vmem>>, vector<1x1x16x4xbf16>
    %565 = vector.shape_cast %564 : vector<1x1x16x4xbf16> to vector<16x4xbf16>
    %c2_821 = arith.constant 2 : index
    %c1_822 = arith.constant 1 : index
    %c0_823 = arith.constant 0 : index
    %c0_824 = arith.constant 0 : index
    %566 = vector.load %arg3[%c2_821, %c1_822, %c0_823, %c0_824] : memref<3x3x4x128xbf16, #tpu.memory_space<vmem>>, vector<1x1x4x128xbf16>
    %567 = vector.shape_cast %566 : vector<1x1x4x128xbf16> to vector<4x128xbf16>
    %cst_825 = arith.constant dense<0.000000e+00> : vector<16x128xf32>
    %568 = tpu.matmul %565, %567, %cst_825 {dimension_numbers = #tpu.dot_dimension_numbers<[1], [0], [0], [1], [0, 0, 1, 1], [], []>} : vector<16x4xbf16>, vector<4x128xbf16>, vector<16x128xf32> -> vector<16x128xf32>
    %569 = arith.addf %563, %568 : vector<16x128xf32>
    %c0_826 = arith.constant 0 : index
    %c11_827 = arith.constant 11 : index
    %c2_828 = arith.constant 2 : index
    %c0_829 = arith.constant 0 : index
    %570 = vector.load %arg2[%c0_826, %c11_827, %c2_828, %c0_829] : memref<1x18x18x4xbf16, #tpu.memory_space<vmem>>, vector<1x1x16x4xbf16>
    %571 = vector.shape_cast %570 : vector<1x1x16x4xbf16> to vector<16x4xbf16>
    %c2_830 = arith.constant 2 : index
    %c2_831 = arith.constant 2 : index
    %c0_832 = arith.constant 0 : index
    %c0_833 = arith.constant 0 : index
    %572 = vector.load %arg3[%c2_830, %c2_831, %c0_832, %c0_833] : memref<3x3x4x128xbf16, #tpu.memory_space<vmem>>, vector<1x1x4x128xbf16>
    %573 = vector.shape_cast %572 : vector<1x1x4x128xbf16> to vector<4x128xbf16>
    %cst_834 = arith.constant dense<0.000000e+00> : vector<16x128xf32>
    %574 = tpu.matmul %571, %573, %cst_834 {dimension_numbers = #tpu.dot_dimension_numbers<[1], [0], [0], [1], [0, 0, 1, 1], [], []>} : vector<16x4xbf16>, vector<4x128xbf16>, vector<16x128xf32> -> vector<16x128xf32>
    %575 = arith.addf %569, %574 : vector<16x128xf32>
    %576 = vector.broadcast %0 : vector<1x128xf32> to vector<16x128xf32>
    %577 = arith.addf %575, %576 : vector<16x128xf32>
    %c0_835 = arith.constant 0 : index
    %c9_836 = arith.constant 9 : index
    %c0_837 = arith.constant 0 : index
    %c0_838 = arith.constant 0 : index
    %578 = vector.load %arg5[%c0_835, %c9_836, %c0_837, %c0_838] : memref<1x16x16x128xf32, #tpu.memory_space<vmem>>, vector<1x1x16x128xf32>
    %579 = vector.shape_cast %578 : vector<1x1x16x128xf32> to vector<16x128xf32>
    %580 = vector.shape_cast %577 : vector<16x128xf32> to vector<1x1x16x128xf32>
    tpu.vector_store %arg5[%c0_835, %c9_836, %c0_837, %c0_838], %580 {strides = array<i32>} : memref<1x16x16x128xf32, #tpu.memory_space<vmem>>, vector<1x1x16x128xf32>,
    %c0_839 = arith.constant 0 : index
    %c10_840 = arith.constant 10 : index
    %c0_841 = arith.constant 0 : index
    %c0_842 = arith.constant 0 : index
    %581 = vector.load %arg2[%c0_839, %c10_840, %c0_841, %c0_842] : memref<1x18x18x4xbf16, #tpu.memory_space<vmem>>, vector<1x1x16x4xbf16>
    %582 = vector.shape_cast %581 : vector<1x1x16x4xbf16> to vector<16x4xbf16>
    %c0_843 = arith.constant 0 : index
    %c0_844 = arith.constant 0 : index
    %c0_845 = arith.constant 0 : index
    %c0_846 = arith.constant 0 : index
    %583 = vector.load %arg3[%c0_843, %c0_844, %c0_845, %c0_846] : memref<3x3x4x128xbf16, #tpu.memory_space<vmem>>, vector<1x1x4x128xbf16>
    %584 = vector.shape_cast %583 : vector<1x1x4x128xbf16> to vector<4x128xbf16>
    %cst_847 = arith.constant dense<0.000000e+00> : vector<16x128xf32>
    %585 = tpu.matmul %582, %584, %cst_847 {dimension_numbers = #tpu.dot_dimension_numbers<[1], [0], [0], [1], [0, 0, 1, 1], [], []>} : vector<16x4xbf16>, vector<4x128xbf16>, vector<16x128xf32> -> vector<16x128xf32>
    %c0_848 = arith.constant 0 : index
    %c10_849 = arith.constant 10 : index
    %c1_850 = arith.constant 1 : index
    %c0_851 = arith.constant 0 : index
    %586 = vector.load %arg2[%c0_848, %c10_849, %c1_850, %c0_851] : memref<1x18x18x4xbf16, #tpu.memory_space<vmem>>, vector<1x1x16x4xbf16>
    %587 = vector.shape_cast %586 : vector<1x1x16x4xbf16> to vector<16x4xbf16>
    %c0_852 = arith.constant 0 : index
    %c1_853 = arith.constant 1 : index
    %c0_854 = arith.constant 0 : index
    %c0_855 = arith.constant 0 : index
    %588 = vector.load %arg3[%c0_852, %c1_853, %c0_854, %c0_855] : memref<3x3x4x128xbf16, #tpu.memory_space<vmem>>, vector<1x1x4x128xbf16>
    %589 = vector.shape_cast %588 : vector<1x1x4x128xbf16> to vector<4x128xbf16>
    %cst_856 = arith.constant dense<0.000000e+00> : vector<16x128xf32>
    %590 = tpu.matmul %587, %589, %cst_856 {dimension_numbers = #tpu.dot_dimension_numbers<[1], [0], [0], [1], [0, 0, 1, 1], [], []>} : vector<16x4xbf16>, vector<4x128xbf16>, vector<16x128xf32> -> vector<16x128xf32>
    %591 = arith.addf %585, %590 : vector<16x128xf32>
    %c0_857 = arith.constant 0 : index
    %c10_858 = arith.constant 10 : index
    %c2_859 = arith.constant 2 : index
    %c0_860 = arith.constant 0 : index
    %592 = vector.load %arg2[%c0_857, %c10_858, %c2_859, %c0_860] : memref<1x18x18x4xbf16, #tpu.memory_space<vmem>>, vector<1x1x16x4xbf16>
    %593 = vector.shape_cast %592 : vector<1x1x16x4xbf16> to vector<16x4xbf16>
    %c0_861 = arith.constant 0 : index
    %c2_862 = arith.constant 2 : index
    %c0_863 = arith.constant 0 : index
    %c0_864 = arith.constant 0 : index
    %594 = vector.load %arg3[%c0_861, %c2_862, %c0_863, %c0_864] : memref<3x3x4x128xbf16, #tpu.memory_space<vmem>>, vector<1x1x4x128xbf16>
    %595 = vector.shape_cast %594 : vector<1x1x4x128xbf16> to vector<4x128xbf16>
    %cst_865 = arith.constant dense<0.000000e+00> : vector<16x128xf32>
    %596 = tpu.matmul %593, %595, %cst_865 {dimension_numbers = #tpu.dot_dimension_numbers<[1], [0], [0], [1], [0, 0, 1, 1], [], []>} : vector<16x4xbf16>, vector<4x128xbf16>, vector<16x128xf32> -> vector<16x128xf32>
    %597 = arith.addf %591, %596 : vector<16x128xf32>
    %c0_866 = arith.constant 0 : index
    %c11_867 = arith.constant 11 : index
    %c0_868 = arith.constant 0 : index
    %c0_869 = arith.constant 0 : index
    %598 = vector.load %arg2[%c0_866, %c11_867, %c0_868, %c0_869] : memref<1x18x18x4xbf16, #tpu.memory_space<vmem>>, vector<1x1x16x4xbf16>
    %599 = vector.shape_cast %598 : vector<1x1x16x4xbf16> to vector<16x4xbf16>
    %c1_870 = arith.constant 1 : index
    %c0_871 = arith.constant 0 : index
    %c0_872 = arith.constant 0 : index
    %c0_873 = arith.constant 0 : index
    %600 = vector.load %arg3[%c1_870, %c0_871, %c0_872, %c0_873] : memref<3x3x4x128xbf16, #tpu.memory_space<vmem>>, vector<1x1x4x128xbf16>
    %601 = vector.shape_cast %600 : vector<1x1x4x128xbf16> to vector<4x128xbf16>
    %cst_874 = arith.constant dense<0.000000e+00> : vector<16x128xf32>
    %602 = tpu.matmul %599, %601, %cst_874 {dimension_numbers = #tpu.dot_dimension_numbers<[1], [0], [0], [1], [0, 0, 1, 1], [], []>} : vector<16x4xbf16>, vector<4x128xbf16>, vector<16x128xf32> -> vector<16x128xf32>
    %603 = arith.addf %597, %602 : vector<16x128xf32>
    %c0_875 = arith.constant 0 : index
    %c11_876 = arith.constant 11 : index
    %c1_877 = arith.constant 1 : index
    %c0_878 = arith.constant 0 : index
    %604 = vector.load %arg2[%c0_875, %c11_876, %c1_877, %c0_878] : memref<1x18x18x4xbf16, #tpu.memory_space<vmem>>, vector<1x1x16x4xbf16>
    %605 = vector.shape_cast %604 : vector<1x1x16x4xbf16> to vector<16x4xbf16>
    %c1_879 = arith.constant 1 : index
    %c1_880 = arith.constant 1 : index
    %c0_881 = arith.constant 0 : index
    %c0_882 = arith.constant 0 : index
    %606 = vector.load %arg3[%c1_879, %c1_880, %c0_881, %c0_882] : memref<3x3x4x128xbf16, #tpu.memory_space<vmem>>, vector<1x1x4x128xbf16>
    %607 = vector.shape_cast %606 : vector<1x1x4x128xbf16> to vector<4x128xbf16>
    %cst_883 = arith.constant dense<0.000000e+00> : vector<16x128xf32>
    %608 = tpu.matmul %605, %607, %cst_883 {dimension_numbers = #tpu.dot_dimension_numbers<[1], [0], [0], [1], [0, 0, 1, 1], [], []>} : vector<16x4xbf16>, vector<4x128xbf16>, vector<16x128xf32> -> vector<16x128xf32>
    %609 = arith.addf %603, %608 : vector<16x128xf32>
    %c0_884 = arith.constant 0 : index
    %c11_885 = arith.constant 11 : index
    %c2_886 = arith.constant 2 : index
    %c0_887 = arith.constant 0 : index
    %610 = vector.load %arg2[%c0_884, %c11_885, %c2_886, %c0_887] : memref<1x18x18x4xbf16, #tpu.memory_space<vmem>>, vector<1x1x16x4xbf16>
    %611 = vector.shape_cast %610 : vector<1x1x16x4xbf16> to vector<16x4xbf16>
    %c1_888 = arith.constant 1 : index
    %c2_889 = arith.constant 2 : index
    %c0_890 = arith.constant 0 : index
    %c0_891 = arith.constant 0 : index
    %612 = vector.load %arg3[%c1_888, %c2_889, %c0_890, %c0_891] : memref<3x3x4x128xbf16, #tpu.memory_space<vmem>>, vector<1x1x4x128xbf16>
    %613 = vector.shape_cast %612 : vector<1x1x4x128xbf16> to vector<4x128xbf16>
    %cst_892 = arith.constant dense<0.000000e+00> : vector<16x128xf32>
    %614 = tpu.matmul %611, %613, %cst_892 {dimension_numbers = #tpu.dot_dimension_numbers<[1], [0], [0], [1], [0, 0, 1, 1], [], []>} : vector<16x4xbf16>, vector<4x128xbf16>, vector<16x128xf32> -> vector<16x128xf32>
    %615 = arith.addf %609, %614 : vector<16x128xf32>
    %c0_893 = arith.constant 0 : index
    %c12 = arith.constant 12 : index
    %c0_894 = arith.constant 0 : index
    %c0_895 = arith.constant 0 : index
    %616 = vector.load %arg2[%c0_893, %c12, %c0_894, %c0_895] : memref<1x18x18x4xbf16, #tpu.memory_space<vmem>>, vector<1x1x16x4xbf16>
    %617 = vector.shape_cast %616 : vector<1x1x16x4xbf16> to vector<16x4xbf16>
    %c2_896 = arith.constant 2 : index
    %c0_897 = arith.constant 0 : index
    %c0_898 = arith.constant 0 : index
    %c0_899 = arith.constant 0 : index
    %618 = vector.load %arg3[%c2_896, %c0_897, %c0_898, %c0_899] : memref<3x3x4x128xbf16, #tpu.memory_space<vmem>>, vector<1x1x4x128xbf16>
    %619 = vector.shape_cast %618 : vector<1x1x4x128xbf16> to vector<4x128xbf16>
    %cst_900 = arith.constant dense<0.000000e+00> : vector<16x128xf32>
    %620 = tpu.matmul %617, %619, %cst_900 {dimension_numbers = #tpu.dot_dimension_numbers<[1], [0], [0], [1], [0, 0, 1, 1], [], []>} : vector<16x4xbf16>, vector<4x128xbf16>, vector<16x128xf32> -> vector<16x128xf32>
    %621 = arith.addf %615, %620 : vector<16x128xf32>
    %c0_901 = arith.constant 0 : index
    %c12_902 = arith.constant 12 : index
    %c1_903 = arith.constant 1 : index
    %c0_904 = arith.constant 0 : index
    %622 = vector.load %arg2[%c0_901, %c12_902, %c1_903, %c0_904] : memref<1x18x18x4xbf16, #tpu.memory_space<vmem>>, vector<1x1x16x4xbf16>
    %623 = vector.shape_cast %622 : vector<1x1x16x4xbf16> to vector<16x4xbf16>
    %c2_905 = arith.constant 2 : index
    %c1_906 = arith.constant 1 : index
    %c0_907 = arith.constant 0 : index
    %c0_908 = arith.constant 0 : index
    %624 = vector.load %arg3[%c2_905, %c1_906, %c0_907, %c0_908] : memref<3x3x4x128xbf16, #tpu.memory_space<vmem>>, vector<1x1x4x128xbf16>
    %625 = vector.shape_cast %624 : vector<1x1x4x128xbf16> to vector<4x128xbf16>
    %cst_909 = arith.constant dense<0.000000e+00> : vector<16x128xf32>
    %626 = tpu.matmul %623, %625, %cst_909 {dimension_numbers = #tpu.dot_dimension_numbers<[1], [0], [0], [1], [0, 0, 1, 1], [], []>} : vector<16x4xbf16>, vector<4x128xbf16>, vector<16x128xf32> -> vector<16x128xf32>
    %627 = arith.addf %621, %626 : vector<16x128xf32>
    %c0_910 = arith.constant 0 : index
    %c12_911 = arith.constant 12 : index
    %c2_912 = arith.constant 2 : index
    %c0_913 = arith.constant 0 : index
    %628 = vector.load %arg2[%c0_910, %c12_911, %c2_912, %c0_913] : memref<1x18x18x4xbf16, #tpu.memory_space<vmem>>, vector<1x1x16x4xbf16>
    %629 = vector.shape_cast %628 : vector<1x1x16x4xbf16> to vector<16x4xbf16>
    %c2_914 = arith.constant 2 : index
    %c2_915 = arith.constant 2 : index
    %c0_916 = arith.constant 0 : index
    %c0_917 = arith.constant 0 : index
    %630 = vector.load %arg3[%c2_914, %c2_915, %c0_916, %c0_917] : memref<3x3x4x128xbf16, #tpu.memory_space<vmem>>, vector<1x1x4x128xbf16>
    %631 = vector.shape_cast %630 : vector<1x1x4x128xbf16> to vector<4x128xbf16>
    %cst_918 = arith.constant dense<0.000000e+00> : vector<16x128xf32>
    %632 = tpu.matmul %629, %631, %cst_918 {dimension_numbers = #tpu.dot_dimension_numbers<[1], [0], [0], [1], [0, 0, 1, 1], [], []>} : vector<16x4xbf16>, vector<4x128xbf16>, vector<16x128xf32> -> vector<16x128xf32>
    %633 = arith.addf %627, %632 : vector<16x128xf32>
    %634 = vector.broadcast %0 : vector<1x128xf32> to vector<16x128xf32>
    %635 = arith.addf %633, %634 : vector<16x128xf32>
    %c0_919 = arith.constant 0 : index
    %c10_920 = arith.constant 10 : index
    %c0_921 = arith.constant 0 : index
    %c0_922 = arith.constant 0 : index
    %636 = vector.load %arg5[%c0_919, %c10_920, %c0_921, %c0_922] : memref<1x16x16x128xf32, #tpu.memory_space<vmem>>, vector<1x1x16x128xf32>
    %637 = vector.shape_cast %636 : vector<1x1x16x128xf32> to vector<16x128xf32>
    %638 = vector.shape_cast %635 : vector<16x128xf32> to vector<1x1x16x128xf32>
    tpu.vector_store %arg5[%c0_919, %c10_920, %c0_921, %c0_922], %638 {strides = array<i32>} : memref<1x16x16x128xf32, #tpu.memory_space<vmem>>, vector<1x1x16x128xf32>,
    %c0_923 = arith.constant 0 : index
    %c11_924 = arith.constant 11 : index
    %c0_925 = arith.constant 0 : index
    %c0_926 = arith.constant 0 : index
    %639 = vector.load %arg2[%c0_923, %c11_924, %c0_925, %c0_926] : memref<1x18x18x4xbf16, #tpu.memory_space<vmem>>, vector<1x1x16x4xbf16>
    %640 = vector.shape_cast %639 : vector<1x1x16x4xbf16> to vector<16x4xbf16>
    %c0_927 = arith.constant 0 : index
    %c0_928 = arith.constant 0 : index
    %c0_929 = arith.constant 0 : index
    %c0_930 = arith.constant 0 : index
    %641 = vector.load %arg3[%c0_927, %c0_928, %c0_929, %c0_930] : memref<3x3x4x128xbf16, #tpu.memory_space<vmem>>, vector<1x1x4x128xbf16>
    %642 = vector.shape_cast %641 : vector<1x1x4x128xbf16> to vector<4x128xbf16>
    %cst_931 = arith.constant dense<0.000000e+00> : vector<16x128xf32>
    %643 = tpu.matmul %640, %642, %cst_931 {dimension_numbers = #tpu.dot_dimension_numbers<[1], [0], [0], [1], [0, 0, 1, 1], [], []>} : vector<16x4xbf16>, vector<4x128xbf16>, vector<16x128xf32> -> vector<16x128xf32>
    %c0_932 = arith.constant 0 : index
    %c11_933 = arith.constant 11 : index
    %c1_934 = arith.constant 1 : index
    %c0_935 = arith.constant 0 : index
    %644 = vector.load %arg2[%c0_932, %c11_933, %c1_934, %c0_935] : memref<1x18x18x4xbf16, #tpu.memory_space<vmem>>, vector<1x1x16x4xbf16>
    %645 = vector.shape_cast %644 : vector<1x1x16x4xbf16> to vector<16x4xbf16>
    %c0_936 = arith.constant 0 : index
    %c1_937 = arith.constant 1 : index
    %c0_938 = arith.constant 0 : index
    %c0_939 = arith.constant 0 : index
    %646 = vector.load %arg3[%c0_936, %c1_937, %c0_938, %c0_939] : memref<3x3x4x128xbf16, #tpu.memory_space<vmem>>, vector<1x1x4x128xbf16>
    %647 = vector.shape_cast %646 : vector<1x1x4x128xbf16> to vector<4x128xbf16>
    %cst_940 = arith.constant dense<0.000000e+00> : vector<16x128xf32>
    %648 = tpu.matmul %645, %647, %cst_940 {dimension_numbers = #tpu.dot_dimension_numbers<[1], [0], [0], [1], [0, 0, 1, 1], [], []>} : vector<16x4xbf16>, vector<4x128xbf16>, vector<16x128xf32> -> vector<16x128xf32>
    %649 = arith.addf %643, %648 : vector<16x128xf32>
    %c0_941 = arith.constant 0 : index
    %c11_942 = arith.constant 11 : index
    %c2_943 = arith.constant 2 : index
    %c0_944 = arith.constant 0 : index
    %650 = vector.load %arg2[%c0_941, %c11_942, %c2_943, %c0_944] : memref<1x18x18x4xbf16, #tpu.memory_space<vmem>>, vector<1x1x16x4xbf16>
    %651 = vector.shape_cast %650 : vector<1x1x16x4xbf16> to vector<16x4xbf16>
    %c0_945 = arith.constant 0 : index
    %c2_946 = arith.constant 2 : index
    %c0_947 = arith.constant 0 : index
    %c0_948 = arith.constant 0 : index
    %652 = vector.load %arg3[%c0_945, %c2_946, %c0_947, %c0_948] : memref<3x3x4x128xbf16, #tpu.memory_space<vmem>>, vector<1x1x4x128xbf16>
    %653 = vector.shape_cast %652 : vector<1x1x4x128xbf16> to vector<4x128xbf16>
    %cst_949 = arith.constant dense<0.000000e+00> : vector<16x128xf32>
    %654 = tpu.matmul %651, %653, %cst_949 {dimension_numbers = #tpu.dot_dimension_numbers<[1], [0], [0], [1], [0, 0, 1, 1], [], []>} : vector<16x4xbf16>, vector<4x128xbf16>, vector<16x128xf32> -> vector<16x128xf32>
    %655 = arith.addf %649, %654 : vector<16x128xf32>
    %c0_950 = arith.constant 0 : index
    %c12_951 = arith.constant 12 : index
    %c0_952 = arith.constant 0 : index
    %c0_953 = arith.constant 0 : index
    %656 = vector.load %arg2[%c0_950, %c12_951, %c0_952, %c0_953] : memref<1x18x18x4xbf16, #tpu.memory_space<vmem>>, vector<1x1x16x4xbf16>
    %657 = vector.shape_cast %656 : vector<1x1x16x4xbf16> to vector<16x4xbf16>
    %c1_954 = arith.constant 1 : index
    %c0_955 = arith.constant 0 : index
    %c0_956 = arith.constant 0 : index
    %c0_957 = arith.constant 0 : index
    %658 = vector.load %arg3[%c1_954, %c0_955, %c0_956, %c0_957] : memref<3x3x4x128xbf16, #tpu.memory_space<vmem>>, vector<1x1x4x128xbf16>
    %659 = vector.shape_cast %658 : vector<1x1x4x128xbf16> to vector<4x128xbf16>
    %cst_958 = arith.constant dense<0.000000e+00> : vector<16x128xf32>
    %660 = tpu.matmul %657, %659, %cst_958 {dimension_numbers = #tpu.dot_dimension_numbers<[1], [0], [0], [1], [0, 0, 1, 1], [], []>} : vector<16x4xbf16>, vector<4x128xbf16>, vector<16x128xf32> -> vector<16x128xf32>
    %661 = arith.addf %655, %660 : vector<16x128xf32>
    %c0_959 = arith.constant 0 : index
    %c12_960 = arith.constant 12 : index
    %c1_961 = arith.constant 1 : index
    %c0_962 = arith.constant 0 : index
    %662 = vector.load %arg2[%c0_959, %c12_960, %c1_961, %c0_962] : memref<1x18x18x4xbf16, #tpu.memory_space<vmem>>, vector<1x1x16x4xbf16>
    %663 = vector.shape_cast %662 : vector<1x1x16x4xbf16> to vector<16x4xbf16>
    %c1_963 = arith.constant 1 : index
    %c1_964 = arith.constant 1 : index
    %c0_965 = arith.constant 0 : index
    %c0_966 = arith.constant 0 : index
    %664 = vector.load %arg3[%c1_963, %c1_964, %c0_965, %c0_966] : memref<3x3x4x128xbf16, #tpu.memory_space<vmem>>, vector<1x1x4x128xbf16>
    %665 = vector.shape_cast %664 : vector<1x1x4x128xbf16> to vector<4x128xbf16>
    %cst_967 = arith.constant dense<0.000000e+00> : vector<16x128xf32>
    %666 = tpu.matmul %663, %665, %cst_967 {dimension_numbers = #tpu.dot_dimension_numbers<[1], [0], [0], [1], [0, 0, 1, 1], [], []>} : vector<16x4xbf16>, vector<4x128xbf16>, vector<16x128xf32> -> vector<16x128xf32>
    %667 = arith.addf %661, %666 : vector<16x128xf32>
    %c0_968 = arith.constant 0 : index
    %c12_969 = arith.constant 12 : index
    %c2_970 = arith.constant 2 : index
    %c0_971 = arith.constant 0 : index
    %668 = vector.load %arg2[%c0_968, %c12_969, %c2_970, %c0_971] : memref<1x18x18x4xbf16, #tpu.memory_space<vmem>>, vector<1x1x16x4xbf16>
    %669 = vector.shape_cast %668 : vector<1x1x16x4xbf16> to vector<16x4xbf16>
    %c1_972 = arith.constant 1 : index
    %c2_973 = arith.constant 2 : index
    %c0_974 = arith.constant 0 : index
    %c0_975 = arith.constant 0 : index
    %670 = vector.load %arg3[%c1_972, %c2_973, %c0_974, %c0_975] : memref<3x3x4x128xbf16, #tpu.memory_space<vmem>>, vector<1x1x4x128xbf16>
    %671 = vector.shape_cast %670 : vector<1x1x4x128xbf16> to vector<4x128xbf16>
    %cst_976 = arith.constant dense<0.000000e+00> : vector<16x128xf32>
    %672 = tpu.matmul %669, %671, %cst_976 {dimension_numbers = #tpu.dot_dimension_numbers<[1], [0], [0], [1], [0, 0, 1, 1], [], []>} : vector<16x4xbf16>, vector<4x128xbf16>, vector<16x128xf32> -> vector<16x128xf32>
    %673 = arith.addf %667, %672 : vector<16x128xf32>
    %c0_977 = arith.constant 0 : index
    %c13 = arith.constant 13 : index
    %c0_978 = arith.constant 0 : index
    %c0_979 = arith.constant 0 : index
    %674 = vector.load %arg2[%c0_977, %c13, %c0_978, %c0_979] : memref<1x18x18x4xbf16, #tpu.memory_space<vmem>>, vector<1x1x16x4xbf16>
    %675 = vector.shape_cast %674 : vector<1x1x16x4xbf16> to vector<16x4xbf16>
    %c2_980 = arith.constant 2 : index
    %c0_981 = arith.constant 0 : index
    %c0_982 = arith.constant 0 : index
    %c0_983 = arith.constant 0 : index
    %676 = vector.load %arg3[%c2_980, %c0_981, %c0_982, %c0_983] : memref<3x3x4x128xbf16, #tpu.memory_space<vmem>>, vector<1x1x4x128xbf16>
    %677 = vector.shape_cast %676 : vector<1x1x4x128xbf16> to vector<4x128xbf16>
    %cst_984 = arith.constant dense<0.000000e+00> : vector<16x128xf32>
    %678 = tpu.matmul %675, %677, %cst_984 {dimension_numbers = #tpu.dot_dimension_numbers<[1], [0], [0], [1], [0, 0, 1, 1], [], []>} : vector<16x4xbf16>, vector<4x128xbf16>, vector<16x128xf32> -> vector<16x128xf32>
    %679 = arith.addf %673, %678 : vector<16x128xf32>
    %c0_985 = arith.constant 0 : index
    %c13_986 = arith.constant 13 : index
    %c1_987 = arith.constant 1 : index
    %c0_988 = arith.constant 0 : index
    %680 = vector.load %arg2[%c0_985, %c13_986, %c1_987, %c0_988] : memref<1x18x18x4xbf16, #tpu.memory_space<vmem>>, vector<1x1x16x4xbf16>
    %681 = vector.shape_cast %680 : vector<1x1x16x4xbf16> to vector<16x4xbf16>
    %c2_989 = arith.constant 2 : index
    %c1_990 = arith.constant 1 : index
    %c0_991 = arith.constant 0 : index
    %c0_992 = arith.constant 0 : index
    %682 = vector.load %arg3[%c2_989, %c1_990, %c0_991, %c0_992] : memref<3x3x4x128xbf16, #tpu.memory_space<vmem>>, vector<1x1x4x128xbf16>
    %683 = vector.shape_cast %682 : vector<1x1x4x128xbf16> to vector<4x128xbf16>
    %cst_993 = arith.constant dense<0.000000e+00> : vector<16x128xf32>
    %684 = tpu.matmul %681, %683, %cst_993 {dimension_numbers = #tpu.dot_dimension_numbers<[1], [0], [0], [1], [0, 0, 1, 1], [], []>} : vector<16x4xbf16>, vector<4x128xbf16>, vector<16x128xf32> -> vector<16x128xf32>
    %685 = arith.addf %679, %684 : vector<16x128xf32>
    %c0_994 = arith.constant 0 : index
    %c13_995 = arith.constant 13 : index
    %c2_996 = arith.constant 2 : index
    %c0_997 = arith.constant 0 : index
    %686 = vector.load %arg2[%c0_994, %c13_995, %c2_996, %c0_997] : memref<1x18x18x4xbf16, #tpu.memory_space<vmem>>, vector<1x1x16x4xbf16>
    %687 = vector.shape_cast %686 : vector<1x1x16x4xbf16> to vector<16x4xbf16>
    %c2_998 = arith.constant 2 : index
    %c2_999 = arith.constant 2 : index
    %c0_1000 = arith.constant 0 : index
    %c0_1001 = arith.constant 0 : index
    %688 = vector.load %arg3[%c2_998, %c2_999, %c0_1000, %c0_1001] : memref<3x3x4x128xbf16, #tpu.memory_space<vmem>>, vector<1x1x4x128xbf16>
    %689 = vector.shape_cast %688 : vector<1x1x4x128xbf16> to vector<4x128xbf16>
    %cst_1002 = arith.constant dense<0.000000e+00> : vector<16x128xf32>
    %690 = tpu.matmul %687, %689, %cst_1002 {dimension_numbers = #tpu.dot_dimension_numbers<[1], [0], [0], [1], [0, 0, 1, 1], [], []>} : vector<16x4xbf16>, vector<4x128xbf16>, vector<16x128xf32> -> vector<16x128xf32>
    %691 = arith.addf %685, %690 : vector<16x128xf32>
    %692 = vector.broadcast %0 : vector<1x128xf32> to vector<16x128xf32>
    %693 = arith.addf %691, %692 : vector<16x128xf32>
    %c0_1003 = arith.constant 0 : index
    %c11_1004 = arith.constant 11 : index
    %c0_1005 = arith.constant 0 : index
    %c0_1006 = arith.constant 0 : index
    %694 = vector.load %arg5[%c0_1003, %c11_1004, %c0_1005, %c0_1006] : memref<1x16x16x128xf32, #tpu.memory_space<vmem>>, vector<1x1x16x128xf32>
    %695 = vector.shape_cast %694 : vector<1x1x16x128xf32> to vector<16x128xf32>
    %696 = vector.shape_cast %693 : vector<16x128xf32> to vector<1x1x16x128xf32>
    tpu.vector_store %arg5[%c0_1003, %c11_1004, %c0_1005, %c0_1006], %696 {strides = array<i32>} : memref<1x16x16x128xf32, #tpu.memory_space<vmem>>, vector<1x1x16x128xf32>,
    %c0_1007 = arith.constant 0 : index
    %c12_1008 = arith.constant 12 : index
    %c0_1009 = arith.constant 0 : index
    %c0_1010 = arith.constant 0 : index
    %697 = vector.load %arg2[%c0_1007, %c12_1008, %c0_1009, %c0_1010] : memref<1x18x18x4xbf16, #tpu.memory_space<vmem>>, vector<1x1x16x4xbf16>
    %698 = vector.shape_cast %697 : vector<1x1x16x4xbf16> to vector<16x4xbf16>
    %c0_1011 = arith.constant 0 : index
    %c0_1012 = arith.constant 0 : index
    %c0_1013 = arith.constant 0 : index
    %c0_1014 = arith.constant 0 : index
    %699 = vector.load %arg3[%c0_1011, %c0_1012, %c0_1013, %c0_1014] : memref<3x3x4x128xbf16, #tpu.memory_space<vmem>>, vector<1x1x4x128xbf16>
    %700 = vector.shape_cast %699 : vector<1x1x4x128xbf16> to vector<4x128xbf16>
    %cst_1015 = arith.constant dense<0.000000e+00> : vector<16x128xf32>
    %701 = tpu.matmul %698, %700, %cst_1015 {dimension_numbers = #tpu.dot_dimension_numbers<[1], [0], [0], [1], [0, 0, 1, 1], [], []>} : vector<16x4xbf16>, vector<4x128xbf16>, vector<16x128xf32> -> vector<16x128xf32>
    %c0_1016 = arith.constant 0 : index
    %c12_1017 = arith.constant 12 : index
    %c1_1018 = arith.constant 1 : index
    %c0_1019 = arith.constant 0 : index
    %702 = vector.load %arg2[%c0_1016, %c12_1017, %c1_1018, %c0_1019] : memref<1x18x18x4xbf16, #tpu.memory_space<vmem>>, vector<1x1x16x4xbf16>
    %703 = vector.shape_cast %702 : vector<1x1x16x4xbf16> to vector<16x4xbf16>
    %c0_1020 = arith.constant 0 : index
    %c1_1021 = arith.constant 1 : index
    %c0_1022 = arith.constant 0 : index
    %c0_1023 = arith.constant 0 : index
    %704 = vector.load %arg3[%c0_1020, %c1_1021, %c0_1022, %c0_1023] : memref<3x3x4x128xbf16, #tpu.memory_space<vmem>>, vector<1x1x4x128xbf16>
    %705 = vector.shape_cast %704 : vector<1x1x4x128xbf16> to vector<4x128xbf16>
    %cst_1024 = arith.constant dense<0.000000e+00> : vector<16x128xf32>
    %706 = tpu.matmul %703, %705, %cst_1024 {dimension_numbers = #tpu.dot_dimension_numbers<[1], [0], [0], [1], [0, 0, 1, 1], [], []>} : vector<16x4xbf16>, vector<4x128xbf16>, vector<16x128xf32> -> vector<16x128xf32>
    %707 = arith.addf %701, %706 : vector<16x128xf32>
    %c0_1025 = arith.constant 0 : index
    %c12_1026 = arith.constant 12 : index
    %c2_1027 = arith.constant 2 : index
    %c0_1028 = arith.constant 0 : index
    %708 = vector.load %arg2[%c0_1025, %c12_1026, %c2_1027, %c0_1028] : memref<1x18x18x4xbf16, #tpu.memory_space<vmem>>, vector<1x1x16x4xbf16>
    %709 = vector.shape_cast %708 : vector<1x1x16x4xbf16> to vector<16x4xbf16>
    %c0_1029 = arith.constant 0 : index
    %c2_1030 = arith.constant 2 : index
    %c0_1031 = arith.constant 0 : index
    %c0_1032 = arith.constant 0 : index
    %710 = vector.load %arg3[%c0_1029, %c2_1030, %c0_1031, %c0_1032] : memref<3x3x4x128xbf16, #tpu.memory_space<vmem>>, vector<1x1x4x128xbf16>
    %711 = vector.shape_cast %710 : vector<1x1x4x128xbf16> to vector<4x128xbf16>
    %cst_1033 = arith.constant dense<0.000000e+00> : vector<16x128xf32>
    %712 = tpu.matmul %709, %711, %cst_1033 {dimension_numbers = #tpu.dot_dimension_numbers<[1], [0], [0], [1], [0, 0, 1, 1], [], []>} : vector<16x4xbf16>, vector<4x128xbf16>, vector<16x128xf32> -> vector<16x128xf32>
    %713 = arith.addf %707, %712 : vector<16x128xf32>
    %c0_1034 = arith.constant 0 : index
    %c13_1035 = arith.constant 13 : index
    %c0_1036 = arith.constant 0 : index
    %c0_1037 = arith.constant 0 : index
    %714 = vector.load %arg2[%c0_1034, %c13_1035, %c0_1036, %c0_1037] : memref<1x18x18x4xbf16, #tpu.memory_space<vmem>>, vector<1x1x16x4xbf16>
    %715 = vector.shape_cast %714 : vector<1x1x16x4xbf16> to vector<16x4xbf16>
    %c1_1038 = arith.constant 1 : index
    %c0_1039 = arith.constant 0 : index
    %c0_1040 = arith.constant 0 : index
    %c0_1041 = arith.constant 0 : index
    %716 = vector.load %arg3[%c1_1038, %c0_1039, %c0_1040, %c0_1041] : memref<3x3x4x128xbf16, #tpu.memory_space<vmem>>, vector<1x1x4x128xbf16>
    %717 = vector.shape_cast %716 : vector<1x1x4x128xbf16> to vector<4x128xbf16>
    %cst_1042 = arith.constant dense<0.000000e+00> : vector<16x128xf32>
    %718 = tpu.matmul %715, %717, %cst_1042 {dimension_numbers = #tpu.dot_dimension_numbers<[1], [0], [0], [1], [0, 0, 1, 1], [], []>} : vector<16x4xbf16>, vector<4x128xbf16>, vector<16x128xf32> -> vector<16x128xf32>
    %719 = arith.addf %713, %718 : vector<16x128xf32>
    %c0_1043 = arith.constant 0 : index
    %c13_1044 = arith.constant 13 : index
    %c1_1045 = arith.constant 1 : index
    %c0_1046 = arith.constant 0 : index
    %720 = vector.load %arg2[%c0_1043, %c13_1044, %c1_1045, %c0_1046] : memref<1x18x18x4xbf16, #tpu.memory_space<vmem>>, vector<1x1x16x4xbf16>
    %721 = vector.shape_cast %720 : vector<1x1x16x4xbf16> to vector<16x4xbf16>
    %c1_1047 = arith.constant 1 : index
    %c1_1048 = arith.constant 1 : index
    %c0_1049 = arith.constant 0 : index
    %c0_1050 = arith.constant 0 : index
    %722 = vector.load %arg3[%c1_1047, %c1_1048, %c0_1049, %c0_1050] : memref<3x3x4x128xbf16, #tpu.memory_space<vmem>>, vector<1x1x4x128xbf16>
    %723 = vector.shape_cast %722 : vector<1x1x4x128xbf16> to vector<4x128xbf16>
    %cst_1051 = arith.constant dense<0.000000e+00> : vector<16x128xf32>
    %724 = tpu.matmul %721, %723, %cst_1051 {dimension_numbers = #tpu.dot_dimension_numbers<[1], [0], [0], [1], [0, 0, 1, 1], [], []>} : vector<16x4xbf16>, vector<4x128xbf16>, vector<16x128xf32> -> vector<16x128xf32>
    %725 = arith.addf %719, %724 : vector<16x128xf32>
    %c0_1052 = arith.constant 0 : index
    %c13_1053 = arith.constant 13 : index
    %c2_1054 = arith.constant 2 : index
    %c0_1055 = arith.constant 0 : index
    %726 = vector.load %arg2[%c0_1052, %c13_1053, %c2_1054, %c0_1055] : memref<1x18x18x4xbf16, #tpu.memory_space<vmem>>, vector<1x1x16x4xbf16>
    %727 = vector.shape_cast %726 : vector<1x1x16x4xbf16> to vector<16x4xbf16>
    %c1_1056 = arith.constant 1 : index
    %c2_1057 = arith.constant 2 : index
    %c0_1058 = arith.constant 0 : index
    %c0_1059 = arith.constant 0 : index
    %728 = vector.load %arg3[%c1_1056, %c2_1057, %c0_1058, %c0_1059] : memref<3x3x4x128xbf16, #tpu.memory_space<vmem>>, vector<1x1x4x128xbf16>
    %729 = vector.shape_cast %728 : vector<1x1x4x128xbf16> to vector<4x128xbf16>
    %cst_1060 = arith.constant dense<0.000000e+00> : vector<16x128xf32>
    %730 = tpu.matmul %727, %729, %cst_1060 {dimension_numbers = #tpu.dot_dimension_numbers<[1], [0], [0], [1], [0, 0, 1, 1], [], []>} : vector<16x4xbf16>, vector<4x128xbf16>, vector<16x128xf32> -> vector<16x128xf32>
    %731 = arith.addf %725, %730 : vector<16x128xf32>
    %c0_1061 = arith.constant 0 : index
    %c14 = arith.constant 14 : index
    %c0_1062 = arith.constant 0 : index
    %c0_1063 = arith.constant 0 : index
    %732 = vector.load %arg2[%c0_1061, %c14, %c0_1062, %c0_1063] : memref<1x18x18x4xbf16, #tpu.memory_space<vmem>>, vector<1x1x16x4xbf16>
    %733 = vector.shape_cast %732 : vector<1x1x16x4xbf16> to vector<16x4xbf16>
    %c2_1064 = arith.constant 2 : index
    %c0_1065 = arith.constant 0 : index
    %c0_1066 = arith.constant 0 : index
    %c0_1067 = arith.constant 0 : index
    %734 = vector.load %arg3[%c2_1064, %c0_1065, %c0_1066, %c0_1067] : memref<3x3x4x128xbf16, #tpu.memory_space<vmem>>, vector<1x1x4x128xbf16>
    %735 = vector.shape_cast %734 : vector<1x1x4x128xbf16> to vector<4x128xbf16>
    %cst_1068 = arith.constant dense<0.000000e+00> : vector<16x128xf32>
    %736 = tpu.matmul %733, %735, %cst_1068 {dimension_numbers = #tpu.dot_dimension_numbers<[1], [0], [0], [1], [0, 0, 1, 1], [], []>} : vector<16x4xbf16>, vector<4x128xbf16>, vector<16x128xf32> -> vector<16x128xf32>
    %737 = arith.addf %731, %736 : vector<16x128xf32>
    %c0_1069 = arith.constant 0 : index
    %c14_1070 = arith.constant 14 : index
    %c1_1071 = arith.constant 1 : index
    %c0_1072 = arith.constant 0 : index
    %738 = vector.load %arg2[%c0_1069, %c14_1070, %c1_1071, %c0_1072] : memref<1x18x18x4xbf16, #tpu.memory_space<vmem>>, vector<1x1x16x4xbf16>
    %739 = vector.shape_cast %738 : vector<1x1x16x4xbf16> to vector<16x4xbf16>
    %c2_1073 = arith.constant 2 : index
    %c1_1074 = arith.constant 1 : index
    %c0_1075 = arith.constant 0 : index
    %c0_1076 = arith.constant 0 : index
    %740 = vector.load %arg3[%c2_1073, %c1_1074, %c0_1075, %c0_1076] : memref<3x3x4x128xbf16, #tpu.memory_space<vmem>>, vector<1x1x4x128xbf16>
    %741 = vector.shape_cast %740 : vector<1x1x4x128xbf16> to vector<4x128xbf16>
    %cst_1077 = arith.constant dense<0.000000e+00> : vector<16x128xf32>
    %742 = tpu.matmul %739, %741, %cst_1077 {dimension_numbers = #tpu.dot_dimension_numbers<[1], [0], [0], [1], [0, 0, 1, 1], [], []>} : vector<16x4xbf16>, vector<4x128xbf16>, vector<16x128xf32> -> vector<16x128xf32>
    %743 = arith.addf %737, %742 : vector<16x128xf32>
    %c0_1078 = arith.constant 0 : index
    %c14_1079 = arith.constant 14 : index
    %c2_1080 = arith.constant 2 : index
    %c0_1081 = arith.constant 0 : index
    %744 = vector.load %arg2[%c0_1078, %c14_1079, %c2_1080, %c0_1081] : memref<1x18x18x4xbf16, #tpu.memory_space<vmem>>, vector<1x1x16x4xbf16>
    %745 = vector.shape_cast %744 : vector<1x1x16x4xbf16> to vector<16x4xbf16>
    %c2_1082 = arith.constant 2 : index
    %c2_1083 = arith.constant 2 : index
    %c0_1084 = arith.constant 0 : index
    %c0_1085 = arith.constant 0 : index
    %746 = vector.load %arg3[%c2_1082, %c2_1083, %c0_1084, %c0_1085] : memref<3x3x4x128xbf16, #tpu.memory_space<vmem>>, vector<1x1x4x128xbf16>
    %747 = vector.shape_cast %746 : vector<1x1x4x128xbf16> to vector<4x128xbf16>
    %cst_1086 = arith.constant dense<0.000000e+00> : vector<16x128xf32>
    %748 = tpu.matmul %745, %747, %cst_1086 {dimension_numbers = #tpu.dot_dimension_numbers<[1], [0], [0], [1], [0, 0, 1, 1], [], []>} : vector<16x4xbf16>, vector<4x128xbf16>, vector<16x128xf32> -> vector<16x128xf32>
    %749 = arith.addf %743, %748 : vector<16x128xf32>
    %750 = vector.broadcast %0 : vector<1x128xf32> to vector<16x128xf32>
    %751 = arith.addf %749, %750 : vector<16x128xf32>
    %c0_1087 = arith.constant 0 : index
    %c12_1088 = arith.constant 12 : index
    %c0_1089 = arith.constant 0 : index
    %c0_1090 = arith.constant 0 : index
    %752 = vector.load %arg5[%c0_1087, %c12_1088, %c0_1089, %c0_1090] : memref<1x16x16x128xf32, #tpu.memory_space<vmem>>, vector<1x1x16x128xf32>
    %753 = vector.shape_cast %752 : vector<1x1x16x128xf32> to vector<16x128xf32>
    %754 = vector.shape_cast %751 : vector<16x128xf32> to vector<1x1x16x128xf32>
    tpu.vector_store %arg5[%c0_1087, %c12_1088, %c0_1089, %c0_1090], %754 {strides = array<i32>} : memref<1x16x16x128xf32, #tpu.memory_space<vmem>>, vector<1x1x16x128xf32>,
    %c0_1091 = arith.constant 0 : index
    %c13_1092 = arith.constant 13 : index
    %c0_1093 = arith.constant 0 : index
    %c0_1094 = arith.constant 0 : index
    %755 = vector.load %arg2[%c0_1091, %c13_1092, %c0_1093, %c0_1094] : memref<1x18x18x4xbf16, #tpu.memory_space<vmem>>, vector<1x1x16x4xbf16>
    %756 = vector.shape_cast %755 : vector<1x1x16x4xbf16> to vector<16x4xbf16>
    %c0_1095 = arith.constant 0 : index
    %c0_1096 = arith.constant 0 : index
    %c0_1097 = arith.constant 0 : index
    %c0_1098 = arith.constant 0 : index
    %757 = vector.load %arg3[%c0_1095, %c0_1096, %c0_1097, %c0_1098] : memref<3x3x4x128xbf16, #tpu.memory_space<vmem>>, vector<1x1x4x128xbf16>
    %758 = vector.shape_cast %757 : vector<1x1x4x128xbf16> to vector<4x128xbf16>
    %cst_1099 = arith.constant dense<0.000000e+00> : vector<16x128xf32>
    %759 = tpu.matmul %756, %758, %cst_1099 {dimension_numbers = #tpu.dot_dimension_numbers<[1], [0], [0], [1], [0, 0, 1, 1], [], []>} : vector<16x4xbf16>, vector<4x128xbf16>, vector<16x128xf32> -> vector<16x128xf32>
    %c0_1100 = arith.constant 0 : index
    %c13_1101 = arith.constant 13 : index
    %c1_1102 = arith.constant 1 : index
    %c0_1103 = arith.constant 0 : index
    %760 = vector.load %arg2[%c0_1100, %c13_1101, %c1_1102, %c0_1103] : memref<1x18x18x4xbf16, #tpu.memory_space<vmem>>, vector<1x1x16x4xbf16>
    %761 = vector.shape_cast %760 : vector<1x1x16x4xbf16> to vector<16x4xbf16>
    %c0_1104 = arith.constant 0 : index
    %c1_1105 = arith.constant 1 : index
    %c0_1106 = arith.constant 0 : index
    %c0_1107 = arith.constant 0 : index
    %762 = vector.load %arg3[%c0_1104, %c1_1105, %c0_1106, %c0_1107] : memref<3x3x4x128xbf16, #tpu.memory_space<vmem>>, vector<1x1x4x128xbf16>
    %763 = vector.shape_cast %762 : vector<1x1x4x128xbf16> to vector<4x128xbf16>
    %cst_1108 = arith.constant dense<0.000000e+00> : vector<16x128xf32>
    %764 = tpu.matmul %761, %763, %cst_1108 {dimension_numbers = #tpu.dot_dimension_numbers<[1], [0], [0], [1], [0, 0, 1, 1], [], []>} : vector<16x4xbf16>, vector<4x128xbf16>, vector<16x128xf32> -> vector<16x128xf32>
    %765 = arith.addf %759, %764 : vector<16x128xf32>
    %c0_1109 = arith.constant 0 : index
    %c13_1110 = arith.constant 13 : index
    %c2_1111 = arith.constant 2 : index
    %c0_1112 = arith.constant 0 : index
    %766 = vector.load %arg2[%c0_1109, %c13_1110, %c2_1111, %c0_1112] : memref<1x18x18x4xbf16, #tpu.memory_space<vmem>>, vector<1x1x16x4xbf16>
    %767 = vector.shape_cast %766 : vector<1x1x16x4xbf16> to vector<16x4xbf16>
    %c0_1113 = arith.constant 0 : index
    %c2_1114 = arith.constant 2 : index
    %c0_1115 = arith.constant 0 : index
    %c0_1116 = arith.constant 0 : index
    %768 = vector.load %arg3[%c0_1113, %c2_1114, %c0_1115, %c0_1116] : memref<3x3x4x128xbf16, #tpu.memory_space<vmem>>, vector<1x1x4x128xbf16>
    %769 = vector.shape_cast %768 : vector<1x1x4x128xbf16> to vector<4x128xbf16>
    %cst_1117 = arith.constant dense<0.000000e+00> : vector<16x128xf32>
    %770 = tpu.matmul %767, %769, %cst_1117 {dimension_numbers = #tpu.dot_dimension_numbers<[1], [0], [0], [1], [0, 0, 1, 1], [], []>} : vector<16x4xbf16>, vector<4x128xbf16>, vector<16x128xf32> -> vector<16x128xf32>
    %771 = arith.addf %765, %770 : vector<16x128xf32>
    %c0_1118 = arith.constant 0 : index
    %c14_1119 = arith.constant 14 : index
    %c0_1120 = arith.constant 0 : index
    %c0_1121 = arith.constant 0 : index
    %772 = vector.load %arg2[%c0_1118, %c14_1119, %c0_1120, %c0_1121] : memref<1x18x18x4xbf16, #tpu.memory_space<vmem>>, vector<1x1x16x4xbf16>
    %773 = vector.shape_cast %772 : vector<1x1x16x4xbf16> to vector<16x4xbf16>
    %c1_1122 = arith.constant 1 : index
    %c0_1123 = arith.constant 0 : index
    %c0_1124 = arith.constant 0 : index
    %c0_1125 = arith.constant 0 : index
    %774 = vector.load %arg3[%c1_1122, %c0_1123, %c0_1124, %c0_1125] : memref<3x3x4x128xbf16, #tpu.memory_space<vmem>>, vector<1x1x4x128xbf16>
    %775 = vector.shape_cast %774 : vector<1x1x4x128xbf16> to vector<4x128xbf16>
    %cst_1126 = arith.constant dense<0.000000e+00> : vector<16x128xf32>
    %776 = tpu.matmul %773, %775, %cst_1126 {dimension_numbers = #tpu.dot_dimension_numbers<[1], [0], [0], [1], [0, 0, 1, 1], [], []>} : vector<16x4xbf16>, vector<4x128xbf16>, vector<16x128xf32> -> vector<16x128xf32>
    %777 = arith.addf %771, %776 : vector<16x128xf32>
    %c0_1127 = arith.constant 0 : index
    %c14_1128 = arith.constant 14 : index
    %c1_1129 = arith.constant 1 : index
    %c0_1130 = arith.constant 0 : index
    %778 = vector.load %arg2[%c0_1127, %c14_1128, %c1_1129, %c0_1130] : memref<1x18x18x4xbf16, #tpu.memory_space<vmem>>, vector<1x1x16x4xbf16>
    %779 = vector.shape_cast %778 : vector<1x1x16x4xbf16> to vector<16x4xbf16>
    %c1_1131 = arith.constant 1 : index
    %c1_1132 = arith.constant 1 : index
    %c0_1133 = arith.constant 0 : index
    %c0_1134 = arith.constant 0 : index
    %780 = vector.load %arg3[%c1_1131, %c1_1132, %c0_1133, %c0_1134] : memref<3x3x4x128xbf16, #tpu.memory_space<vmem>>, vector<1x1x4x128xbf16>
    %781 = vector.shape_cast %780 : vector<1x1x4x128xbf16> to vector<4x128xbf16>
    %cst_1135 = arith.constant dense<0.000000e+00> : vector<16x128xf32>
    %782 = tpu.matmul %779, %781, %cst_1135 {dimension_numbers = #tpu.dot_dimension_numbers<[1], [0], [0], [1], [0, 0, 1, 1], [], []>} : vector<16x4xbf16>, vector<4x128xbf16>, vector<16x128xf32> -> vector<16x128xf32>
    %783 = arith.addf %777, %782 : vector<16x128xf32>
    %c0_1136 = arith.constant 0 : index
    %c14_1137 = arith.constant 14 : index
    %c2_1138 = arith.constant 2 : index
    %c0_1139 = arith.constant 0 : index
    %784 = vector.load %arg2[%c0_1136, %c14_1137, %c2_1138, %c0_1139] : memref<1x18x18x4xbf16, #tpu.memory_space<vmem>>, vector<1x1x16x4xbf16>
    %785 = vector.shape_cast %784 : vector<1x1x16x4xbf16> to vector<16x4xbf16>
    %c1_1140 = arith.constant 1 : index
    %c2_1141 = arith.constant 2 : index
    %c0_1142 = arith.constant 0 : index
    %c0_1143 = arith.constant 0 : index
    %786 = vector.load %arg3[%c1_1140, %c2_1141, %c0_1142, %c0_1143] : memref<3x3x4x128xbf16, #tpu.memory_space<vmem>>, vector<1x1x4x128xbf16>
    %787 = vector.shape_cast %786 : vector<1x1x4x128xbf16> to vector<4x128xbf16>
    %cst_1144 = arith.constant dense<0.000000e+00> : vector<16x128xf32>
    %788 = tpu.matmul %785, %787, %cst_1144 {dimension_numbers = #tpu.dot_dimension_numbers<[1], [0], [0], [1], [0, 0, 1, 1], [], []>} : vector<16x4xbf16>, vector<4x128xbf16>, vector<16x128xf32> -> vector<16x128xf32>
    %789 = arith.addf %783, %788 : vector<16x128xf32>
    %c0_1145 = arith.constant 0 : index
    %c15 = arith.constant 15 : index
    %c0_1146 = arith.constant 0 : index
    %c0_1147 = arith.constant 0 : index
    %790 = vector.load %arg2[%c0_1145, %c15, %c0_1146, %c0_1147] : memref<1x18x18x4xbf16, #tpu.memory_space<vmem>>, vector<1x1x16x4xbf16>
    %791 = vector.shape_cast %790 : vector<1x1x16x4xbf16> to vector<16x4xbf16>
    %c2_1148 = arith.constant 2 : index
    %c0_1149 = arith.constant 0 : index
    %c0_1150 = arith.constant 0 : index
    %c0_1151 = arith.constant 0 : index
    %792 = vector.load %arg3[%c2_1148, %c0_1149, %c0_1150, %c0_1151] : memref<3x3x4x128xbf16, #tpu.memory_space<vmem>>, vector<1x1x4x128xbf16>
    %793 = vector.shape_cast %792 : vector<1x1x4x128xbf16> to vector<4x128xbf16>
    %cst_1152 = arith.constant dense<0.000000e+00> : vector<16x128xf32>
    %794 = tpu.matmul %791, %793, %cst_1152 {dimension_numbers = #tpu.dot_dimension_numbers<[1], [0], [0], [1], [0, 0, 1, 1], [], []>} : vector<16x4xbf16>, vector<4x128xbf16>, vector<16x128xf32> -> vector<16x128xf32>
    %795 = arith.addf %789, %794 : vector<16x128xf32>
    %c0_1153 = arith.constant 0 : index
    %c15_1154 = arith.constant 15 : index
    %c1_1155 = arith.constant 1 : index
    %c0_1156 = arith.constant 0 : index
    %796 = vector.load %arg2[%c0_1153, %c15_1154, %c1_1155, %c0_1156] : memref<1x18x18x4xbf16, #tpu.memory_space<vmem>>, vector<1x1x16x4xbf16>
    %797 = vector.shape_cast %796 : vector<1x1x16x4xbf16> to vector<16x4xbf16>
    %c2_1157 = arith.constant 2 : index
    %c1_1158 = arith.constant 1 : index
    %c0_1159 = arith.constant 0 : index
    %c0_1160 = arith.constant 0 : index
    %798 = vector.load %arg3[%c2_1157, %c1_1158, %c0_1159, %c0_1160] : memref<3x3x4x128xbf16, #tpu.memory_space<vmem>>, vector<1x1x4x128xbf16>
    %799 = vector.shape_cast %798 : vector<1x1x4x128xbf16> to vector<4x128xbf16>
    %cst_1161 = arith.constant dense<0.000000e+00> : vector<16x128xf32>
    %800 = tpu.matmul %797, %799, %cst_1161 {dimension_numbers = #tpu.dot_dimension_numbers<[1], [0], [0], [1], [0, 0, 1, 1], [], []>} : vector<16x4xbf16>, vector<4x128xbf16>, vector<16x128xf32> -> vector<16x128xf32>
    %801 = arith.addf %795, %800 : vector<16x128xf32>
    %c0_1162 = arith.constant 0 : index
    %c15_1163 = arith.constant 15 : index
    %c2_1164 = arith.constant 2 : index
    %c0_1165 = arith.constant 0 : index
    %802 = vector.load %arg2[%c0_1162, %c15_1163, %c2_1164, %c0_1165] : memref<1x18x18x4xbf16, #tpu.memory_space<vmem>>, vector<1x1x16x4xbf16>
    %803 = vector.shape_cast %802 : vector<1x1x16x4xbf16> to vector<16x4xbf16>
    %c2_1166 = arith.constant 2 : index
    %c2_1167 = arith.constant 2 : index
    %c0_1168 = arith.constant 0 : index
    %c0_1169 = arith.constant 0 : index
    %804 = vector.load %arg3[%c2_1166, %c2_1167, %c0_1168, %c0_1169] : memref<3x3x4x128xbf16, #tpu.memory_space<vmem>>, vector<1x1x4x128xbf16>
    %805 = vector.shape_cast %804 : vector<1x1x4x128xbf16> to vector<4x128xbf16>
    %cst_1170 = arith.constant dense<0.000000e+00> : vector<16x128xf32>
    %806 = tpu.matmul %803, %805, %cst_1170 {dimension_numbers = #tpu.dot_dimension_numbers<[1], [0], [0], [1], [0, 0, 1, 1], [], []>} : vector<16x4xbf16>, vector<4x128xbf16>, vector<16x128xf32> -> vector<16x128xf32>
    %807 = arith.addf %801, %806 : vector<16x128xf32>
    %808 = vector.broadcast %0 : vector<1x128xf32> to vector<16x128xf32>
    %809 = arith.addf %807, %808 : vector<16x128xf32>
    %c0_1171 = arith.constant 0 : index
    %c13_1172 = arith.constant 13 : index
    %c0_1173 = arith.constant 0 : index
    %c0_1174 = arith.constant 0 : index
    %810 = vector.load %arg5[%c0_1171, %c13_1172, %c0_1173, %c0_1174] : memref<1x16x16x128xf32, #tpu.memory_space<vmem>>, vector<1x1x16x128xf32>
    %811 = vector.shape_cast %810 : vector<1x1x16x128xf32> to vector<16x128xf32>
    %812 = vector.shape_cast %809 : vector<16x128xf32> to vector<1x1x16x128xf32>
    tpu.vector_store %arg5[%c0_1171, %c13_1172, %c0_1173, %c0_1174], %812 {strides = array<i32>} : memref<1x16x16x128xf32, #tpu.memory_space<vmem>>, vector<1x1x16x128xf32>,
    %c0_1175 = arith.constant 0 : index
    %c14_1176 = arith.constant 14 : index
    %c0_1177 = arith.constant 0 : index
    %c0_1178 = arith.constant 0 : index
    %813 = vector.load %arg2[%c0_1175, %c14_1176, %c0_1177, %c0_1178] : memref<1x18x18x4xbf16, #tpu.memory_space<vmem>>, vector<1x1x16x4xbf16>
    %814 = vector.shape_cast %813 : vector<1x1x16x4xbf16> to vector<16x4xbf16>
    %c0_1179 = arith.constant 0 : index
    %c0_1180 = arith.constant 0 : index
    %c0_1181 = arith.constant 0 : index
    %c0_1182 = arith.constant 0 : index
    %815 = vector.load %arg3[%c0_1179, %c0_1180, %c0_1181, %c0_1182] : memref<3x3x4x128xbf16, #tpu.memory_space<vmem>>, vector<1x1x4x128xbf16>
    %816 = vector.shape_cast %815 : vector<1x1x4x128xbf16> to vector<4x128xbf16>
    %cst_1183 = arith.constant dense<0.000000e+00> : vector<16x128xf32>
    %817 = tpu.matmul %814, %816, %cst_1183 {dimension_numbers = #tpu.dot_dimension_numbers<[1], [0], [0], [1], [0, 0, 1, 1], [], []>} : vector<16x4xbf16>, vector<4x128xbf16>, vector<16x128xf32> -> vector<16x128xf32>
    %c0_1184 = arith.constant 0 : index
    %c14_1185 = arith.constant 14 : index
    %c1_1186 = arith.constant 1 : index
    %c0_1187 = arith.constant 0 : index
    %818 = vector.load %arg2[%c0_1184, %c14_1185, %c1_1186, %c0_1187] : memref<1x18x18x4xbf16, #tpu.memory_space<vmem>>, vector<1x1x16x4xbf16>
    %819 = vector.shape_cast %818 : vector<1x1x16x4xbf16> to vector<16x4xbf16>
    %c0_1188 = arith.constant 0 : index
    %c1_1189 = arith.constant 1 : index
    %c0_1190 = arith.constant 0 : index
    %c0_1191 = arith.constant 0 : index
    %820 = vector.load %arg3[%c0_1188, %c1_1189, %c0_1190, %c0_1191] : memref<3x3x4x128xbf16, #tpu.memory_space<vmem>>, vector<1x1x4x128xbf16>
    %821 = vector.shape_cast %820 : vector<1x1x4x128xbf16> to vector<4x128xbf16>
    %cst_1192 = arith.constant dense<0.000000e+00> : vector<16x128xf32>
    %822 = tpu.matmul %819, %821, %cst_1192 {dimension_numbers = #tpu.dot_dimension_numbers<[1], [0], [0], [1], [0, 0, 1, 1], [], []>} : vector<16x4xbf16>, vector<4x128xbf16>, vector<16x128xf32> -> vector<16x128xf32>
    %823 = arith.addf %817, %822 : vector<16x128xf32>
    %c0_1193 = arith.constant 0 : index
    %c14_1194 = arith.constant 14 : index
    %c2_1195 = arith.constant 2 : index
    %c0_1196 = arith.constant 0 : index
    %824 = vector.load %arg2[%c0_1193, %c14_1194, %c2_1195, %c0_1196] : memref<1x18x18x4xbf16, #tpu.memory_space<vmem>>, vector<1x1x16x4xbf16>
    %825 = vector.shape_cast %824 : vector<1x1x16x4xbf16> to vector<16x4xbf16>
    %c0_1197 = arith.constant 0 : index
    %c2_1198 = arith.constant 2 : index
    %c0_1199 = arith.constant 0 : index
    %c0_1200 = arith.constant 0 : index
    %826 = vector.load %arg3[%c0_1197, %c2_1198, %c0_1199, %c0_1200] : memref<3x3x4x128xbf16, #tpu.memory_space<vmem>>, vector<1x1x4x128xbf16>
    %827 = vector.shape_cast %826 : vector<1x1x4x128xbf16> to vector<4x128xbf16>
    %cst_1201 = arith.constant dense<0.000000e+00> : vector<16x128xf32>
    %828 = tpu.matmul %825, %827, %cst_1201 {dimension_numbers = #tpu.dot_dimension_numbers<[1], [0], [0], [1], [0, 0, 1, 1], [], []>} : vector<16x4xbf16>, vector<4x128xbf16>, vector<16x128xf32> -> vector<16x128xf32>
    %829 = arith.addf %823, %828 : vector<16x128xf32>
    %c0_1202 = arith.constant 0 : index
    %c15_1203 = arith.constant 15 : index
    %c0_1204 = arith.constant 0 : index
    %c0_1205 = arith.constant 0 : index
    %830 = vector.load %arg2[%c0_1202, %c15_1203, %c0_1204, %c0_1205] : memref<1x18x18x4xbf16, #tpu.memory_space<vmem>>, vector<1x1x16x4xbf16>
    %831 = vector.shape_cast %830 : vector<1x1x16x4xbf16> to vector<16x4xbf16>
    %c1_1206 = arith.constant 1 : index
    %c0_1207 = arith.constant 0 : index
    %c0_1208 = arith.constant 0 : index
    %c0_1209 = arith.constant 0 : index
    %832 = vector.load %arg3[%c1_1206, %c0_1207, %c0_1208, %c0_1209] : memref<3x3x4x128xbf16, #tpu.memory_space<vmem>>, vector<1x1x4x128xbf16>
    %833 = vector.shape_cast %832 : vector<1x1x4x128xbf16> to vector<4x128xbf16>
    %cst_1210 = arith.constant dense<0.000000e+00> : vector<16x128xf32>
    %834 = tpu.matmul %831, %833, %cst_1210 {dimension_numbers = #tpu.dot_dimension_numbers<[1], [0], [0], [1], [0, 0, 1, 1], [], []>} : vector<16x4xbf16>, vector<4x128xbf16>, vector<16x128xf32> -> vector<16x128xf32>
    %835 = arith.addf %829, %834 : vector<16x128xf32>
    %c0_1211 = arith.constant 0 : index
    %c15_1212 = arith.constant 15 : index
    %c1_1213 = arith.constant 1 : index
    %c0_1214 = arith.constant 0 : index
    %836 = vector.load %arg2[%c0_1211, %c15_1212, %c1_1213, %c0_1214] : memref<1x18x18x4xbf16, #tpu.memory_space<vmem>>, vector<1x1x16x4xbf16>
    %837 = vector.shape_cast %836 : vector<1x1x16x4xbf16> to vector<16x4xbf16>
    %c1_1215 = arith.constant 1 : index
    %c1_1216 = arith.constant 1 : index
    %c0_1217 = arith.constant 0 : index
    %c0_1218 = arith.constant 0 : index
    %838 = vector.load %arg3[%c1_1215, %c1_1216, %c0_1217, %c0_1218] : memref<3x3x4x128xbf16, #tpu.memory_space<vmem>>, vector<1x1x4x128xbf16>
    %839 = vector.shape_cast %838 : vector<1x1x4x128xbf16> to vector<4x128xbf16>
    %cst_1219 = arith.constant dense<0.000000e+00> : vector<16x128xf32>
    %840 = tpu.matmul %837, %839, %cst_1219 {dimension_numbers = #tpu.dot_dimension_numbers<[1], [0], [0], [1], [0, 0, 1, 1], [], []>} : vector<16x4xbf16>, vector<4x128xbf16>, vector<16x128xf32> -> vector<16x128xf32>
    %841 = arith.addf %835, %840 : vector<16x128xf32>
    %c0_1220 = arith.constant 0 : index
    %c15_1221 = arith.constant 15 : index
    %c2_1222 = arith.constant 2 : index
    %c0_1223 = arith.constant 0 : index
    %842 = vector.load %arg2[%c0_1220, %c15_1221, %c2_1222, %c0_1223] : memref<1x18x18x4xbf16, #tpu.memory_space<vmem>>, vector<1x1x16x4xbf16>
    %843 = vector.shape_cast %842 : vector<1x1x16x4xbf16> to vector<16x4xbf16>
    %c1_1224 = arith.constant 1 : index
    %c2_1225 = arith.constant 2 : index
    %c0_1226 = arith.constant 0 : index
    %c0_1227 = arith.constant 0 : index
    %844 = vector.load %arg3[%c1_1224, %c2_1225, %c0_1226, %c0_1227] : memref<3x3x4x128xbf16, #tpu.memory_space<vmem>>, vector<1x1x4x128xbf16>
    %845 = vector.shape_cast %844 : vector<1x1x4x128xbf16> to vector<4x128xbf16>
    %cst_1228 = arith.constant dense<0.000000e+00> : vector<16x128xf32>
    %846 = tpu.matmul %843, %845, %cst_1228 {dimension_numbers = #tpu.dot_dimension_numbers<[1], [0], [0], [1], [0, 0, 1, 1], [], []>} : vector<16x4xbf16>, vector<4x128xbf16>, vector<16x128xf32> -> vector<16x128xf32>
    %847 = arith.addf %841, %846 : vector<16x128xf32>
    %c0_1229 = arith.constant 0 : index
    %c16 = arith.constant 16 : index
    %c0_1230 = arith.constant 0 : index
    %c0_1231 = arith.constant 0 : index
    %848 = vector.load %arg2[%c0_1229, %c16, %c0_1230, %c0_1231] : memref<1x18x18x4xbf16, #tpu.memory_space<vmem>>, vector<1x1x16x4xbf16>
    %849 = vector.shape_cast %848 : vector<1x1x16x4xbf16> to vector<16x4xbf16>
    %c2_1232 = arith.constant 2 : index
    %c0_1233 = arith.constant 0 : index
    %c0_1234 = arith.constant 0 : index
    %c0_1235 = arith.constant 0 : index
    %850 = vector.load %arg3[%c2_1232, %c0_1233, %c0_1234, %c0_1235] : memref<3x3x4x128xbf16, #tpu.memory_space<vmem>>, vector<1x1x4x128xbf16>
    %851 = vector.shape_cast %850 : vector<1x1x4x128xbf16> to vector<4x128xbf16>
    %cst_1236 = arith.constant dense<0.000000e+00> : vector<16x128xf32>
    %852 = tpu.matmul %849, %851, %cst_1236 {dimension_numbers = #tpu.dot_dimension_numbers<[1], [0], [0], [1], [0, 0, 1, 1], [], []>} : vector<16x4xbf16>, vector<4x128xbf16>, vector<16x128xf32> -> vector<16x128xf32>
    %853 = arith.addf %847, %852 : vector<16x128xf32>
    %c0_1237 = arith.constant 0 : index
    %c16_1238 = arith.constant 16 : index
    %c1_1239 = arith.constant 1 : index
    %c0_1240 = arith.constant 0 : index
    %854 = vector.load %arg2[%c0_1237, %c16_1238, %c1_1239, %c0_1240] : memref<1x18x18x4xbf16, #tpu.memory_space<vmem>>, vector<1x1x16x4xbf16>
    %855 = vector.shape_cast %854 : vector<1x1x16x4xbf16> to vector<16x4xbf16>
    %c2_1241 = arith.constant 2 : index
    %c1_1242 = arith.constant 1 : index
    %c0_1243 = arith.constant 0 : index
    %c0_1244 = arith.constant 0 : index
    %856 = vector.load %arg3[%c2_1241, %c1_1242, %c0_1243, %c0_1244] : memref<3x3x4x128xbf16, #tpu.memory_space<vmem>>, vector<1x1x4x128xbf16>
    %857 = vector.shape_cast %856 : vector<1x1x4x128xbf16> to vector<4x128xbf16>
    %cst_1245 = arith.constant dense<0.000000e+00> : vector<16x128xf32>
    %858 = tpu.matmul %855, %857, %cst_1245 {dimension_numbers = #tpu.dot_dimension_numbers<[1], [0], [0], [1], [0, 0, 1, 1], [], []>} : vector<16x4xbf16>, vector<4x128xbf16>, vector<16x128xf32> -> vector<16x128xf32>
    %859 = arith.addf %853, %858 : vector<16x128xf32>
    %c0_1246 = arith.constant 0 : index
    %c16_1247 = arith.constant 16 : index
    %c2_1248 = arith.constant 2 : index
    %c0_1249 = arith.constant 0 : index
    %860 = vector.load %arg2[%c0_1246, %c16_1247, %c2_1248, %c0_1249] : memref<1x18x18x4xbf16, #tpu.memory_space<vmem>>, vector<1x1x16x4xbf16>
    %861 = vector.shape_cast %860 : vector<1x1x16x4xbf16> to vector<16x4xbf16>
    %c2_1250 = arith.constant 2 : index
    %c2_1251 = arith.constant 2 : index
    %c0_1252 = arith.constant 0 : index
    %c0_1253 = arith.constant 0 : index
    %862 = vector.load %arg3[%c2_1250, %c2_1251, %c0_1252, %c0_1253] : memref<3x3x4x128xbf16, #tpu.memory_space<vmem>>, vector<1x1x4x128xbf16>
    %863 = vector.shape_cast %862 : vector<1x1x4x128xbf16> to vector<4x128xbf16>
    %cst_1254 = arith.constant dense<0.000000e+00> : vector<16x128xf32>
    %864 = tpu.matmul %861, %863, %cst_1254 {dimension_numbers = #tpu.dot_dimension_numbers<[1], [0], [0], [1], [0, 0, 1, 1], [], []>} : vector<16x4xbf16>, vector<4x128xbf16>, vector<16x128xf32> -> vector<16x128xf32>
    %865 = arith.addf %859, %864 : vector<16x128xf32>
    %866 = vector.broadcast %0 : vector<1x128xf32> to vector<16x128xf32>
    %867 = arith.addf %865, %866 : vector<16x128xf32>
    %c0_1255 = arith.constant 0 : index
    %c14_1256 = arith.constant 14 : index
    %c0_1257 = arith.constant 0 : index
    %c0_1258 = arith.constant 0 : index
    %868 = vector.load %arg5[%c0_1255, %c14_1256, %c0_1257, %c0_1258] : memref<1x16x16x128xf32, #tpu.memory_space<vmem>>, vector<1x1x16x128xf32>
    %869 = vector.shape_cast %868 : vector<1x1x16x128xf32> to vector<16x128xf32>
    %870 = vector.shape_cast %867 : vector<16x128xf32> to vector<1x1x16x128xf32>
    tpu.vector_store %arg5[%c0_1255, %c14_1256, %c0_1257, %c0_1258], %870 {strides = array<i32>} : memref<1x16x16x128xf32, #tpu.memory_space<vmem>>, vector<1x1x16x128xf32>,
    %c0_1259 = arith.constant 0 : index
    %c15_1260 = arith.constant 15 : index
    %c0_1261 = arith.constant 0 : index
    %c0_1262 = arith.constant 0 : index
    %871 = vector.load %arg2[%c0_1259, %c15_1260, %c0_1261, %c0_1262] : memref<1x18x18x4xbf16, #tpu.memory_space<vmem>>, vector<1x1x16x4xbf16>
    %872 = vector.shape_cast %871 : vector<1x1x16x4xbf16> to vector<16x4xbf16>
    %c0_1263 = arith.constant 0 : index
    %c0_1264 = arith.constant 0 : index
    %c0_1265 = arith.constant 0 : index
    %c0_1266 = arith.constant 0 : index
    %873 = vector.load %arg3[%c0_1263, %c0_1264, %c0_1265, %c0_1266] : memref<3x3x4x128xbf16, #tpu.memory_space<vmem>>, vector<1x1x4x128xbf16>
    %874 = vector.shape_cast %873 : vector<1x1x4x128xbf16> to vector<4x128xbf16>
    %cst_1267 = arith.constant dense<0.000000e+00> : vector<16x128xf32>
    %875 = tpu.matmul %872, %874, %cst_1267 {dimension_numbers = #tpu.dot_dimension_numbers<[1], [0], [0], [1], [0, 0, 1, 1], [], []>} : vector<16x4xbf16>, vector<4x128xbf16>, vector<16x128xf32> -> vector<16x128xf32>
    %c0_1268 = arith.constant 0 : index
    %c15_1269 = arith.constant 15 : index
    %c1_1270 = arith.constant 1 : index
    %c0_1271 = arith.constant 0 : index
    %876 = vector.load %arg2[%c0_1268, %c15_1269, %c1_1270, %c0_1271] : memref<1x18x18x4xbf16, #tpu.memory_space<vmem>>, vector<1x1x16x4xbf16>
    %877 = vector.shape_cast %876 : vector<1x1x16x4xbf16> to vector<16x4xbf16>
    %c0_1272 = arith.constant 0 : index
    %c1_1273 = arith.constant 1 : index
    %c0_1274 = arith.constant 0 : index
    %c0_1275 = arith.constant 0 : index
    %878 = vector.load %arg3[%c0_1272, %c1_1273, %c0_1274, %c0_1275] : memref<3x3x4x128xbf16, #tpu.memory_space<vmem>>, vector<1x1x4x128xbf16>
    %879 = vector.shape_cast %878 : vector<1x1x4x128xbf16> to vector<4x128xbf16>
    %cst_1276 = arith.constant dense<0.000000e+00> : vector<16x128xf32>
    %880 = tpu.matmul %877, %879, %cst_1276 {dimension_numbers = #tpu.dot_dimension_numbers<[1], [0], [0], [1], [0, 0, 1, 1], [], []>} : vector<16x4xbf16>, vector<4x128xbf16>, vector<16x128xf32> -> vector<16x128xf32>
    %881 = arith.addf %875, %880 : vector<16x128xf32>
    %c0_1277 = arith.constant 0 : index
    %c15_1278 = arith.constant 15 : index
    %c2_1279 = arith.constant 2 : index
    %c0_1280 = arith.constant 0 : index
    %882 = vector.load %arg2[%c0_1277, %c15_1278, %c2_1279, %c0_1280] : memref<1x18x18x4xbf16, #tpu.memory_space<vmem>>, vector<1x1x16x4xbf16>
    %883 = vector.shape_cast %882 : vector<1x1x16x4xbf16> to vector<16x4xbf16>
    %c0_1281 = arith.constant 0 : index
    %c2_1282 = arith.constant 2 : index
    %c0_1283 = arith.constant 0 : index
    %c0_1284 = arith.constant 0 : index
    %884 = vector.load %arg3[%c0_1281, %c2_1282, %c0_1283, %c0_1284] : memref<3x3x4x128xbf16, #tpu.memory_space<vmem>>, vector<1x1x4x128xbf16>
    %885 = vector.shape_cast %884 : vector<1x1x4x128xbf16> to vector<4x128xbf16>
    %cst_1285 = arith.constant dense<0.000000e+00> : vector<16x128xf32>
    %886 = tpu.matmul %883, %885, %cst_1285 {dimension_numbers = #tpu.dot_dimension_numbers<[1], [0], [0], [1], [0, 0, 1, 1], [], []>} : vector<16x4xbf16>, vector<4x128xbf16>, vector<16x128xf32> -> vector<16x128xf32>
    %887 = arith.addf %881, %886 : vector<16x128xf32>
    %c0_1286 = arith.constant 0 : index
    %c16_1287 = arith.constant 16 : index
    %c0_1288 = arith.constant 0 : index
    %c0_1289 = arith.constant 0 : index
    %888 = vector.load %arg2[%c0_1286, %c16_1287, %c0_1288, %c0_1289] : memref<1x18x18x4xbf16, #tpu.memory_space<vmem>>, vector<1x1x16x4xbf16>
    %889 = vector.shape_cast %888 : vector<1x1x16x4xbf16> to vector<16x4xbf16>
    %c1_1290 = arith.constant 1 : index
    %c0_1291 = arith.constant 0 : index
    %c0_1292 = arith.constant 0 : index
    %c0_1293 = arith.constant 0 : index
    %890 = vector.load %arg3[%c1_1290, %c0_1291, %c0_1292, %c0_1293] : memref<3x3x4x128xbf16, #tpu.memory_space<vmem>>, vector<1x1x4x128xbf16>
    %891 = vector.shape_cast %890 : vector<1x1x4x128xbf16> to vector<4x128xbf16>
    %cst_1294 = arith.constant dense<0.000000e+00> : vector<16x128xf32>
    %892 = tpu.matmul %889, %891, %cst_1294 {dimension_numbers = #tpu.dot_dimension_numbers<[1], [0], [0], [1], [0, 0, 1, 1], [], []>} : vector<16x4xbf16>, vector<4x128xbf16>, vector<16x128xf32> -> vector<16x128xf32>
    %893 = arith.addf %887, %892 : vector<16x128xf32>
    %c0_1295 = arith.constant 0 : index
    %c16_1296 = arith.constant 16 : index
    %c1_1297 = arith.constant 1 : index
    %c0_1298 = arith.constant 0 : index
    %894 = vector.load %arg2[%c0_1295, %c16_1296, %c1_1297, %c0_1298] : memref<1x18x18x4xbf16, #tpu.memory_space<vmem>>, vector<1x1x16x4xbf16>
    %895 = vector.shape_cast %894 : vector<1x1x16x4xbf16> to vector<16x4xbf16>
    %c1_1299 = arith.constant 1 : index
    %c1_1300 = arith.constant 1 : index
    %c0_1301 = arith.constant 0 : index
    %c0_1302 = arith.constant 0 : index
    %896 = vector.load %arg3[%c1_1299, %c1_1300, %c0_1301, %c0_1302] : memref<3x3x4x128xbf16, #tpu.memory_space<vmem>>, vector<1x1x4x128xbf16>
    %897 = vector.shape_cast %896 : vector<1x1x4x128xbf16> to vector<4x128xbf16>
    %cst_1303 = arith.constant dense<0.000000e+00> : vector<16x128xf32>
    %898 = tpu.matmul %895, %897, %cst_1303 {dimension_numbers = #tpu.dot_dimension_numbers<[1], [0], [0], [1], [0, 0, 1, 1], [], []>} : vector<16x4xbf16>, vector<4x128xbf16>, vector<16x128xf32> -> vector<16x128xf32>
    %899 = arith.addf %893, %898 : vector<16x128xf32>
    %c0_1304 = arith.constant 0 : index
    %c16_1305 = arith.constant 16 : index
    %c2_1306 = arith.constant 2 : index
    %c0_1307 = arith.constant 0 : index
    %900 = vector.load %arg2[%c0_1304, %c16_1305, %c2_1306, %c0_1307] : memref<1x18x18x4xbf16, #tpu.memory_space<vmem>>, vector<1x1x16x4xbf16>
    %901 = vector.shape_cast %900 : vector<1x1x16x4xbf16> to vector<16x4xbf16>
    %c1_1308 = arith.constant 1 : index
    %c2_1309 = arith.constant 2 : index
    %c0_1310 = arith.constant 0 : index
    %c0_1311 = arith.constant 0 : index
    %902 = vector.load %arg3[%c1_1308, %c2_1309, %c0_1310, %c0_1311] : memref<3x3x4x128xbf16, #tpu.memory_space<vmem>>, vector<1x1x4x128xbf16>
    %903 = vector.shape_cast %902 : vector<1x1x4x128xbf16> to vector<4x128xbf16>
    %cst_1312 = arith.constant dense<0.000000e+00> : vector<16x128xf32>
    %904 = tpu.matmul %901, %903, %cst_1312 {dimension_numbers = #tpu.dot_dimension_numbers<[1], [0], [0], [1], [0, 0, 1, 1], [], []>} : vector<16x4xbf16>, vector<4x128xbf16>, vector<16x128xf32> -> vector<16x128xf32>
    %905 = arith.addf %899, %904 : vector<16x128xf32>
    %c0_1313 = arith.constant 0 : index
    %c17 = arith.constant 17 : index
    %c0_1314 = arith.constant 0 : index
    %c0_1315 = arith.constant 0 : index
    %906 = vector.load %arg2[%c0_1313, %c17, %c0_1314, %c0_1315] : memref<1x18x18x4xbf16, #tpu.memory_space<vmem>>, vector<1x1x16x4xbf16>
    %907 = vector.shape_cast %906 : vector<1x1x16x4xbf16> to vector<16x4xbf16>
    %c2_1316 = arith.constant 2 : index
    %c0_1317 = arith.constant 0 : index
    %c0_1318 = arith.constant 0 : index
    %c0_1319 = arith.constant 0 : index
    %908 = vector.load %arg3[%c2_1316, %c0_1317, %c0_1318, %c0_1319] : memref<3x3x4x128xbf16, #tpu.memory_space<vmem>>, vector<1x1x4x128xbf16>
    %909 = vector.shape_cast %908 : vector<1x1x4x128xbf16> to vector<4x128xbf16>
    %cst_1320 = arith.constant dense<0.000000e+00> : vector<16x128xf32>
    %910 = tpu.matmul %907, %909, %cst_1320 {dimension_numbers = #tpu.dot_dimension_numbers<[1], [0], [0], [1], [0, 0, 1, 1], [], []>} : vector<16x4xbf16>, vector<4x128xbf16>, vector<16x128xf32> -> vector<16x128xf32>
    %911 = arith.addf %905, %910 : vector<16x128xf32>
    %c0_1321 = arith.constant 0 : index
    %c17_1322 = arith.constant 17 : index
    %c1_1323 = arith.constant 1 : index
    %c0_1324 = arith.constant 0 : index
    %912 = vector.load %arg2[%c0_1321, %c17_1322, %c1_1323, %c0_1324] : memref<1x18x18x4xbf16, #tpu.memory_space<vmem>>, vector<1x1x16x4xbf16>
    %913 = vector.shape_cast %912 : vector<1x1x16x4xbf16> to vector<16x4xbf16>
    %c2_1325 = arith.constant 2 : index
    %c1_1326 = arith.constant 1 : index
    %c0_1327 = arith.constant 0 : index
    %c0_1328 = arith.constant 0 : index
    %914 = vector.load %arg3[%c2_1325, %c1_1326, %c0_1327, %c0_1328] : memref<3x3x4x128xbf16, #tpu.memory_space<vmem>>, vector<1x1x4x128xbf16>
    %915 = vector.shape_cast %914 : vector<1x1x4x128xbf16> to vector<4x128xbf16>
    %cst_1329 = arith.constant dense<0.000000e+00> : vector<16x128xf32>
    %916 = tpu.matmul %913, %915, %cst_1329 {dimension_numbers = #tpu.dot_dimension_numbers<[1], [0], [0], [1], [0, 0, 1, 1], [], []>} : vector<16x4xbf16>, vector<4x128xbf16>, vector<16x128xf32> -> vector<16x128xf32>
    %917 = arith.addf %911, %916 : vector<16x128xf32>
    %c0_1330 = arith.constant 0 : index
    %c17_1331 = arith.constant 17 : index
    %c2_1332 = arith.constant 2 : index
    %c0_1333 = arith.constant 0 : index
    %918 = vector.load %arg2[%c0_1330, %c17_1331, %c2_1332, %c0_1333] : memref<1x18x18x4xbf16, #tpu.memory_space<vmem>>, vector<1x1x16x4xbf16>
    %919 = vector.shape_cast %918 : vector<1x1x16x4xbf16> to vector<16x4xbf16>
    %c2_1334 = arith.constant 2 : index
    %c2_1335 = arith.constant 2 : index
    %c0_1336 = arith.constant 0 : index
    %c0_1337 = arith.constant 0 : index
    %920 = vector.load %arg3[%c2_1334, %c2_1335, %c0_1336, %c0_1337] : memref<3x3x4x128xbf16, #tpu.memory_space<vmem>>, vector<1x1x4x128xbf16>
    %921 = vector.shape_cast %920 : vector<1x1x4x128xbf16> to vector<4x128xbf16>
    %cst_1338 = arith.constant dense<0.000000e+00> : vector<16x128xf32>
    %922 = tpu.matmul %919, %921, %cst_1338 {dimension_numbers = #tpu.dot_dimension_numbers<[1], [0], [0], [1], [0, 0, 1, 1], [], []>} : vector<16x4xbf16>, vector<4x128xbf16>, vector<16x128xf32> -> vector<16x128xf32>
    %923 = arith.addf %917, %922 : vector<16x128xf32>
    %924 = vector.broadcast %0 : vector<1x128xf32> to vector<16x128xf32>
    %925 = arith.addf %923, %924 : vector<16x128xf32>
    %c0_1339 = arith.constant 0 : index
    %c15_1340 = arith.constant 15 : index
    %c0_1341 = arith.constant 0 : index
    %c0_1342 = arith.constant 0 : index
    %926 = vector.load %arg5[%c0_1339, %c15_1340, %c0_1341, %c0_1342] : memref<1x16x16x128xf32, #tpu.memory_space<vmem>>, vector<1x1x16x128xf32>
    %927 = vector.shape_cast %926 : vector<1x1x16x128xf32> to vector<16x128xf32>
    %928 = vector.shape_cast %925 : vector<16x128xf32> to vector<1x1x16x128xf32>
    tpu.vector_store %arg5[%c0_1339, %c15_1340, %c0_1341, %c0_1342], %928 {strides = array<i32>} : memref<1x16x16x128xf32, #tpu.memory_space<vmem>>, vector<1x1x16x128xf32>,
    return
  }
  func.func @transform_0(%arg0: i32, %arg1: i32) -> (i32, i32, i32, i32) {
    %c0_i32 = arith.constant 0 : i32
    %c0_i32_0 = arith.constant 0 : i32
    %c0_i32_1 = arith.constant 0 : i32
    %c0_i32_2 = arith.constant 0 : i32
    return %arg1, %c0_i32, %c0_i32_0, %c0_i32_1 : i32, i32, i32, i32
  }
  func.func @transform_1(%arg0: i32, %arg1: i32) -> (i32, i32, i32, i32) {
    %c0_i32 = arith.constant 0 : i32
    %c0_i32_0 = arith.constant 0 : i32
    %c0_i32_1 = arith.constant 0 : i32
    %c0_i32_2 = arith.constant 0 : i32
    return %c0_i32, %c0_i32_0, %c0_i32_1, %arg0 : i32, i32, i32, i32
  }
  func.func @transform_2(%arg0: i32, %arg1: i32) -> (i32, i32) {
    %c0_i32 = arith.constant 0 : i32
    %c0_i32_0 = arith.constant 0 : i32
    return %c0_i32, %arg0 : i32, i32
  }
  func.func @transform_3(%arg0: i32, %arg1: i32) -> (i32, i32, i32, i32) {
    %c0_i32 = arith.constant 0 : i32
    %c0_i32_0 = arith.constant 0 : i32
    %c0_i32_1 = arith.constant 0 : i32
    return %arg1, %c0_i32, %c0_i32_0, %arg0 : i32, i32, i32, i32
  }
}

</mosaic_0001>

<bundles_post_ra>
// kernel: tpu_custom_call.1
= control target key start
LH: loop header
LB: loop body
LE: loop exit
PB: predicated region body
PF: predicated region fallthrough
CT: control target
= control target key end

     0   :  { %8 = vsyncpa [#allocation3], 0  ;;  %s13438_s0 = inlined_call_operand.vmem [shape: bf16[2,18,18,4], index: 0, kind: input, shape index: {}]   ;;  %s13439_s1 = inlined_call_operand.vmem [shape: bf16[3,3,4,128], index: 1, kind: input, shape index: {}]   ;;  %s13440_s2 = inlined_call_operand.vmem [shape: f32[1,128], index: 2, kind: input, shape index: {}]   ;;  %s13441_s3 = inlined_call_operand.hbm [shape: f32[2,16,16,128], index: 3, kind: output, shape index: {}]  }
   0x1   :  { %10 = vsyncpa [#allocation3 + $0x1], 0  ;;  %s11469_s12 = smov 0   ;;  %s11471_s13 = smov 0  }
   0x2   :  { %s11473_s14 = smov 0   ;;  %s11475_s15 = smov 0  }
   0x3   :  { %s11477_s16 = smov 0   ;;  %s11479_s17 = smov 0  }
   0x4 LB: > { %s9228_s18 = sadd.s32 4294967295, %s11442_s17   ;;  %s9229_s19 = sadd.s32 4294967294, %s11442_s17   ;;  %s11442_s17 = sphi %s11479_s17, %s16_s17   ;;  %s11438_s16 = sphi %s11477_s16, %s13448_s16   ;;  %s11434_s15 = sphi %s11475_s15, %s13447_s15   ;;  %s11430_s14 = sphi %s11473_s14, %s13446_s14   ;;  %s11426_s13 = sphi %s11471_s13, %s13445_s13   ;;  %s11422_s12 = sphi %s11469_s12, %s13444_s12  }
   0x5   : > { %s25_s20 = sadd.s32 1, %s11438_s16  ;;  %s115_s21 = sadd.s32 1, %s11430_s14 }
   0x6   : > { %p26_p0 = scmp.ge.s32.totalorder %s25_s20, 2  ;;  %p125_p1 = scmp.ne.s32.totalorder %s11430_s14, %s11426_s13 }
   0x7   : > { %p126_p2 = scmp.eq.s32.totalorder %s9228_s18, 1  ;;  %p131_p3 = scmp.ne.s32.totalorder %s11426_s13, %s11422_s12 }
   0x8   : > { %s13450_s20 = smov (%p26_p0, %s25_s20), 0  ;;  %p132_p5 = scmp.eq.s32.totalorder %s9229_s19, 1 }
   0x9   : > { %p11509_p4 = por %p126_p2, %p125_p1  ;;  %s110_s23 = ssub.s32 %s11438_s16, %s13450_s20 }
   0xa   : > { %p9234_p6 = scmp.ge.s32.totalorder %s11442_s17, 1  ;;  %p113_p7 = scmp.eq.s32.totalorder %s110_s23, 0 }
   0xb   : > { %p11516_p8 = por %p132_p5, %p131_p3  ;;  %p171_p9 = scmp.lt.s32.totalorder %s11442_s17, 3 }
   0xc   : > { %s11522_s25 = scalar_select %p113_p7, %s11430_s14, %s115_s21  }
   0xd   : > { %p172_p10 = pnand %p9234_p6, %p171_p9 }
   0xe   : > { %v9237_v0 = vld [vmem:[%s13439_s1 + $0x2] sm:$0x3] (!%p172_p10)  ;;  %vm247_vm0 = vcmask (!%p172_p10), 1041408   ;;  %v218_v1 = vld [vmem:[%s13439_s1] sm:$0x3] (!%p172_p10)  ;;  %v11444_v2 = vmov (!%p172_p10), 0.0  }
   0xf   : > { %175 = sbr.rel (%p172_p10) target bundleno = 840 (0x348), region = 32  ;;  %10262 = vmatprep.subr.bf16.mxu0 (!%p172_p10), %v11444_v2  ;;  %10268 = vmatprep.subr.bf16.mxu1 (!%p172_p10), %v11444_v2  ;;  %v249_v3 = vsel (!%p172_p10), %vm247_vm0, %v9237_v0, 0  ;;  %v295_v4 = vsel (!%p172_p10), %vm247_vm0, %v218_v1, 0  ;;  %p202_p11 = scmp.lt.s32.totalorder (!%p172_p10), %s11434_s15, 1  ;;  %vm11445_vm1 = vmmov (!%p172_p10), 0   ;;  %vm243_vm2 = vcmask (!%p172_p10), 31744  }
  0x10   : > { %10263 = vmatpush3.bf16.msra.mxu0 (!%p172_p10), %v249_v3  ;;  %10269 = vmatpush3.bf16.msra.mxu1 (!%p172_p10), %v295_v4  ;;  %v9247_v5 = vld [vmem:[%s13439_s1 + $0x6] sm:$0x3] (!%p172_p10)  ;;  %vm230_vm3 = vsmask.f32 (!%p172_p10), 7424  ;;  %v9242_v19 = vld [vmem:[%s13439_s1 + $0x4] sm:$0x3] (!%p172_p10) }
  0x11   : > { %10270 = vmatprep.mubr.msk.bf16.mxu1 (!%p172_p10), %vm11445_vm1, %v11444_v2  ;;  %10264 = vmatprep.mubr.msk.bf16.mxu0 (!%p172_p10), %vm11445_vm1, %v11444_v2  ;;  %v411_v10 = vsel (!%p172_p10), %vm247_vm0, %v9247_v5, 0  ;;  %v9258_v25 = vld [vmem:[%s13439_s1 + $0xa] sm:$0x3] (!%p172_p10)  ;;  %v352_v27 = vsel (!%p172_p10), %vm247_vm0, %v9242_v19, 0  ;;  %vm344_vm4 = vcmask (!%p172_p10), 1046528   ;;  %s199_s5 = sand.u32 (!%p172_p10), 1, %s11426_s13  }
  0x12   : > { %10274 = vmatprep.subr.bf16.mxu0 (!%p172_p10), %v11444_v2  ;;  %10280 = vmatprep.subr.bf16.mxu1 (!%p172_p10), %v11444_v2  ;;  %v543_v33 = vsel (!%p172_p10), %vm247_vm0, %v9258_v25, 0  ;;  %v9253_v37 = vld [vmem:[%s13439_s1 + $0x8] sm:$0x3] (!%p172_p10)  ;;  %v9269_v48 = vld [vmem:[%s13439_s1 + $0xe] sm:$0x3] (!%p172_p10)  ;;  %s9235_s6 = sshll.u32 (!%p172_p10), %s199_s5, 8 }
  0x13   : > { %v485_v49 = vsel (!%p172_p10), %vm247_vm0, %v9253_v37, 0  ;;  %v676_v55 = vsel (!%p172_p10), %vm247_vm0, %v9269_v48, 0  ;;  %v9263_v58 = vld [vmem:[%s13439_s1 + $0xc] sm:$0x3] (!%p172_p10)  ;;  %v9281_v0 = vld [vmem:[%s13439_s1 + $0x2] sm:$0x3] (!%p172_p10) }
  0x14   : > { %v602_v1 = vsel (!%p172_p10), %vm247_vm0, %v9263_v58, 0  ;;  %v791_v25 = vld [vmem:[%s13439_s1] sm:$0x3] (!%p172_p10)  ;;  %v9303_v48 = vld [vmem:[%s13439_s1 + $0xa] sm:$0x3] (!%p172_p10)  ;;  %s12345_s21 = scalar_lea.vmem (!%p172_p10), [#allocation2], %s9235_s6 }
  0x15   : > { %s9973_s28 = sshll.u32 (!%p172_p10), %s11434_s15, 12  ;;  %s9129_s29 = sshll.u32 (!%p172_p10), %s12345_s21, 4  ;;  %s13385_s29 = int_to_ptr.vmem [resolvable:$true] %s9129_s29 }
  0x16   : > { %s203_s30 = scalar_select %p202_p11, %s11434_s15, 1 }
  0x17   : > { %s13383_s6 = scalar_lea.hbm %s13441_s3, %s9973_s28  ;;  %s13392_s15 = scalar_lea.sflag [#allocation3], %s199_s5 }
  0x18   : > { %s11126_s4 = smul.u32 216, %s203_s30  ;;  %s11364_s7 = scalar_lea.vmem %s13385_s29, 4096 }
  0x19   : > { %p11365_p12 = scmp.ne.s32.totalorder %s13385_s29, %s11364_s7  ;;  %s11446_s8 = smov [#allocation2]  }
  0x1a   : > { %s11548_s9 = scalar_lea.vmem %s13438_s0, %s11126_s4  ;;  %s11368_s10 = sshll.u32 %s11446_s8, 4  ;;  %s11369_s10 = int_to_ptr.vmem [resolvable:$false] %s11368_s10 }
  0x1b   : > { %v216_v6 = vld [vmem:[%s11548_s9] sm:$0xf]  ;;  %v217_v7 = vld [vmem:[%s11548_s9 + $0x4] sm:$0xf]  ;;  %v9250_v15 = vld [vmem:[%s11548_s9 + $0xc] sm:$0xf]  ;;  %p11366_p13 = pnand %p11365_p12, %p11509_p4  ;;  %p11371_p1 = scmp.lt.s32.totalorder %s13385_s29, %s11369_s10 }
  0x1c   : > { %v9238_v8 = vcombine.low %v216_v6, %v217_v7  ;;  %v11188_v9 = vld [vmem:[%s11548_s9 + $0x8] ss:$0 sps:$4 sm:$0x11]   ;;  %v338_v11 = vld [vmem:[%s11548_s9] sm:$0xe]  ;;  %v11189_v28 = vld [vmem:[%s11548_s9 + $0xc] sm:$0xff]  }
  0x1d   : > { %v239_v14 = vshll.u32 %v11188_v9, 16  ;;  %v9251_v16 = vld [vmem:[%s11548_s9 + $0x10] sm:$0xf]  ;;  %v9257_v20 = vld [vmem:[%s11548_s9 + $0xc] sm:$0xe]  ;;  %v9243_v23 = vcombine.low %v338_v11, %v217_v7  ;;  %v346_v35 = vrot.slane %v11188_v9, 1  ;;  %p11367_p0 = pneg %p11366_p13 }
  0x1e   : > { %10271 = vmatmul.mubr.msk.bf16.vlgmr.msra.gmra.mrb[0].mxu1 %vm243_vm2, %v9238_v8  ;;  %v232_v12 = vshrl.u32 %v9238_v8, 16  ;;  %v234_v13 = vshll.u32 %v9238_v8, 16  ;;  %v9266_v21 = vld [vmem:[%s11548_s9 + $0x18] sm:$0xf]  ;;  %v11567_v22 = vld [vmem:[%s11548_s9 + $0x1c] sm:$0xf]  ;;  %v9254_v26 = vcombine.low %v9250_v15, %v9251_v16  ;;  %v9259_v31 = vcombine.low %v9257_v20, %v9251_v16 }
  0x1f   : > { %10281 = vmatpush3.bf16.msra.mxu1 %v411_v10  ;;  %10282 = vmatprep.mubr.msk.bf16.mxu1 %vm11445_vm1, %v11444_v2  ;;  %v241_v18 = vrot.slane %v239_v14, 1  ;;  %v11191_v30 = vld [vmem:[%s11548_s9 + $0x14] ss:$0 sps:$4 sm:$0x11]   ;;  %v9270_v32 = vcombine.low %v9266_v21, %v11567_v22  ;;  %v345_v34 = vrot.slane %v9243_v23, 1  ;;  %v818_v7 = vsel %vm247_vm0, %v9281_v0, 0 }
  0x20   : > { %v236_v17 = vrot.slane %v234_v13, 1  ;;  %10292 = vmatprep.subr.bf16.mxu1 %v11444_v2  ;;  %v472_v36 = vshll.u32 %v9254_v26, 16  ;;  %v536_v38 = vrot.slane %v9259_v31, 1  ;;  %v537_v39 = vrot.slane %v11191_v30, 1  ;;  %v9278_v42 = vld [vmem:[%s11548_s9 + $0xc] sm:$0xf] }
  0x21   : > { %v11589_v40 = vld [vmem:[%s11548_s9 + $0x20] ss:$0 sps:$4 sm:$0x11]   ;;  %v663_v41 = vshll.u32 %v9270_v32, 16  ;;  %v11594_v43 = vld [vmem:[%s11548_s9 + $0x10] sm:$0xf]  ;;  %v347_v44 = vsel %vm344_vm4, %v345_v34, %v346_v35 }
  0x22   : > { %v237_v24 = vor.u32 %v236_v17, %v232_v12  ;;  %v470_v45 = vshrl.u32 %v9254_v26, 16  ;;  %v474_v46 = vrot.slane %v472_v36, 1  ;;  %v477_v47 = vshll.u32 %v11191_v30, 16  ;;  %v11197_v61 = vld [vmem:[%s11548_s9 + $0x14] ss:$0 sps:$4 sm:$0x11]  }
  0x23   : > { %v661_v50 = vshrl.u32 %v9270_v32, 16  ;;  %v538_v51 = vsel %vm344_vm4, %v536_v38, %v537_v39  ;;  %v665_v52 = vrot.slane %v663_v41, 1  ;;  %v668_v53 = vshll.u32 %v11589_v40, 16  ;;  %v9274_v8 = vld [vmem:[%s13439_s1 + $0x10] sm:$0x3]  ;;  %v11195_v13 = vld [vmem:[%s11548_s9 + $0x18] sm:$0xff]  }
  0x24   : > { %v242_v29 = vsel %vm230_vm3, %v237_v24, %v241_v18  ;;  %v11604_v54 = vcombine.low %v9278_v42, %v11594_v43  ;;  %v475_v56 = vor.u32 %v474_v46, %v470_v45  ;;  %v479_v57 = vrot.slane %v477_v47, 1  ;;  %v9273_v9 = vld [vmem:[%s11548_s9 + $0x18] sm:$0xe]  ;;  %v9286_v12 = vld [vmem:[%s11548_s9 + $0xc] sm:$0xe]  ;;  %s11370_s11 = scalar_lea.vmem %s11369_s10, 8192 }
  0x25   : > { %10265 = vmatmul.mubr.msk.bf16.vlgmr.msra.gmra.mrb[0].mxu0 %vm243_vm2, %v242_v29  ;;  %v666_v59 = vor.u32 %v665_v52, %v661_v50  ;;  %v670_v60 = vrot.slane %v668_v53, 1  ;;  %v810_v6 = vshll.u32 %v11197_v61, 16  ;;  %v9295_v14 = vld [vmem:[%s11548_s9 + $0x18] sm:$0xf]  ;;  %v11644_v15 = vld [vmem:[%s11548_s9 + $0x1c] sm:$0xf]  ;;  %v9275_v16 = vcombine.low %v9273_v9, %v11567_v22  ;;  %p11372_p2 = scmp.lt.s32.totalorder %s11370_s11, %s11364_s7 }
  0x26   : > { %10275 = vmatpush3.bf16.msra.mxu0 %v352_v27  ;;  %10276 = vmatprep.mubr.msk.bf16.mxu0 %vm11445_vm1, %v11444_v2  ;;  %v805_v62 = vshll.u32 %v11604_v54, 16  ;;  %v480_v63 = vsel %vm230_vm3, %v475_v56, %v479_v57  ;;  %v803_v4 = vshrl.u32 %v11604_v54, 16  ;;  %v9287_v17 = vld [vmem:[%s13439_s1 + $0x4] sm:$0x3]  ;;  %v734_v18 = vsel %vm247_vm0, %v9274_v8, 0 }
  0x27   : > { %10283 = vmatmul.mubr.msk.bf16.vlgmr.msra.gmra.mrb[4].mxu1 %vm243_vm2, %v11189_v28  ;;  %10286 = vmatprep.subr.bf16.mxu0 %v11444_v2  ;;  %v671_v3 = vsel %vm230_vm3, %v666_v59, %v670_v60  ;;  %v812_v11 = vrot.slane %v810_v6, 1  ;;  %v9288_v19 = vcombine.low %v9286_v12, %v11594_v43  ;;  %v9299_v21 = vcombine.low %v9295_v14, %v11644_v15  ;;  %v11667_v28 = vld [vmem:[%s11548_s9 + $0x20] ss:$0 sps:$4 sm:$0x11]   ;;  %v9298_v31 = vld [vmem:[%s13439_s1 + $0x8] sm:$0x3]  ;;  %p11373_p3 = por %p11372_p2, %p11371_p1 }
  0x28   : > { %10293 = vmatpush3.bf16.msra.mxu1 %v543_v33  ;;  %10294 = vmatprep.mubr.msk.bf16.mxu1 %vm11445_vm1, %v11444_v2  ;;  %v807_v5 = vrot.slane %v805_v62, 1  ;;  %v919_v23 = vsel %vm247_vm0, %v9287_v17, 0  ;;  %v727_v22 = vrot.slane %v9275_v16, 1  ;;  %v728_v24 = vrot.slane %v11589_v40, 1  ;;  %v9292_v38 = vld [vmem:[%s13439_s1 + $0x6] sm:$0x3] }
  0x29   : > { %10304 = vmatprep.subr.bf16.mxu1 %v11444_v2  ;;  %v912_v26 = vrot.slane %v9288_v19, 1  ;;  %v913_v27 = vrot.slane %v11197_v61, 1  ;;  %v1036_v29 = vshll.u32 %v9299_v21, 16  ;;  %v864_v32 = vsel %vm247_vm0, %v791_v25, 0  ;;  %v9308_v41 = vld [vmem:[%s13439_s1 + $0xc] sm:$0x3]  ;;  %p11374_p5 = pnand %p11373_p3, %p11367_p0 }
  0x2a   : > { %v808_v10 = vor.u32 %v807_v5, %v803_v4  ;;  %v729_v30 = vsel %vm344_vm4, %v727_v22, %v728_v24  ;;  %v1034_v34 = vshrl.u32 %v9299_v21, 16  ;;  %v1041_v36 = vshll.u32 %v11667_v28, 16  ;;  %v9302_v45 = vld [vmem:[%s11548_s9 + $0x18] sm:$0xe]  ;;  %v9311_v46 = vld [vmem:[%s11548_s9 + $0x24] sm:$0xf] }
  0x2b   : > { %v914_v33 = vsel %vm344_vm4, %v912_v26, %v913_v27  ;;  %v1038_v35 = vrot.slane %v1036_v29, 1  ;;  %v1049_v37 = vsel %vm247_vm0, %v9298_v31, 0  ;;  %v976_v42 = vsel %vm247_vm0, %v9292_v38, 0  ;;  %v9312_v47 = vld [vmem:[%s11548_s9 + $0x28] sm:$0xf] }
  0x2c   : > { %v813_v20 = vsel %vm230_vm3, %v808_v10, %v812_v11  ;;  %v1043_v40 = vrot.slane %v1041_v36, 1  ;;  %v9304_v50 = vcombine.low %v9302_v45, %v11644_v15  ;;  %v9319_v52 = vld [vmem:[%s13439_s1 + $0x10] sm:$0x3]  ;;  %v9315_v53 = vcombine.low %v9311_v46, %v9312_v47  ;;  %v11206_v56 = vld [vmem:[%s11548_s9 + $0x2c] ss:$0 sps:$4 sm:$0x11]  }
  0x2d   : > { %10277 = vmatmul.mubr.msk.bf16.vlgmr.msra.gmra.mrb[4].mxu0 %vm243_vm2, %v347_v44  ;;  %v1039_v39 = vor.u32 %v1038_v35, %v1034_v34  ;;  %v1164_v44 = vsel %vm247_vm0, %v9308_v41, 0  ;;  %v1100_v59 = vrot.slane %v11667_v28, 1  ;;  %v1294_v60 = vsel %vm247_vm0, %v9319_v52, 0  ;;  %v9324_v62 = vld [vmem:[%s11548_s9 + $0x18] sm:$0xf] }
  0x2e   : > { %10287 = vmatpush3.bf16.msra.mxu0 %v485_v49  ;;  %10288 = vmatprep.mubr.msk.bf16.mxu0 %vm11445_vm1, %v11444_v2  ;;  %v11202_v49 = vld [vmem:[%s11548_s9 + $0x18] sm:$0xff]   ;;  %v1099_v58 = vrot.slane %v9304_v50, 1  ;;  %v1224_v61 = vshll.u32 %v9315_v53, 16  ;;  %v9314_v0 = vld [vmem:[%s13439_s1 + $0xe] sm:$0x3]  ;;  %v1222_v6 = vshrl.u32 %v9315_v53, 16 }
  0x2f   : > { %10295 = vmatmul.mubr.msk.bf16.vlgmr.msra.gmra.mrb[8].mxu1 %vm243_vm2, %v538_v51  ;;  %10298 = vmatprep.subr.bf16.mxu0 %v11444_v2  ;;  %v1044_v43 = vsel %vm230_vm3, %v1039_v39, %v1043_v40  ;;  %v9318_v51 = vld [vmem:[%s11548_s9 + $0x24] sm:$0xe]  ;;  %v1346_v5 = vld [vmem:[%s13439_s1] sm:$0x3]  ;;  %v1229_v8 = vshll.u32 %v11206_v56, 16  ;;  %v1237_v10 = vsel %vm247_vm0, %v9314_v0, 0 }
  0x30   : > { %10305 = vmatpush3.bf16.msra.mxu1 %v676_v55  ;;  %10306 = vmatprep.mubr.msk.bf16.mxu1 %vm11445_vm1, %v11444_v2  ;;  %v11203_v55 = vld [vmem:[%s11548_s9 + $0x24] sm:$0xff]   ;;  %v9320_v57 = vcombine.low %v9318_v51, %v9312_v47  ;;  %v1101_v4 = vsel %vm344_vm4, %v1099_v58, %v1100_v59  ;;  %v1419_v12 = vsel %vm247_vm0, %v1346_v5, 0  ;;  %v9327_v17 = vld [vmem:[%s13439_s1 + $0x2] sm:$0x3]  ;;  %v9332_v27 = vld [vmem:[%s11548_s9 + $0x18] sm:$0xe] }
  0x31   : > { %10316 = vmatprep.subr.bf16.mxu1 %v11444_v2  ;;  %v1231_v15 = vrot.slane %v1229_v8, 1  ;;  %v1373_v22 = vsel %vm247_vm0, %v9327_v17, 0  ;;  %v9341_v28 = vld [vmem:[%s11548_s9 + $0x24] sm:$0xf]  ;;  %v9342_v29 = vld [vmem:[%s11548_s9 + $0x28] sm:$0xf] }
  0x32   : > { %v9348_v31 = vld [vmem:[%s11548_s9 + $0x24] sm:$0xe]  ;;  %v11783_v34 = vld [vmem:[%s11548_s9 + $0x34] sm:$0xf]  ;;  %v9349_v36 = vld [vmem:[%s13439_s1 + $0xa] sm:$0x3] }
  0x33   : > { %v11210_v39 = vld [vmem:[%s11548_s9 + $0x24] sm:$0xff]   ;;  %v11213_v40 = vld [vmem:[%s11548_s9 + $0x2c] ss:$0 sps:$4 sm:$0x11]   ;;  %v9350_v41 = vcombine.low %v9348_v31, %v9342_v29  ;;  %v1661_v45 = vsel %vm247_vm0, %v9349_v36, 0 }
  0x34   : > { %v9344_v46 = vld [vmem:[%s13439_s1 + $0x8] sm:$0x3]  ;;  %v1655_v51 = vrot.slane %v11213_v40, 1  ;;  %v9360_v52 = vld [vmem:[%s13439_s1 + $0xe] sm:$0x3]  ;;  %v1596_v58 = vshll.u32 %v11213_v40, 16 }
  0x35   : > { %10289 = vmatmul.mubr.msk.bf16.vlgmr.msra.gmra.mrb[8].mxu0 %vm243_vm2, %v480_v63  ;;  %v11728_v63 = vld [vmem:[%s11548_s9 + $0x1c] sm:$0xf]  ;;  %v1654_v50 = vrot.slane %v9350_v41, 1  ;;  %v11813_v53 = vld [vmem:[%s11548_s9 + $0x38] ss:$0 sps:$4 sm:$0x11]  }
  0x36   : > { %10299 = vmatpush3.bf16.msra.mxu0 %v602_v1  ;;  %10300 = vmatprep.mubr.msk.bf16.mxu0 %vm11445_vm1, %v11444_v2  ;;  %v1287_v1 = vrot.slane %v9320_v57, 1  ;;  %v9328_v9 = vcombine.low %v9324_v62, %v11728_v63  ;;  %v1784_v0 = vshll.u32 %v11813_v53, 16  ;;  %v1598_v5 = vrot.slane %v1596_v58, 1  ;;  %v1901_v31 = vld [vmem:[%s13439_s1] sm:$0x3]  ;;  %v11224_v58 = vld [vmem:[%s11548_s9 + $0x30] sm:$0xff]  }
  0x37   : > { %10307 = vmatmul.mubr.msk.bf16.vlgmr.msra.gmra.mrb[12].mxu1 %vm243_vm2, %v671_v3  ;;  %10310 = vmatprep.subr.bf16.mxu0 %v11444_v2  ;;  %v1288_v3 = vrot.slane %v11206_v56, 1  ;;  %v1656_v62 = vsel %vm344_vm4, %v1654_v50, %v1655_v51  ;;  %v11883_v36 = vld [vmem:[%s11548_s9 + $0x38] ss:$0 sps:$4 sm:$0x11]   ;;  %v1974_v40 = vsel %vm247_vm0, %v1901_v31, 0 }
  0x38   : > { %10317 = vmatpush3.bf16.msra.mxu1 %v818_v7  ;;  %10318 = vmatprep.mubr.msk.bf16.mxu1 %vm11445_vm1, %v11444_v2  ;;  %v1226_v7 = vrot.slane %v1224_v61, 1  ;;  %v1360_v16 = vshll.u32 %v9328_v9, 16  ;;  %v9400_v51 = vld [vmem:[%s13439_s1 + $0xc] sm:$0x3] }
  0x39   : > { %10328 = vmatprep.subr.bf16.mxu1 %v11444_v2  ;;  %v1289_v11 = vsel %vm344_vm4, %v1287_v1, %v1288_v3  ;;  %v9354_v1 = vld [vmem:[%s13439_s1 + $0xc] sm:$0x3]  ;;  %v1792_v3 = vsel %vm247_vm0, %v9360_v52, 0 }
  0x3a   : > { %v1227_v14 = vor.u32 %v1226_v7, %v1222_v6  ;;  %v1362_v21 = vrot.slane %v1360_v16, 1  ;;  %v11831_v6 = vld [vmem:[%s11548_s9 + $0x2c] ss:$0 sps:$4 sm:$0x11]  }
  0x3c   : > { %v1232_v19 = vsel %vm230_vm3, %v1227_v14, %v1231_v15  ;;  %v1920_v15 = vshll.u32 %v11831_v6, 16 }
  0x3d   : > { %10301 = vmatmul.mubr.msk.bf16.vlgmr.msra.gmra.mrb[12].mxu0 %vm243_vm2, %v11195_v13  ;;  %v11746_v13 = vld [vmem:[%s11548_s9 + $0x20] ss:$0 sps:$4 sm:$0x11]  }
  0x3e   : > { %10311 = vmatpush3.bf16.msra.mxu0 %v734_v18  ;;  %10312 = vmatprep.mubr.msk.bf16.mxu0 %vm11445_vm1, %v11444_v2  ;;  %v9338_v18 = vld [vmem:[%s13439_s1 + $0x6] sm:$0x3] }
  0x3f   : > { %10319 = vmatmul.mubr.msk.bf16.vlgmr.msra.gmra.mrb[16].mxu1 %vm243_vm2, %v813_v20  ;;  %10322 = vmatprep.subr.bf16.mxu0 %v11444_v2  ;;  %v1358_v20 = vshrl.u32 %v9328_v9, 16  ;;  %v1531_v24 = vsel %vm247_vm0, %v9338_v18, 0  ;;  %v9365_v18 = vld [vmem:[%s13439_s1 + $0x10] sm:$0x3] }
  0x40   : > { %10329 = vmatpush3.bf16.msra.mxu1 %v919_v23  ;;  %10330 = vmatprep.mubr.msk.bf16.mxu1 %vm11445_vm1, %v11444_v2  ;;  %v1365_v23 = vshll.u32 %v11746_v13, 16 }
  0x41   : > { %10340 = vmatprep.subr.bf16.mxu1 %v11444_v2  ;;  %v1363_v25 = vor.u32 %v1362_v21, %v1358_v20  ;;  %v9364_v20 = vld [vmem:[%s11548_s9 + $0x30] sm:$0xe] }
  0x42   : > { %v1367_v26 = vrot.slane %v1365_v23, 1  ;;  %v11217_v21 = vld [vmem:[%s11548_s9 + $0x30] sm:$0xff]   ;;  %v9378_v23 = vld [vmem:[%s11548_s9 + $0x24] sm:$0xe] }
  0x44   : > { %v1368_v35 = vsel %vm230_vm3, %v1363_v25, %v1367_v26  ;;  %v9366_v26 = vcombine.low %v9364_v20, %v11783_v34 }
  0x45   : > { %10313 = vmatmul.mubr.msk.bf16.vlgmr.msra.gmra.mrb[16].mxu0 %vm243_vm2, %v729_v30  ;;  %v9333_v30 = vld [vmem:[%s13439_s1 + $0x4] sm:$0x3] }
  0x46   : > { %10323 = vmatpush3.bf16.msra.mxu0 %v864_v32  ;;  %10324 = vmatprep.mubr.msk.bf16.mxu0 %vm11445_vm1, %v11444_v2  ;;  %v9334_v32 = vcombine.low %v9332_v27, %v11728_v63  ;;  %v1474_v38 = vsel %vm247_vm0, %v9333_v30, 0  ;;  %v9379_v27 = vld [vmem:[%s13439_s1 + $0x4] sm:$0x3] }
  0x47   : > { %10331 = vmatmul.mubr.msk.bf16.vlgmr.msra.gmra.mrb[20].mxu1 %vm243_vm2, %v914_v33  ;;  %10334 = vmatprep.subr.bf16.mxu0 %v11444_v2  ;;  %v9357_v33 = vld [vmem:[%s11548_s9 + $0x30] sm:$0xf] }
  0x48   : > { %10341 = vmatpush3.bf16.msra.mxu1 %v1049_v37  ;;  %10342 = vmatprep.mubr.msk.bf16.mxu1 %vm11445_vm1, %v11444_v2  ;;  %v9345_v37 = vcombine.low %v9341_v28, %v9342_v29  ;;  %v1849_v29 = vsel %vm247_vm0, %v9365_v18, 0  ;;  %v2456_v18 = vld [vmem:[%s13439_s1] sm:$0x3] }
  0x49   : > { %10352 = vmatprep.subr.bf16.mxu1 %v11444_v2 }
  0x4a   : > { %v1591_v47 = vshll.u32 %v9345_v37, 16  ;;  %v1589_v56 = vshrl.u32 %v9345_v37, 16 }
  0x4c   : > { %v1593_v57 = vrot.slane %v1591_v47, 1 }
  0x4d   : > { %10325 = vmatmul.mubr.msk.bf16.vlgmr.msra.gmra.mrb[20].mxu0 %vm243_vm2, %v11604_v54  ;;  %v1106_v54 = vsel %vm247_vm0, %v9303_v48, 0  ;;  %v9370_v48 = vld [vmem:[%s11548_s9 + $0x24] sm:$0xf] }
  0x4e   : > { %10335 = vmatpush3.bf16.msra.mxu0 %v976_v42  ;;  %10336 = vmatprep.mubr.msk.bf16.mxu0 %vm11445_vm1, %v11444_v2  ;;  %v9361_v42 = vcombine.low %v9357_v33, %v11783_v34  ;;  %v2029_v33 = vsel %vm247_vm0, %v9379_v27, 0  ;;  %v1842_v34 = vrot.slane %v9366_v26, 1  ;;  %v9419_v27 = vld [vmem:[%s13439_s1 + $0x2] sm:$0x3] }
  0x4f   : > { %10343 = vmatmul.mubr.msk.bf16.vlgmr.msra.gmra.mrb[24].mxu1 %vm243_vm2, %v1044_v43  ;;  %10346 = vmatprep.subr.bf16.mxu0 %v11444_v2  ;;  %v1467_v43 = vrot.slane %v9334_v32, 1 }
  0x50   : > { %10353 = vmatpush3.bf16.msra.mxu1 %v1164_v44  ;;  %10354 = vmatprep.mubr.msk.bf16.mxu1 %vm11445_vm1, %v11444_v2  ;;  %v1468_v44 = vrot.slane %v11746_v13, 1  ;;  %v1777_v61 = vshrl.u32 %v9361_v42, 16 }
  0x51   : > { %10364 = vmatprep.subr.bf16.mxu1 %v11444_v2 }
  0x55   : > { %10337 = vmatmul.mubr.msk.bf16.vlgmr.msra.gmra.mrb[24].mxu0 %vm243_vm2, %v11202_v49  ;;  %v11805_v49 = vld [vmem:[%s11548_s9 + $0x28] sm:$0xf] }
  0x56   : > { %10347 = vmatpush3.bf16.msra.mxu0 %v1106_v54  ;;  %10348 = vmatprep.mubr.msk.bf16.mxu0 %vm11445_vm1, %v11444_v2  ;;  %v1779_v54 = vshll.u32 %v9361_v42, 16  ;;  %v11818_v59 = vcombine.low %v9370_v48, %v11805_v49  ;;  %v9380_v32 = vcombine.low %v9378_v23, %v11805_v49  ;;  %v9390_v42 = vld [vmem:[%s13439_s1 + $0x8] sm:$0x3]  ;;  %v9384_v48 = vld [vmem:[%s13439_s1 + $0x6] sm:$0x3]  ;;  %v2529_v23 = vsel %vm247_vm0, %v2456_v18, 0 }
  0x57   : > { %10355 = vmatmul.mubr.msk.bf16.vlgmr.msra.gmra.mrb[28].mxu1 %vm243_vm2, %v11203_v55  ;;  %10358 = vmatprep.subr.bf16.mxu0 %v11444_v2  ;;  %v1469_v55 = vsel %vm344_vm4, %v1467_v43, %v1468_v44  ;;  %v2159_v47 = vsel %vm247_vm0, %v9390_v42, 0  ;;  %v2086_v52 = vsel %vm247_vm0, %v9384_v48, 0  ;;  %v9449_v42 = vld [vmem:[%s11548_s9 + $0x48] sm:$0xf] }
  0x58   : > { %10365 = vmatpush3.bf16.msra.mxu1 %v1294_v60  ;;  %10366 = vmatprep.mubr.msk.bf16.mxu1 %vm11445_vm1, %v11444_v2  ;;  %v1604_v60 = vsel %vm247_vm0, %v9344_v46, 0  ;;  %v1781_v63 = vrot.slane %v1779_v54, 1  ;;  %v1915_v7 = vshll.u32 %v11818_v59, 16  ;;  %v2274_v54 = vsel %vm247_vm0, %v9400_v51, 0 }
  0x59   : > { %10376 = vmatprep.subr.bf16.mxu1 %v11444_v2  ;;  %v11241_v18 = vld [vmem:[%s11548_s9 + $0x44] ss:$0 sps:$4 sm:$0x11]  }
  0x5a   : > { %v1782_v8 = vor.u32 %v1781_v63, %v1777_v61  ;;  %v1917_v14 = vrot.slane %v1915_v7, 1  ;;  %v9410_v61 = vld [vmem:[%s11548_s9 + $0x3c] sm:$0xe] }
  0x5d   : > { %10349 = vmatmul.mubr.msk.bf16.vlgmr.msra.gmra.mrb[28].mxu0 %vm243_vm2, %v1101_v4  ;;  %v1594_v4 = vor.u32 %v1593_v57, %v1589_v56  ;;  %v9403_v56 = vld [vmem:[%s11548_s9 + $0x3c] sm:$0xf]  ;;  %v9404_v57 = vld [vmem:[%s11548_s9 + $0x40] sm:$0xf] }
  0x5e   : > { %10359 = vmatpush3.bf16.msra.mxu0 %v1237_v10  ;;  %10360 = vmatprep.mubr.msk.bf16.mxu0 %vm11445_vm1, %v11444_v2  ;;  %v9373_v10 = vld [vmem:[%s13439_s1 + $0x2] sm:$0x3]  ;;  %v9407_v63 = vcombine.low %v9403_v56, %v9404_v57 }
  0x5f   : > { %10367 = vmatmul.mubr.msk.bf16.vlgmr.msra.gmra.mrb[32].mxu1 %vm243_vm2, %v1289_v11  ;;  %10370 = vmatprep.subr.bf16.mxu0 %v11444_v2  ;;  %v1719_v11 = vsel %vm247_vm0, %v9354_v1, 0  ;;  %v1599_v13 = vsel %vm230_vm3, %v1594_v4, %v1598_v5  ;;  %v1928_v17 = vsel %vm247_vm0, %v9373_v10, 0  ;;  %v11225_v1 = vld [vmem:[%s11548_s9 + $0x3c] sm:$0xff]   ;;  %v9412_v4 = vcombine.low %v9410_v61, %v9404_v57  ;;  %v11949_v10 = vld [vmem:[%s11548_s9 + $0x34] sm:$0xf] }
  0x60   : > { %10377 = vmatpush3.bf16.msra.mxu1 %v1419_v12  ;;  %10378 = vmatprep.mubr.msk.bf16.mxu1 %vm11445_vm1, %v11444_v2  ;;  %v1913_v12 = vshrl.u32 %v11818_v59, 16 }
  0x61   : > { %10388 = vmatprep.subr.bf16.mxu1 %v11444_v2 }
  0x62   : > { %v1918_v25 = vor.u32 %v1917_v14, %v1913_v12  ;;  %v2397_v12 = vrot.slane %v9412_v4, 1 }
  0x65   : > { %10361 = vmatmul.mubr.msk.bf16.vlgmr.msra.gmra.mrb[32].mxu0 %vm243_vm2, %v1232_v19  ;;  %v1922_v19 = vrot.slane %v1920_v15, 1  ;;  %v2332_v15 = vshrl.u32 %v9407_v63, 16 }
  0x66   : > { %10371 = vmatpush3.bf16.msra.mxu0 %v1373_v22  ;;  %10372 = vmatprep.mubr.msk.bf16.mxu0 %vm11445_vm1, %v11444_v2  ;;  %v9387_v22 = vld [vmem:[%s11548_s9 + $0x30] sm:$0xf] }
  0x67   : > { %10379 = vmatmul.mubr.msk.bf16.vlgmr.msra.gmra.mrb[36].mxu1 %vm243_vm2, %v9328_v9  ;;  %10382 = vmatprep.subr.bf16.mxu0 %v11444_v2  ;;  %v1786_v9 = vrot.slane %v1784_v0, 1  ;;  %v1923_v30 = vsel %vm230_vm3, %v1918_v25, %v1922_v19  ;;  %v11231_v25 = vld [vmem:[%s11548_s9 + $0x38] ss:$0 sps:$4 sm:$0x11]  }
  0x68   : > { %10389 = vmatpush3.bf16.msra.mxu1 %v1531_v24  ;;  %10390 = vmatprep.mubr.msk.bf16.mxu1 %vm11445_vm1, %v11444_v2  ;;  %v11861_v24 = vld [vmem:[%s11548_s9 + $0x34] sm:$0xf]  ;;  %v2475_v31 = vshll.u32 %v11231_v25, 16 }
  0x69   : > { %10400 = vmatprep.subr.bf16.mxu1 %v11444_v2  ;;  %v1787_v16 = vsel %vm230_vm3, %v1782_v8, %v1786_v9  ;;  %v9391_v28 = vcombine.low %v9387_v22, %v11861_v24  ;;  %v2334_v8 = vshll.u32 %v9407_v63, 16  ;;  %v9416_v9 = vld [vmem:[%s11548_s9 + $0x30] sm:$0xf]  ;;  %v12028_v63 = vld [vmem:[%s11548_s9 + $0x40] sm:$0xf] }
  0x6a   : > { %v9420_v19 = vcombine.low %v9416_v9, %v11949_v10 }
  0x6b   : > { %v2146_v37 = vshll.u32 %v9391_v28, 16  ;;  %v2144_v43 = vshrl.u32 %v9391_v28, 16 }
  0x6c   : > { %v2470_v26 = vshll.u32 %v9420_v19, 16 }
  0x6d   : > { %10373 = vmatmul.mubr.msk.bf16.vlgmr.msra.gmra.mrb[36].mxu0 %vm243_vm2, %v1368_v35  ;;  %v1843_v35 = vrot.slane %v11813_v53, 1  ;;  %v2148_v44 = vrot.slane %v2146_v37, 1  ;;  %v9424_v37 = vld [vmem:[%s11548_s9 + $0x30] sm:$0xe] }
  0x6e   : > { %10383 = vmatpush3.bf16.msra.mxu0 %v1474_v38  ;;  %10384 = vmatprep.mubr.msk.bf16.mxu0 %vm11445_vm1, %v11444_v2  ;;  %v2022_v38 = vrot.slane %v9380_v32, 1  ;;  %v9430_v32 = vld [vmem:[%s13439_s1 + $0x6] sm:$0x3] }
  0x6f   : > { %10391 = vmatmul.mubr.msk.bf16.vlgmr.msra.gmra.mrb[40].mxu1 %vm243_vm2, %v11210_v39  ;;  %10394 = vmatprep.subr.bf16.mxu0 %v11444_v2  ;;  %v2023_v39 = vrot.slane %v11831_v6, 1  ;;  %v1844_v41 = vsel %vm344_vm4, %v1842_v34, %v1843_v35  ;;  %v2149_v50 = vor.u32 %v2148_v44, %v2144_v43  ;;  %v2210_v6 = vrot.slane %v11883_v36, 1  ;;  %v12000_v43 = vld [vmem:[%s11548_s9 + $0x4c] sm:$0xf] }
  0x70   : > { %10401 = vmatpush3.bf16.msra.mxu1 %v1661_v45  ;;  %10402 = vmatprep.mubr.msk.bf16.mxu1 %vm11445_vm1, %v11444_v2  ;;  %v2151_v45 = vshll.u32 %v11883_v36, 16  ;;  %v2641_v34 = vsel %vm247_vm0, %v9430_v32, 0  ;;  %v2477_v36 = vrot.slane %v2475_v31, 1 }
  0x71   : > { %10412 = vmatprep.subr.bf16.mxu1 %v11444_v2  ;;  %v2024_v46 = vsel %vm344_vm4, %v2022_v38, %v2023_v39  ;;  %v9433_v38 = vld [vmem:[%s11548_s9 + $0x3c] sm:$0xf]  ;;  %v9434_v39 = vld [vmem:[%s11548_s9 + $0x40] sm:$0xf] }
  0x72   : > { %v2153_v49 = vrot.slane %v2151_v45, 1  ;;  %v9426_v45 = vcombine.low %v9424_v37, %v11949_v10  ;;  %v9471_v37 = vld [vmem:[%s13439_s1 + $0x4] sm:$0x3] }
  0x74   : > { %v2154_v53 = vsel %vm230_vm3, %v2149_v50, %v2153_v49  ;;  %v11232_v49 = vld [vmem:[%s11548_s9 + $0x3c] sm:$0xff]   ;;  %v11235_v50 = vld [vmem:[%s11548_s9 + $0x44] ss:$0 sps:$4 sm:$0x11]  }
  0x75   : > { %10385 = vmatmul.mubr.msk.bf16.vlgmr.msra.gmra.mrb[40].mxu0 %vm243_vm2, %v1469_v55  ;;  %v9394_v55 = vld [vmem:[%s11548_s9 + $0x30] sm:$0xe]  ;;  %v2706_v4 = vshll.u32 %v11235_v50, 16 }
  0x76   : > { %10395 = vmatpush3.bf16.msra.mxu0 %v1604_v60  ;;  %10396 = vmatprep.mubr.msk.bf16.mxu0 %vm11445_vm1, %v11444_v2  ;;  %v9396_v60 = vcombine.low %v9394_v55, %v11861_v24  ;;  %v2578_v55 = vrot.slane %v11231_v25, 1 }
  0x77   : > { %10403 = vmatmul.mubr.msk.bf16.vlgmr.msra.gmra.mrb[44].mxu1 %vm243_vm2, %v1656_v62  ;;  %10406 = vmatprep.subr.bf16.mxu0 %v11444_v2  ;;  %v9411_v62 = vld [vmem:[%s13439_s1 + $0x10] sm:$0x3] }
  0x78   : > { %10413 = vmatpush3.bf16.msra.mxu1 %v1792_v3  ;;  %10414 = vmatprep.mubr.msk.bf16.mxu1 %vm11445_vm1, %v11444_v2  ;;  %v11228_v3 = vld [vmem:[%s11548_s9 + $0x44] ss:$0 sps:$4 sm:$0x11]   ;;  %v2209_v5 = vrot.slane %v9396_v60, 1  ;;  %v2404_v7 = vsel %vm247_vm0, %v9411_v62, 0 }
  0x79   : > { %10424 = vmatprep.subr.bf16.mxu1 %v11444_v2  ;;  %v12023_v60 = vld [vmem:[%s11548_s9 + $0x50] ss:$0 sps:$4 sm:$0x11]   ;;  %v9462_v62 = vld [vmem:[%s11548_s9 + $0x3c] sm:$0xf] }
  0x7a   : > { %v2211_v14 = vsel %vm344_vm4, %v2209_v5, %v2210_v6  ;;  %v9452_v5 = vld [vmem:[%s13439_s1 + $0xe] sm:$0x3]  ;;  %v2894_v10 = vshll.u32 %v12023_v60, 16 }
  0x7d   : > { %10397 = vmatmul.mubr.msk.bf16.vlgmr.msra.gmra.mrb[44].mxu0 %vm243_vm2, %v1599_v13  ;;  %v2398_v13 = vrot.slane %v11228_v3, 1 }
  0x7e   : > { %10407 = vmatpush3.bf16.msra.mxu0 %v1719_v11  ;;  %10408 = vmatprep.mubr.msk.bf16.mxu0 %vm11445_vm1, %v11444_v2  ;;  %v9406_v11 = vld [vmem:[%s13439_s1 + $0xe] sm:$0x3] }
  0x7f   : > { %10415 = vmatmul.mubr.msk.bf16.vlgmr.msra.gmra.mrb[48].mxu1 %vm243_vm2, %v1787_v16  ;;  %10418 = vmatprep.subr.bf16.mxu0 %v11444_v2  ;;  %v2336_v16 = vrot.slane %v2334_v8, 1  ;;  %v2347_v20 = vsel %vm247_vm0, %v9406_v11, 0  ;;  %v12038_v11 = vcombine.low %v9462_v62, %v12028_v63 }
  0x80   : > { %10425 = vmatpush3.bf16.msra.mxu1 %v1928_v17  ;;  %10426 = vmatprep.mubr.msk.bf16.mxu1 %vm11445_vm1, %v11444_v2  ;;  %v2339_v17 = vshll.u32 %v11228_v3, 16 }
  0x81   : > { %10436 = vmatprep.subr.bf16.mxu1 %v11444_v2  ;;  %v2337_v22 = vor.u32 %v2336_v16, %v2332_v15  ;;  %v9446_v15 = vld [vmem:[%s13439_s1 + $0xc] sm:$0x3] }
  0x82   : > { %v2341_v24 = vrot.slane %v2339_v17, 1  ;;  %v2896_v17 = vrot.slane %v2894_v10, 1 }
  0x84   : > { %v2342_v28 = vsel %vm230_vm3, %v2337_v22, %v2341_v24  ;;  %v3023_v24 = vshrl.u32 %v12038_v11, 16 }
  0x85   : > { %10409 = vmatmul.mubr.msk.bf16.vlgmr.msra.gmra.mrb[48].mxu0 %vm243_vm2, %v11217_v21  ;;  %v2399_v21 = vsel %vm344_vm4, %v2397_v12, %v2398_v13  ;;  %v2902_v12 = vsel %vm247_vm0, %v9452_v5, 0  ;;  %v9487_v5 = vld [vmem:[%s13439_s1 + $0xa] sm:$0x3] }
  0x86   : > { %10419 = vmatpush3.bf16.msra.mxu0 %v1849_v29  ;;  %10420 = vmatprep.mubr.msk.bf16.mxu0 %vm11445_vm1, %v11444_v2  ;;  %v2468_v29 = vshrl.u32 %v9420_v19, 16 }
  0x87   : > { %10427 = vmatmul.mubr.msk.bf16.vlgmr.msra.gmra.mrb[52].mxu1 %vm243_vm2, %v1923_v30  ;;  %10430 = vmatprep.subr.bf16.mxu0 %v11444_v2  ;;  %v2472_v30 = vrot.slane %v2470_v26, 1  ;;  %v3030_v26 = vshll.u32 %v11241_v18, 16 }
  0x88   : > { %10437 = vmatpush3.bf16.msra.mxu1 %v2029_v33  ;;  %10438 = vmatprep.mubr.msk.bf16.mxu1 %vm11445_vm1, %v11444_v2  ;;  %v2483_v33 = vsel %vm247_vm0, %v9419_v27, 0 }
  0x89   : > { %10448 = vmatprep.subr.bf16.mxu1 %v11444_v2  ;;  %v2473_v35 = vor.u32 %v2472_v30, %v2468_v29  ;;  %v11239_v29 = vld [vmem:[%s11548_s9 + $0x48] sm:$0xff]   ;;  %v9457_v30 = vld [vmem:[%s13439_s1 + $0x10] sm:$0x3]  ;;  %v3032_v32 = vrot.slane %v3030_v26, 1 }
  0x8b   : > { %v2478_v44 = vsel %vm230_vm3, %v2473_v35, %v2477_v36  ;;  %v12078_v35 = vld [vmem:[%s11548_s9 + $0x4c] sm:$0xf] }
  0x8d   : > { %10421 = vmatmul.mubr.msk.bf16.vlgmr.msra.gmra.mrb[52].mxu0 %vm243_vm2, %v1844_v41  ;;  %v9440_v41 = vld [vmem:[%s11548_s9 + $0x3c] sm:$0xe] }
  0x8e   : > { %10431 = vmatpush3.bf16.msra.mxu0 %v1974_v40  ;;  %10432 = vmatprep.mubr.msk.bf16.mxu0 %vm11445_vm1, %v11444_v2  ;;  %v9425_v40 = vld [vmem:[%s13439_s1 + $0x4] sm:$0x3]  ;;  %v9442_v51 = vcombine.low %v9440_v41, %v9434_v39 }
  0x8f   : > { %10439 = vmatmul.mubr.msk.bf16.vlgmr.msra.gmra.mrb[56].mxu1 %vm243_vm2, %v2024_v46  ;;  %10442 = vmatprep.subr.bf16.mxu0 %v11444_v2  ;;  %v9441_v46 = vld [vmem:[%s13439_s1 + $0xa] sm:$0x3]  ;;  %v2584_v48 = vsel %vm247_vm0, %v9425_v40, 0 }
  0x90   : > { %10449 = vmatpush3.bf16.msra.mxu1 %v2159_v47  ;;  %10450 = vmatprep.mubr.msk.bf16.mxu1 %vm11445_vm1, %v11444_v2  ;;  %v9437_v47 = vcombine.low %v9433_v38, %v9434_v39  ;;  %v2764_v57 = vrot.slane %v9442_v51, 1  ;;  %v2959_v38 = vsel %vm247_vm0, %v9457_v30, 0  ;;  %v9482_v51 = vld [vmem:[%s13439_s1 + $0x8] sm:$0x3] }
  0x91   : > { %10460 = vmatprep.subr.bf16.mxu1 %v11444_v2 }
  0x92   : > { %v2701_v56 = vshll.u32 %v9437_v47, 16 }
  0x94   : > { %v2703_v3 = vrot.slane %v2701_v56, 1 }
  0x95   : > { %10433 = vmatmul.mubr.msk.bf16.vlgmr.msra.gmra.mrb[56].mxu0 %vm243_vm2, %v11818_v59  ;;  %v9395_v59 = vld [vmem:[%s13439_s1 + $0xa] sm:$0x3] }
  0x96   : > { %10443 = vmatpush3.bf16.msra.mxu0 %v2086_v52  ;;  %10444 = vmatprep.mubr.msk.bf16.mxu0 %vm11445_vm1, %v11444_v2  ;;  %v2216_v0 = vsel %vm247_vm0, %v9395_v59, 0  ;;  %v9453_v52 = vcombine.low %v9449_v42, %v12000_v43  ;;  %v9436_v59 = vld [vmem:[%s13439_s1 + $0x8] sm:$0x3]  ;;  %v3139_v42 = vsel %vm247_vm0, %v9471_v37, 0  ;;  %v9511_v37 = vld [vmem:[%s13439_s1 + $0x2] sm:$0x3] }
  0x97   : > { %10451 = vmatmul.mubr.msk.bf16.vlgmr.msra.gmra.mrb[60].mxu1 %vm243_vm2, %v2154_v53  ;;  %10454 = vmatprep.subr.bf16.mxu0 %v11444_v2  ;;  %v2771_v53 = vsel %vm247_vm0, %v9441_v46, 0  ;;  %v2714_v6 = vsel %vm247_vm0, %v9436_v59, 0 }
  0x98   : > { %10461 = vmatpush3.bf16.msra.mxu1 %v2274_v54  ;;  %10462 = vmatprep.mubr.msk.bf16.mxu1 %vm11445_vm1, %v11444_v2  ;;  %v2577_v54 = vrot.slane %v9426_v45, 1  ;;  %v2889_v61 = vshll.u32 %v9453_v52, 16  ;;  %v2887_v8 = vshrl.u32 %v9453_v52, 16  ;;  %v3011_v45 = vld [vmem:[%s13439_s1] sm:$0x3] }
  0x99   : > { %10472 = vmatprep.subr.bf16.mxu1 %v11444_v2  ;;  %v3084_v52 = vsel %vm247_vm0, %v3011_v45, 0  ;;  %v3593_v45 = vsel %vm247_vm0, %v9511_v37, 0 }
  0x9a   : > { %v2891_v9 = vrot.slane %v2889_v61, 1  ;;  %v9492_v61 = vld [vmem:[%s13439_s1 + $0xc] sm:$0x3] }
  0x9c   : > { %v2892_v16 = vor.u32 %v2891_v9, %v2887_v8  ;;  %v9502_v8 = vld [vmem:[%s11548_s9 + $0x54] sm:$0xe]  ;;  %v9503_v9 = vld [vmem:[%s13439_s1 + $0x10] sm:$0x3] }
  0x9d   : > { %10445 = vmatmul.mubr.msk.bf16.vlgmr.msra.gmra.mrb[60].mxu0 %vm243_vm2, %v11224_v58  ;;  %v2765_v58 = vrot.slane %v11235_v50, 1 }
  0x9e   : > { %10455 = vmatpush3.bf16.msra.mxu0 %v2216_v0  ;;  %10456 = vmatprep.mubr.msk.bf16.mxu0 %vm11445_vm1, %v11444_v2  ;;  %v2579_v0 = vsel %vm344_vm4, %v2577_v54, %v2578_v55  ;;  %v2897_v22 = vsel %vm230_vm3, %v2892_v16, %v2896_v17  ;;  %v3514_v17 = vsel %vm247_vm0, %v9503_v9, 0  ;;  %v11257_v9 = vld [vmem:[%s11548_s9 + $0x5c] ss:$0 sps:$4 sm:$0x11]  }
  0x9f   : > { %10463 = vmatmul.mubr.msk.bf16.vlgmr.msra.gmra.mrb[64].mxu1 %vm243_vm2, %v11225_v1  ;;  %10466 = vmatprep.subr.bf16.mxu0 %v11444_v2  ;;  %v2699_v1 = vshrl.u32 %v9437_v47, 16  ;;  %v3133_v47 = vrot.slane %v11241_v18, 1 }
  0xa0   : > { %10473 = vmatpush3.bf16.msra.mxu1 %v2404_v7  ;;  %10474 = vmatprep.mubr.msk.bf16.mxu1 %vm11445_vm1, %v11444_v2  ;;  %v2766_v7 = vsel %vm344_vm4, %v2764_v57, %v2765_v58  ;;  %v3269_v57 = vsel %vm247_vm0, %v9482_v51, 0  ;;  %v9476_v58 = vld [vmem:[%s13439_s1 + $0x6] sm:$0x3]  ;;  %v9517_v51 = vld [vmem:[%s13439_s1 + $0x4] sm:$0x3] }
  0xa1   : > { %10484 = vmatprep.subr.bf16.mxu1 %v11444_v2  ;;  %v2704_v13 = vor.u32 %v2703_v3, %v2699_v1  ;;  %v3196_v62 = vsel %vm247_vm0, %v9476_v58, 0  ;;  %v9486_v1 = vld [vmem:[%s11548_s9 + $0x48] sm:$0xe]  ;;  %v9495_v3 = vld [vmem:[%s11548_s9 + $0x54] sm:$0xf] }
  0xa5   : > { %10457 = vmatmul.mubr.msk.bf16.vlgmr.msra.gmra.mrb[64].mxu0 %vm243_vm2, %v2211_v14  ;;  %v2708_v14 = vrot.slane %v2706_v4, 1  ;;  %v9496_v4 = vld [vmem:[%s11548_s9 + $0x58] sm:$0xf] }
  0xa6   : > { %10467 = vmatpush3.bf16.msra.mxu0 %v2347_v20  ;;  %10468 = vmatprep.mubr.msk.bf16.mxu0 %vm11445_vm1, %v11444_v2  ;;  %v9499_v10 = vcombine.low %v9495_v3, %v9496_v4  ;;  %v9533_v3 = vld [vmem:[%s13439_s1 + $0xa] sm:$0x3] }
  0xa7   : > { %10475 = vmatmul.mubr.msk.bf16.vlgmr.msra.gmra.mrb[68].mxu1 %vm243_vm2, %v2399_v21  ;;  %10478 = vmatprep.subr.bf16.mxu0 %v11444_v2  ;;  %v2709_v20 = vsel %vm230_vm3, %v2704_v13, %v2708_v14  ;;  %v9465_v21 = vld [vmem:[%s13439_s1 + $0x2] sm:$0x3]  ;;  %v11250_v13 = vld [vmem:[%s11548_s9 + $0x5c] ss:$0 sps:$4 sm:$0x11]   ;;  %v9504_v14 = vcombine.low %v9502_v8, %v9496_v4  ;;  %v11254_v8 = vld [vmem:[%s11548_s9 + $0x54] sm:$0xff]  }
  0xa8   : > { %10485 = vmatpush3.bf16.msra.mxu1 %v2529_v23  ;;  %10486 = vmatprep.mubr.msk.bf16.mxu1 %vm11445_vm1, %v11444_v2  ;;  %v2829_v23 = vsel %vm247_vm0, %v9446_v15, 0  ;;  %v3038_v27 = vsel %vm247_vm0, %v9465_v21, 0  ;;  %v3444_v18 = vshll.u32 %v9499_v10, 16  ;;  %v9498_v21 = vld [vmem:[%s13439_s1 + $0xe] sm:$0x3] }
  0xa9   : > { %10496 = vmatprep.subr.bf16.mxu1 %v11444_v2  ;;  %v3457_v30 = vsel %vm247_vm0, %v9498_v21, 0 }
  0xaa   : > { %v3446_v26 = vrot.slane %v3444_v18, 1  ;;  %v9528_v18 = vld [vmem:[%s13439_s1 + $0x8] sm:$0x3] }
  0xab   : > { %v3824_v37 = vsel %vm247_vm0, %v9528_v18, 0 }
  0xad   : > { %10469 = vmatmul.mubr.msk.bf16.vlgmr.msra.gmra.mrb[68].mxu0 %vm243_vm2, %v2342_v28  ;;  %v9456_v28 = vld [vmem:[%s11548_s9 + $0x48] sm:$0xe] }
  0xae   : > { %10479 = vmatpush3.bf16.msra.mxu0 %v2483_v33  ;;  %10480 = vmatprep.mubr.msk.bf16.mxu0 %vm11445_vm1, %v11444_v2  ;;  %v9470_v33 = vld [vmem:[%s11548_s9 + $0x3c] sm:$0xe]  ;;  %v9458_v36 = vcombine.low %v9456_v28, %v12000_v43  ;;  %v3566_v28 = vld [vmem:[%s13439_s1] sm:$0x3] }
  0xaf   : > { %10487 = vmatmul.mubr.msk.bf16.vlgmr.msra.gmra.mrb[72].mxu1 %vm243_vm2, %v9420_v19  ;;  %10490 = vmatprep.subr.bf16.mxu0 %v11444_v2  ;;  %v3025_v19 = vshll.u32 %v12038_v11, 16  ;;  %v9472_v40 = vcombine.low %v9470_v33, %v12028_v63 }
  0xb0   : > { %10497 = vmatpush3.bf16.msra.mxu1 %v2641_v34  ;;  %10498 = vmatprep.mubr.msk.bf16.mxu1 %vm11445_vm1, %v11444_v2  ;;  %v9479_v34 = vld [vmem:[%s11548_s9 + $0x48] sm:$0xf]  ;;  %v2952_v43 = vrot.slane %v9458_v36, 1 }
  0xb1   : > { %10508 = vmatprep.subr.bf16.mxu1 %v11444_v2  ;;  %v3027_v25 = vrot.slane %v3025_v19, 1  ;;  %v9483_v41 = vcombine.low %v9479_v34, %v12078_v35  ;;  %v3132_v46 = vrot.slane %v9472_v40, 1  ;;  %v9508_v19 = vld [vmem:[%s11548_s9 + $0x48] sm:$0xf] }
  0xb3   : > { %v3028_v31 = vor.u32 %v3027_v25, %v3023_v24  ;;  %v3254_v54 = vshrl.u32 %v9483_v41, 16  ;;  %v3442_v25 = vshrl.u32 %v9499_v10, 16 }
  0xb5   : > { %10481 = vmatmul.mubr.msk.bf16.vlgmr.msra.gmra.mrb[72].mxu0 %vm243_vm2, %v2478_v44  ;;  %v3033_v39 = vsel %vm230_vm3, %v3028_v31, %v3032_v32  ;;  %v2953_v44 = vrot.slane %v12023_v60, 1  ;;  %v3639_v32 = vsel %vm247_vm0, %v3566_v28, 0  ;;  %v3447_v33 = vor.u32 %v3446_v26, %v3442_v25  ;;  %v12245_v28 = vld [vmem:[%s11548_s9 + $0x58] sm:$0xf] }
  0xb6   : > { %10491 = vmatpush3.bf16.msra.mxu0 %v2584_v48  ;;  %10492 = vmatprep.mubr.msk.bf16.mxu0 %vm11445_vm1, %v11444_v2  ;;  %v12101_v48 = vld [vmem:[%s11548_s9 + $0x50] ss:$0 sps:$4 sm:$0x11]  }
  0xb7   : > { %10499 = vmatmul.mubr.msk.bf16.vlgmr.msra.gmra.mrb[76].mxu1 %vm243_vm2, %v11232_v49  ;;  %10502 = vmatprep.subr.bf16.mxu0 %v11444_v2  ;;  %v3256_v49 = vshll.u32 %v9483_v41, 16  ;;  %v2954_v50 = vsel %vm344_vm4, %v2952_v43, %v2953_v44  ;;  %v3261_v56 = vshll.u32 %v12101_v48, 16  ;;  %v3320_v16 = vrot.slane %v12101_v48, 1  ;;  %v9522_v44 = vld [vmem:[%s13439_s1 + $0x6] sm:$0x3] }
  0xb8   : > { %10509 = vmatpush3.bf16.msra.mxu1 %v2771_v53  ;;  %10510 = vmatprep.mubr.msk.bf16.mxu1 %vm11445_vm1, %v11444_v2  ;;  %v3134_v53 = vsel %vm344_vm4, %v3132_v46, %v3133_v47  ;;  %v3751_v48 = vsel %vm247_vm0, %v9522_v44, 0 }
  0xb9   : > { %10520 = vmatprep.subr.bf16.mxu1 %v11444_v2  ;;  %v3258_v55 = vrot.slane %v3256_v49, 1  ;;  %v3263_v60 = vrot.slane %v3261_v56, 1  ;;  %v9532_v56 = vld [vmem:[%s11548_s9 + $0x54] sm:$0xe] }
  0xbb   : > { %v3259_v59 = vor.u32 %v3258_v55, %v3254_v54  ;;  %v9526_v54 = vld [vmem:[%s11548_s9 + $0x58] sm:$0xf] }
  0xbc   : > { %v9534_v10 = vcombine.low %v9532_v56, %v9526_v54 }
  0xbd   : > { %10493 = vmatmul.mubr.msk.bf16.vlgmr.msra.gmra.mrb[76].mxu0 %vm243_vm2, %v2579_v0  ;;  %v3264_v63 = vsel %vm230_vm3, %v3259_v59, %v3263_v60  ;;  %v3384_v0 = vsel %vm247_vm0, %v9492_v61, 0  ;;  %v9541_v59 = vld [vmem:[%s11548_s9 + $0x60] sm:$0xf]  ;;  %v12216_v60 = vld [vmem:[%s11548_s9 + $0x64] sm:$0xf] }
  0xbe   : > { %10503 = vmatpush3.bf16.msra.mxu0 %v2714_v6  ;;  %10504 = vmatprep.mubr.msk.bf16.mxu0 %vm11445_vm1, %v11444_v2  ;;  %v11246_v6 = vld [vmem:[%s11548_s9 + $0x48] sm:$0xff]  }
  0xbf   : > { %10511 = vmatmul.mubr.msk.bf16.vlgmr.msra.gmra.mrb[80].mxu1 %vm243_vm2, %v2766_v7  ;;  %10514 = vmatprep.subr.bf16.mxu0 %v11444_v2  ;;  %v9488_v7 = vcombine.low %v9486_v1, %v12078_v35  ;;  %v12182_v35 = vld [vmem:[%s11548_s9 + $0x50] ss:$0 sps:$4 sm:$0x11]  }
  0xc0   : > { %10521 = vmatpush3.bf16.msra.mxu1 %v2902_v12  ;;  %10522 = vmatprep.mubr.msk.bf16.mxu1 %vm11445_vm1, %v11444_v2  ;;  %v11247_v12 = vld [vmem:[%s11548_s9 + $0x54] sm:$0xff]   ;;  %v3585_v43 = vshll.u32 %v12182_v35, 16 }
  0xc1   : > { %10532 = vmatprep.subr.bf16.mxu1 %v11444_v2  ;;  %v3319_v15 = vrot.slane %v9488_v7, 1 }
  0xc3   : > { %v3321_v24 = vsel %vm344_vm4, %v3319_v15, %v3320_v16  ;;  %v3688_v16 = vrot.slane %v12182_v35, 1 }
  0xc5   : > { %10505 = vmatmul.mubr.msk.bf16.vlgmr.msra.gmra.mrb[80].mxu0 %vm243_vm2, %v2709_v20  ;;  %v12162_v20 = vld [vmem:[%s11548_s9 + $0x4c] sm:$0xf] }
  0xc6   : > { %10515 = vmatpush3.bf16.msra.mxu0 %v2829_v23  ;;  %10516 = vmatprep.mubr.msk.bf16.mxu0 %vm11445_vm1, %v11444_v2  ;;  %v3507_v23 = vrot.slane %v9504_v14, 1  ;;  %v3881_v14 = vsel %vm247_vm0, %v9533_v3, 0 }
  0xc7   : > { %10523 = vmatmul.mubr.msk.bf16.vlgmr.msra.gmra.mrb[84].mxu1 %vm243_vm2, %v2897_v22  ;;  %10526 = vmatprep.subr.bf16.mxu0 %v11444_v2  ;;  %v3508_v22 = vrot.slane %v11250_v13, 1 }
  0xc8   : > { %10533 = vmatpush3.bf16.msra.mxu1 %v3038_v27  ;;  %10534 = vmatprep.mubr.msk.bf16.mxu1 %vm11445_vm1, %v11444_v2  ;;  %v3449_v27 = vshll.u32 %v11250_v13, 16 }
  0xc9   : > { %10544 = vmatprep.subr.bf16.mxu1 %v11444_v2  ;;  %v3509_v31 = vsel %vm344_vm4, %v3507_v23, %v3508_v22  ;;  %v12240_v23 = vld [vmem:[%s11548_s9 + $0x68] ss:$0 sps:$4 sm:$0x11]  }
  0xca   : > { %v3451_v34 = vrot.slane %v3449_v27, 1  ;;  %v9554_v27 = vld [vmem:[%s11548_s9 + $0x54] sm:$0xf]  ;;  %v4004_v44 = vshll.u32 %v12240_v23, 16 }
  0xcd   : > { %10517 = vmatmul.mubr.msk.bf16.vlgmr.msra.gmra.mrb[84].mxu0 %vm243_vm2, %v11239_v29  ;;  %v9512_v29 = vcombine.low %v9508_v19, %v12162_v20  ;;  %v3874_v19 = vrot.slane %v9534_v10, 1 }
  0xce   : > { %10527 = vmatpush3.bf16.msra.mxu0 %v2959_v38  ;;  %10528 = vmatprep.mubr.msk.bf16.mxu0 %vm11445_vm1, %v11444_v2 }
  0xcf   : > { %10535 = vmatmul.mubr.msk.bf16.vlgmr.msra.gmra.mrb[88].mxu1 %vm243_vm2, %v3033_v39  ;;  %10538 = vmatprep.subr.bf16.mxu0 %v11444_v2  ;;  %v3580_v36 = vshll.u32 %v9512_v29, 16  ;;  %v3452_v39 = vsel %vm230_vm3, %v3447_v33, %v3451_v34  ;;  %v3578_v41 = vshrl.u32 %v9512_v29, 16  ;;  %v3816_v33 = vshll.u32 %v11257_v9, 16  ;;  %v9544_v34 = vld [vmem:[%s13439_s1 + $0xe] sm:$0x3] }
  0xd0   : > { %10545 = vmatpush3.bf16.msra.mxu1 %v3139_v42  ;;  %10546 = vmatprep.mubr.msk.bf16.mxu1 %vm11445_vm1, %v11444_v2 }
  0xd1   : > { %10556 = vmatprep.subr.bf16.mxu1 %v11444_v2  ;;  %v3582_v42 = vrot.slane %v3580_v36, 1 }
  0xd3   : > { %v3583_v49 = vor.u32 %v3582_v42, %v3578_v41 }
  0xd5   : > { %10529 = vmatmul.mubr.msk.bf16.vlgmr.msra.gmra.mrb[88].mxu0 %vm243_vm2, %v2954_v50  ;;  %v3587_v50 = vrot.slane %v3585_v43, 1 }
  0xd6   : > { %10539 = vmatpush3.bf16.msra.mxu0 %v3084_v52  ;;  %10540 = vmatprep.mubr.msk.bf16.mxu0 %vm11445_vm1, %v11444_v2  ;;  %v9516_v52 = vld [vmem:[%s11548_s9 + $0x48] sm:$0xe] }
  0xd7   : > { %10547 = vmatmul.mubr.msk.bf16.vlgmr.msra.gmra.mrb[92].mxu1 %vm243_vm2, %v3134_v53  ;;  %10550 = vmatprep.subr.bf16.mxu0 %v11444_v2  ;;  %v9525_v53 = vld [vmem:[%s11548_s9 + $0x54] sm:$0xf]  ;;  %v9518_v1 = vcombine.low %v9516_v52, %v12162_v20  ;;  %v3875_v20 = vrot.slane %v11257_v9, 1 }
  0xd8   : > { %10557 = vmatpush3.bf16.msra.mxu1 %v3269_v57  ;;  %10558 = vmatprep.mubr.msk.bf16.mxu1 %vm11445_vm1, %v11444_v2  ;;  %v9529_v4 = vcombine.low %v9525_v53, %v9526_v54  ;;  %v4006_v54 = vrot.slane %v4004_v44, 1  ;;  %v4121_v44 = vld [vmem:[%s13439_s1] sm:$0x3] }
  0xd9   : > { %10568 = vmatprep.subr.bf16.mxu1 %v11444_v2  ;;  %v3687_v15 = vrot.slane %v9518_v1, 1 }
  0xda   : > { %v3809_v26 = vshrl.u32 %v9529_v4, 16 }
  0xdd   : > { %10541 = vmatmul.mubr.msk.bf16.vlgmr.msra.gmra.mrb[92].mxu0 %vm243_vm2, %v12038_v11  ;;  %v3326_v11 = vsel %vm247_vm0, %v9487_v5, 0 }
  0xde   : > { %10551 = vmatpush3.bf16.msra.mxu0 %v3196_v62  ;;  %10552 = vmatprep.mubr.msk.bf16.mxu0 %vm11445_vm1, %v11444_v2  ;;  %v3588_v62 = vsel %vm230_vm3, %v3583_v49, %v3587_v50  ;;  %v3818_v50 = vrot.slane %v3816_v33, 1 }
  0xdf   : > { %10559 = vmatmul.mubr.msk.bf16.vlgmr.msra.gmra.mrb[96].mxu1 %vm243_vm2, %v3264_v63  ;;  %10562 = vmatprep.subr.bf16.mxu0 %v11444_v2  ;;  %v3694_v63 = vsel %vm247_vm0, %v9517_v51, 0  ;;  %v9538_v51 = vld [vmem:[%s13439_s1 + $0xc] sm:$0x3] }
  0xe0   : > { %10569 = vmatpush3.bf16.msra.mxu1 %v3384_v0  ;;  %10570 = vmatprep.mubr.msk.bf16.mxu1 %vm11445_vm1, %v11444_v2  ;;  %v3939_v3 = vsel %vm247_vm0, %v9538_v51, 0 }
  0xe1   : > { %10580 = vmatprep.subr.bf16.mxu1 %v11444_v2 }
  0xe5   : > { %10553 = vmatmul.mubr.msk.bf16.vlgmr.msra.gmra.mrb[96].mxu0 %vm243_vm2, %v11246_v6 }
  0xe6   : > { %10563 = vmatpush3.bf16.msra.mxu0 %v3326_v11  ;;  %10564 = vmatprep.mubr.msk.bf16.mxu0 %vm11445_vm1, %v11444_v2 }
  0xe7   : > { %10571 = vmatmul.mubr.msk.bf16.vlgmr.msra.gmra.mrb[100].mxu1 %vm243_vm2, %v11247_v12  ;;  %10574 = vmatprep.subr.bf16.mxu0 %v11444_v2  ;;  %v9545_v12 = vcombine.low %v9541_v59, %v12216_v60 }
  0xe8   : > { %10581 = vmatpush3.bf16.msra.mxu1 %v3514_v17  ;;  %10582 = vmatprep.mubr.msk.bf16.mxu1 %vm11445_vm1, %v11444_v2  ;;  %v3811_v17 = vshll.u32 %v9529_v4, 16 }
  0xe9   : > { %10592 = vmatprep.subr.bf16.mxu1 %v11444_v2  ;;  %v3999_v22 = vshll.u32 %v9545_v12, 16  ;;  %v3997_v42 = vshrl.u32 %v9545_v12, 16 }
  0xeb   : > { %v4001_v43 = vrot.slane %v3999_v22, 1  ;;  %v11261_v22 = vld [vmem:[%s11548_s9 + $0x60] sm:$0xff]  }
  0xed   : > { %10565 = vmatmul.mubr.msk.bf16.vlgmr.msra.gmra.mrb[100].mxu0 %vm243_vm2, %v3321_v24  ;;  %v4002_v53 = vor.u32 %v4001_v43, %v3997_v42  ;;  %v12323_v43 = vld [vmem:[%s13440_s2] ss:$0 sm:$0xff] }
  0xee   : > { %10575 = vmatpush3.bf16.msra.mxu0 %v3457_v30  ;;  %10576 = vmatprep.mubr.msk.bf16.mxu0 %vm11445_vm1, %v11444_v2  ;;  %v3689_v30 = vsel %vm344_vm4, %v3687_v15, %v3688_v16  ;;  %v9549_v16 = vld [vmem:[%s13439_s1 + $0x10] sm:$0x3] }
  0xef   : > { %10583 = vmatmul.mubr.msk.bf16.vlgmr.msra.gmra.mrb[104].mxu1 %vm243_vm2, %v3509_v31  ;;  %10586 = vmatprep.subr.bf16.mxu0 %v11444_v2  ;;  %v4069_v33 = vsel %vm247_vm0, %v9549_v16, 0 }
  0xf0   : > { %10593 = vmatpush3.bf16.msra.mxu1 %v3639_v32  ;;  %10594 = vmatprep.mubr.msk.bf16.mxu1 %vm11445_vm1, %v11444_v2  ;;  %v3813_v32 = vrot.slane %v3811_v17, 1 }
  0xf1   : > { %v331_v38 = vpop.f32.mrb[0].mxu1  ;;  %10604 = vmatprep.subr.bf16.mxu1 %v11444_v2 }
  0xf2   : > { %v10272_v40 = vpop.f32.mrb[1].mxu1  ;;  %v3814_v49 = vor.u32 %v3813_v32, %v3809_v26 }
  0xf3   : > { %v334_v46 = vpop.f32.mrb[2].mxu1  ;;  %v3876_v40 = vsel %vm344_vm4, %v3874_v19, %v3875_v20  ;;  %v9562_v19 = vld [vmem:[%s11548_s9 + $0x54] sm:$0xe] }
  0xf4   : > { %v10273_v47 = vpop.f32.mrb[3].mxu1 }
  0xf5   : > { %10577 = vmatmul.mubr.msk.bf16.vlgmr.msra.gmra.mrb[104].mxu0 %vm243_vm2, %v3452_v39 }
  0xf6   : > { %10587 = vmatpush3.bf16.msra.mxu0 %v3593_v45  ;;  %10588 = vmatprep.mubr.msk.bf16.mxu0 %vm11445_vm1, %v11444_v2  ;;  %v12255_v45 = vcombine.low %v9554_v27, %v12245_v28 }
  0xf7   : > { %10595 = vmatmul.mubr.msk.bf16.vlgmr.msra.gmra.mrb[108].mxu1 %vm243_vm2, %v9512_v29  ;;  %10598 = vmatprep.subr.bf16.mxu0 %v11444_v2 }
  0xf8   : > { %v285_v55 = vpop.f32.mrb[0].mxu0  ;;  %10605 = vmatpush3.bf16.msra.mxu1 %v3751_v48  ;;  %10606 = vmatprep.mubr.msk.bf16.mxu1 %vm11445_vm1, %v11444_v2  ;;  %v4012_v48 = vsel %vm247_vm0, %v9544_v34, 0  ;;  %v4135_v56 = vshll.u32 %v12255_v45, 16 }
  0xf9   : > { %v332_v57 = vadd.f32 %v331_v38, %v285_v55  ;;  %v10266_v58 = vpop.f32.mrb[1].mxu0  ;;  %10616 = vmatprep.subr.bf16.mxu1 %v11444_v2  ;;  %v12269_v55 = vld [vmem:[%s11548_s9 + $0x5c] ss:$0 sps:$4 sm:$0x11]  }
  0xfa   : > { %v288_v61 = vpop.f32.mrb[2].mxu0  ;;  %v447_v0 = vpop.f32.mrb[4].mxu1  ;;  %v4137_v9 = vrot.slane %v4135_v56, 1  ;;  %v4140_v10 = vshll.u32 %v12269_v55, 16  ;;  %v9574_v56 = vld [vmem:[%s13439_s1 + $0x8] sm:$0x3] }
  0xfb   : > { %v335_v5 = vadd.f32 %v334_v46, %v288_v61  ;;  %v10267_v6 = vpop.f32.mrb[3].mxu0  ;;  %v10284_v7 = vpop.f32.mrb[5].mxu1  ;;  %v3819_v61 = vsel %vm230_vm3, %v3814_v49, %v3818_v50 }
  0xfc   : > { %v450_v11 = vpop.f32.mrb[6].mxu1  ;;  %v4007_v7 = vsel %vm230_vm3, %v4002_v53, %v4006_v54  ;;  %v4142_v18 = vrot.slane %v4140_v10, 1 }
  0xfd   : > { %10589 = vmatmul.mubr.msk.bf16.vlgmr.msra.gmra.mrb[108].mxu0 %vm243_vm2, %v3588_v62  ;;  %v10285_v13 = vpop.f32.mrb[7].mxu1 }
  0xfe   : > { %10599 = vmatpush3.bf16.msra.mxu0 %v3694_v63  ;;  %10600 = vmatprep.mubr.msk.bf16.mxu0 %vm11445_vm1, %v11444_v2  ;;  %v9557_v63 = vld [vmem:[%s13439_s1 + $0x2] sm:$0x3] }
  0xff   : > { %10607 = vmatmul.mubr.msk.bf16.vlgmr.msra.gmra.mrb[112].mxu1 %vm243_vm2, %v11254_v8  ;;  %10610 = vmatprep.subr.bf16.mxu0 %v11444_v2  ;;  %v4133_v8 = vshrl.u32 %v12255_v45, 16  ;;  %v4148_v13 = vsel %vm247_vm0, %v9557_v63, 0 }
 0x100   : > { %v388_v21 = vpop.f32.mrb[4].mxu0  ;;  %10617 = vmatpush3.bf16.msra.mxu1 %v3881_v14  ;;  %10618 = vmatprep.mubr.msk.bf16.mxu1 %vm11445_vm1, %v11444_v2  ;;  %v9548_v14 = vld [vmem:[%s11548_s9 + $0x60] sm:$0xe] }
 0x101   : > { %v395_v24 = vadd.f32 %v388_v21, %v332_v57  ;;  %v10278_v25 = vpop.f32.mrb[5].mxu0  ;;  %10628 = vmatprep.subr.bf16.mxu1 %v11444_v2  ;;  %v4138_v17 = vor.u32 %v4137_v9, %v4133_v8  ;;  %v9568_v8 = vld [vmem:[%s13439_s1 + $0x6] sm:$0x3] }
 0x102   : > { %v391_v29 = vpop.f32.mrb[6].mxu0  ;;  %v579_v31 = vpop.f32.mrb[8].mxu1  ;;  %v12298_v25 = vld [vmem:[%s11548_s9 + $0x64] sm:$0xf] }
 0x103   : > { %v396_v35 = vadd.f32 %v391_v29, %v335_v5  ;;  %v10279_v36 = vpop.f32.mrb[7].mxu0  ;;  %v454_v38 = vadd.f32 %v447_v0, %v395_v24  ;;  %v10296_v39 = vpop.f32.mrb[9].mxu1  ;;  %v9571_v24 = vld [vmem:[%s11548_s9 + $0x60] sm:$0xf]  ;;  %v9550_v29 = vcombine.low %v9548_v14, %v12216_v60 }
 0x104   : > { %v582_v41 = vpop.f32.mrb[10].mxu1  ;;  %v9564_v36 = vcombine.low %v9562_v19, %v12245_v28  ;;  %v9575_v60 = vcombine.low %v9571_v24, %v12298_v25  ;;  %v4063_v28 = vrot.slane %v12240_v23, 1  ;;  %v4243_v23 = vrot.slane %v12269_v55, 1 }
 0x105   : > { %10601 = vmatmul.mubr.msk.bf16.vlgmr.msra.gmra.mrb[112].mxu0 %vm243_vm2, %v3689_v30  ;;  %v455_v46 = vadd.f32 %v450_v11, %v396_v35  ;;  %v10297_v47 = vpop.f32.mrb[11].mxu1  ;;  %v9563_v30 = vld [vmem:[%s13439_s1 + $0x4] sm:$0x3]  ;;  %v4062_v42 = vrot.slane %v9550_v29, 1  ;;  %v4194_v55 = vsel %vm247_vm0, %v4121_v44, 0 }
 0x106   : > { %10611 = vmatpush3.bf16.msra.mxu0 %v3824_v37  ;;  %10612 = vmatprep.mubr.msk.bf16.mxu0 %vm11445_vm1, %v11444_v2  ;;  %v4366_v49 = vshll.u32 %v9575_v60, 16  ;;  %v9578_v29 = vld [vmem:[%s11548_s9 + $0x60] sm:$0xe] }
 0x107   : > { %10619 = vmatmul.mubr.msk.bf16.vlgmr.msra.gmra.mrb[116].mxu1 %vm243_vm2, %v3876_v40  ;;  %10622 = vmatprep.subr.bf16.mxu0 %v11444_v2  ;;  %v4064_v53 = vsel %vm344_vm4, %v4062_v42, %v4063_v28 }
 0x108   : > { %v521_v52 = vpop.f32.mrb[8].mxu0  ;;  %10629 = vmatpush3.bf16.msra.mxu1 %v4012_v48  ;;  %10630 = vmatprep.mubr.msk.bf16.mxu1 %vm11445_vm1, %v11444_v2  ;;  %v12334_v48 = vld [vmem:[%s11548_s9 + $0x68] ss:$0 sps:$4 sm:$0x11]  }
 0x109   : > { %v528_v57 = vadd.f32 %v521_v52, %v454_v38  ;;  %v10290_v58 = vpop.f32.mrb[9].mxu0  ;;  %10640 = vmatprep.subr.bf16.mxu1 %v11444_v2  ;;  %v4143_v38 = vsel %vm230_vm3, %v4138_v17, %v4142_v18  ;;  %v4306_v18 = vsel %vm247_vm0, %v9568_v8, 0 }
 0x10a   : > { %v524_v59 = vpop.f32.mrb[10].mxu0  ;;  %v712_v62 = vpop.f32.mrb[12].mxu1 }
 0x10b   : > { %v529_v0 = vadd.f32 %v524_v59, %v455_v46  ;;  %v10291_v1 = vpop.f32.mrb[11].mxu0  ;;  %v586_v4 = vadd.f32 %v579_v31, %v528_v57  ;;  %v10308_v5 = vpop.f32.mrb[13].mxu1  ;;  %v4242_v46 = vrot.slane %v9564_v36, 1  ;;  %v9594_v36 = vld [vmem:[%s11548_s9 + $0x6c] sm:$0xe] }
 0x10c   : > { %v715_v6 = vpop.f32.mrb[14].mxu1  ;;  %v4368_v1 = vrot.slane %v4366_v49, 1  ;;  %v11272_v49 = vld [vmem:[%s11548_s9 + $0x74] ss:$0 sps:$4 sm:$0x11]  }
 0x10d   : > { %10613 = vmatmul.mubr.msk.bf16.vlgmr.msra.gmra.mrb[116].mxu0 %vm243_vm2, %v3819_v61  ;;  %v587_v11 = vadd.f32 %v582_v41, %v529_v0  ;;  %v10309_v12 = vpop.f32.mrb[15].mxu1  ;;  %v4249_v41 = vsel %vm247_vm0, %v9563_v30, 0  ;;  %v4244_v63 = vsel %vm344_vm4, %v4242_v46, %v4243_v23  ;;  %v4364_v0 = vshrl.u32 %v9575_v60, 16  ;;  %v9587_v30 = vld [vmem:[%s11548_s9 + $0x6c] sm:$0xf] }
 0x10e   : > { %10623 = vmatpush3.bf16.msra.mxu0 %v3939_v3  ;;  %10624 = vmatprep.mubr.msk.bf16.mxu0 %vm11445_vm1, %v11444_v2  ;;  %v4371_v3 = vshll.u32 %v12334_v48, 16  ;;  %v9580_v60 = vcombine.low %v9578_v29, %v12298_v25 }
 0x10f   : > { %10631 = vmatmul.mubr.msk.bf16.vlgmr.msra.gmra.mrb[120].mxu1 %vm243_vm2, %v4007_v7  ;;  %10634 = vmatprep.subr.bf16.mxu0 %v11444_v2  ;;  %v4369_v9 = vor.u32 %v4368_v1, %v4364_v0 }
 0x110   : > { %v638_v15 = vpop.f32.mrb[12].mxu0  ;;  %10641 = vmatpush3.bf16.msra.mxu1 %v4148_v13  ;;  %10642 = vmatprep.mubr.msk.bf16.mxu1 %vm11445_vm1, %v11444_v2  ;;  %v4373_v10 = vrot.slane %v4371_v3, 1 }
 0x111   : > { %v645_v20 = vadd.f32 %v638_v15, %v586_v4  ;;  %v10302_v21 = vpop.f32.mrb[13].mxu0  ;;  %10652 = vmatprep.subr.bf16.mxu1 %v11444_v2  ;;  %v9584_v15 = vld [vmem:[%s13439_s1 + $0xc] sm:$0x3] }
 0x112   : > { %v641_v26 = vpop.f32.mrb[14].mxu0  ;;  %v12300_v27 = vpop.f32.mrb[16].mxu1 }
 0x113   : > { %v646_v31 = vadd.f32 %v641_v26, %v587_v11  ;;  %v10303_v32 = vpop.f32.mrb[15].mxu0  ;;  %v719_v34 = vadd.f32 %v712_v62, %v645_v20  ;;  %v10320_v35 = vpop.f32.mrb[17].mxu1 }
 0x114   : > { %v12309_v37 = vpop.f32.mrb[18].mxu1  ;;  %v11268_v35 = vld [vmem:[%s11548_s9 + $0x60] sm:$0xff]  }
 0x115   : > { %10625 = vmatmul.mubr.msk.bf16.vlgmr.msra.gmra.mrb[120].mxu0 %vm243_vm2, %v11261_v22  ;;  %v720_v39 = vadd.f32 %v715_v6, %v646_v31  ;;  %v10321_v40 = vpop.f32.mrb[19].mxu1  ;;  %v4379_v6 = vsel %vm247_vm0, %v9574_v56, 0  ;;  %v4374_v22 = vsel %vm230_vm3, %v4369_v9, %v4373_v10  ;;  %v9588_v31 = vld [vmem:[%s11548_s9 + $0x70] sm:$0xf] }
 0x116   : > { %10635 = vmatpush3.bf16.msra.mxu0 %v4069_v33  ;;  %10636 = vmatprep.mubr.msk.bf16.mxu0 %vm11445_vm1, %v11444_v2  ;;  %v9591_v40 = vcombine.low %v9587_v30, %v9588_v31 }
 0x117   : > { %10643 = vmatmul.mubr.msk.bf16.vlgmr.msra.gmra.mrb[124].mxu1 %vm243_vm2, %v4143_v38  ;;  %10646 = vmatprep.subr.bf16.mxu0 %v11444_v2 }
 0x118   : > { %v770_v47 = vpop.f32.mrb[16].mxu0  ;;  %10653 = vmatpush3.bf16.msra.mxu1 %v4249_v41  ;;  %10654 = vmatprep.mubr.msk.bf16.mxu1 %vm11445_vm1, %v11444_v2  ;;  %v4554_v56 = vshll.u32 %v9591_v40, 16  ;;  %v4552_v0 = vshrl.u32 %v9591_v40, 16 }
 0x119   : > { %v777_v50 = vadd.f32 %v770_v47, %v719_v34  ;;  %v10314_v51 = vpop.f32.mrb[17].mxu0  ;;  %10664 = vmatprep.subr.bf16.mxu1 %v11444_v2  ;;  %v11269_v47 = vld [vmem:[%s11548_s9 + $0x6c] sm:$0xff]  }
 0x11a   : > { %v773_v52 = vpop.f32.mrb[18].mxu0  ;;  %v955_v54 = vpop.f32.mrb[20].mxu1 }
 0x11b   : > { %v785_v57 = vadd.f32 %v12323_v43, %v777_v50  ;;  %v778_v58 = vadd.f32 %v773_v52, %v720_v39  ;;  %v10315_v59 = vpop.f32.mrb[19].mxu0  ;;  %v10332_v61 = vpop.f32.mrb[21].mxu1  ;;  %v9595_v39 = vld [vmem:[%s13439_s1 + $0x10] sm:$0x3]  ;;  %v9596_v50 = vcombine.low %v9594_v36, %v9588_v31 }
 0x11c   : > { %v958_v62 = vpop.f32.mrb[22].mxu1  ;;  %v4624_v52 = vsel %vm247_vm0, %v9595_v39, 0 }
 0x11d   : > { %787 = vst [vmem:[%s12345_s21] sm:$0xff] %v785_v57  ;;  %v786_v4 = vadd.f32 %v12323_v43, %v778_v58  ;;  %10637 = vmatmul.mubr.msk.bf16.vlgmr.msra.gmra.mrb[124].mxu0 %vm243_vm2, %v4064_v53  ;;  %v10333_v5 = vpop.f32.mrb[23].mxu1  ;;  %v4429_v53 = vrot.slane %v9580_v60, 1  ;;  %v9600_v57 = vld [vmem:[%s11548_s9 + $0x60] sm:$0xf]  ;;  %v12403_v58 = vld [vmem:[%s11548_s9 + $0x64] sm:$0xf] }
 0x11e   : > { %10647 = vmatpush3.bf16.msra.mxu0 %v4194_v55  ;;  %10648 = vmatprep.mubr.msk.bf16.mxu0 %vm11445_vm1, %v11444_v2  ;;  %v9590_v55 = vld [vmem:[%s13439_s1 + $0xe] sm:$0x3]  ;;  %v4617_v61 = vrot.slane %v9596_v50, 1  ;;  %v4556_v5 = vrot.slane %v4554_v56, 1  ;;  %v9604_v8 = vcombine.low %v9600_v57, %v12403_v58  ;;  %v9608_v50 = vld [vmem:[%s11548_s9 + $0x60] sm:$0xe] }
 0x11f   : > { %788 = vst [vmem:[%s12345_s21 + $0x8] sm:$0xff] %v786_v4  ;;  %10655 = vmatmul.mubr.msk.bf16.vlgmr.msra.gmra.mrb[128].mxu1 %vm243_vm2, %v4244_v63  ;;  %10658 = vmatprep.subr.bf16.mxu0 %v11444_v2  ;;  %v9633_v57 = vld [vmem:[%s11548_s9 + $0x78] sm:$0xf] }
 0x120   : > { %v900_v7 = vpop.f32.mrb[20].mxu0  ;;  %10665 = vmatpush3.bf16.msra.mxu1 %v4379_v6  ;;  %10666 = vmatprep.mubr.msk.bf16.mxu1 %vm11445_vm1, %v11444_v2  ;;  %v4559_v6 = vshll.u32 %v11272_v49, 16  ;;  %v4688_v30 = vshrl.u32 %v9604_v8, 16 }
 0x121   : > { %v901_v11 = vadd.f32 %v900_v7, %v12300_v27  ;;  %v10326_v12 = vpop.f32.mrb[21].mxu0  ;;  %10676 = vmatprep.subr.bf16.mxu1 %v11444_v2  ;;  %v4494_v27 = vsel %vm247_vm0, %v9584_v15, 0  ;;  %v4676_v7 = vld [vmem:[%s13439_s1] sm:$0x3] }
 0x122   : > { %v903_v13 = vpop.f32.mrb[22].mxu0  ;;  %v1085_v14 = vpop.f32.mrb[24].mxu1 }
 0x123   : > { %v904_v16 = vadd.f32 %v903_v13, %v12309_v37  ;;  %v10327_v17 = vpop.f32.mrb[23].mxu0  ;;  %v962_v19 = vadd.f32 %v955_v54, %v901_v11  ;;  %v10344_v20 = vpop.f32.mrb[25].mxu1  ;;  %v4430_v54 = vrot.slane %v12334_v48, 1  ;;  %v4567_v11 = vsel %vm247_vm0, %v9590_v55, 0 }
 0x124   : > { %v1088_v21 = vpop.f32.mrb[26].mxu1  ;;  %v4561_v20 = vrot.slane %v4559_v6, 1  ;;  %v11276_v6 = vld [vmem:[%s11548_s9 + $0x6c] sm:$0xff]  }
 0x125   : > { %10649 = vmatmul.mubr.msk.bf16.vlgmr.msra.gmra.mrb[128].mxu0 %vm243_vm2, %v12255_v45  ;;  %v963_v24 = vadd.f32 %v958_v62, %v904_v16  ;;  %v10345_v26 = vpop.f32.mrb[27].mxu1  ;;  %v9579_v45 = vld [vmem:[%s13439_s1 + $0xa] sm:$0x3]  ;;  %v4618_v62 = vrot.slane %v11272_v49, 1  ;;  %v4431_v3 = vsel %vm344_vm4, %v4429_v53, %v4430_v54  ;;  %v9624_v53 = vld [vmem:[%s11548_s9 + $0x6c] sm:$0xe] }
 0x126   : > { %10659 = vmatpush3.bf16.msra.mxu0 %v4306_v18  ;;  %10660 = vmatprep.mubr.msk.bf16.mxu0 %vm11445_vm1, %v11444_v2  ;;  %v4436_v28 = vsel %vm247_vm0, %v9579_v45, 0  ;;  %v4749_v18 = vsel %vm247_vm0, %v4676_v7, 0  ;;  %v9603_v26 = vld [vmem:[%s13439_s1 + $0x2] sm:$0x3] }
 0x127   : > { %10667 = vmatmul.mubr.msk.bf16.vlgmr.msra.gmra.mrb[132].mxu1 %vm243_vm2, %v4374_v22  ;;  %10670 = vmatprep.subr.bf16.mxu0 %v11444_v2  ;;  %v4619_v15 = vsel %vm344_vm4, %v4617_v61, %v4618_v62  ;;  %v4690_v22 = vshll.u32 %v9604_v8, 16  ;;  %v4703_v60 = vsel %vm247_vm0, %v9603_v26, 0  ;;  %v11279_v7 = vld [vmem:[%s11548_s9 + $0x74] ss:$0 sps:$4 sm:$0x11]  }
 0x128   : > { %v1012_v32 = vpop.f32.mrb[24].mxu0  ;;  %10677 = vmatpush3.bf16.msra.mxu1 %v4494_v27  ;;  %10678 = vmatprep.mubr.msk.bf16.mxu1 %vm11445_vm1, %v11444_v2  ;;  %v9646_v26 = vld [vmem:[%s11548_s9 + $0x6c] sm:$0xf] }
 0x129   : > { %v1019_v33 = vadd.f32 %v1012_v32, %v962_v19  ;;  %v10338_v34 = vpop.f32.mrb[25].mxu0  ;;  %10688 = vmatprep.subr.bf16.mxu1 %v11444_v2  ;;  %v4557_v19 = vor.u32 %v4556_v5, %v4552_v0  ;;  %v9625_v0 = vld [vmem:[%s13439_s1 + $0xa] sm:$0x3] }
 0x12a   : > { %v1015_v37 = vpop.f32.mrb[26].mxu0  ;;  %v1200_v38 = vpop.f32.mrb[28].mxu1 }
 0x12b   : > { %v1020_v41 = vadd.f32 %v1015_v37, %v963_v24  ;;  %v10339_v42 = vpop.f32.mrb[27].mxu0  ;;  %v1092_v44 = vadd.f32 %v1085_v14, %v1019_v33  ;;  %v10356_v46 = vpop.f32.mrb[29].mxu1  ;;  %v4562_v32 = vsel %vm230_vm3, %v4557_v19, %v4561_v20  ;;  %v4692_v33 = vrot.slane %v4690_v22, 1  ;;  %v12485_v19 = vld [vmem:[%s11548_s9 + $0x80] ss:$0 sps:$4 sm:$0x11]  }
 0x12c   : > { %v1203_v23 = vpop.f32.mrb[30].mxu1 }
 0x12d   : > { %10661 = vmatmul.mubr.msk.bf16.vlgmr.msra.gmra.mrb[132].mxu0 %vm243_vm2, %v11268_v35  ;;  %v1093_v25 = vadd.f32 %v1088_v21, %v1020_v41  ;;  %v10357_v51 = vpop.f32.mrb[31].mxu1  ;;  %v12423_v21 = vld [vmem:[%s11548_s9 + $0x68] ss:$0 sps:$4 sm:$0x11]   ;;  %v9614_v35 = vld [vmem:[%s13439_s1 + $0x6] sm:$0x3]  ;;  %v4693_v46 = vor.u32 %v4692_v33, %v4688_v30 }
 0x12e   : > { %10671 = vmatpush3.bf16.msra.mxu0 %v4436_v28  ;;  %10672 = vmatprep.mubr.msk.bf16.mxu0 %vm11445_vm1, %v11444_v2  ;;  %v4695_v34 = vshll.u32 %v12423_v21, 16  ;;  %v9618_v51 = vld [vmem:[%s11548_s9 + $0x70] sm:$0xf]  ;;  %v9636_v33 = vld [vmem:[%s13439_s1 + $0xe] sm:$0x3] }
 0x12f   : > { %10679 = vmatmul.mubr.msk.bf16.vlgmr.msra.gmra.mrb[136].mxu1 %vm243_vm2, %v11269_v47  ;;  %10682 = vmatprep.subr.bf16.mxu0 %v11444_v2 }
 0x130   : > { %v1142_v59 = vpop.f32.mrb[28].mxu0  ;;  %10689 = vmatpush3.bf16.msra.mxu1 %v4624_v52  ;;  %10690 = vmatprep.mubr.msk.bf16.mxu1 %vm11445_vm1, %v11444_v2  ;;  %v4697_v47 = vrot.slane %v4695_v34, 1 }
 0x131   : > { %v1149_v48 = vadd.f32 %v1142_v59, %v1092_v44  ;;  %v10350_v63 = vpop.f32.mrb[29].mxu0  ;;  %10700 = vmatprep.subr.bf16.mxu1 %v11444_v2  ;;  %v4861_v44 = vsel %vm247_vm0, %v9614_v35, 0  ;;  %v12461_v59 = vld [vmem:[%s11548_s9 + $0x7c] sm:$0xf] }
 0x132   : > { %v1145_v1 = vpop.f32.mrb[30].mxu0  ;;  %v1330_v4 = vpop.f32.mrb[32].mxu1  ;;  %v4698_v61 = vsel %vm230_vm3, %v4693_v46, %v4697_v47  ;;  %v9610_v63 = vcombine.low %v9608_v50, %v12403_v58  ;;  %v4991_v58 = vsel %vm247_vm0, %v9625_v0, 0  ;;  %v5122_v47 = vsel %vm247_vm0, %v9636_v33, 0  ;;  %v9630_v50 = vld [vmem:[%s13439_s1 + $0xc] sm:$0x3] }
 0x133   : > { %v1150_v9 = vadd.f32 %v1145_v1, %v1093_v25  ;;  %v10351_v10 = vpop.f32.mrb[31].mxu0  ;;  %v1207_v12 = vadd.f32 %v1200_v38, %v1149_v48  ;;  %v10368_v13 = vpop.f32.mrb[33].mxu1  ;;  %v9617_v25 = vld [vmem:[%s11548_s9 + $0x6c] sm:$0xf] }
 0x134   : > { %v1333_v14 = vpop.f32.mrb[34].mxu1  ;;  %v9621_v1 = vcombine.low %v9617_v25, %v9618_v51  ;;  %v9637_v10 = vcombine.low %v9633_v57, %v12461_v59  ;;  %v4798_v13 = vrot.slane %v12423_v21, 1 }
 0x135   : > { %10673 = vmatmul.mubr.msk.bf16.vlgmr.msra.gmra.mrb[136].mxu0 %vm243_vm2, %v4431_v3  ;;  %v1208_v16 = vadd.f32 %v1203_v23, %v1150_v9  ;;  %v10369_v17 = vpop.f32.mrb[35].mxu1  ;;  %v9609_v23 = vld [vmem:[%s13439_s1 + $0x4] sm:$0x3] }
 0x136   : > { %10683 = vmatpush3.bf16.msra.mxu0 %v4567_v11  ;;  %10684 = vmatprep.mubr.msk.bf16.mxu0 %vm11445_vm1, %v11444_v2  ;;  %v4804_v62 = vsel %vm247_vm0, %v9609_v23, 0  ;;  %v4985_v17 = vrot.slane %v11279_v7, 1  ;;  %v5109_v20 = vshll.u32 %v9637_v10, 16 }
 0x137   : > { %10691 = vmatmul.mubr.msk.bf16.vlgmr.msra.gmra.mrb[140].mxu1 %vm243_vm2, %v4619_v15  ;;  %10694 = vmatprep.subr.bf16.mxu0 %v11444_v2  ;;  %v9620_v15 = vld [vmem:[%s13439_s1 + $0x8] sm:$0x3] }
 0x138   : > { %v1273_v24 = vpop.f32.mrb[32].mxu0  ;;  %10701 = vmatpush3.bf16.msra.mxu1 %v4749_v18  ;;  %10702 = vmatprep.mubr.msk.bf16.mxu1 %vm11445_vm1, %v11444_v2 }
 0x139   : > { %v1280_v27 = vadd.f32 %v1273_v24, %v1207_v12  ;;  %v10362_v29 = vpop.f32.mrb[33].mxu0  ;;  %10712 = vmatprep.subr.bf16.mxu1 %v11444_v2  ;;  %v4797_v12 = vrot.slane %v9610_v63, 1  ;;  %v4919_v24 = vshrl.u32 %v9621_v1, 16 }
 0x13a   : > { %v1276_v31 = vpop.f32.mrb[34].mxu0  ;;  %v1455_v45 = vpop.f32.mrb[36].mxu1 }
 0x13b   : > { %v1337_v36 = vadd.f32 %v1330_v4, %v1280_v27  ;;  %v1281_v37 = vadd.f32 %v1276_v31, %v1208_v16  ;;  %v10363_v38 = vpop.f32.mrb[35].mxu0  ;;  %v10380_v39 = vpop.f32.mrb[37].mxu1  ;;  %v12490_v27 = vld [vmem:[%s11548_s9 + $0x70] sm:$0xf]  ;;  %v4799_v30 = vsel %vm344_vm4, %v4797_v12, %v4798_v13  ;;  %v9640_v12 = vld [vmem:[%s11548_s9 + $0x78] sm:$0xe] }
 0x13c   : > { %v1458_v40 = vpop.f32.mrb[38].mxu1 }
 0x13d   : > { %v1339_v41 = vadd.f32 %v12323_v43, %v1337_v36  ;;  %v1338_v42 = vadd.f32 %v1333_v14, %v1281_v37  ;;  %10685 = vmatmul.mubr.msk.bf16.vlgmr.msra.gmra.mrb[140].mxu0 %vm243_vm2, %v4562_v32  ;;  %v10381_v28 = vpop.f32.mrb[39].mxu1  ;;  %v4921_v14 = vshll.u32 %v9621_v1, 16  ;;  %v4934_v36 = vsel %vm247_vm0, %v9620_v15, 0 }
 0x13e   : > { %10695 = vmatpush3.bf16.msra.mxu0 %v4703_v60  ;;  %10696 = vmatprep.mubr.msk.bf16.mxu0 %vm11445_vm1, %v11444_v2  ;;  %v12500_v28 = vcombine.low %v9646_v26, %v12490_v27  ;;  %v5049_v1 = vsel %vm247_vm0, %v9630_v50, 0 }
 0x13f   : > { %9322 = vst [vmem:[%s12345_s21 + $0x10] sm:$0xff] %v1339_v41  ;;  %v1340_v49 = vadd.f32 %v12323_v43, %v1338_v42  ;;  %10703 = vmatmul.mubr.msk.bf16.vlgmr.msra.gmra.mrb[144].mxu1 %vm243_vm2, %v9604_v8  ;;  %10706 = vmatprep.subr.bf16.mxu0 %v11444_v2  ;;  %v9626_v8 = vcombine.low %v9624_v53, %v9618_v51  ;;  %v4923_v32 = vrot.slane %v4921_v14, 1  ;;  %v5111_v41 = vrot.slane %v5109_v20, 1  ;;  %v12514_v53 = vld [vmem:[%s11548_s9 + $0x74] ss:$0 sps:$4 sm:$0x11]  }
 0x140   : > { %v1409_v52 = vpop.f32.mrb[36].mxu0  ;;  %10713 = vmatpush3.bf16.msra.mxu1 %v4861_v44  ;;  %10714 = vmatprep.mubr.msk.bf16.mxu1 %vm11445_vm1, %v11444_v2  ;;  %v5114_v42 = vshll.u32 %v12485_v19, 16  ;;  %v9641_v14 = vld [vmem:[%s13439_s1 + $0x10] sm:$0x3] }
 0x141   : > { %9323 = vst [vmem:[%s12345_s21 + $0x18] sm:$0xff] %v1340_v49  ;;  %v1456_v54 = vadd.f32 %v1455_v45, %v1409_v52  ;;  %v10374_v56 = vpop.f32.mrb[37].mxu0  ;;  %10724 = vmatprep.subr.bf16.mxu1 %v11444_v2  ;;  %v4984_v16 = vrot.slane %v9626_v8, 1  ;;  %v4926_v45 = vshll.u32 %v11279_v7, 16  ;;  %v4924_v23 = vor.u32 %v4923_v32, %v4919_v24  ;;  %v12543_v24 = vld [vmem:[%s11548_s9 + $0x7c] sm:$0xf] }
 0x142   : > { %v1412_v55 = vpop.f32.mrb[38].mxu0  ;;  %v1567_v48 = vpop.f32.mrb[40].mxu1  ;;  %v5116_v52 = vrot.slane %v5114_v42, 1  ;;  %v5243_v7 = vshrl.u32 %v12500_v28, 16  ;;  %v5179_v33 = vsel %vm247_vm0, %v9641_v14, 0  ;;  %v5173_v42 = vrot.slane %v12485_v19, 1 }
 0x143   : > { %v1459_v3 = vadd.f32 %v1458_v40, %v1412_v55  ;;  %v10375_v4 = vpop.f32.mrb[39].mxu0  ;;  %v10392_v5 = vpop.f32.mrb[41].mxu1  ;;  %v4986_v60 = vsel %vm344_vm4, %v4984_v16, %v4985_v17  ;;  %v5107_v40 = vshrl.u32 %v9637_v10, 16  ;;  %v4928_v49 = vrot.slane %v4926_v45, 1  ;;  %v9654_v17 = vld [vmem:[%s11548_s9 + $0x6c] sm:$0xe] }
 0x144   : > { %v1570_v9 = vpop.f32.mrb[42].mxu1 }
 0x145   : > { %10697 = vmatmul.mubr.msk.bf16.vlgmr.msra.gmra.mrb[144].mxu0 %vm243_vm2, %v4698_v61  ;;  %v10393_v11 = vpop.f32.mrb[43].mxu1  ;;  %v5112_v51 = vor.u32 %v5111_v41, %v5107_v40  ;;  %v4929_v61 = vsel %vm230_vm3, %v4924_v23, %v4928_v49  ;;  %v12569_v23 = vld [vmem:[%s11548_s9 + $0x80] ss:$0 sps:$4 sm:$0x11]  }
 0x146   : > { %10707 = vmatpush3.bf16.msra.mxu0 %v4804_v62  ;;  %10708 = vmatprep.mubr.msk.bf16.mxu0 %vm11445_vm1, %v11444_v2 }
 0x147   : > { %10715 = vmatmul.mubr.msk.bf16.vlgmr.msra.gmra.mrb[148].mxu1 %vm243_vm2, %v11276_v6  ;;  %10718 = vmatprep.subr.bf16.mxu0 %v11444_v2  ;;  %v5117_v6 = vsel %vm230_vm3, %v5112_v51, %v5116_v52 }
 0x148   : > { %v1510_v18 = vpop.f32.mrb[40].mxu0  ;;  %10725 = vmatpush3.bf16.msra.mxu1 %v4991_v58  ;;  %10726 = vmatprep.mubr.msk.bf16.mxu1 %vm11445_vm1, %v11444_v2 }
 0x149   : > { %v1517_v21 = vadd.f32 %v1510_v18, %v1456_v54  ;;  %v10386_v22 = vpop.f32.mrb[41].mxu0  ;;  %10736 = vmatprep.subr.bf16.mxu1 %v11444_v2  ;;  %v5245_v54 = vshll.u32 %v12500_v28, 16 }
 0x14a   : > { %v1513_v29 = vpop.f32.mrb[42].mxu0  ;;  %v1697_v31 = vpop.f32.mrb[44].mxu1  ;;  %v9663_v22 = vld [vmem:[%s11548_s9 + $0x78] sm:$0xf] }
 0x14b   : > { %v1518_v34 = vadd.f32 %v1513_v29, %v1459_v3  ;;  %v10387_v35 = vpop.f32.mrb[43].mxu0  ;;  %v1574_v37 = vadd.f32 %v1567_v48, %v1517_v21  ;;  %v10404_v38 = vpop.f32.mrb[45].mxu1  ;;  %v9649_v48 = vld [vmem:[%s13439_s1 + $0x2] sm:$0x3]  ;;  %v5247_v8 = vrot.slane %v5245_v54, 1  ;;  %v11283_v21 = vld [vmem:[%s11548_s9 + $0x78] sm:$0xff]  }
 0x14c   : > { %v1700_v39 = vpop.f32.mrb[46].mxu1  ;;  %v5258_v58 = vsel %vm247_vm0, %v9649_v48, 0  ;;  %v9666_v54 = vld [vmem:[%s13439_s1 + $0x8] sm:$0x3] }
 0x14d   : > { %10709 = vmatmul.mubr.msk.bf16.vlgmr.msra.gmra.mrb[148].mxu0 %vm243_vm2, %v4799_v30  ;;  %v1575_v44 = vadd.f32 %v1570_v9, %v1518_v34  ;;  %v10405_v46 = vpop.f32.mrb[47].mxu1  ;;  %v5250_v9 = vshll.u32 %v12514_v53, 16  ;;  %v5248_v15 = vor.u32 %v5247_v8, %v5243_v7  ;;  %v9642_v30 = vcombine.low %v9640_v12, %v12461_v59  ;;  %v9660_v7 = vld [vmem:[%s13439_s1 + $0x6] sm:$0x3] }
 0x14e   : > { %10719 = vmatpush3.bf16.msra.mxu0 %v4934_v36  ;;  %10720 = vmatprep.mubr.msk.bf16.mxu0 %vm11445_vm1, %v11444_v2  ;;  %v9656_v36 = vcombine.low %v9654_v17, %v12490_v27  ;;  %v5231_v27 = vld [vmem:[%s13439_s1] sm:$0x3] }
 0x14f   : > { %10727 = vmatmul.mubr.msk.bf16.vlgmr.msra.gmra.mrb[152].mxu1 %vm243_vm2, %v4986_v60  ;;  %10730 = vmatprep.subr.bf16.mxu0 %v11444_v2  ;;  %v5252_v16 = vrot.slane %v5250_v9, 1  ;;  %v9667_v60 = vcombine.low %v9663_v22, %v12543_v24  ;;  %v5172_v41 = vrot.slane %v9642_v30, 1  ;;  %v9670_v30 = vld [vmem:[%s11548_s9 + $0x78] sm:$0xe] }
 0x150   : > { %v1640_v25 = vpop.f32.mrb[44].mxu0  ;;  %10737 = vmatpush3.bf16.msra.mxu1 %v5122_v47  ;;  %10738 = vmatprep.mubr.msk.bf16.mxu1 %vm11445_vm1, %v11444_v2  ;;  %v5353_v47 = vrot.slane %v12514_v53, 1 }
 0x151   : > { %v1647_v56 = vadd.f32 %v1640_v25, %v1574_v37  ;;  %v10398_v57 = vpop.f32.mrb[45].mxu0  ;;  %10748 = vmatprep.subr.bf16.mxu1 %v11444_v2  ;;  %v5253_v38 = vsel %vm230_vm3, %v5248_v15, %v5252_v16  ;;  %v5476_v49 = vshll.u32 %v9667_v60, 16  ;;  %v5174_v51 = vsel %vm344_vm4, %v5172_v41, %v5173_v42 }
 0x152   : > { %v1643_v55 = vpop.f32.mrb[46].mxu0  ;;  %v1828_v62 = vpop.f32.mrb[48].mxu1  ;;  %v5416_v16 = vsel %vm247_vm0, %v9660_v7, 0 }
 0x153   : > { %v1648_v63 = vadd.f32 %v1643_v55, %v1575_v44  ;;  %v10399_v0 = vpop.f32.mrb[47].mxu0  ;;  %v1704_v3 = vadd.f32 %v1697_v31, %v1647_v56  ;;  %v10416_v4 = vpop.f32.mrb[49].mxu1  ;;  %v9655_v31 = vld [vmem:[%s13439_s1 + $0x4] sm:$0x3]  ;;  %v5352_v44 = vrot.slane %v9656_v36, 1  ;;  %v5304_v55 = vsel %vm247_vm0, %v5231_v27, 0 }
 0x154   : > { %v1831_v5 = vpop.f32.mrb[50].mxu1  ;;  %v5359_v40 = vsel %vm247_vm0, %v9655_v31, 0  ;;  %v5478_v0 = vrot.slane %v5476_v49, 1  ;;  %v9679_v31 = vld [vmem:[%s11548_s9 + $0x84] sm:$0xf] }
 0x155   : > { %10721 = vmatmul.mubr.msk.bf16.vlgmr.msra.gmra.mrb[152].mxu0 %vm243_vm2, %v4929_v61  ;;  %v1705_v10 = vadd.f32 %v1700_v39, %v1648_v63  ;;  %v10417_v11 = vpop.f32.mrb[51].mxu1  ;;  %v5354_v48 = vsel %vm344_vm4, %v5352_v44, %v5353_v47  ;;  %v5474_v63 = vshrl.u32 %v9667_v60, 16  ;;  %v9686_v36 = vld [vmem:[%s11548_s9 + $0x84] sm:$0xe]  ;;  %v9672_v60 = vcombine.low %v9670_v30, %v12543_v24 }
 0x156   : > { %10731 = vmatpush3.bf16.msra.mxu0 %v5049_v1  ;;  %10732 = vmatprep.mubr.msk.bf16.mxu0 %vm11445_vm1, %v11444_v2  ;;  %v5481_v1 = vshll.u32 %v12569_v23, 16  ;;  %v11294_v49 = vld [vmem:[%s11548_s9 + $0x8c] ss:$0 sps:$4 sm:$0x11]  }
 0x157   : > { %10739 = vmatmul.mubr.msk.bf16.vlgmr.msra.gmra.mrb[156].mxu1 %vm243_vm2, %v5117_v6  ;;  %10742 = vmatprep.subr.bf16.mxu0 %v11444_v2  ;;  %v5479_v8 = vor.u32 %v5478_v0, %v5474_v63 }
 0x158   : > { %v1755_v13 = vpop.f32.mrb[48].mxu0  ;;  %10749 = vmatpush3.bf16.msra.mxu1 %v5258_v58  ;;  %10750 = vmatprep.mubr.msk.bf16.mxu1 %vm11445_vm1, %v11444_v2  ;;  %v5483_v9 = vrot.slane %v5481_v1, 1 }
 0x159   : > { %v1762_v18 = vadd.f32 %v1755_v13, %v1704_v3  ;;  %v10410_v20 = vpop.f32.mrb[49].mxu0  ;;  %10760 = vmatprep.subr.bf16.mxu1 %v11444_v2  ;;  %v9676_v13 = vld [vmem:[%s13439_s1 + $0xc] sm:$0x3] }
 0x15a   : > { %v1758_v26 = vpop.f32.mrb[50].mxu0  ;;  %v12545_v29 = vpop.f32.mrb[52].mxu1 }
 0x15b   : > { %v1763_v32 = vadd.f32 %v1758_v26, %v1705_v10  ;;  %v10411_v45 = vpop.f32.mrb[51].mxu0  ;;  %v1835_v34 = vadd.f32 %v1828_v62, %v1762_v18  ;;  %v10428_v35 = vpop.f32.mrb[53].mxu1 }
 0x15c   : > { %v1967_v37 = vpop.f32.mrb[54].mxu1  ;;  %v11290_v35 = vld [vmem:[%s11548_s9 + $0x78] sm:$0xff]  }
 0x15d   : > { %10733 = vmatmul.mubr.msk.bf16.vlgmr.msra.gmra.mrb[156].mxu0 %vm243_vm2, %v11283_v21  ;;  %v1836_v59 = vadd.f32 %v1831_v5, %v1763_v32  ;;  %v10429_v39 = vpop.f32.mrb[55].mxu1  ;;  %v5489_v5 = vsel %vm247_vm0, %v9666_v54, 0  ;;  %v5484_v21 = vsel %vm230_vm3, %v5479_v8, %v5483_v9  ;;  %v9680_v32 = vld [vmem:[%s11548_s9 + $0x88] sm:$0xf] }
 0x15e   : > { %10743 = vmatpush3.bf16.msra.mxu0 %v5179_v33  ;;  %10744 = vmatprep.mubr.msk.bf16.mxu0 %vm11445_vm1, %v11444_v2  ;;  %v9683_v39 = vcombine.low %v9679_v31, %v9680_v32 }
 0x15f   : > { %10751 = vmatmul.mubr.msk.bf16.vlgmr.msra.gmra.mrb[160].mxu1 %vm243_vm2, %v5253_v38  ;;  %10754 = vmatprep.subr.bf16.mxu0 %v11444_v2 }
 0x160   : > { %v1885_v46 = vpop.f32.mrb[52].mxu0  ;;  %10761 = vmatpush3.bf16.msra.mxu1 %v5359_v40  ;;  %10762 = vmatprep.mubr.msk.bf16.mxu1 %vm11445_vm1, %v11444_v2  ;;  %v5664_v54 = vshll.u32 %v9683_v39, 16  ;;  %v5662_v63 = vshrl.u32 %v9683_v39, 16 }
 0x161   : > { %v1892_v19 = vadd.f32 %v1885_v46, %v1835_v34  ;;  %v10422_v50 = vpop.f32.mrb[53].mxu0  ;;  %10772 = vmatprep.subr.bf16.mxu1 %v11444_v2  ;;  %v11291_v46 = vld [vmem:[%s11548_s9 + $0x84] sm:$0xff]  }
 0x162   : > { %v1888_v25 = vpop.f32.mrb[54].mxu0  ;;  %v2065_v52 = vpop.f32.mrb[56].mxu1 }
 0x163   : > { %v1894_v56 = vadd.f32 %v12323_v43, %v1892_v19  ;;  %v1893_v57 = vadd.f32 %v1888_v25, %v1836_v59  ;;  %v10423_v53 = vpop.f32.mrb[55].mxu0  ;;  %v10440_v61 = vpop.f32.mrb[57].mxu1  ;;  %v9687_v59 = vld [vmem:[%s13439_s1 + $0x10] sm:$0x3]  ;;  %v9688_v19 = vcombine.low %v9686_v36, %v9680_v32 }
 0x164   : > { %v2068_v62 = vpop.f32.mrb[58].mxu1  ;;  %v5734_v25 = vsel %vm247_vm0, %v9687_v59, 0 }
 0x165   : > { %9368 = vst [vmem:[%s12345_s21 + $0x20] sm:$0xff] %v1894_v56  ;;  %v1895_v3 = vadd.f32 %v12323_v43, %v1893_v57  ;;  %10745 = vmatmul.mubr.msk.bf16.vlgmr.msra.gmra.mrb[160].mxu0 %vm243_vm2, %v5174_v51  ;;  %v10441_v4 = vpop.f32.mrb[59].mxu1  ;;  %v5539_v51 = vrot.slane %v9672_v60, 1  ;;  %v9692_v56 = vld [vmem:[%s11548_s9 + $0x78] sm:$0xf]  ;;  %v5727_v61 = vrot.slane %v9688_v19, 1 }
 0x166   : > { %10755 = vmatpush3.bf16.msra.mxu0 %v5304_v55  ;;  %10756 = vmatprep.mubr.msk.bf16.mxu0 %vm11445_vm1, %v11444_v2  ;;  %v12635_v57 = vld [vmem:[%s11548_s9 + $0x7c] sm:$0xf]  ;;  %v9682_v55 = vld [vmem:[%s13439_s1 + $0xe] sm:$0x3]  ;;  %v5666_v4 = vrot.slane %v5664_v54, 1 }
 0x167   : > { %9369 = vst [vmem:[%s12345_s21 + $0x28] sm:$0xff] %v1895_v3  ;;  %10763 = vmatmul.mubr.msk.bf16.vlgmr.msra.gmra.mrb[164].mxu1 %vm243_vm2, %v5354_v48  ;;  %10766 = vmatprep.subr.bf16.mxu0 %v11444_v2  ;;  %v9696_v7 = vcombine.low %v9692_v56, %v12635_v57  ;;  %v9700_v19 = vld [vmem:[%s11548_s9 + $0x78] sm:$0xe]  ;;  %v12693_v56 = vld [vmem:[%s11548_s9 + $0x94] sm:$0xf] }
 0x168   : > { %v2010_v6 = vpop.f32.mrb[56].mxu0  ;;  %10773 = vmatpush3.bf16.msra.mxu1 %v5489_v5  ;;  %10774 = vmatprep.mubr.msk.bf16.mxu1 %vm11445_vm1, %v11444_v2  ;;  %v5669_v5 = vshll.u32 %v11294_v49, 16 }
 0x169   : > { %v2011_v10 = vadd.f32 %v2010_v6, %v12545_v29  ;;  %v10434_v11 = vpop.f32.mrb[57].mxu0  ;;  %10784 = vmatprep.subr.bf16.mxu1 %v11444_v2  ;;  %v5604_v29 = vsel %vm247_vm0, %v9676_v13, 0  ;;  %v5786_v6 = vld [vmem:[%s13439_s1] sm:$0x3]  ;;  %v5798_v31 = vshrl.u32 %v9696_v7, 16 }
 0x16a   : > { %v2013_v58 = vpop.f32.mrb[58].mxu0  ;;  %v2195_v12 = vpop.f32.mrb[60].mxu1 }
 0x16b   : > { %v2014_v14 = vadd.f32 %v2013_v58, %v1967_v37  ;;  %v10435_v15 = vpop.f32.mrb[59].mxu0  ;;  %v2072_v17 = vadd.f32 %v2065_v52, %v2011_v10  ;;  %v10452_v18 = vpop.f32.mrb[61].mxu1  ;;  %v5540_v52 = vrot.slane %v12569_v23, 1  ;;  %v5677_v10 = vsel %vm247_vm0, %v9682_v55, 0 }
 0x16c   : > { %v2198_v20 = vpop.f32.mrb[62].mxu1  ;;  %v5671_v18 = vrot.slane %v5669_v5, 1  ;;  %v11301_v5 = vld [vmem:[%s11548_s9 + $0x8c] ss:$0 sps:$4 sm:$0x11]  }
 0x16d   : > { %10757 = vmatmul.mubr.msk.bf16.vlgmr.msra.gmra.mrb[164].mxu0 %vm243_vm2, %v12500_v28  ;;  %v2073_v22 = vadd.f32 %v2068_v62, %v2014_v14  ;;  %v10453_v26 = vpop.f32.mrb[63].mxu1  ;;  %v9671_v28 = vld [vmem:[%s13439_s1 + $0xa] sm:$0x3]  ;;  %v5728_v62 = vrot.slane %v11294_v49, 1  ;;  %v5541_v1 = vsel %vm344_vm4, %v5539_v51, %v5540_v52  ;;  %v9716_v51 = vld [vmem:[%s11548_s9 + $0x84] sm:$0xe] }
 0x16e   : > { %10767 = vmatpush3.bf16.msra.mxu0 %v5416_v16  ;;  %10768 = vmatprep.mubr.msk.bf16.mxu0 %vm11445_vm1, %v11444_v2  ;;  %v5546_v42 = vsel %vm247_vm0, %v9671_v28, 0  ;;  %v5859_v16 = vsel %vm247_vm0, %v5786_v6, 0  ;;  %v9695_v26 = vld [vmem:[%s13439_s1 + $0x2] sm:$0x3] }
 0x16f   : > { %10775 = vmatmul.mubr.msk.bf16.vlgmr.msra.gmra.mrb[168].mxu1 %vm243_vm2, %v5484_v21  ;;  %10778 = vmatprep.subr.bf16.mxu0 %v11444_v2  ;;  %v5729_v13 = vsel %vm344_vm4, %v5727_v61, %v5728_v62  ;;  %v5800_v21 = vshll.u32 %v9696_v7, 16  ;;  %v5813_v60 = vsel %vm247_vm0, %v9695_v26, 0  ;;  %v12722_v26 = vld [vmem:[%s11548_s9 + $0x88] sm:$0xf] }
 0x170   : > { %v2122_v45 = vpop.f32.mrb[60].mxu0  ;;  %10785 = vmatpush3.bf16.msra.mxu1 %v5604_v29  ;;  %10786 = vmatprep.mubr.msk.bf16.mxu1 %vm11445_vm1, %v11444_v2 }
 0x171   : > { %v2129_v33 = vadd.f32 %v2122_v45, %v2072_v17  ;;  %v10446_v34 = vpop.f32.mrb[61].mxu0  ;;  %10796 = vmatprep.subr.bf16.mxu1 %v11444_v2  ;;  %v5667_v17 = vor.u32 %v5666_v4, %v5662_v63  ;;  %v11298_v4 = vld [vmem:[%s11548_s9 + $0x84] sm:$0xff]  }
 0x172   : > { %v2125_v37 = vpop.f32.mrb[62].mxu0  ;;  %v2310_v38 = vpop.f32.mrb[64].mxu1 }
 0x173   : > { %v2130_v40 = vadd.f32 %v2125_v37, %v2073_v22  ;;  %v10447_v41 = vpop.f32.mrb[63].mxu0  ;;  %v2202_v27 = vadd.f32 %v2195_v12, %v2129_v33  ;;  %v10464_v44 = vpop.f32.mrb[65].mxu1  ;;  %v5672_v45 = vsel %vm230_vm3, %v5667_v17, %v5671_v18  ;;  %v5802_v33 = vrot.slane %v5800_v21, 1 }
 0x174   : > { %v2313_v47 = vpop.f32.mrb[66].mxu1 }
 0x175   : > { %10769 = vmatmul.mubr.msk.bf16.vlgmr.msra.gmra.mrb[168].mxu0 %vm243_vm2, %v11290_v35  ;;  %v2203_v24 = vadd.f32 %v2198_v20, %v2130_v40  ;;  %v10465_v50 = vpop.f32.mrb[67].mxu1  ;;  %v12655_v20 = vld [vmem:[%s11548_s9 + $0x80] ss:$0 sps:$4 sm:$0x11]   ;;  %v9706_v35 = vld [vmem:[%s13439_s1 + $0x6] sm:$0x3]  ;;  %v5803_v44 = vor.u32 %v5802_v33, %v5798_v31 }
 0x176   : > { %10779 = vmatpush3.bf16.msra.mxu0 %v5546_v42  ;;  %10780 = vmatprep.mubr.msk.bf16.mxu0 %vm11445_vm1, %v11444_v2  ;;  %v5805_v34 = vshll.u32 %v12655_v20, 16  ;;  %v9710_v50 = vld [vmem:[%s11548_s9 + $0x88] sm:$0xf] }
 0x177   : > { %10787 = vmatmul.mubr.msk.bf16.vlgmr.msra.gmra.mrb[172].mxu1 %vm243_vm2, %v11291_v46  ;;  %10790 = vmatprep.subr.bf16.mxu0 %v11444_v2  ;;  %v9718_v6 = vcombine.low %v9716_v51, %v9710_v50 }
 0x178   : > { %v2252_v53 = vpop.f32.mrb[64].mxu0  ;;  %10797 = vmatpush3.bf16.msra.mxu1 %v5734_v25  ;;  %10798 = vmatprep.mubr.msk.bf16.mxu1 %vm11445_vm1, %v11444_v2  ;;  %v5807_v46 = vrot.slane %v5805_v34, 1 }
 0x179   : > { %v2259_v23 = vadd.f32 %v2252_v53, %v2202_v27  ;;  %v10458_v48 = vpop.f32.mrb[65].mxu0  ;;  %10808 = vmatprep.subr.bf16.mxu1 %v11444_v2  ;;  %v5971_v27 = vsel %vm247_vm0, %v9706_v35, 0 }
 0x17a   : > { %v2255_v0 = vpop.f32.mrb[66].mxu0  ;;  %v2440_v3 = vpop.f32.mrb[68].mxu1  ;;  %v5808_v55 = vsel %vm230_vm3, %v5803_v44, %v5807_v46  ;;  %v9717_v48 = vld [vmem:[%s13439_s1 + $0xa] sm:$0x3] }
 0x17b   : > { %v2260_v8 = vadd.f32 %v2255_v0, %v2203_v24  ;;  %v10459_v9 = vpop.f32.mrb[67].mxu0  ;;  %v2317_v11 = vadd.f32 %v2310_v38, %v2259_v23  ;;  %v10476_v58 = vpop.f32.mrb[69].mxu1  ;;  %v9709_v24 = vld [vmem:[%s11548_s9 + $0x84] sm:$0xf]  ;;  %v9702_v23 = vcombine.low %v9700_v19, %v12635_v57  ;;  %v6101_v57 = vsel %vm247_vm0, %v9717_v48, 0 }
 0x17c   : > { %v2443_v12 = vpop.f32.mrb[70].mxu1  ;;  %v9713_v63 = vcombine.low %v9709_v24, %v9710_v50 }
 0x17d   : > { %10781 = vmatmul.mubr.msk.bf16.vlgmr.msra.gmra.mrb[172].mxu0 %vm243_vm2, %v5541_v1  ;;  %v2318_v14 = vadd.f32 %v2313_v47, %v2260_v8  ;;  %v10477_v15 = vpop.f32.mrb[71].mxu1  ;;  %v9701_v47 = vld [vmem:[%s13439_s1 + $0x4] sm:$0x3] }
 0x17e   : > { %10791 = vmatpush3.bf16.msra.mxu0 %v5677_v10  ;;  %10792 = vmatprep.mubr.msk.bf16.mxu0 %vm11445_vm1, %v11444_v2  ;;  %v5914_v61 = vsel %vm247_vm0, %v9701_v47, 0  ;;  %v5907_v10 = vrot.slane %v9702_v23, 1  ;;  %v6031_v58 = vshll.u32 %v9713_v63, 16  ;;  %v6029_v21 = vshrl.u32 %v9713_v63, 16 }
 0x17f   : > { %10799 = vmatmul.mubr.msk.bf16.vlgmr.msra.gmra.mrb[176].mxu1 %vm243_vm2, %v5729_v13  ;;  %10802 = vmatprep.subr.bf16.mxu0 %v11444_v2  ;;  %v6094_v13 = vrot.slane %v9718_v6, 1 }
 0x180   : > { %v2383_v22 = vpop.f32.mrb[68].mxu0  ;;  %10809 = vmatpush3.bf16.msra.mxu1 %v5859_v16  ;;  %10810 = vmatprep.mubr.msk.bf16.mxu1 %vm11445_vm1, %v11444_v2  ;;  %v12717_v16 = vld [vmem:[%s11548_s9 + $0x98] ss:$0 sps:$4 sm:$0x11]  }
 0x181   : > { %v2390_v29 = vadd.f32 %v2383_v22, %v2317_v11  ;;  %v10470_v30 = vpop.f32.mrb[69].mxu0  ;;  %10820 = vmatprep.subr.bf16.mxu1 %v11444_v2  ;;  %v5908_v11 = vrot.slane %v12655_v20, 1  ;;  %v9738_v22 = vld [vmem:[%s11548_s9 + $0x84] sm:$0xf] }
 0x182   : > { %v2386_v32 = vpop.f32.mrb[70].mxu0  ;;  %v2565_v28 = vpop.f32.mrb[72].mxu1 }
 0x183   : > { %v2447_v36 = vadd.f32 %v2440_v3, %v2390_v29  ;;  %v2391_v37 = vadd.f32 %v2386_v32, %v2318_v14  ;;  %v10471_v38 = vpop.f32.mrb[71].mxu0  ;;  %v10488_v59 = vpop.f32.mrb[73].mxu1  ;;  %v6095_v14 = vrot.slane %v11301_v5, 1  ;;  %v5909_v30 = vsel %vm344_vm4, %v5907_v10, %v5908_v11  ;;  %v9733_v11 = vld [vmem:[%s13439_s1 + $0x10] sm:$0x3] }
 0x184   : > { %v2568_v39 = vpop.f32.mrb[74].mxu1  ;;  %v6033_v32 = vrot.slane %v6031_v58, 1 }
 0x185   : > { %v2449_v40 = vadd.f32 %v12323_v43, %v2447_v36  ;;  %v2448_v41 = vadd.f32 %v2443_v12, %v2391_v37  ;;  %10793 = vmatmul.mubr.msk.bf16.vlgmr.msra.gmra.mrb[176].mxu0 %vm243_vm2, %v5672_v45  ;;  %v10489_v42 = vpop.f32.mrb[75].mxu1  ;;  %v9712_v12 = vld [vmem:[%s13439_s1 + $0x8] sm:$0x3]  ;;  %v6036_v45 = vshll.u32 %v11301_v5, 16  ;;  %v6096_v38 = vsel %vm344_vm4, %v6094_v13, %v6095_v14  ;;  %v9746_v13 = vld [vmem:[%s11548_s9 + $0x84] sm:$0xe] }
 0x186   : > { %10803 = vmatpush3.bf16.msra.mxu0 %v5813_v60  ;;  %10804 = vmatprep.mubr.msk.bf16.mxu0 %vm11445_vm1, %v11444_v2  ;;  %v6044_v35 = vsel %vm247_vm0, %v9712_v12, 0  ;;  %v6034_v46 = vor.u32 %v6033_v32, %v6029_v21 }
 0x187   : > { %9414 = vst [vmem:[%s12345_s21 + $0x30] sm:$0xff] %v2449_v40  ;;  %v2450_v49 = vadd.f32 %v12323_v43, %v2448_v41  ;;  %10811 = vmatmul.mubr.msk.bf16.vlgmr.msra.gmra.mrb[180].mxu1 %vm243_vm2, %v9696_v7  ;;  %10814 = vmatprep.subr.bf16.mxu0 %v11444_v2  ;;  %v9725_v43 = vld [vmem:[%s11548_s9 + $0x90] sm:$0xf]  ;;  %v6224_v40 = vshll.u32 %v12717_v16, 16  ;;  %v12732_v41 = vcombine.low %v9738_v22, %v12722_v26  ;;  %v6038_v47 = vrot.slane %v6036_v45, 1 }
 0x188   : > { %v2519_v25 = vpop.f32.mrb[72].mxu0  ;;  %10821 = vmatpush3.bf16.msra.mxu1 %v5971_v27  ;;  %10822 = vmatprep.mubr.msk.bf16.mxu1 %vm11445_vm1, %v11444_v2  ;;  %v9729_v8 = vcombine.low %v9725_v43, %v12693_v56  ;;  %v6289_v45 = vsel %vm247_vm0, %v9733_v11, 0 }
 0x189   : > { %9415 = vst [vmem:[%s12345_s21 + $0x38] sm:$0xff] %v2450_v49  ;;  %v2566_v52 = vadd.f32 %v2565_v28, %v2519_v25  ;;  %v10482_v54 = vpop.f32.mrb[73].mxu0  ;;  %10832 = vmatprep.subr.bf16.mxu1 %v11444_v2  ;;  %v9728_v28 = vld [vmem:[%s13439_s1 + $0xe] sm:$0x3]  ;;  %v9722_v49 = vld [vmem:[%s13439_s1 + $0xc] sm:$0x3] }
 0x18a   : > { %v2522_v53 = vpop.f32.mrb[74].mxu0  ;;  %v2677_v62 = vpop.f32.mrb[76].mxu1  ;;  %v6219_v17 = vshll.u32 %v9729_v8, 16  ;;  %v6217_v59 = vshrl.u32 %v9729_v8, 16  ;;  %v6232_v44 = vsel %vm247_vm0, %v9728_v28, 0  ;;  %v6226_v50 = vrot.slane %v6224_v40, 1 }
 0x18b   : > { %v2569_v0 = vadd.f32 %v2568_v39, %v2522_v53  ;;  %v10483_v1 = vpop.f32.mrb[75].mxu0  ;;  %v10500_v3 = vpop.f32.mrb[77].mxu1  ;;  %v12746_v25 = vld [vmem:[%s11548_s9 + $0x8c] ss:$0 sps:$4 sm:$0x11]   ;;  %v6355_v51 = vshll.u32 %v12732_v41, 16  ;;  %v6039_v53 = vsel %vm230_vm3, %v6034_v46, %v6038_v47 }
 0x18c   : > { %v2680_v7 = vpop.f32.mrb[78].mxu1  ;;  %v6221_v39 = vrot.slane %v6219_v17, 1  ;;  %v6159_v48 = vsel %vm247_vm0, %v9722_v49, 0  ;;  %v6360_v6 = vshll.u32 %v12746_v25, 16  ;;  %v11305_v17 = vld [vmem:[%s11548_s9 + $0x90] sm:$0xff]  }
 0x18d   : > { %10805 = vmatmul.mubr.msk.bf16.vlgmr.msra.gmra.mrb[180].mxu0 %vm243_vm2, %v5808_v55  ;;  %v10501_v9 = vpop.f32.mrb[79].mxu1  ;;  %v6357_v5 = vrot.slane %v6355_v51, 1 }
 0x18e   : > { %10815 = vmatpush3.bf16.msra.mxu0 %v5914_v61  ;;  %10816 = vmatprep.mubr.msk.bf16.mxu0 %vm11445_vm1, %v11444_v2  ;;  %v6222_v24 = vor.u32 %v6221_v39, %v6217_v59  ;;  %v9741_v61 = vld [vmem:[%s13439_s1 + $0x2] sm:$0x3]  ;;  %v6362_v12 = vrot.slane %v6360_v6, 1  ;;  %v6283_v39 = vrot.slane %v12717_v16, 1 }
 0x18f   : > { %10823 = vmatmul.mubr.msk.bf16.vlgmr.msra.gmra.mrb[184].mxu1 %vm243_vm2, %v11298_v4  ;;  %10826 = vmatprep.subr.bf16.mxu0 %v11444_v2  ;;  %v6353_v4 = vshrl.u32 %v12732_v41, 16  ;;  %v6368_v9 = vsel %vm247_vm0, %v9741_v61, 0 }
 0x190   : > { %v2620_v15 = vpop.f32.mrb[76].mxu0  ;;  %10833 = vmatpush3.bf16.msra.mxu1 %v6101_v57  ;;  %10834 = vmatprep.mubr.msk.bf16.mxu1 %vm11445_vm1, %v11444_v2  ;;  %v6227_v3 = vsel %vm230_vm3, %v6222_v24, %v6226_v50  ;;  %v9732_v57 = vld [vmem:[%s11548_s9 + $0x90] sm:$0xe]  ;;  %v9758_v50 = vld [vmem:[%s13439_s1 + $0x8] sm:$0x3] }
 0x191   : > { %v2627_v18 = vadd.f32 %v2620_v15, %v2566_v52  ;;  %v10494_v20 = vpop.f32.mrb[77].mxu0  ;;  %10844 = vmatprep.subr.bf16.mxu1 %v11444_v2  ;;  %v6358_v58 = vor.u32 %v6357_v5, %v6353_v4  ;;  %v9752_v4 = vld [vmem:[%s13439_s1 + $0x6] sm:$0x3] }
 0x192   : > { %v2623_v29 = vpop.f32.mrb[78].mxu0  ;;  %v2807_v31 = vpop.f32.mrb[80].mxu1  ;;  %v12775_v20 = vld [vmem:[%s11548_s9 + $0x94] sm:$0xf] }
 0x193   : > { %v2628_v33 = vadd.f32 %v2623_v29, %v2569_v0  ;;  %v10495_v34 = vpop.f32.mrb[79].mxu0  ;;  %v2684_v36 = vadd.f32 %v2677_v62, %v2627_v18  ;;  %v10512_v37 = vpop.f32.mrb[81].mxu1  ;;  %v9755_v18 = vld [vmem:[%s11548_s9 + $0x90] sm:$0xf]  ;;  %v9734_v29 = vcombine.low %v9732_v57, %v12693_v56 }
 0x194   : > { %v2810_v60 = vpop.f32.mrb[82].mxu1  ;;  %v9748_v34 = vcombine.low %v9746_v13, %v12722_v26  ;;  %v9759_v37 = vcombine.low %v9755_v18, %v12775_v20  ;;  %v6341_v26 = vld [vmem:[%s13439_s1] sm:$0x3] }
 0x195   : > { %10817 = vmatmul.mubr.msk.bf16.vlgmr.msra.gmra.mrb[184].mxu0 %vm243_vm2, %v5909_v30  ;;  %v2685_v42 = vadd.f32 %v2680_v7, %v2628_v33  ;;  %v10513_v27 = vpop.f32.mrb[83].mxu1  ;;  %v9747_v30 = vld [vmem:[%s13439_s1 + $0x4] sm:$0x3]  ;;  %v6282_v59 = vrot.slane %v9734_v29, 1  ;;  %v9762_v29 = vld [vmem:[%s11548_s9 + $0x90] sm:$0xe] }
 0x196   : > { %10827 = vmatpush3.bf16.msra.mxu0 %v6044_v35  ;;  %10828 = vmatprep.mubr.msk.bf16.mxu0 %vm11445_vm1, %v11444_v2  ;;  %v6462_v40 = vrot.slane %v9748_v34, 1  ;;  %v6463_v27 = vrot.slane %v12746_v25, 1  ;;  %v6586_v46 = vshll.u32 %v9759_v37, 16  ;;  %v12811_v25 = vld [vmem:[%s13440_s2] ss:$0 sm:$0xff] }
 0x197   : > { %10835 = vmatmul.mubr.msk.bf16.vlgmr.msra.gmra.mrb[188].mxu1 %vm243_vm2, %v6096_v38  ;;  %10838 = vmatprep.subr.bf16.mxu0 %v11444_v2  ;;  %v9778_v34 = vld [vmem:[%s11548_s9 + $0x9c] sm:$0xe] }
 0x198   : > { %v2750_v19 = vpop.f32.mrb[80].mxu0  ;;  %10845 = vmatpush3.bf16.msra.mxu1 %v6232_v44  ;;  %10846 = vmatprep.mubr.msk.bf16.mxu1 %vm11445_vm1, %v11444_v2  ;;  %v12801_v44 = vld [vmem:[%s11548_s9 + $0x98] ss:$0 sps:$4 sm:$0x11]   ;;  %v6464_v61 = vsel %vm344_vm4, %v6462_v40, %v6463_v27 }
 0x199   : > { %v2757_v52 = vadd.f32 %v2750_v19, %v2684_v36  ;;  %v10506_v54 = vpop.f32.mrb[81].mxu0  ;;  %10856 = vmatprep.subr.bf16.mxu1 %v11444_v2  ;;  %v6363_v36 = vsel %vm230_vm3, %v6358_v58, %v6362_v12  ;;  %v6284_v19 = vsel %vm344_vm4, %v6282_v59, %v6283_v39  ;;  %v6526_v12 = vsel %vm247_vm0, %v9752_v4, 0 }
 0x19a   : > { %v2753_v43 = vpop.f32.mrb[82].mxu0  ;;  %v2938_v55 = vpop.f32.mrb[84].mxu1 }
 0x19b   : > { %v2758_v62 = vadd.f32 %v2753_v43, %v2685_v42  ;;  %v10507_v23 = vpop.f32.mrb[83].mxu0  ;;  %v2814_v63 = vadd.f32 %v2807_v31, %v2757_v52  ;;  %v10524_v0 = vpop.f32.mrb[85].mxu1  ;;  %v6414_v43 = vsel %vm247_vm0, %v6341_v26, 0 }
 0x19c   : > { %v2941_v1 = vpop.f32.mrb[86].mxu1  ;;  %v6588_v23 = vrot.slane %v6586_v46, 1  ;;  %v11316_v46 = vld [vmem:[%s11548_s9 + $0xa4] ss:$0 sps:$4 sm:$0x11]  }
 0x19d   : > { %10829 = vmatmul.mubr.msk.bf16.vlgmr.msra.gmra.mrb[188].mxu0 %vm243_vm2, %v6039_v53  ;;  %v2815_v7 = vadd.f32 %v2810_v60, %v2758_v62  ;;  %v10525_v8 = vpop.f32.mrb[87].mxu1  ;;  %v6469_v60 = vsel %vm247_vm0, %v9747_v30, 0  ;;  %v6584_v62 = vshrl.u32 %v9759_v37, 16  ;;  %v9771_v30 = vld [vmem:[%s11548_s9 + $0x9c] sm:$0xf]  ;;  %v9764_v37 = vcombine.low %v9762_v29, %v12775_v20 }
 0x19e   : > { %10839 = vmatpush3.bf16.msra.mxu0 %v6159_v48  ;;  %10840 = vmatprep.mubr.msk.bf16.mxu0 %vm11445_vm1, %v11444_v2  ;;  %v6591_v48 = vshll.u32 %v12801_v44, 16 }
 0x19f   : > { %10847 = vmatmul.mubr.msk.bf16.vlgmr.msra.gmra.mrb[192].mxu1 %vm243_vm2, %v6227_v3  ;;  %10850 = vmatprep.subr.bf16.mxu0 %v11444_v2  ;;  %v6589_v5 = vor.u32 %v6588_v23, %v6584_v62 }
 0x1a0   : > { %v2865_v10 = vpop.f32.mrb[84].mxu0  ;;  %10857 = vmatpush3.bf16.msra.mxu1 %v6368_v9  ;;  %10858 = vmatprep.mubr.msk.bf16.mxu1 %vm11445_vm1, %v11444_v2  ;;  %v6593_v6 = vrot.slane %v6591_v48, 1 }
 0x1a1   : > { %v2872_v14 = vadd.f32 %v2865_v10, %v2814_v63  ;;  %v10518_v15 = vpop.f32.mrb[85].mxu0  ;;  %10868 = vmatprep.subr.bf16.mxu1 %v11444_v2  ;;  %v9768_v10 = vld [vmem:[%s13439_s1 + $0xc] sm:$0x3] }
 0x1a2   : > { %v2868_v21 = vpop.f32.mrb[86].mxu0  ;;  %v12777_v22 = vpop.f32.mrb[88].mxu1 }
 0x1a3   : > { %v2873_v31 = vadd.f32 %v2868_v21, %v2815_v7  ;;  %v10519_v32 = vpop.f32.mrb[87].mxu0  ;;  %v2945_v28 = vadd.f32 %v2938_v55, %v2872_v14  ;;  %v10536_v33 = vpop.f32.mrb[89].mxu1 }
 0x1a4   : > { %v3077_v35 = vpop.f32.mrb[90].mxu1  ;;  %v11312_v33 = vld [vmem:[%s11548_s9 + $0x90] sm:$0xff]  }
 0x1a5   : > { %10841 = vmatmul.mubr.msk.bf16.vlgmr.msra.gmra.mrb[192].mxu0 %vm243_vm2, %v11305_v17  ;;  %v2946_v56 = vadd.f32 %v2941_v1, %v2873_v31  ;;  %v10537_v38 = vpop.f32.mrb[91].mxu1  ;;  %v6599_v1 = vsel %vm247_vm0, %v9758_v50, 0  ;;  %v6594_v17 = vsel %vm230_vm3, %v6589_v5, %v6593_v6  ;;  %v9772_v31 = vld [vmem:[%s11548_s9 + $0xa0] sm:$0xf] }
 0x1a6   : > { %10851 = vmatpush3.bf16.msra.mxu0 %v6289_v45  ;;  %10852 = vmatprep.mubr.msk.bf16.mxu0 %vm11445_vm1, %v11444_v2  ;;  %v9775_v38 = vcombine.low %v9771_v30, %v9772_v31 }
 0x1a7   : > { %10859 = vmatmul.mubr.msk.bf16.vlgmr.msra.gmra.mrb[196].mxu1 %vm243_vm2, %v6363_v36  ;;  %10862 = vmatprep.subr.bf16.mxu0 %v11444_v2 }
 0x1a8   : > { %v2995_v42 = vpop.f32.mrb[88].mxu0  ;;  %10869 = vmatpush3.bf16.msra.mxu1 %v6469_v60  ;;  %10870 = vmatprep.mubr.msk.bf16.mxu1 %vm11445_vm1, %v11444_v2  ;;  %v6774_v50 = vshll.u32 %v9775_v38, 16  ;;  %v6772_v62 = vshrl.u32 %v9775_v38, 16 }
 0x1a9   : > { %v3002_v16 = vadd.f32 %v2995_v42, %v2945_v28  ;;  %v10530_v47 = vpop.f32.mrb[89].mxu0  ;;  %10880 = vmatprep.subr.bf16.mxu1 %v11444_v2  ;;  %v11313_v42 = vld [vmem:[%s11548_s9 + $0x9c] sm:$0xff]  }
 0x1aa   : > { %v2998_v49 = vpop.f32.mrb[90].mxu0  ;;  %v3175_v24 = vpop.f32.mrb[92].mxu1 }
 0x1ab   : > { %v3004_v51 = vadd.f32 %v12811_v25, %v3002_v16  ;;  %v3003_v52 = vadd.f32 %v2998_v49, %v2946_v56  ;;  %v10531_v54 = vpop.f32.mrb[91].mxu0  ;;  %v10548_v53 = vpop.f32.mrb[93].mxu1  ;;  %v9779_v56 = vld [vmem:[%s13439_s1 + $0x10] sm:$0x3]  ;;  %v9780_v16 = vcombine.low %v9778_v34, %v9772_v31 }
 0x1ac   : > { %v3178_v55 = vpop.f32.mrb[94].mxu1  ;;  %v6844_v49 = vsel %vm247_vm0, %v9779_v56, 0 }
 0x1ad   : > { %9460 = vst [vmem:[%s12345_s21 + $0x40] sm:$0xff] %v3004_v51  ;;  %v3005_v63 = vadd.f32 %v12811_v25, %v3003_v52  ;;  %10853 = vmatmul.mubr.msk.bf16.vlgmr.msra.gmra.mrb[196].mxu0 %vm243_vm2, %v6284_v19  ;;  %v10549_v0 = vpop.f32.mrb[95].mxu1  ;;  %v6649_v19 = vrot.slane %v9764_v37, 1  ;;  %v9784_v51 = vld [vmem:[%s11548_s9 + $0x90] sm:$0xf]  ;;  %v6837_v53 = vrot.slane %v9780_v16, 1 }
 0x1ae   : > { %10863 = vmatpush3.bf16.msra.mxu0 %v6414_v43  ;;  %10864 = vmatprep.mubr.msk.bf16.mxu0 %vm11445_vm1, %v11444_v2  ;;  %v12872_v52 = vld [vmem:[%s11548_s9 + $0x94] sm:$0xf]  ;;  %v9774_v43 = vld [vmem:[%s13439_s1 + $0xe] sm:$0x3]  ;;  %v6776_v0 = vrot.slane %v6774_v50, 1 }
 0x1af   : > { %9461 = vst [vmem:[%s12345_s21 + $0x48] sm:$0xff] %v3005_v63  ;;  %10871 = vmatmul.mubr.msk.bf16.vlgmr.msra.gmra.mrb[200].mxu1 %vm243_vm2, %v6464_v61  ;;  %10874 = vmatprep.subr.bf16.mxu0 %v11444_v2  ;;  %v9788_v4 = vcombine.low %v9784_v51, %v12872_v52  ;;  %v9792_v16 = vld [vmem:[%s11548_s9 + $0x90] sm:$0xe]  ;;  %v9817_v51 = vld [vmem:[%s11548_s9 + $0xa8] sm:$0xf] }
 0x1b0   : > { %v3120_v3 = vpop.f32.mrb[92].mxu0  ;;  %10881 = vmatpush3.bf16.msra.mxu1 %v6599_v1  ;;  %10882 = vmatprep.mubr.msk.bf16.mxu1 %vm11445_vm1, %v11444_v2  ;;  %v6779_v1 = vshll.u32 %v11316_v46, 16 }
 0x1b1   : > { %v3121_v7 = vadd.f32 %v3120_v3, %v12777_v22  ;;  %v10542_v8 = vpop.f32.mrb[93].mxu0  ;;  %10892 = vmatprep.subr.bf16.mxu1 %v11444_v2  ;;  %v6714_v22 = vsel %vm247_vm0, %v9768_v10, 0  ;;  %v6896_v3 = vld [vmem:[%s13439_s1] sm:$0x3]  ;;  %v6908_v30 = vshrl.u32 %v9788_v4, 16 }
 0x1b2   : > { %v3123_v9 = vpop.f32.mrb[94].mxu0  ;;  %v3305_v57 = vpop.f32.mrb[96].mxu1 }
 0x1b3   : > { %v3124_v11 = vadd.f32 %v3123_v9, %v3077_v35  ;;  %v10543_v58 = vpop.f32.mrb[95].mxu0  ;;  %v3182_v13 = vadd.f32 %v3175_v24, %v3121_v7  ;;  %v10560_v14 = vpop.f32.mrb[97].mxu1  ;;  %v6650_v24 = vrot.slane %v12801_v44, 1  ;;  %v6787_v7 = vsel %vm247_vm0, %v9774_v43, 0 }
 0x1b4   : > { %v3308_v15 = vpop.f32.mrb[98].mxu1  ;;  %v6781_v14 = vrot.slane %v6779_v1, 1  ;;  %v11320_v1 = vld [vmem:[%s11548_s9 + $0x9c] sm:$0xff]  }
 0x1b5   : > { %10865 = vmatmul.mubr.msk.bf16.vlgmr.msra.gmra.mrb[200].mxu0 %vm243_vm2, %v12732_v41  ;;  %v3183_v18 = vadd.f32 %v3178_v55, %v3124_v11  ;;  %v10561_v21 = vpop.f32.mrb[99].mxu1  ;;  %v9763_v41 = vld [vmem:[%s13439_s1 + $0xa] sm:$0x3]  ;;  %v6838_v55 = vrot.slane %v11316_v46, 1  ;;  %v6651_v48 = vsel %vm344_vm4, %v6649_v19, %v6650_v24  ;;  %v9808_v19 = vld [vmem:[%s11548_s9 + $0x9c] sm:$0xe] }
 0x1b6   : > { %10875 = vmatpush3.bf16.msra.mxu0 %v6526_v12  ;;  %10876 = vmatprep.mubr.msk.bf16.mxu0 %vm11445_vm1, %v11444_v2  ;;  %v6656_v39 = vsel %vm247_vm0, %v9763_v41, 0  ;;  %v6969_v12 = vsel %vm247_vm0, %v6896_v3, 0  ;;  %v9787_v21 = vld [vmem:[%s13439_s1 + $0x2] sm:$0x3] }
 0x1b7   : > { %10883 = vmatmul.mubr.msk.bf16.vlgmr.msra.gmra.mrb[204].mxu1 %vm243_vm2, %v6594_v17  ;;  %10886 = vmatprep.subr.bf16.mxu0 %v11444_v2  ;;  %v6839_v10 = vsel %vm344_vm4, %v6837_v53, %v6838_v55  ;;  %v6910_v17 = vshll.u32 %v9788_v4, 16  ;;  %v6923_v37 = vsel %vm247_vm0, %v9787_v21, 0  ;;  %v11323_v3 = vld [vmem:[%s11548_s9 + $0xa4] ss:$0 sps:$4 sm:$0x11]  }
 0x1b8   : > { %v3232_v32 = vpop.f32.mrb[96].mxu0  ;;  %10893 = vmatpush3.bf16.msra.mxu1 %v6714_v22  ;;  %10894 = vmatprep.mubr.msk.bf16.mxu1 %vm11445_vm1, %v11444_v2  ;;  %v9830_v21 = vld [vmem:[%s11548_s9 + $0x9c] sm:$0xf] }
 0x1b9   : > { %v3239_v45 = vadd.f32 %v3232_v32, %v3182_v13  ;;  %v10554_v28 = vpop.f32.mrb[97].mxu0  ;;  %10904 = vmatprep.subr.bf16.mxu1 %v11444_v2  ;;  %v6777_v13 = vor.u32 %v6776_v0, %v6772_v62  ;;  %v9809_v62 = vld [vmem:[%s13439_s1 + $0xa] sm:$0x3] }
 0x1ba   : > { %v3235_v35 = vpop.f32.mrb[98].mxu0  ;;  %v3420_v36 = vpop.f32.mrb[100].mxu1 }
 0x1bb   : > { %v3240_v60 = vadd.f32 %v3235_v35, %v3183_v18  ;;  %v10555_v59 = vpop.f32.mrb[99].mxu0  ;;  %v3312_v26 = vadd.f32 %v3305_v57, %v3239_v45  ;;  %v10572_v40 = vpop.f32.mrb[101].mxu1  ;;  %v6782_v32 = vsel %vm230_vm3, %v6777_v13, %v6781_v14  ;;  %v6912_v45 = vrot.slane %v6910_v17, 1  ;;  %v12954_v13 = vld [vmem:[%s11548_s9 + $0xb0] ss:$0 sps:$4 sm:$0x11]  }
 0x1bc   : > { %v3423_v27 = vpop.f32.mrb[102].mxu1 }
 0x1bd   : > { %10877 = vmatmul.mubr.msk.bf16.vlgmr.msra.gmra.mrb[204].mxu0 %vm243_vm2, %v11312_v33  ;;  %v3313_v20 = vadd.f32 %v3308_v15, %v3240_v60  ;;  %v10573_v47 = vpop.f32.mrb[103].mxu1  ;;  %v12892_v15 = vld [vmem:[%s11548_s9 + $0x98] ss:$0 sps:$4 sm:$0x11]   ;;  %v9798_v33 = vld [vmem:[%s13439_s1 + $0x6] sm:$0x3]  ;;  %v6913_v40 = vor.u32 %v6912_v45, %v6908_v30 }
 0x1be   : > { %10887 = vmatpush3.bf16.msra.mxu0 %v6656_v39  ;;  %10888 = vmatprep.mubr.msk.bf16.mxu0 %vm11445_vm1, %v11444_v2  ;;  %v6915_v28 = vshll.u32 %v12892_v15, 16  ;;  %v9802_v47 = vld [vmem:[%s11548_s9 + $0xa0] sm:$0xf]  ;;  %v9820_v45 = vld [vmem:[%s13439_s1 + $0xe] sm:$0x3] }
 0x1bf   : > { %10895 = vmatmul.mubr.msk.bf16.vlgmr.msra.gmra.mrb[208].mxu1 %vm243_vm2, %v11313_v42  ;;  %10898 = vmatprep.subr.bf16.mxu0 %v11444_v2 }
 0x1c0   : > { %v3362_v54 = vpop.f32.mrb[100].mxu0  ;;  %10905 = vmatpush3.bf16.msra.mxu1 %v6844_v49  ;;  %10906 = vmatprep.mubr.msk.bf16.mxu1 %vm11445_vm1, %v11444_v2  ;;  %v6917_v42 = vrot.slane %v6915_v28, 1 }
 0x1c1   : > { %v3369_v44 = vadd.f32 %v3362_v54, %v3312_v26  ;;  %v10566_v61 = vpop.f32.mrb[101].mxu0  ;;  %10916 = vmatprep.subr.bf16.mxu1 %v11444_v2  ;;  %v7081_v26 = vsel %vm247_vm0, %v9798_v33, 0  ;;  %v12930_v54 = vld [vmem:[%s11548_s9 + $0xac] sm:$0xf] }
 0x1c2   : > { %v3365_v23 = vpop.f32.mrb[102].mxu0  ;;  %v3550_v63 = vpop.f32.mrb[104].mxu1  ;;  %v6918_v53 = vsel %vm230_vm3, %v6913_v40, %v6917_v42  ;;  %v9794_v61 = vcombine.low %v9792_v16, %v12872_v52  ;;  %v7211_v52 = vsel %vm247_vm0, %v9809_v62, 0  ;;  %v7342_v42 = vsel %vm247_vm0, %v9820_v45, 0  ;;  %v9814_v16 = vld [vmem:[%s13439_s1 + $0xc] sm:$0x3] }
 0x1c3   : > { %v3370_v5 = vadd.f32 %v3365_v23, %v3313_v20  ;;  %v10567_v6 = vpop.f32.mrb[103].mxu0  ;;  %v3427_v8 = vadd.f32 %v3420_v36, %v3369_v44  ;;  %v10584_v9 = vpop.f32.mrb[105].mxu1  ;;  %v9801_v20 = vld [vmem:[%s11548_s9 + $0x9c] sm:$0xf] }
 0x1c4   : > { %v3553_v57 = vpop.f32.mrb[106].mxu1  ;;  %v9805_v23 = vcombine.low %v9801_v20, %v9802_v47  ;;  %v9821_v6 = vcombine.low %v9817_v51, %v12930_v54  ;;  %v7018_v9 = vrot.slane %v12892_v15, 1 }
 0x1c5   : > { %10889 = vmatmul.mubr.msk.bf16.vlgmr.msra.gmra.mrb[208].mxu0 %vm243_vm2, %v6651_v48  ;;  %v3428_v11 = vadd.f32 %v3423_v27, %v3370_v5  ;;  %v10585_v58 = vpop.f32.mrb[107].mxu1  ;;  %v9793_v27 = vld [vmem:[%s13439_s1 + $0x4] sm:$0x3] }
 0x1c6   : > { %10899 = vmatpush3.bf16.msra.mxu0 %v6787_v7  ;;  %10900 = vmatprep.mubr.msk.bf16.mxu0 %vm11445_vm1, %v11444_v2  ;;  %v7024_v55 = vsel %vm247_vm0, %v9793_v27, 0  ;;  %v7205_v58 = vrot.slane %v11323_v3, 1  ;;  %v7329_v14 = vshll.u32 %v9821_v6, 16 }
 0x1c7   : > { %10907 = vmatmul.mubr.msk.bf16.vlgmr.msra.gmra.mrb[212].mxu1 %vm243_vm2, %v6839_v10  ;;  %10910 = vmatprep.subr.bf16.mxu0 %v11444_v2  ;;  %v9804_v10 = vld [vmem:[%s13439_s1 + $0x8] sm:$0x3] }
 0x1c8   : > { %v3493_v18 = vpop.f32.mrb[104].mxu0  ;;  %10917 = vmatpush3.bf16.msra.mxu1 %v6969_v12  ;;  %10918 = vmatprep.mubr.msk.bf16.mxu1 %vm11445_vm1, %v11444_v2 }
 0x1c9   : > { %v3500_v22 = vadd.f32 %v3493_v18, %v3427_v8  ;;  %v10578_v29 = vpop.f32.mrb[105].mxu0  ;;  %10928 = vmatprep.subr.bf16.mxu1 %v11444_v2  ;;  %v7017_v8 = vrot.slane %v9794_v61, 1  ;;  %v7139_v18 = vshrl.u32 %v9805_v23, 16 }
 0x1ca   : > { %v3496_v31 = vpop.f32.mrb[106].mxu0  ;;  %v3675_v41 = vpop.f32.mrb[108].mxu1 }
 0x1cb   : > { %v3557_v34 = vadd.f32 %v3550_v63, %v3500_v22  ;;  %v3501_v35 = vadd.f32 %v3496_v31, %v3428_v11  ;;  %v10579_v36 = vpop.f32.mrb[107].mxu0  ;;  %v10596_v56 = vpop.f32.mrb[109].mxu1  ;;  %v12959_v22 = vld [vmem:[%s11548_s9 + $0xa0] sm:$0xf]  ;;  %v7019_v30 = vsel %vm344_vm4, %v7017_v8, %v7018_v9  ;;  %v9824_v8 = vld [vmem:[%s11548_s9 + $0xa8] sm:$0xe] }
 0x1cc   : > { %v3678_v38 = vpop.f32.mrb[110].mxu1 }
 0x1cd   : > { %v3559_v60 = vadd.f32 %v12811_v25, %v3557_v34  ;;  %v3558_v59 = vadd.f32 %v3553_v57, %v3501_v35  ;;  %10901 = vmatmul.mubr.msk.bf16.vlgmr.msra.gmra.mrb[212].mxu0 %vm243_vm2, %v6782_v32  ;;  %v10597_v39 = vpop.f32.mrb[111].mxu1  ;;  %v7141_v57 = vshll.u32 %v9805_v23, 16  ;;  %v7154_v34 = vsel %vm247_vm0, %v9804_v10, 0 }
 0x1ce   : > { %10911 = vmatpush3.bf16.msra.mxu0 %v6923_v37  ;;  %10912 = vmatprep.mubr.msk.bf16.mxu0 %vm11445_vm1, %v11444_v2  ;;  %v12969_v39 = vcombine.low %v9830_v21, %v12959_v22  ;;  %v7269_v23 = vsel %vm247_vm0, %v9814_v16, 0 }
 0x1cf   : > { %9506 = vst [vmem:[%s12345_s21 + $0x50] sm:$0xff] %v3559_v60  ;;  %v3560_v46 = vadd.f32 %v12811_v25, %v3558_v59  ;;  %10919 = vmatmul.mubr.msk.bf16.vlgmr.msra.gmra.mrb[216].mxu1 %vm243_vm2, %v9788_v4  ;;  %10922 = vmatprep.subr.bf16.mxu0 %v11444_v2  ;;  %v9810_v4 = vcombine.low %v9808_v19, %v9802_v47  ;;  %v7143_v32 = vrot.slane %v7141_v57, 1  ;;  %v7331_v60 = vrot.slane %v7329_v14, 1  ;;  %v12983_v19 = vld [vmem:[%s11548_s9 + $0xa4] ss:$0 sps:$4 sm:$0x11]  }
 0x1d0   : > { %v3629_v49 = vpop.f32.mrb[108].mxu0  ;;  %10929 = vmatpush3.bf16.msra.mxu1 %v7081_v26  ;;  %10930 = vmatprep.mubr.msk.bf16.mxu1 %vm11445_vm1, %v11444_v2  ;;  %v7334_v59 = vshll.u32 %v12954_v13, 16  ;;  %v9825_v57 = vld [vmem:[%s13439_s1 + $0x10] sm:$0x3] }
 0x1d1   : > { %9507 = vst [vmem:[%s12345_s21 + $0x58] sm:$0xff] %v3560_v46  ;;  %v3676_v24 = vadd.f32 %v3675_v41, %v3629_v49  ;;  %v10590_v50 = vpop.f32.mrb[109].mxu0  ;;  %10940 = vmatprep.subr.bf16.mxu1 %v11444_v2  ;;  %v7204_v11 = vrot.slane %v9810_v4, 1  ;;  %v7146_v41 = vshll.u32 %v11323_v3, 16  ;;  %v7144_v27 = vor.u32 %v7143_v32, %v7139_v18  ;;  %v13012_v18 = vld [vmem:[%s11548_s9 + $0xac] sm:$0xf] }
 0x1d2   : > { %v3632_v43 = vpop.f32.mrb[110].mxu0  ;;  %v3787_v44 = vpop.f32.mrb[112].mxu1  ;;  %v7336_v49 = vrot.slane %v7334_v59, 1  ;;  %v7463_v3 = vshrl.u32 %v12969_v39, 16  ;;  %v7399_v45 = vsel %vm247_vm0, %v9825_v57, 0  ;;  %v7393_v59 = vrot.slane %v12954_v13, 1 }
 0x1d3   : > { %v3679_v48 = vadd.f32 %v3678_v38, %v3632_v43  ;;  %v10591_v63 = vpop.f32.mrb[111].mxu0  ;;  %v10608_v0 = vpop.f32.mrb[113].mxu1  ;;  %v7206_v37 = vsel %vm344_vm4, %v7204_v11, %v7205_v58  ;;  %v7327_v38 = vshrl.u32 %v9821_v6, 16  ;;  %v7148_v46 = vrot.slane %v7146_v41, 1  ;;  %v9838_v58 = vld [vmem:[%s11548_s9 + $0x9c] sm:$0xe] }
 0x1d4   : > { %v3790_v5 = vpop.f32.mrb[114].mxu1 }
 0x1d5   : > { %10913 = vmatmul.mubr.msk.bf16.vlgmr.msra.gmra.mrb[216].mxu0 %vm243_vm2, %v6918_v53  ;;  %v10609_v7 = vpop.f32.mrb[115].mxu1  ;;  %v7332_v47 = vor.u32 %v7331_v60, %v7327_v38  ;;  %v7149_v53 = vsel %vm230_vm3, %v7144_v27, %v7148_v46  ;;  %v13038_v27 = vld [vmem:[%s11548_s9 + $0xb0] ss:$0 sps:$4 sm:$0x11]  }
 0x1d6   : > { %10923 = vmatpush3.bf16.msra.mxu0 %v7024_v55  ;;  %10924 = vmatprep.mubr.msk.bf16.mxu0 %vm11445_vm1, %v11444_v2 }
 0x1d7   : > { %10931 = vmatmul.mubr.msk.bf16.vlgmr.msra.gmra.mrb[220].mxu1 %vm243_vm2, %v11320_v1  ;;  %10934 = vmatprep.subr.bf16.mxu0 %v11444_v2  ;;  %v7337_v1 = vsel %vm230_vm3, %v7332_v47, %v7336_v49 }
 0x1d8   : > { %v3730_v12 = vpop.f32.mrb[112].mxu0  ;;  %10941 = vmatpush3.bf16.msra.mxu1 %v7211_v52  ;;  %10942 = vmatprep.mubr.msk.bf16.mxu1 %vm11445_vm1, %v11444_v2 }
 0x1d9   : > { %v3737_v15 = vadd.f32 %v3730_v12, %v3676_v24  ;;  %v10602_v17 = vpop.f32.mrb[113].mxu0  ;;  %10952 = vmatprep.subr.bf16.mxu1 %v11444_v2  ;;  %v7465_v24 = vshll.u32 %v12969_v39, 16 }
 0x1da   : > { %v3733_v29 = vpop.f32.mrb[114].mxu0  ;;  %v3917_v31 = vpop.f32.mrb[116].mxu1  ;;  %v9847_v17 = vld [vmem:[%s11548_s9 + $0xa8] sm:$0xf] }
 0x1db   : > { %v3738_v28 = vadd.f32 %v3733_v29, %v3679_v48  ;;  %v10603_v33 = vpop.f32.mrb[115].mxu0  ;;  %v3794_v35 = vadd.f32 %v3787_v44, %v3737_v15  ;;  %v10620_v36 = vpop.f32.mrb[117].mxu1  ;;  %v9833_v44 = vld [vmem:[%s13439_s1 + $0x2] sm:$0x3]  ;;  %v7467_v4 = vrot.slane %v7465_v24, 1  ;;  %v11327_v15 = vld [vmem:[%s11548_s9 + $0xa8] sm:$0xff]  }
 0x1dc   : > { %v3920_v56 = vpop.f32.mrb[118].mxu1  ;;  %v7478_v52 = vsel %vm247_vm0, %v9833_v44, 0  ;;  %v9850_v24 = vld [vmem:[%s13439_s1 + $0x8] sm:$0x3] }
 0x1dd   : > { %10925 = vmatmul.mubr.msk.bf16.vlgmr.msra.gmra.mrb[220].mxu0 %vm243_vm2, %v7019_v30  ;;  %v3795_v26 = vadd.f32 %v3790_v5, %v3738_v28  ;;  %v10621_v40 = vpop.f32.mrb[119].mxu1  ;;  %v7470_v5 = vshll.u32 %v12983_v19, 16  ;;  %v7468_v10 = vor.u32 %v7467_v4, %v7463_v3  ;;  %v9826_v30 = vcombine.low %v9824_v8, %v12930_v54  ;;  %v9844_v3 = vld [vmem:[%s13439_s1 + $0x6] sm:$0x3] }
 0x1de   : > { %10935 = vmatpush3.bf16.msra.mxu0 %v7154_v34  ;;  %10936 = vmatprep.mubr.msk.bf16.mxu0 %vm11445_vm1, %v11444_v2  ;;  %v9840_v34 = vcombine.low %v9838_v58, %v12959_v22  ;;  %v7451_v22 = vld [vmem:[%s13439_s1] sm:$0x3] }
 0x1df   : > { %10943 = vmatmul.mubr.msk.bf16.vlgmr.msra.gmra.mrb[224].mxu1 %vm243_vm2, %v7206_v37  ;;  %10946 = vmatprep.subr.bf16.mxu0 %v11444_v2  ;;  %v7472_v11 = vrot.slane %v7470_v5, 1  ;;  %v9851_v37 = vcombine.low %v9847_v17, %v13012_v18  ;;  %v7392_v60 = vrot.slane %v9826_v30, 1  ;;  %v9854_v30 = vld [vmem:[%s11548_s9 + $0xa8] sm:$0xe] }
 0x1e0   : > { %v3860_v20 = vpop.f32.mrb[116].mxu0  ;;  %10953 = vmatpush3.bf16.msra.mxu1 %v7342_v42  ;;  %10954 = vmatprep.mubr.msk.bf16.mxu1 %vm11445_vm1, %v11444_v2  ;;  %v7573_v42 = vrot.slane %v12983_v19, 1 }
 0x1e1   : > { %v3867_v50 = vadd.f32 %v3860_v20, %v3794_v35  ;;  %v10614_v51 = vpop.f32.mrb[117].mxu0  ;;  %10964 = vmatprep.subr.bf16.mxu1 %v11444_v2  ;;  %v7473_v36 = vsel %vm230_vm3, %v7468_v10, %v7472_v11  ;;  %v7696_v46 = vshll.u32 %v9851_v37, 16  ;;  %v7394_v47 = vsel %vm344_vm4, %v7392_v60, %v7393_v59 }
 0x1e2   : > { %v3863_v43 = vpop.f32.mrb[118].mxu0  ;;  %v4048_v55 = vpop.f32.mrb[120].mxu1  ;;  %v7636_v11 = vsel %vm247_vm0, %v9844_v3, 0 }
 0x1e3   : > { %v3868_v61 = vadd.f32 %v3863_v43, %v3795_v26  ;;  %v10615_v62 = vpop.f32.mrb[119].mxu0  ;;  %v3924_v48 = vadd.f32 %v3917_v31, %v3867_v50  ;;  %v10632_v63 = vpop.f32.mrb[121].mxu1  ;;  %v9839_v31 = vld [vmem:[%s13439_s1 + $0x4] sm:$0x3]  ;;  %v7572_v26 = vrot.slane %v9840_v34, 1  ;;  %v7524_v43 = vsel %vm247_vm0, %v7451_v22, 0 }
 0x1e4   : > { %v4051_v0 = vpop.f32.mrb[122].mxu1  ;;  %v7579_v38 = vsel %vm247_vm0, %v9839_v31, 0  ;;  %v7698_v62 = vrot.slane %v7696_v46, 1  ;;  %v9863_v31 = vld [vmem:[%s11548_s9 + $0xb4] sm:$0xf] }
 0x1e5   : > { %10937 = vmatmul.mubr.msk.bf16.vlgmr.msra.gmra.mrb[224].mxu0 %vm243_vm2, %v7149_v53  ;;  %v3925_v6 = vadd.f32 %v3920_v56, %v3868_v61  ;;  %v10633_v7 = vpop.f32.mrb[123].mxu1  ;;  %v7574_v44 = vsel %vm344_vm4, %v7572_v26, %v7573_v42  ;;  %v7694_v61 = vshrl.u32 %v9851_v37, 16  ;;  %v9870_v34 = vld [vmem:[%s11548_s9 + $0xb4] sm:$0xe]  ;;  %v9856_v37 = vcombine.low %v9854_v30, %v13012_v18 }
 0x1e6   : > { %10947 = vmatpush3.bf16.msra.mxu0 %v7269_v23  ;;  %10948 = vmatprep.mubr.msk.bf16.mxu0 %vm11445_vm1, %v11444_v2  ;;  %v7701_v23 = vshll.u32 %v13038_v27, 16  ;;  %v11338_v46 = vld [vmem:[%s11548_s9 + $0xbc] ss:$0 sps:$4 sm:$0x11]  }
 0x1e7   : > { %10955 = vmatmul.mubr.msk.bf16.vlgmr.msra.gmra.mrb[228].mxu1 %vm243_vm2, %v7337_v1  ;;  %10958 = vmatprep.subr.bf16.mxu0 %v11444_v2  ;;  %v7699_v4 = vor.u32 %v7698_v62, %v7694_v61 }
 0x1e8   : > { %v3975_v9 = vpop.f32.mrb[120].mxu0  ;;  %10965 = vmatpush3.bf16.msra.mxu1 %v7478_v52  ;;  %10966 = vmatprep.mubr.msk.bf16.mxu1 %vm11445_vm1, %v11444_v2  ;;  %v7703_v5 = vrot.slane %v7701_v23, 1 }
 0x1e9   : > { %v3982_v12 = vadd.f32 %v3975_v9, %v3924_v48  ;;  %v10626_v14 = vpop.f32.mrb[121].mxu0  ;;  %10976 = vmatprep.subr.bf16.mxu1 %v11444_v2  ;;  %v9860_v9 = vld [vmem:[%s13439_s1 + $0xc] sm:$0x3] }
 0x1ea   : > { %v3978_v21 = vpop.f32.mrb[122].mxu0  ;;  %v13014_v29 = vpop.f32.mrb[124].mxu1 }
 0x1eb   : > { %v3983_v32 = vadd.f32 %v3978_v21, %v3925_v6  ;;  %v10627_v41 = vpop.f32.mrb[123].mxu0  ;;  %v4055_v28 = vadd.f32 %v4048_v55, %v3982_v12  ;;  %v10644_v33 = vpop.f32.mrb[125].mxu1 }
 0x1ec   : > { %v4187_v35 = vpop.f32.mrb[126].mxu1  ;;  %v11334_v33 = vld [vmem:[%s11548_s9 + $0xa8] sm:$0xff]  }
 0x1ed   : > { %10949 = vmatmul.mubr.msk.bf16.vlgmr.msra.gmra.mrb[228].mxu0 %vm243_vm2, %v11327_v15  ;;  %v4056_v54 = vadd.f32 %v4051_v0, %v3983_v32  ;;  %v10645_v56 = vpop.f32.mrb[127].mxu1  ;;  %v7709_v0 = vsel %vm247_vm0, %v9850_v24, 0  ;;  %v7704_v15 = vsel %vm230_vm3, %v7699_v4, %v7703_v5  ;;  %v9864_v32 = vld [vmem:[%s11548_s9 + $0xb8] sm:$0xf] }
 0x1ee   : > { %10959 = vmatpush3.bf16.msra.mxu0 %v7399_v45  ;;  %10960 = vmatprep.mubr.msk.bf16.mxu0 %vm11445_vm1, %v11444_v2  ;;  %v9867_v56 = vcombine.low %v9863_v31, %v9864_v32 }
 0x1ef   : > { %10967 = vmatmul.mubr.msk.bf16.vlgmr.msra.gmra.mrb[232].mxu1 %vm243_vm2, %v7473_v36  ;;  %10970 = vmatprep.subr.bf16.mxu0 %v11444_v2 }
 0x1f0   : > { %v4105_v40 = vpop.f32.mrb[124].mxu0  ;;  %10977 = vmatpush3.bf16.msra.mxu1 %v7579_v38  ;;  %10978 = vmatprep.mubr.msk.bf16.mxu1 %vm11445_vm1, %v11444_v2  ;;  %v7884_v24 = vshll.u32 %v9867_v56, 16  ;;  %v7882_v61 = vshrl.u32 %v9867_v56, 16 }
 0x1f1   : > { %v4112_v13 = vadd.f32 %v4105_v40, %v4055_v28  ;;  %v10638_v16 = vpop.f32.mrb[125].mxu0  ;;  %10988 = vmatprep.subr.bf16.mxu1 %v11444_v2  ;;  %v11335_v40 = vld [vmem:[%s11548_s9 + $0xb4] sm:$0xff]  }
 0x1f2   : > { %v4108_v20 = vpop.f32.mrb[126].mxu0  ;;  %v4285_v49 = vpop.f32.mrb[128].mxu1 }
 0x1f3   : > { %v4114_v50 = vadd.f32 %v12811_v25, %v4112_v13  ;;  %v4113_v51 = vadd.f32 %v4108_v20, %v4056_v54  ;;  %v10639_v19 = vpop.f32.mrb[127].mxu0  ;;  %v10656_v53 = vpop.f32.mrb[129].mxu1  ;;  %v9871_v54 = vld [vmem:[%s13439_s1 + $0x10] sm:$0x3]  ;;  %v9872_v13 = vcombine.low %v9870_v34, %v9864_v32 }
 0x1f4   : > { %v4288_v55 = vpop.f32.mrb[130].mxu1  ;;  %v7954_v20 = vsel %vm247_vm0, %v9871_v54, 0 }
 0x1f5   : > { %9552 = vst [vmem:[%s12345_s21 + $0x60] sm:$0xff] %v4114_v50  ;;  %v4115_v48 = vadd.f32 %v12811_v25, %v4113_v51  ;;  %10961 = vmatmul.mubr.msk.bf16.vlgmr.msra.gmra.mrb[232].mxu0 %vm243_vm2, %v7394_v47  ;;  %v10657_v63 = vpop.f32.mrb[131].mxu1  ;;  %v7759_v47 = vrot.slane %v9856_v37, 1  ;;  %v9876_v50 = vld [vmem:[%s11548_s9 + $0xa8] sm:$0xf]  ;;  %v7947_v53 = vrot.slane %v9872_v13, 1 }
 0x1f6   : > { %10971 = vmatpush3.bf16.msra.mxu0 %v7524_v43  ;;  %10972 = vmatprep.mubr.msk.bf16.mxu0 %vm11445_vm1, %v11444_v2  ;;  %v13104_v51 = vld [vmem:[%s11548_s9 + $0xac] sm:$0xf]  ;;  %v7886_v63 = vrot.slane %v7884_v24, 1  ;;  %v9885_v13 = vld [vmem:[%s13439_s1 + $0x4] sm:$0x3] }
 0x1f7   : > { %9553 = vst [vmem:[%s12345_s21 + $0x68] sm:$0xff] %v4115_v48  ;;  %10979 = vmatmul.mubr.msk.bf16.vlgmr.msra.gmra.mrb[236].mxu1 %vm243_vm2, %v7574_v44  ;;  %10982 = vmatprep.subr.bf16.mxu0 %v11444_v2  ;;  %v9866_v43 = vld [vmem:[%s13439_s1 + $0xe] sm:$0x3]  ;;  %v9880_v3 = vcombine.low %v9876_v50, %v13104_v51  ;;  %v9909_v24 = vld [vmem:[%s11548_s9 + $0xc0] sm:$0xf] }
 0x1f8   : > { %v4230_v1 = vpop.f32.mrb[128].mxu0  ;;  %10989 = vmatpush3.bf16.msra.mxu1 %v7709_v0  ;;  %10990 = vmatprep.mubr.msk.bf16.mxu1 %vm11445_vm1, %v11444_v2  ;;  %v7889_v0 = vshll.u32 %v11338_v46, 16  ;;  %v13162_v50 = vld [vmem:[%s11548_s9 + $0xc4] sm:$0xf] }
 0x1f9   : > { %v4231_v6 = vadd.f32 %v4230_v1, %v13014_v29  ;;  %v10650_v7 = vpop.f32.mrb[129].mxu0  ;;  %11000 = vmatprep.subr.bf16.mxu1 %v11444_v2  ;;  %v7824_v29 = vsel %vm247_vm0, %v9860_v9, 0  ;;  %v8006_v1 = vld [vmem:[%s13439_s1] sm:$0x3]  ;;  %v8018_v31 = vshrl.u32 %v9880_v3, 16 }
 0x1fa   : > { %v4233_v52 = vpop.f32.mrb[130].mxu0  ;;  %v4415_v8 = vpop.f32.mrb[132].mxu1 }
 0x1fb   : > { %v4234_v57 = vadd.f32 %v4233_v52, %v4187_v35  ;;  %v10651_v10 = vpop.f32.mrb[131].mxu0  ;;  %v4292_v58 = vadd.f32 %v4285_v49, %v4231_v6  ;;  %v10668_v12 = vpop.f32.mrb[133].mxu1  ;;  %v7760_v49 = vrot.slane %v13038_v27, 1  ;;  %v7897_v6 = vsel %vm247_vm0, %v9866_v43, 0 }
 0x1fc   : > { %v4418_v14 = vpop.f32.mrb[134].mxu1  ;;  %v7891_v12 = vrot.slane %v7889_v0, 1  ;;  %v11345_v0 = vld [vmem:[%s11548_s9 + $0xbc] ss:$0 sps:$4 sm:$0x11]  }
 0x1fd   : > { %10973 = vmatmul.mubr.msk.bf16.vlgmr.msra.gmra.mrb[236].mxu0 %vm243_vm2, %v12969_v39  ;;  %v4293_v17 = vadd.f32 %v4288_v55, %v4234_v57  ;;  %v10669_v21 = vpop.f32.mrb[135].mxu1  ;;  %v9855_v39 = vld [vmem:[%s13439_s1 + $0xa] sm:$0x3]  ;;  %v7948_v55 = vrot.slane %v11338_v46, 1  ;;  %v7761_v23 = vsel %vm344_vm4, %v7759_v47, %v7760_v49  ;;  %v9900_v47 = vld [vmem:[%s11548_s9 + $0xb4] sm:$0xe] }
 0x1fe   : > { %10983 = vmatpush3.bf16.msra.mxu0 %v7636_v11  ;;  %10984 = vmatprep.mubr.msk.bf16.mxu0 %vm11445_vm1, %v11444_v2  ;;  %v7766_v59 = vsel %vm247_vm0, %v9855_v39, 0  ;;  %v8079_v11 = vsel %vm247_vm0, %v8006_v1, 0  ;;  %v9879_v21 = vld [vmem:[%s13439_s1 + $0x2] sm:$0x3] }
 0x1ff   : > { %10991 = vmatmul.mubr.msk.bf16.vlgmr.msra.gmra.mrb[240].mxu1 %vm243_vm2, %v7704_v15  ;;  %10994 = vmatprep.subr.bf16.mxu0 %v11444_v2  ;;  %v7949_v9 = vsel %vm344_vm4, %v7947_v53, %v7948_v55  ;;  %v8020_v15 = vshll.u32 %v9880_v3, 16  ;;  %v8033_v37 = vsel %vm247_vm0, %v9879_v21, 0  ;;  %v8134_v55 = vsel %vm247_vm0, %v9885_v13, 0  ;;  %v13191_v21 = vld [vmem:[%s11548_s9 + $0xb8] sm:$0xf] }
 0x200   : > { %v4342_v41 = vpop.f32.mrb[132].mxu0  ;;  %11001 = vmatpush3.bf16.msra.mxu1 %v7824_v29  ;;  %11002 = vmatprep.mubr.msk.bf16.mxu1 %vm11445_vm1, %v11444_v2 }
 0x201   : > { %v4349_v45 = vadd.f32 %v4342_v41, %v4292_v58  ;;  %v10662_v28 = vpop.f32.mrb[133].mxu0  ;;  %11012 = vmatprep.subr.bf16.mxu1 %v11444_v2  ;;  %v7887_v58 = vor.u32 %v7886_v63, %v7882_v61  ;;  %v11343_v63 = vld [vmem:[%s11548_s9 + $0xb4] sm:$0xff]  }
 0x202   : > { %v4345_v35 = vpop.f32.mrb[134].mxu0  ;;  %v4530_v36 = vpop.f32.mrb[136].mxu1 }
 0x203   : > { %v4350_v38 = vadd.f32 %v4345_v35, %v4293_v17  ;;  %v10663_v60 = vpop.f32.mrb[135].mxu0  ;;  %v4422_v22 = vadd.f32 %v4415_v8, %v4349_v45  ;;  %v10680_v26 = vpop.f32.mrb[137].mxu1  ;;  %v7892_v41 = vsel %vm230_vm3, %v7887_v58, %v7891_v12  ;;  %v8022_v45 = vrot.slane %v8020_v15, 1 }
 0x204   : > { %v4533_v42 = vpop.f32.mrb[138].mxu1  ;;  %v9884_v26 = vld [vmem:[%s11548_s9 + $0xa8] sm:$0xe] }
 0x205   : > { %10985 = vmatmul.mubr.msk.bf16.vlgmr.msra.gmra.mrb[240].mxu0 %vm243_vm2, %v11334_v33  ;;  %v4423_v18 = vadd.f32 %v4418_v14, %v4350_v38  ;;  %v10681_v16 = vpop.f32.mrb[139].mxu1  ;;  %v13124_v14 = vld [vmem:[%s11548_s9 + $0xb0] ss:$0 sps:$4 sm:$0x11]   ;;  %v9890_v33 = vld [vmem:[%s13439_s1 + $0x6] sm:$0x3]  ;;  %v9886_v43 = vcombine.low %v9884_v26, %v13104_v51 }
 0x206   : > { %10995 = vmatpush3.bf16.msra.mxu0 %v7766_v59  ;;  %10996 = vmatprep.mubr.msk.bf16.mxu0 %vm11445_vm1, %v11444_v2  ;;  %v8025_v28 = vshll.u32 %v13124_v14, 16  ;;  %v9894_v16 = vld [vmem:[%s11548_s9 + $0xb8] sm:$0xf] }
 0x207   : > { %11003 = vmatmul.mubr.msk.bf16.vlgmr.msra.gmra.mrb[244].mxu1 %vm243_vm2, %v11335_v40  ;;  %11006 = vmatprep.subr.bf16.mxu0 %v11444_v2  ;;  %v8023_v40 = vor.u32 %v8022_v45, %v8018_v31  ;;  %v9902_v1 = vcombine.low %v9900_v47, %v9894_v16 }
 0x208   : > { %v4472_v19 = vpop.f32.mrb[136].mxu0  ;;  %11013 = vmatpush3.bf16.msra.mxu1 %v7954_v20  ;;  %11014 = vmatprep.mubr.msk.bf16.mxu1 %vm11445_vm1, %v11444_v2 }
 0x209   : > { %v4479_v27 = vadd.f32 %v4472_v19, %v4422_v22  ;;  %v10674_v44 = vpop.f32.mrb[137].mxu0  ;;  %11024 = vmatprep.subr.bf16.mxu1 %v11444_v2  ;;  %v8191_v22 = vsel %vm247_vm0, %v9890_v33, 0 }
 0x20a   : > { %v4475_v62 = vpop.f32.mrb[138].mxu0  ;;  %v4660_v48 = vpop.f32.mrb[140].mxu1  ;;  %v9901_v44 = vld [vmem:[%s13439_s1 + $0xa] sm:$0x3] }
 0x20b   : > { %v4480_v4 = vadd.f32 %v4475_v62, %v4423_v18  ;;  %v10675_v5 = vpop.f32.mrb[139].mxu0  ;;  %v4537_v7 = vadd.f32 %v4530_v36, %v4479_v27  ;;  %v10692_v52 = vpop.f32.mrb[141].mxu1  ;;  %v9893_v18 = vld [vmem:[%s11548_s9 + $0xb4] sm:$0xf] }
 0x20c   : > { %v4663_v8 = vpop.f32.mrb[142].mxu1  ;;  %v9897_v61 = vcombine.low %v9893_v18, %v9894_v16  ;;  %v8321_v5 = vsel %vm247_vm0, %v9901_v44, 0 }
 0x20d   : > { %10997 = vmatmul.mubr.msk.bf16.vlgmr.msra.gmra.mrb[244].mxu0 %vm243_vm2, %v7761_v23  ;;  %v4538_v57 = vadd.f32 %v4533_v42, %v4480_v4  ;;  %v10693_v10 = vpop.f32.mrb[143].mxu1  ;;  %v8027_v42 = vrot.slane %v8025_v28, 1  ;;  %v9913_v4 = vcombine.low %v9909_v24, %v13162_v50 }
 0x20e   : > { %11007 = vmatpush3.bf16.msra.mxu0 %v7897_v6  ;;  %11008 = vmatprep.mubr.msk.bf16.mxu0 %vm11445_vm1, %v11444_v2  ;;  %v8127_v6 = vrot.slane %v9886_v43, 1  ;;  %v8251_v52 = vshll.u32 %v9897_v61, 16  ;;  %v8249_v15 = vshrl.u32 %v9897_v61, 16 }
 0x20f   : > { %11015 = vmatmul.mubr.msk.bf16.vlgmr.msra.gmra.mrb[248].mxu1 %vm243_vm2, %v7949_v9  ;;  %11018 = vmatprep.subr.bf16.mxu0 %v11444_v2  ;;  %v8028_v53 = vsel %vm230_vm3, %v8023_v40, %v8027_v42  ;;  %v8314_v9 = vrot.slane %v9902_v1, 1  ;;  %v8439_v58 = vshll.u32 %v9913_v4, 16 }
 0x210   : > { %v4603_v17 = vpop.f32.mrb[140].mxu0  ;;  %11025 = vmatpush3.bf16.msra.mxu1 %v8079_v11  ;;  %11026 = vmatprep.mubr.msk.bf16.mxu1 %vm11445_vm1, %v11444_v2  ;;  %v13186_v11 = vld [vmem:[%s11548_s9 + $0xc8] ss:$0 sps:$4 sm:$0x11]  }
 0x211   : > { %v4610_v29 = vadd.f32 %v4603_v17, %v4537_v7  ;;  %v10686_v30 = vpop.f32.mrb[141].mxu0  ;;  %11036 = vmatprep.subr.bf16.mxu1 %v11444_v2  ;;  %v8128_v7 = vrot.slane %v13124_v14, 1  ;;  %v9922_v17 = vld [vmem:[%s11548_s9 + $0xb4] sm:$0xf] }
 0x212   : > { %v4606_v32 = vpop.f32.mrb[142].mxu0  ;;  %v4785_v39 = vpop.f32.mrb[144].mxu1 }
 0x213   : > { %v4667_v34 = vadd.f32 %v4660_v48, %v4610_v29  ;;  %v4611_v35 = vadd.f32 %v4606_v32, %v4538_v57  ;;  %v10687_v36 = vpop.f32.mrb[143].mxu0  ;;  %v10704_v54 = vpop.f32.mrb[145].mxu1  ;;  %v8315_v57 = vrot.slane %v11345_v0, 1  ;;  %v8129_v29 = vsel %vm344_vm4, %v8127_v6, %v8128_v7  ;;  %v9917_v7 = vld [vmem:[%s13439_s1 + $0x10] sm:$0x3] }
 0x214   : > { %v4788_v56 = vpop.f32.mrb[146].mxu1  ;;  %v8253_v32 = vrot.slane %v8251_v52, 1  ;;  %v8437_v54 = vshrl.u32 %v9913_v4, 16 }
 0x215   : > { %v4669_v38 = vadd.f32 %v12811_v25, %v4667_v34  ;;  %v4668_v60 = vadd.f32 %v4663_v8, %v4611_v35  ;;  %11009 = vmatmul.mubr.msk.bf16.vlgmr.msra.gmra.mrb[248].mxu0 %vm243_vm2, %v7892_v41  ;;  %v10705_v59 = vpop.f32.mrb[147].mxu1  ;;  %v9896_v8 = vld [vmem:[%s13439_s1 + $0x8] sm:$0x3]  ;;  %v8256_v41 = vshll.u32 %v11345_v0, 16  ;;  %v8316_v36 = vsel %vm344_vm4, %v8314_v9, %v8315_v57  ;;  %v9930_v9 = vld [vmem:[%s11548_s9 + $0xb4] sm:$0xe] }
 0x216   : > { %11019 = vmatpush3.bf16.msra.mxu0 %v8033_v37  ;;  %11020 = vmatprep.mubr.msk.bf16.mxu0 %vm11445_vm1, %v11444_v2  ;;  %v8264_v33 = vsel %vm247_vm0, %v9896_v8, 0  ;;  %v8254_v40 = vor.u32 %v8253_v32, %v8249_v15 }
 0x217   : > { %9598 = vst [vmem:[%s12345_s21 + $0x70] sm:$0xff] %v4669_v38  ;;  %v4670_v46 = vadd.f32 %v12811_v25, %v4668_v60  ;;  %11027 = vmatmul.mubr.msk.bf16.vlgmr.msra.gmra.mrb[252].mxu1 %vm243_vm2, %v9880_v3  ;;  %11030 = vmatprep.subr.bf16.mxu0 %v11444_v2  ;;  %v8444_v38 = vshll.u32 %v13186_v11, 16  ;;  %v13201_v60 = vcombine.low %v9922_v17, %v13191_v21  ;;  %v8258_v42 = vrot.slane %v8256_v41, 1 }
 0x218   : > { %v4739_v20 = vpop.f32.mrb[144].mxu0  ;;  %11037 = vmatpush3.bf16.msra.mxu1 %v8191_v22  ;;  %11038 = vmatprep.mubr.msk.bf16.mxu1 %vm11445_vm1, %v11444_v2  ;;  %v8509_v41 = vsel %vm247_vm0, %v9917_v7, 0 }
 0x219   : > { %9599 = vst [vmem:[%s12345_s21 + $0x78] sm:$0xff] %v4670_v46  ;;  %v4786_v49 = vadd.f32 %v4785_v39, %v4739_v20  ;;  %v10698_v25 = vpop.f32.mrb[145].mxu0  ;;  %11048 = vmatprep.subr.bf16.mxu1 %v11444_v2  ;;  %v9912_v39 = vld [vmem:[%s13439_s1 + $0xe] sm:$0x3]  ;;  %v9906_v46 = vld [vmem:[%s13439_s1 + $0xc] sm:$0x3] }
 0x21a   : > { %v4742_v19 = vpop.f32.mrb[146].mxu0  ;;  %v4897_v27 = vpop.f32.mrb[148].mxu1  ;;  %v8452_v26 = vsel %vm247_vm0, %v9912_v39, 0  ;;  %v8446_v16 = vrot.slane %v8444_v38, 1  ;;  %v8575_v47 = vshll.u32 %v13201_v60, 16  ;;  %v8379_v44 = vsel %vm247_vm0, %v9906_v46, 0 }
 0x21b   : > { %v4789_v62 = vadd.f32 %v4788_v56, %v4742_v19  ;;  %v10699_v23 = vpop.f32.mrb[147].mxu0  ;;  %v10716_v48 = vpop.f32.mrb[149].mxu1  ;;  %v8441_v56 = vrot.slane %v8439_v58, 1  ;;  %v13215_v20 = vld [vmem:[%s11548_s9 + $0xbc] ss:$0 sps:$4 sm:$0x11]   ;;  %v8259_v19 = vsel %vm230_vm3, %v8254_v40, %v8258_v42 }
 0x21c   : > { %v4900_v3 = vpop.f32.mrb[150].mxu1  ;;  %v8577_v0 = vrot.slane %v8575_v47, 1  ;;  %v8580_v1 = vshll.u32 %v13215_v20, 16  ;;  %v11349_v58 = vld [vmem:[%s11548_s9 + $0xc0] sm:$0xff]  }
 0x21d   : > { %11021 = vmatmul.mubr.msk.bf16.vlgmr.msra.gmra.mrb[252].mxu0 %vm243_vm2, %v8028_v53  ;;  %v10717_v51 = vpop.f32.mrb[151].mxu1  ;;  %v8442_v18 = vor.u32 %v8441_v56, %v8437_v54  ;;  %v9925_v53 = vld [vmem:[%s13439_s1 + $0x2] sm:$0x3]  ;;  %v8503_v56 = vrot.slane %v13186_v11, 1 }
 0x21e   : > { %11031 = vmatpush3.bf16.msra.mxu0 %v8134_v55  ;;  %11032 = vmatprep.mubr.msk.bf16.mxu0 %vm11445_vm1, %v11444_v2  ;;  %v8588_v51 = vsel %vm247_vm0, %v9925_v53, 0  ;;  %v8582_v8 = vrot.slane %v8580_v1, 1 }
 0x21f   : > { %11039 = vmatmul.mubr.msk.bf16.vlgmr.msra.gmra.mrb[0].mxu1 %vm243_vm2, %v11343_v63  ;;  %11042 = vmatprep.subr.bf16.mxu0 %v11444_v2  ;;  %v8447_v48 = vsel %vm230_vm3, %v8442_v18, %v8446_v16  ;;  %v8573_v63 = vshrl.u32 %v13201_v60, 16  ;;  %v9942_v16 = vld [vmem:[%s13439_s1 + $0x8] sm:$0x3] }
 0x220   : > { %v4840_v10 = vpop.f32.mrb[148].mxu0  ;;  %11049 = vmatpush3.bf16.msra.mxu1 %v8321_v5  ;;  %11050 = vmatprep.mubr.msk.bf16.mxu1 %vm11445_vm1, %v11444_v2  ;;  %v9916_v5 = vld [vmem:[%s11548_s9 + $0xc0] sm:$0xe] }
 0x221   : > { %v4847_v12 = vadd.f32 %v4840_v10, %v4786_v49  ;;  %v10710_v14 = vpop.f32.mrb[149].mxu0  ;;  %11060 = vmatprep.subr.bf16.mxu1 %v11444_v2  ;;  %v8578_v52 = vor.u32 %v8577_v0, %v8573_v63  ;;  %v9936_v63 = vld [vmem:[%s13439_s1 + $0x6] sm:$0x3] }
 0x222   : > { %v4843_v30 = vpop.f32.mrb[150].mxu0  ;;  %v5027_v31 = vpop.f32.mrb[152].mxu1  ;;  %v13244_v14 = vld [vmem:[%s11548_s9 + $0xc4] sm:$0xf] }
 0x223   : > { %v4848_v45 = vadd.f32 %v4843_v30, %v4789_v62  ;;  %v10711_v28 = vpop.f32.mrb[151].mxu0  ;;  %v4904_v34 = vadd.f32 %v4897_v27, %v4847_v12  ;;  %v10728_v35 = vpop.f32.mrb[153].mxu1  ;;  %v9939_v12 = vld [vmem:[%s11548_s9 + $0xc0] sm:$0xf]  ;;  %v9931_v30 = vld [vmem:[%s13439_s1 + $0x4] sm:$0x3] }
 0x224   : > { %v5030_v37 = vpop.f32.mrb[154].mxu1  ;;  %v9932_v28 = vcombine.low %v9930_v9, %v13191_v21  ;;  %v9943_v35 = vcombine.low %v9939_v12, %v13244_v14  ;;  %v8561_v21 = vld [vmem:[%s13439_s1] sm:$0x3] }
 0x225   : > { %11033 = vmatmul.mubr.msk.bf16.vlgmr.msra.gmra.mrb[0].mxu0 %vm243_vm2, %v8129_v29  ;;  %v4905_v59 = vadd.f32 %v4900_v3, %v4848_v45  ;;  %v10729_v22 = vpop.f32.mrb[155].mxu1  ;;  %v9918_v29 = vcombine.low %v9916_v5, %v13162_v50 }
 0x226   : > { %11043 = vmatpush3.bf16.msra.mxu0 %v8264_v33  ;;  %11044 = vmatprep.mubr.msk.bf16.mxu0 %vm11445_vm1, %v11444_v2  ;;  %v8682_v38 = vrot.slane %v9932_v28, 1  ;;  %v8683_v22 = vrot.slane %v13215_v20, 1  ;;  %v8806_v40 = vshll.u32 %v9943_v35, 16  ;;  %v13280_v20 = vld [vmem:[%s13440_s2] ss:$0 sm:$0xff] }
 0x227   : > { %11051 = vmatmul.mubr.msk.bf16.vlgmr.msra.gmra.mrb[4].mxu1 %vm243_vm2, %v8316_v36  ;;  %11054 = vmatprep.subr.bf16.mxu0 %v11444_v2  ;;  %v8502_v54 = vrot.slane %v9918_v29, 1  ;;  %v9946_v29 = vld [vmem:[%s11548_s9 + $0xc0] sm:$0xe]  ;;  %v9962_v28 = vld [vmem:[%s11548_s9 + $0xcc] sm:$0xe] }
 0x228   : > { %v4970_v13 = vpop.f32.mrb[152].mxu0  ;;  %11061 = vmatpush3.bf16.msra.mxu1 %v8452_v26  ;;  %11062 = vmatprep.mubr.msk.bf16.mxu1 %vm11445_vm1, %v11444_v2  ;;  %v13270_v26 = vld [vmem:[%s11548_s9 + $0xc8] ss:$0 sps:$4 sm:$0x11]   ;;  %v8684_v53 = vsel %vm344_vm4, %v8682_v38, %v8683_v22 }
 0x229   : > { %v4977_v49 = vadd.f32 %v4970_v13, %v4904_v34  ;;  %v10722_v25 = vpop.f32.mrb[153].mxu0  ;;  %11072 = vmatprep.subr.bf16.mxu1 %v11444_v2  ;;  %v8583_v34 = vsel %vm230_vm3, %v8578_v52, %v8582_v8  ;;  %v8504_v13 = vsel %vm344_vm4, %v8502_v54, %v8503_v56  ;;  %v8746_v8 = vsel %vm247_vm0, %v9936_v63, 0 }
 0x22a   : > { %v4973_v24 = vpop.f32.mrb[154].mxu0  ;;  %v5158_v43 = vpop.f32.mrb[156].mxu1 }
 0x22b   : > { %v4978_v55 = vadd.f32 %v4973_v24, %v4905_v59  ;;  %v10723_v27 = vpop.f32.mrb[155].mxu0  ;;  %v5034_v61 = vadd.f32 %v5027_v31, %v4977_v49  ;;  %v10740_v62 = vpop.f32.mrb[157].mxu1  ;;  %v8634_v24 = vsel %vm247_vm0, %v8561_v21, 0 }
 0x22c   : > { %v5161_v23 = vpop.f32.mrb[158].mxu1  ;;  %v8808_v27 = vrot.slane %v8806_v40, 1  ;;  %v11360_v40 = vld [vmem:[%s11548_s9 + $0xd4] ss:$0 sps:$4 sm:$0x11]  }
 0x22d   : > { %11045 = vmatmul.mubr.msk.bf16.vlgmr.msra.gmra.mrb[4].mxu0 %vm243_vm2, %v8259_v19  ;;  %v5035_v3 = vadd.f32 %v5030_v37, %v4978_v55  ;;  %v10741_v4 = vpop.f32.mrb[159].mxu1  ;;  %v8689_v37 = vsel %vm247_vm0, %v9931_v30, 0  ;;  %v8804_v55 = vshrl.u32 %v9943_v35, 16  ;;  %v9955_v30 = vld [vmem:[%s11548_s9 + $0xcc] sm:$0xf]  ;;  %v9948_v35 = vcombine.low %v9946_v29, %v13244_v14 }
 0x22e   : > { %11055 = vmatpush3.bf16.msra.mxu0 %v8379_v44  ;;  %11056 = vmatprep.mubr.msk.bf16.mxu0 %vm11445_vm1, %v11444_v2  ;;  %v8811_v44 = vshll.u32 %v13270_v26, 16 }
 0x22f   : > { %11063 = vmatmul.mubr.msk.bf16.vlgmr.msra.gmra.mrb[8].mxu1 %vm243_vm2, %v8447_v48  ;;  %11066 = vmatprep.subr.bf16.mxu0 %v11444_v2  ;;  %v8809_v0 = vor.u32 %v8808_v27, %v8804_v55 }
 0x230   : > { %v5085_v6 = vpop.f32.mrb[156].mxu0  ;;  %11073 = vmatpush3.bf16.msra.mxu1 %v8588_v51  ;;  %11074 = vmatprep.mubr.msk.bf16.mxu1 %vm11445_vm1, %v11444_v2  ;;  %v8813_v1 = vrot.slane %v8811_v44, 1 }
 0x231   : > { %v5092_v57 = vadd.f32 %v5085_v6, %v5034_v61  ;;  %v10734_v10 = vpop.f32.mrb[157].mxu0  ;;  %11084 = vmatprep.subr.bf16.mxu1 %v11444_v2  ;;  %v9952_v6 = vld [vmem:[%s13439_s1 + $0xc] sm:$0x3] }
 0x232   : > { %v5088_v15 = vpop.f32.mrb[158].mxu0  ;;  %v13246_v17 = vpop.f32.mrb[160].mxu1 }
 0x233   : > { %v5093_v31 = vadd.f32 %v5088_v15, %v5035_v3  ;;  %v10735_v32 = vpop.f32.mrb[159].mxu0  ;;  %v5165_v39 = vadd.f32 %v5158_v43, %v5092_v57  ;;  %v10752_v45 = vpop.f32.mrb[161].mxu1 }
 0x234   : > { %v5297_v33 = vpop.f32.mrb[162].mxu1  ;;  %v11356_v45 = vld [vmem:[%s11548_s9 + $0xc0] sm:$0xff]  }
 0x235   : > { %11057 = vmatmul.mubr.msk.bf16.vlgmr.msra.gmra.mrb[8].mxu0 %vm243_vm2, %v11349_v58  ;;  %v5166_v50 = vadd.f32 %v5161_v23, %v5093_v31  ;;  %v10753_v36 = vpop.f32.mrb[163].mxu1  ;;  %v8819_v23 = vsel %vm247_vm0, %v9942_v16, 0  ;;  %v8814_v58 = vsel %vm230_vm3, %v8809_v0, %v8813_v1  ;;  %v9956_v31 = vld [vmem:[%s11548_s9 + $0xd0] sm:$0xf] }
 0x236   : > { %11067 = vmatpush3.bf16.msra.mxu0 %v8509_v41  ;;  %11068 = vmatprep.mubr.msk.bf16.mxu0 %vm11445_vm1, %v11444_v2  ;;  %v9959_v36 = vcombine.low %v9955_v30, %v9956_v31 }
 0x237   : > { %11075 = vmatmul.mubr.msk.bf16.vlgmr.msra.gmra.mrb[12].mxu1 %vm243_vm2, %v8583_v34  ;;  %11078 = vmatprep.subr.bf16.mxu0 %v11444_v2 }
 0x238   : > { %v5215_v59 = vpop.f32.mrb[160].mxu0  ;;  %11085 = vmatpush3.bf16.msra.mxu1 %v8689_v37  ;;  %11086 = vmatprep.mubr.msk.bf16.mxu1 %vm11445_vm1, %v11444_v2  ;;  %v8994_v16 = vshll.u32 %v9959_v36, 16  ;;  %v8992_v27 = vshrl.u32 %v9959_v36, 16 }
 0x239   : > { %v5222_v11 = vadd.f32 %v5215_v59, %v5165_v39  ;;  %v10746_v42 = vpop.f32.mrb[161].mxu0  ;;  %11096 = vmatprep.subr.bf16.mxu1 %v11444_v2  ;;  %v11357_v59 = vld [vmem:[%s11548_s9 + $0xcc] sm:$0xff]  }
 0x23a   : > { %v5218_v46 = vpop.f32.mrb[162].mxu0  ;;  %v5395_v18 = vpop.f32.mrb[164].mxu1  ;;  %v8996_v44 = vrot.slane %v8994_v16, 1 }
 0x23b   : > { %v5224_v47 = vadd.f32 %v13280_v20, %v5222_v11  ;;  %v5223_v49 = vadd.f32 %v5218_v46, %v5166_v50  ;;  %v10747_v25 = vpop.f32.mrb[163].mxu0  ;;  %v10764_v19 = vpop.f32.mrb[165].mxu1  ;;  %v9963_v50 = vld [vmem:[%s13439_s1 + $0x10] sm:$0x3]  ;;  %v9964_v11 = vcombine.low %v9962_v28, %v9956_v31 }
 0x23c   : > { %v5398_v43 = vpop.f32.mrb[166].mxu1  ;;  %v9064_v14 = vsel %vm247_vm0, %v9963_v50, 0 }
 0x23d   : > { %9644 = vst [vmem:[%s12345_s21 + $0x80] sm:$0xff] %v5224_v47  ;;  %v5225_v61 = vadd.f32 %v13280_v20, %v5223_v49  ;;  %11069 = vmatmul.mubr.msk.bf16.vlgmr.msra.gmra.mrb[12].mxu0 %vm243_vm2, %v8504_v13  ;;  %v10765_v62 = vpop.f32.mrb[167].mxu1  ;;  %v8869_v13 = vrot.slane %v9948_v35, 1  ;;  %v9958_v49 = vld [vmem:[%s13439_s1 + $0xe] sm:$0x3]  ;;  %v9057_v25 = vrot.slane %v9964_v11, 1 }
 0x23e   : > { %11079 = vmatpush3.bf16.msra.mxu0 %v8634_v24  ;;  %11080 = vmatprep.mubr.msk.bf16.mxu0 %vm11445_vm1, %v11444_v2  ;;  %v9058_v24 = vrot.slane %v11360_v40, 1 }
 0x23f   : > { %9645 = vst [vmem:[%s12345_s21 + $0x88] sm:$0xff] %v5225_v61  ;;  %11087 = vmatmul.mubr.msk.bf16.vlgmr.msra.gmra.mrb[16].mxu1 %vm243_vm2, %v8684_v53  ;;  %11090 = vmatprep.subr.bf16.mxu0 %v11444_v2  ;;  %v8999_v61 = vshll.u32 %v11360_v40, 16 }
 0x240   : > { %v5340_v48 = vpop.f32.mrb[164].mxu0  ;;  %11097 = vmatpush3.bf16.msra.mxu1 %v8819_v23  ;;  %11098 = vmatprep.mubr.msk.bf16.mxu1 %vm11445_vm1, %v11444_v2 }
 0x241   : > { %v5341_v3 = vadd.f32 %v5340_v48, %v13246_v17  ;;  %v10758_v4 = vpop.f32.mrb[165].mxu0  ;;  %11108 = vmatprep.subr.bf16.mxu1 %v11444_v2  ;;  %v8934_v17 = vsel %vm247_vm0, %v9952_v6, 0  ;;  %v9007_v48 = vsel %vm247_vm0, %v9958_v49, 0  ;;  %v9001_v6 = vrot.slane %v8999_v61, 1 }
 0x242   : > { %v5343_v51 = vpop.f32.mrb[166].mxu0  ;;  %v5525_v5 = vpop.f32.mrb[168].mxu1 }
 0x243   : > { %v5344_v7 = vadd.f32 %v5343_v51, %v5297_v33  ;;  %v10759_v52 = vpop.f32.mrb[167].mxu0  ;;  %v5402_v9 = vadd.f32 %v5395_v18, %v5341_v3  ;;  %v10776_v57 = vpop.f32.mrb[169].mxu1  ;;  %v8870_v18 = vrot.slane %v13270_v26, 1  ;;  %v9059_v3 = vsel %vm344_vm4, %v9057_v25, %v9058_v24 }
 0x244   : > { %v5528_v10 = vpop.f32.mrb[170].mxu1 }
 0x245   : > { %11081 = vmatmul.mubr.msk.bf16.vlgmr.msra.gmra.mrb[16].mxu0 %vm243_vm2, %v13201_v60  ;;  %v5403_v12 = vadd.f32 %v5398_v43, %v5344_v7  ;;  %v10777_v15 = vpop.f32.mrb[171].mxu1  ;;  %v9947_v60 = vld [vmem:[%s13439_s1 + $0xa] sm:$0x3]  ;;  %v8871_v26 = vsel %vm344_vm4, %v8869_v13, %v8870_v18 }
 0x246   : > { %11091 = vmatpush3.bf16.msra.mxu0 %v8746_v8  ;;  %11092 = vmatprep.mubr.msk.bf16.mxu0 %vm11445_vm1, %v11444_v2  ;;  %v8876_v56 = vsel %vm247_vm0, %v9947_v60, 0 }
 0x247   : > { %11099 = vmatmul.mubr.msk.bf16.vlgmr.msra.gmra.mrb[20].mxu1 %vm243_vm2, %v8814_v58  ;;  %11102 = vmatprep.subr.bf16.mxu0 %v11444_v2 }
 0x248   : > { %v5452_v32 = vpop.f32.mrb[168].mxu0  ;;  %11109 = vmatpush3.bf16.msra.mxu1 %v8934_v17  ;;  %11110 = vmatprep.mubr.msk.bf16.mxu1 %vm11445_vm1, %v11444_v2 }
 0x249   : > { %v5459_v41 = vadd.f32 %v5452_v32, %v5402_v9  ;;  %v10770_v39 = vpop.f32.mrb[169].mxu0  ;;  %11120 = vmatprep.subr.bf16.mxu1 %v11444_v2 }
 0x24a   : > { %v5455_v33 = vpop.f32.mrb[170].mxu0  ;;  %v5640_v34 = vpop.f32.mrb[172].mxu1 }
 0x24b   : > { %v5460_v37 = vadd.f32 %v5455_v33, %v5403_v12  ;;  %v10771_v54 = vpop.f32.mrb[171].mxu0  ;;  %v5532_v21 = vadd.f32 %v5525_v5, %v5459_v41  ;;  %v10788_v38 = vpop.f32.mrb[173].mxu1  ;;  %v8997_v5 = vor.u32 %v8996_v44, %v8992_v27 }
 0x24c   : > { %v5643_v22 = vpop.f32.mrb[174].mxu1 }
 0x24d   : > { %11093 = vmatmul.mubr.msk.bf16.vlgmr.msra.gmra.mrb[20].mxu0 %vm243_vm2, %v11356_v45  ;;  %v5533_v42 = vadd.f32 %v5528_v10, %v5460_v37  ;;  %v10789_v46 = vpop.f32.mrb[175].mxu1  ;;  %v9002_v57 = vsel %vm230_vm3, %v8997_v5, %v9001_v6 }
 0x24e   : > { %11103 = vmatpush3.bf16.msra.mxu0 %v8876_v56  ;;  %11104 = vmatprep.mubr.msk.bf16.mxu0 %vm11445_vm1, %v11444_v2 }
 0x24f   : > { %11111 = vmatmul.mubr.msk.bf16.vlgmr.msra.gmra.mrb[24].mxu1 %vm243_vm2, %v11357_v59  ;;  %11114 = vmatprep.subr.bf16.mxu0 %v11444_v2 }
 0x250   : > { %v5582_v47 = vpop.f32.mrb[172].mxu0  ;;  %11121 = vmatpush3.bf16.msra.mxu1 %v9064_v14  ;;  %11122 = vmatprep.mubr.msk.bf16.mxu1 %vm11445_vm1, %v11444_v2 }
 0x251   : > { %v5589_v19 = vadd.f32 %v5582_v47, %v5532_v21  ;;  %v10782_v43 = vpop.f32.mrb[173].mxu0 }
 0x252   : > { %v5585_v53 = vpop.f32.mrb[174].mxu0  ;;  %v5770_v55 = vpop.f32.mrb[176].mxu1 }
 0x253   : > { %v5590_v62 = vadd.f32 %v5585_v53, %v5533_v42  ;;  %v10783_v23 = vpop.f32.mrb[175].mxu0  ;;  %v5647_v63 = vadd.f32 %v5640_v34, %v5589_v19  ;;  %v10800_v0 = vpop.f32.mrb[177].mxu1 }
 0x254   : > { %v5773_v1 = vpop.f32.mrb[178].mxu1 }
 0x255   : > { %11105 = vmatmul.mubr.msk.bf16.vlgmr.msra.gmra.mrb[24].mxu0 %vm243_vm2, %v8871_v26  ;;  %v5648_v4 = vadd.f32 %v5643_v22, %v5590_v62  ;;  %v10801_v51 = vpop.f32.mrb[179].mxu1 }
 0x256   : > { %11115 = vmatpush3.bf16.msra.mxu0 %v9007_v48  ;;  %11116 = vmatprep.mubr.msk.bf16.mxu0 %vm11445_vm1, %v11444_v2 }
 0x257   : > { %11123 = vmatmul.mubr.msk.bf16.vlgmr.msra.gmra.mrb[28].mxu1 %vm243_vm2, %v9059_v3 }
 0x258   : > { %v5713_v7 = vpop.f32.mrb[176].mxu0 }
 0x259   : > { %v5720_v52 = vadd.f32 %v5713_v7, %v5647_v63  ;;  %v10794_v8 = vpop.f32.mrb[177].mxu0 }
 0x25a   : > { %v5716_v9 = vpop.f32.mrb[178].mxu0  ;;  %v5895_v10 = vpop.f32.mrb[180].mxu1 }
 0x25b   : > { %v5777_v58 = vadd.f32 %v5770_v55, %v5720_v52  ;;  %v5721_v12 = vadd.f32 %v5716_v9, %v5648_v4  ;;  %v10795_v15 = vpop.f32.mrb[179].mxu0  ;;  %v10812_v17 = vpop.f32.mrb[181].mxu1 }
 0x25c   : > { %v5898_v29 = vpop.f32.mrb[182].mxu1 }
 0x25d   : > { %v5779_v2 = vadd.f32 %v13280_v20, %v5777_v58  ;;  %v5778_v30 = vadd.f32 %v5773_v1, %v5721_v12  ;;  %11117 = vmatmul.mubr.msk.bf16.vlgmr.msra.gmra.mrb[28].mxu0 %vm243_vm2, %v9002_v57  ;;  %v10813_v31 = vpop.f32.mrb[183].mxu1 }
 0x25f   : > { %9690 = vst [vmem:[%s12345_s21 + $0x90] sm:$0xff] %v5779_v2  ;;  %v5780_v32 = vadd.f32 %v13280_v20, %v5778_v30 }
 0x260   : > { %v5849_v60 = vpop.f32.mrb[180].mxu0 }
 0x261   : > { %9691 = vst [vmem:[%s12345_s21 + $0x98] sm:$0xff] %v5780_v32  ;;  %v5896_v41 = vadd.f32 %v5895_v10, %v5849_v60  ;;  %v10806_v39 = vpop.f32.mrb[181].mxu0 }
 0x262   : > { %v5852_v45 = vpop.f32.mrb[182].mxu0  ;;  %v6007_v28 = vpop.f32.mrb[184].mxu1 }
 0x263   : > { %v5899_v33 = vadd.f32 %v5898_v29, %v5852_v45  ;;  %v10807_v34 = vpop.f32.mrb[183].mxu0  ;;  %v10824_v35 = vpop.f32.mrb[185].mxu1 }
 0x264   : > { %v6010_v50 = vpop.f32.mrb[186].mxu1 }
 0x265   : > { %v10825_v36 = vpop.f32.mrb[187].mxu1 }
 0x268   : > { %v5950_v37 = vpop.f32.mrb[184].mxu0 }
 0x269   : > { %v5957_v54 = vadd.f32 %v5950_v37, %v5896_v41  ;;  %v10818_v56 = vpop.f32.mrb[185].mxu0 }
 0x26a   : > { %v5953_v21 = vpop.f32.mrb[186].mxu0  ;;  %v6137_v38 = vpop.f32.mrb[188].mxu1 }
 0x26b   : > { %v5958_v59 = vadd.f32 %v5953_v21, %v5899_v33  ;;  %v10819_v22 = vpop.f32.mrb[187].mxu0  ;;  %v6014_v40 = vadd.f32 %v6007_v28, %v5957_v54  ;;  %v10836_v11 = vpop.f32.mrb[189].mxu1 }
 0x26c   : > { %v6140_v42 = vpop.f32.mrb[190].mxu1 }
 0x26d   : > { %v6015_v46 = vadd.f32 %v6010_v50, %v5958_v59  ;;  %v10837_v14 = vpop.f32.mrb[191].mxu1 }
 0x270   : > { %v6080_v13 = vpop.f32.mrb[188].mxu0 }
 0x271   : > { %v6087_v18 = vadd.f32 %v6080_v13, %v6014_v40  ;;  %v10830_v16 = vpop.f32.mrb[189].mxu0 }
 0x272   : > { %v6083_v47 = vpop.f32.mrb[190].mxu0  ;;  %v6268_v49 = vpop.f32.mrb[192].mxu1 }
 0x273   : > { %v6088_v25 = vadd.f32 %v6083_v47, %v6015_v46  ;;  %v10831_v24 = vpop.f32.mrb[191].mxu0  ;;  %v6144_v19 = vadd.f32 %v6137_v38, %v6087_v18  ;;  %v10848_v43 = vpop.f32.mrb[193].mxu1 }
 0x274   : > { %v6271_v53 = vpop.f32.mrb[194].mxu1 }
 0x275   : > { %v6145_v26 = vadd.f32 %v6140_v42, %v6088_v25  ;;  %v10849_v55 = vpop.f32.mrb[195].mxu1 }
 0x278   : > { %v6195_v27 = vpop.f32.mrb[192].mxu0 }
 0x279   : > { %v6202_v44 = vadd.f32 %v6195_v27, %v6144_v19  ;;  %v10842_v61 = vpop.f32.mrb[193].mxu0 }
 0x27a   : > { %v6198_v62 = vpop.f32.mrb[194].mxu0  ;;  %v6404_v23 = vpop.f32.mrb[196].mxu1 }
 0x27b   : > { %v6203_v48 = vadd.f32 %v6198_v62, %v6145_v26  ;;  %v10843_v63 = vpop.f32.mrb[195].mxu0  ;;  %v6275_v0 = vadd.f32 %v6268_v49, %v6202_v44  ;;  %v10860_v1 = vpop.f32.mrb[197].mxu1 }
 0x27c   : > { %v6407_v3 = vpop.f32.mrb[198].mxu1 }
 0x27d   : > { %v6276_v4 = vadd.f32 %v6271_v53, %v6203_v48  ;;  %v10861_v51 = vpop.f32.mrb[199].mxu1 }
 0x280   : > { %v6325_v5 = vpop.f32.mrb[196].mxu0 }
 0x281   : > { %v6332_v6 = vadd.f32 %v6325_v5, %v6275_v0  ;;  %v10854_v7 = vpop.f32.mrb[197].mxu0 }
 0x282   : > { %v6328_v52 = vpop.f32.mrb[198].mxu0  ;;  %v6505_v8 = vpop.f32.mrb[200].mxu1 }
 0x283   : > { %v6334_v9 = vadd.f32 %v13280_v20, %v6332_v6  ;;  %v6333_v57 = vadd.f32 %v6328_v52, %v6276_v4  ;;  %v10855_v10 = vpop.f32.mrb[199].mxu0  ;;  %v10872_v58 = vpop.f32.mrb[201].mxu1 }
 0x284   : > { %v6508_v12 = vpop.f32.mrb[202].mxu1 }
 0x285   : > { %9736 = vst [vmem:[%s12345_s21 + $0xa0] sm:$0xff] %v6334_v9  ;;  %v6335_v15 = vadd.f32 %v13280_v20, %v6333_v57  ;;  %v10873_v17 = vpop.f32.mrb[203].mxu1 }
 0x287   : > { %9737 = vst [vmem:[%s12345_s21 + $0xa8] sm:$0xff] %v6335_v15 }
 0x288   : > { %v6450_v29 = vpop.f32.mrb[200].mxu0 }
 0x289   : > { %v6451_v2 = vadd.f32 %v6450_v29, %v6404_v23  ;;  %v10866_v30 = vpop.f32.mrb[201].mxu0 }
 0x28a   : > { %v6453_v31 = vpop.f32.mrb[202].mxu0  ;;  %v6635_v32 = vpop.f32.mrb[204].mxu1 }
 0x28b   : > { %v6454_v60 = vadd.f32 %v6453_v31, %v6407_v3  ;;  %v10867_v41 = vpop.f32.mrb[203].mxu0  ;;  %v6512_v39 = vadd.f32 %v6505_v8, %v6451_v2  ;;  %v10884_v45 = vpop.f32.mrb[205].mxu1 }
 0x28c   : > { %v6638_v28 = vpop.f32.mrb[206].mxu1 }
 0x28d   : > { %v6513_v33 = vadd.f32 %v6508_v12, %v6454_v60  ;;  %v10885_v34 = vpop.f32.mrb[207].mxu1 }
 0x290   : > { %v6562_v35 = vpop.f32.mrb[204].mxu0 }
 0x291   : > { %v6569_v50 = vadd.f32 %v6562_v35, %v6512_v39  ;;  %v10878_v36 = vpop.f32.mrb[205].mxu0 }
 0x292   : > { %v6565_v37 = vpop.f32.mrb[206].mxu0  ;;  %v6750_v54 = vpop.f32.mrb[208].mxu1 }
 0x293   : > { %v6570_v56 = vadd.f32 %v6565_v37, %v6513_v33  ;;  %v10879_v21 = vpop.f32.mrb[207].mxu0  ;;  %v6642_v38 = vadd.f32 %v6635_v32, %v6569_v50  ;;  %v10896_v59 = vpop.f32.mrb[209].mxu1 }
 0x294   : > { %v6753_v22 = vpop.f32.mrb[210].mxu1 }
 0x295   : > { %v6643_v40 = vadd.f32 %v6638_v28, %v6570_v56  ;;  %v10897_v11 = vpop.f32.mrb[211].mxu1 }
 0x298   : > { %v6692_v42 = vpop.f32.mrb[208].mxu0 }
 0x299   : > { %v6699_v46 = vadd.f32 %v6692_v42, %v6642_v38  ;;  %v10890_v14 = vpop.f32.mrb[209].mxu0 }
 0x29a   : > { %v6695_v13 = vpop.f32.mrb[210].mxu0  ;;  %v6880_v18 = vpop.f32.mrb[212].mxu1 }
 0x29b   : > { %v6700_v16 = vadd.f32 %v6695_v13, %v6643_v40  ;;  %v10891_v47 = vpop.f32.mrb[211].mxu0  ;;  %v6757_v49 = vadd.f32 %v6750_v54, %v6699_v46  ;;  %v10908_v25 = vpop.f32.mrb[213].mxu1 }
 0x29c   : > { %v6883_v24 = vpop.f32.mrb[214].mxu1 }
 0x29d   : > { %v6758_v19 = vadd.f32 %v6753_v22, %v6700_v16  ;;  %v10909_v43 = vpop.f32.mrb[215].mxu1 }
 0x2a0   : > { %v6823_v53 = vpop.f32.mrb[212].mxu0 }
 0x2a1   : > { %v6830_v26 = vadd.f32 %v6823_v53, %v6757_v49  ;;  %v10902_v55 = vpop.f32.mrb[213].mxu0 }
 0x2a2   : > { %v6826_v27 = vpop.f32.mrb[214].mxu0  ;;  %v7005_v44 = vpop.f32.mrb[216].mxu1 }
 0x2a3   : > { %v6887_v61 = vadd.f32 %v6880_v18, %v6830_v26  ;;  %v6831_v62 = vadd.f32 %v6826_v27, %v6758_v19  ;;  %v10903_v23 = vpop.f32.mrb[215].mxu0  ;;  %v10920_v48 = vpop.f32.mrb[217].mxu1 }
 0x2a4   : > { %v7008_v63 = vpop.f32.mrb[218].mxu1 }
 0x2a5   : > { %v6889_v0 = vadd.f32 %v13280_v20, %v6887_v61  ;;  %v6888_v1 = vadd.f32 %v6883_v24, %v6831_v62  ;;  %v10921_v3 = vpop.f32.mrb[219].mxu1 }
 0x2a7   : > { %9782 = vst [vmem:[%s12345_s21 + $0xb0] sm:$0xff] %v6889_v0  ;;  %v6890_v4 = vadd.f32 %v13280_v20, %v6888_v1 }
 0x2a8   : > { %v6959_v51 = vpop.f32.mrb[216].mxu0 }
 0x2a9   : > { %9783 = vst [vmem:[%s12345_s21 + $0xb8] sm:$0xff] %v6890_v4  ;;  %v7006_v5 = vadd.f32 %v7005_v44, %v6959_v51  ;;  %v10914_v6 = vpop.f32.mrb[217].mxu0 }
 0x2aa   : > { %v6962_v7 = vpop.f32.mrb[218].mxu0  ;;  %v7117_v52 = vpop.f32.mrb[220].mxu1 }
 0x2ab   : > { %v7009_v8 = vadd.f32 %v7008_v63, %v6962_v7  ;;  %v10915_v9 = vpop.f32.mrb[219].mxu0  ;;  %v10932_v57 = vpop.f32.mrb[221].mxu1 }
 0x2ac   : > { %v7120_v10 = vpop.f32.mrb[222].mxu1 }
 0x2ad   : > { %v10933_v58 = vpop.f32.mrb[223].mxu1 }
 0x2b0   : > { %v7060_v12 = vpop.f32.mrb[220].mxu0 }
 0x2b1   : > { %v7067_v15 = vadd.f32 %v7060_v12, %v7006_v5  ;;  %v10926_v17 = vpop.f32.mrb[221].mxu0 }
 0x2b2   : > { %v7063_v29 = vpop.f32.mrb[222].mxu0  ;;  %v7247_v2 = vpop.f32.mrb[224].mxu1 }
 0x2b3   : > { %v7068_v30 = vadd.f32 %v7063_v29, %v7009_v8  ;;  %v10927_v31 = vpop.f32.mrb[223].mxu0  ;;  %v7124_v32 = vadd.f32 %v7117_v52, %v7067_v15  ;;  %v10944_v60 = vpop.f32.mrb[225].mxu1 }
 0x2b4   : > { %v7250_v41 = vpop.f32.mrb[226].mxu1 }
 0x2b5   : > { %v7125_v39 = vadd.f32 %v7120_v10, %v7068_v30  ;;  %v10945_v45 = vpop.f32.mrb[227].mxu1 }
 0x2b8   : > { %v7190_v28 = vpop.f32.mrb[224].mxu0 }
 0x2b9   : > { %v7197_v33 = vadd.f32 %v7190_v28, %v7124_v32  ;;  %v10938_v34 = vpop.f32.mrb[225].mxu0 }
 0x2ba   : > { %v7193_v35 = vpop.f32.mrb[226].mxu0  ;;  %v7378_v50 = vpop.f32.mrb[228].mxu1 }
 0x2bb   : > { %v7198_v36 = vadd.f32 %v7193_v35, %v7125_v39  ;;  %v10939_v37 = vpop.f32.mrb[227].mxu0  ;;  %v7254_v54 = vadd.f32 %v7247_v2, %v7197_v33  ;;  %v10956_v56 = vpop.f32.mrb[229].mxu1 }
 0x2bc   : > { %v7381_v21 = vpop.f32.mrb[230].mxu1 }
 0x2bd   : > { %v7255_v38 = vadd.f32 %v7250_v41, %v7198_v36  ;;  %v10957_v59 = vpop.f32.mrb[231].mxu1 }
 0x2c0   : > { %v7305_v22 = vpop.f32.mrb[228].mxu0 }
 0x2c1   : > { %v7312_v40 = vadd.f32 %v7305_v22, %v7254_v54  ;;  %v10950_v11 = vpop.f32.mrb[229].mxu0 }
 0x2c2   : > { %v7308_v42 = vpop.f32.mrb[230].mxu0  ;;  %v7514_v46 = vpop.f32.mrb[232].mxu1 }
 0x2c3   : > { %v7313_v14 = vadd.f32 %v7308_v42, %v7255_v38  ;;  %v10951_v13 = vpop.f32.mrb[231].mxu0  ;;  %v7385_v18 = vadd.f32 %v7378_v50, %v7312_v40  ;;  %v10968_v16 = vpop.f32.mrb[233].mxu1 }
 0x2c4   : > { %v7517_v47 = vpop.f32.mrb[234].mxu1 }
 0x2c5   : > { %v7386_v49 = vadd.f32 %v7381_v21, %v7313_v14  ;;  %v10969_v25 = vpop.f32.mrb[235].mxu1 }
 0x2c8   : > { %v7435_v24 = vpop.f32.mrb[232].mxu0 }
 0x2c9   : > { %v7442_v19 = vadd.f32 %v7435_v24, %v7385_v18  ;;  %v10962_v43 = vpop.f32.mrb[233].mxu0 }
 0x2ca   : > { %v7438_v53 = vpop.f32.mrb[234].mxu0  ;;  %v7615_v26 = vpop.f32.mrb[236].mxu1 }
 0x2cb   : > { %v7444_v55 = vadd.f32 %v13280_v20, %v7442_v19  ;;  %v7443_v27 = vadd.f32 %v7438_v53, %v7386_v49  ;;  %v10963_v44 = vpop.f32.mrb[235].mxu0  ;;  %v10980_v61 = vpop.f32.mrb[237].mxu1 }
 0x2cc   : > { %v7618_v62 = vpop.f32.mrb[238].mxu1 }
 0x2cd   : > { %9828 = vst [vmem:[%s12345_s21 + $0xc0] sm:$0xff] %v7444_v55  ;;  %v7445_v23 = vadd.f32 %v13280_v20, %v7443_v27  ;;  %v10981_v48 = vpop.f32.mrb[239].mxu1 }
 0x2cf   : > { %9829 = vst [vmem:[%s12345_s21 + $0xc8] sm:$0xff] %v7445_v23 }
 0x2d0   : > { %v7560_v63 = vpop.f32.mrb[236].mxu0 }
 0x2d1   : > { %v7561_v0 = vadd.f32 %v7560_v63, %v7514_v46  ;;  %v10974_v1 = vpop.f32.mrb[237].mxu0 }
 0x2d2   : > { %v7563_v3 = vpop.f32.mrb[238].mxu0  ;;  %v7745_v4 = vpop.f32.mrb[240].mxu1 }
 0x2d3   : > { %v7564_v51 = vadd.f32 %v7563_v3, %v7517_v47  ;;  %v10975_v5 = vpop.f32.mrb[239].mxu0  ;;  %v7622_v6 = vadd.f32 %v7615_v26, %v7561_v0  ;;  %v10992_v7 = vpop.f32.mrb[241].mxu1 }
 0x2d4   : > { %v7748_v52 = vpop.f32.mrb[242].mxu1 }
 0x2d5   : > { %v7623_v8 = vadd.f32 %v7618_v62, %v7564_v51  ;;  %v10993_v9 = vpop.f32.mrb[243].mxu1 }
 0x2d8   : > { %v7672_v57 = vpop.f32.mrb[240].mxu0 }
 0x2d9   : > { %v7679_v10 = vadd.f32 %v7672_v57, %v7622_v6  ;;  %v10986_v58 = vpop.f32.mrb[241].mxu0 }
 0x2da   : > { %v7675_v12 = vpop.f32.mrb[242].mxu0  ;;  %v7860_v15 = vpop.f32.mrb[244].mxu1 }
 0x2db   : > { %v7680_v17 = vadd.f32 %v7675_v12, %v7623_v8  ;;  %v10987_v29 = vpop.f32.mrb[243].mxu0  ;;  %v7752_v2 = vadd.f32 %v7745_v4, %v7679_v10  ;;  %v11004_v30 = vpop.f32.mrb[245].mxu1 }
 0x2dc   : > { %v7863_v31 = vpop.f32.mrb[246].mxu1 }
 0x2dd   : > { %v7753_v32 = vadd.f32 %v7748_v52, %v7680_v17  ;;  %v11005_v60 = vpop.f32.mrb[247].mxu1 }
 0x2e0   : > { %v7802_v41 = vpop.f32.mrb[244].mxu0 }
 0x2e1   : > { %v7809_v39 = vadd.f32 %v7802_v41, %v7752_v2  ;;  %v10998_v45 = vpop.f32.mrb[245].mxu0 }
 0x2e2   : > { %v7805_v28 = vpop.f32.mrb[246].mxu0  ;;  %v7990_v33 = vpop.f32.mrb[248].mxu1 }
 0x2e3   : > { %v7810_v34 = vadd.f32 %v7805_v28, %v7753_v32  ;;  %v10999_v35 = vpop.f32.mrb[247].mxu0  ;;  %v7867_v50 = vadd.f32 %v7860_v15, %v7809_v39  ;;  %v11016_v36 = vpop.f32.mrb[249].mxu1 }
 0x2e4   : > { %v7993_v37 = vpop.f32.mrb[250].mxu1 }
 0x2e5   : > { %v7868_v54 = vadd.f32 %v7863_v31, %v7810_v34  ;;  %v11017_v56 = vpop.f32.mrb[251].mxu1 }
 0x2e8   : > { %v7933_v21 = vpop.f32.mrb[248].mxu0 }
 0x2e9   : > { %v7940_v38 = vadd.f32 %v7933_v21, %v7867_v50  ;;  %v11010_v59 = vpop.f32.mrb[249].mxu0 }
 0x2ea   : > { %v7936_v22 = vpop.f32.mrb[250].mxu0  ;;  %v8115_v40 = vpop.f32.mrb[252].mxu1 }
 0x2eb   : > { %v7997_v11 = vadd.f32 %v7990_v33, %v7940_v38  ;;  %v7941_v42 = vadd.f32 %v7936_v22, %v7868_v54  ;;  %v11011_v46 = vpop.f32.mrb[251].mxu0  ;;  %v11028_v14 = vpop.f32.mrb[253].mxu1 }
 0x2ec   : > { %v8118_v13 = vpop.f32.mrb[254].mxu1 }
 0x2ed   : > { %v7999_v18 = vadd.f32 %v13280_v20, %v7997_v11  ;;  %v7998_v16 = vadd.f32 %v7993_v37, %v7941_v42  ;;  %v11029_v47 = vpop.f32.mrb[255].mxu1 }
 0x2ef   : > { %9874 = vst [vmem:[%s12345_s21 + $0xd0] sm:$0xff] %v7999_v18  ;;  %v8000_v49 = vadd.f32 %v13280_v20, %v7998_v16 }
 0x2f0   : > { %v8069_v25 = vpop.f32.mrb[252].mxu0 }
 0x2f1   : > { %9875 = vst [vmem:[%s12345_s21 + $0xd8] sm:$0xff] %v8000_v49  ;;  %v8116_v24 = vadd.f32 %v8115_v40, %v8069_v25  ;;  %v11022_v19 = vpop.f32.mrb[253].mxu0 }
 0x2f2   : > { %v8072_v43 = vpop.f32.mrb[254].mxu0  ;;  %v8227_v53 = vpop.f32.mrb[0].mxu1 }
 0x2f3   : > { %v8119_v26 = vadd.f32 %v8118_v13, %v8072_v43  ;;  %v11023_v55 = vpop.f32.mrb[255].mxu0  ;;  %v11040_v27 = vpop.f32.mrb[1].mxu1 }
 0x2f4   : > { %v8230_v44 = vpop.f32.mrb[2].mxu1 }
 0x2f5   : > { %v11041_v61 = vpop.f32.mrb[3].mxu1 }
 0x2f8   : > { %v8170_v62 = vpop.f32.mrb[0].mxu0 }
 0x2f9   : > { %v8177_v23 = vadd.f32 %v8170_v62, %v8116_v24  ;;  %v11034_v48 = vpop.f32.mrb[1].mxu0 }
 0x2fa   : > { %v8173_v63 = vpop.f32.mrb[2].mxu0  ;;  %v8357_v0 = vpop.f32.mrb[4].mxu1 }
 0x2fb   : > { %v8178_v1 = vadd.f32 %v8173_v63, %v8119_v26  ;;  %v11035_v3 = vpop.f32.mrb[3].mxu0  ;;  %v8234_v4 = vadd.f32 %v8227_v53, %v8177_v23  ;;  %v11052_v51 = vpop.f32.mrb[5].mxu1 }
 0x2fc   : > { %v8360_v5 = vpop.f32.mrb[6].mxu1 }
 0x2fd   : > { %v8235_v6 = vadd.f32 %v8230_v44, %v8178_v1  ;;  %v11053_v7 = vpop.f32.mrb[7].mxu1 }
 0x300   : > { %v8300_v52 = vpop.f32.mrb[4].mxu0 }
 0x301   : > { %v8307_v8 = vadd.f32 %v8300_v52, %v8234_v4  ;;  %v11046_v9 = vpop.f32.mrb[5].mxu0 }
 0x302   : > { %v8303_v57 = vpop.f32.mrb[6].mxu0  ;;  %v8488_v10 = vpop.f32.mrb[8].mxu1 }
 0x303   : > { %v8308_v58 = vadd.f32 %v8303_v57, %v8235_v6  ;;  %v11047_v12 = vpop.f32.mrb[7].mxu0  ;;  %v8364_v15 = vadd.f32 %v8357_v0, %v8307_v8  ;;  %v11064_v17 = vpop.f32.mrb[9].mxu1 }
 0x304   : > { %v8491_v29 = vpop.f32.mrb[10].mxu1 }
 0x305   : > { %v8365_v2 = vadd.f32 %v8360_v5, %v8308_v58  ;;  %v11065_v30 = vpop.f32.mrb[11].mxu1 }
 0x308   : > { %v8415_v31 = vpop.f32.mrb[8].mxu0 }
 0x309   : > { %v8422_v32 = vadd.f32 %v8415_v31, %v8364_v15  ;;  %v11058_v60 = vpop.f32.mrb[9].mxu0 }
 0x30a   : > { %v8418_v41 = vpop.f32.mrb[10].mxu0  ;;  %v8624_v39 = vpop.f32.mrb[12].mxu1 }
 0x30b   : > { %v8423_v45 = vadd.f32 %v8418_v41, %v8365_v2  ;;  %v11059_v28 = vpop.f32.mrb[11].mxu0  ;;  %v8495_v33 = vadd.f32 %v8488_v10, %v8422_v32  ;;  %v11076_v34 = vpop.f32.mrb[13].mxu1 }
 0x30c   : > { %v8627_v35 = vpop.f32.mrb[14].mxu1 }
 0x30d   : > { %v8496_v50 = vadd.f32 %v8491_v29, %v8423_v45  ;;  %v11077_v36 = vpop.f32.mrb[15].mxu1 }
 0x310   : > { %v8545_v37 = vpop.f32.mrb[12].mxu0 }
 0x311   : > { %v8552_v54 = vadd.f32 %v8545_v37, %v8495_v33  ;;  %v11070_v56 = vpop.f32.mrb[13].mxu0 }
 0x312   : > { %v8548_v21 = vpop.f32.mrb[14].mxu0  ;;  %v8725_v38 = vpop.f32.mrb[16].mxu1 }
 0x313   : > { %v8554_v59 = vadd.f32 %v13280_v20, %v8552_v54  ;;  %v8553_v22 = vadd.f32 %v8548_v21, %v8496_v50  ;;  %v11071_v40 = vpop.f32.mrb[15].mxu0  ;;  %v11088_v11 = vpop.f32.mrb[17].mxu1 }
 0x314   : > { %v8728_v42 = vpop.f32.mrb[18].mxu1 }
 0x315   : > { %9920 = vst [vmem:[%s12345_s21 + $0xe0] sm:$0xff] %v8554_v59  ;;  %v8555_v46 = vadd.f32 %v13280_v20, %v8553_v22  ;;  %v11089_v14 = vpop.f32.mrb[19].mxu1 }
 0x317   : > { %9921 = vst [vmem:[%s12345_s21 + $0xe8] sm:$0xff] %v8555_v46 }
 0x318   : > { %v8670_v13 = vpop.f32.mrb[16].mxu0 }
 0x319   : > { %v8671_v18 = vadd.f32 %v8670_v13, %v8624_v39  ;;  %v11082_v16 = vpop.f32.mrb[17].mxu0 }
 0x31a   : > { %v8673_v47 = vpop.f32.mrb[18].mxu0  ;;  %v8855_v49 = vpop.f32.mrb[20].mxu1 }
 0x31b   : > { %v8674_v25 = vadd.f32 %v8673_v47, %v8627_v35  ;;  %v11083_v24 = vpop.f32.mrb[19].mxu0  ;;  %v8732_v19 = vadd.f32 %v8725_v38, %v8671_v18  ;;  %v11100_v43 = vpop.f32.mrb[21].mxu1 }
 0x31c   : > { %v8858_v53 = vpop.f32.mrb[22].mxu1 }
 0x31d   : > { %v8733_v26 = vadd.f32 %v8728_v42, %v8674_v25  ;;  %v11101_v55 = vpop.f32.mrb[23].mxu1 }
 0x320   : > { %v8782_v27 = vpop.f32.mrb[20].mxu0 }
 0x321   : > { %v8789_v44 = vadd.f32 %v8782_v27, %v8732_v19  ;;  %v11094_v61 = vpop.f32.mrb[21].mxu0 }
 0x322   : > { %v8785_v62 = vpop.f32.mrb[22].mxu0  ;;  %v8970_v23 = vpop.f32.mrb[24].mxu1 }
 0x323   : > { %v8790_v48 = vadd.f32 %v8785_v62, %v8733_v26  ;;  %v11095_v63 = vpop.f32.mrb[23].mxu0  ;;  %v8862_v0 = vadd.f32 %v8855_v49, %v8789_v44  ;;  %v11112_v1 = vpop.f32.mrb[25].mxu1 }
 0x324   : > { %v8973_v3 = vpop.f32.mrb[26].mxu1 }
 0x325   : > { %v8863_v4 = vadd.f32 %v8858_v53, %v8790_v48  ;;  %v11113_v51 = vpop.f32.mrb[27].mxu1 }
 0x328   : > { %v8912_v5 = vpop.f32.mrb[24].mxu0 }
 0x329   : > { %v8919_v6 = vadd.f32 %v8912_v5, %v8862_v0  ;;  %v11106_v7 = vpop.f32.mrb[25].mxu0 }
 0x32a   : > { %v8915_v52 = vpop.f32.mrb[26].mxu0  ;;  %v9100_v8 = vpop.f32.mrb[28].mxu1 }
 0x32b   : > { %v8920_v9 = vadd.f32 %v8915_v52, %v8863_v4  ;;  %v11107_v57 = vpop.f32.mrb[27].mxu0  ;;  %v8977_v10 = vadd.f32 %v8970_v23, %v8919_v6  ;;  %v11124_v58 = vpop.f32.mrb[29].mxu1 }
 0x32c   : > { %v9103_v12 = vpop.f32.mrb[30].mxu1 }
 0x32d   : > { %v8978_v15 = vadd.f32 %v8973_v3, %v8920_v9  ;;  %v11125_v17 = vpop.f32.mrb[31].mxu1 }
 0x330   : > { %v9043_v29 = vpop.f32.mrb[28].mxu0 }
 0x331   : > { %v9050_v2 = vadd.f32 %v9043_v29, %v8977_v10  ;;  %v11118_v30 = vpop.f32.mrb[29].mxu0 }
 0x332   : > { %v9046_v31 = vpop.f32.mrb[30].mxu0 }
 0x333   : > { %v9107_v32 = vadd.f32 %v9100_v8, %v9050_v2  ;;  %v9051_v60 = vadd.f32 %v9046_v31, %v8978_v15  ;;  %v11119_v41 = vpop.f32.mrb[31].mxu0 }
 0x335   : > { %v9109_v39 = vadd.f32 %v13280_v20, %v9107_v32  ;;  %v9108_v45 = vadd.f32 %v9103_v12, %v9051_v60 }
 0x337   : > { %9966 = vst [vmem:[%s12345_s21 + $0xf0] sm:$0xff] %v9109_v39  ;;  %v9110_v28 = vadd.f32 %v13280_v20, %v9108_v45 }
 0x339   : > { %9967 = vst [vmem:[%s12345_s21 + $0xf8] sm:$0xff] %v9110_v28 }
 0x33a   : > { %11377 = shalt.err (!%p11374_p5)
}
 0x33b   : > { %s11378_s5 = scalar_lea.hbm %s13383_s6, 4096  ;;  %s11382_s19 = scalar_lea.hbm %s13441_s3, 8192 }
 0x33c   : > { %p11379_p6 = scmp.ne.s32.totalorder %s13383_s6, %s11378_s5  ;;  %p11383_p10 = scmp.lt.u32.totalorder %s13383_s6, %s13441_s3 }
 0x33d   : > { %p11384_p11 = scmp.lt.u32.totalorder %s11382_s19, %s11378_s5  ;;  %p11386_p13 = scmp.lt.u32.totalorder %s11378_s5, %s13383_s6 }
 0x33e   : > { %p11380_p7 = pnand %p11379_p6, %p11509_p4 }
 0x33f   : > { %p11385_p12 = por %p11384_p11, %p11383_p10 }
 0x340   : > { %p11381_p9 = pneg %p11380_p7 }
 0x341   : > { %p11387_p0 = por %p11386_p13, %p11385_p12 }
 0x343   : > { %p11388_p1 = pnand %p11387_p0, %p11381_p9 }
 0x345   : > { %11391 = shalt.err (!%p11388_p1)
}
 0x346   : > { %s11447_s9 = smov 128   ;;  %s11448_s27 = smov 8  }
 0x347   : > { %11127 = dma.vmem_to_hbm [thread:$0]  (%p11509_p4), %s13385_s29, 4096, %s13383_s6, %s13392_s15, %s11447_s9, %s11447_s9, %s11448_s27  }
 0x348 PF: > { %p11133_p2 = scmp.ge.s32.totalorder %s11442_s17, 2  ;;  %s9144_s28 = sand.u32 1, %s11422_s12  }
 0x349   : > { %s9145_s30 = scalar_lea.sflag [#allocation3], %s9144_s28 }
 0x34a   : > { %p11130_p3 = pnand %p11133_p2, %p11516_p8 }
 0x34c   : > { %11417 = dma.done.wait (!%p11130_p3), %s9145_s30, 4096  }
 0x34d   : > { %11419 = vsyncadd (!%p11130_p3), %s9145_s30, 4294963200  ;;  %s16_s17 = sadd.s32 1, %s11442_s17   ;;  %s13444_s12 = smov %s11426_s13 }
 0x34e   : > { %p13_p5 = scmp.ge.s32.totalorder %s16_s17, 4   ;;  %s13445_s13 = smov %s11430_s14 }
 0x34f   : > { %s13446_s14 = smov %s11522_s25  ;;  %s13447_s15 = smov %s11438_s16 }
 0x350   : > { %s13448_s16 = smov %s13450_s20  ;;  %15 = sbr.rel (!%p13_p5) target bundleno = 4 (0x4), region = 113 }
 0x357   :  { %9150 = vsyncpa [#allocation3], 1 }
 0x358   :  { %9152 = vsyncpa [#allocation3 + $0x1], 1 }

</bundles_post_ra>
